<compile_context>
chip_gen: v6e
topology: v6e:2x2x1
jax: 0.10.0
libtpu: 0.0.40
codegen_flags: <defaults>
</compile_context>

<pallas_src>
import numpy as np
import jax
import jax.numpy as jnp
from jax.experimental import pallas as pl
from jax.experimental.pallas import tpu as pltpu

# ---------------- problem sizes (small, consistent with the module) ----------
B = 2            # real batch
BP = 8           # batch padded to the sublane tile
T = 8            # max (padded) sequence length
EMB = 50         # emb_size
VOCAB = 100      # vocab_size
VOCAB_PAD = 128  # lane-padded one-hot contraction width
N_ACT = 4        # n_actions
D1 = 128         # act_mlp output
D2 = 128         # GRU hidden / infersent dim
MLP_HID = 128    # hidden width of the assumed MLP
N_CLASSES = 2    # concat_mlp output


# ---------------------------- Pallas kernel ----------------------------------
def learn_kernel(tokens_ref, lengths_ref, invt_ref, actions_ref,
                 aw1_ref, ab1_ref, aw2_ref, ab2_ref,
                 ew0_ref, bih0_ref, whh0_ref, bhh0_ref,
                 wih1_ref, bih1_ref, whh1_ref, bhh1_ref,
                 cw1t_ref, cw1a_ref, cb1_ref, cw2_ref, cb2_ref,
                 out_ref):
    f32 = jnp.float32
    bf16 = jnp.bfloat16

    # ---- act_mlp (independent of the GRU; issued first so the MXU has work
    #      queued while the serial recurrence drains) ----
    a = actions_ref[...]                                                    # (BP, N_ACT)
    h = jnp.maximum(jnp.dot(a, aw1_ref[...].astype(f32),
                            preferred_element_type=f32) + ab1_ref[...], 0.0)
    ac_out = jnp.dot(h, aw2_ref[...].astype(f32),
                     preferred_element_type=f32) + ab2_ref[...]             # (BP, D1)
    # action half of concat_mlp layer 1 (independent of GRU output)
    c_act = jnp.dot(ac_out, cw1a_ref[...].astype(f32),
                    preferred_element_type=f32)                             # (BP, MLP_HID)

    # ---- fused embedding gather + hoisted layer-0 input projection ----
    # one-hot(tokens) @ (emb @ W_ih0)  ==  emb[tokens] @ W_ih0.
    # one-hot and table are bf16 (exact 0/1 gather of bf16 values, f32 accum);
    # the contraction is lane-padded to 128 (rows >= VOCAB are zero, never hit).
    tok = tokens_ref[...]                                                   # (T*BP, 1) int32, time-major
    col = jax.lax.broadcasted_iota(jnp.int32, (T * BP, VOCAB_PAD), 1)
    onehot = (col == tok).astype(bf16)                                      # (T*BP, 128)
    gi0_all = jnp.dot(onehot, ew0_ref[...],
                      preferred_element_type=f32) + bih0_ref[...]           # (T*BP, 3*D2) f32

    lengths = lengths_ref[...]                                              # (BP, 1) int32

    # hoisted weight up-casts (bf16 storage -> f32 compute, done once) and
    # bias broadcasts (JAX does not CSE broadcast_in_dim)
    whh0 = whh0_ref[...].astype(f32)                                        # (D2, 3*D2)
    wih1 = wih1_ref[...].astype(f32)                                        # (D2, 3*D2)
    whh1 = whh1_ref[...].astype(f32)                                        # (D2, 3*D2)
    bhh0 = jnp.broadcast_to(bhh0_ref[...], (BP, 3 * D2))
    bih1 = jnp.broadcast_to(bih1_ref[...], (BP, 3 * D2))
    bhh1 = jnp.broadcast_to(bhh1_ref[...], (BP, 3 * D2))

    h0 = jnp.zeros((BP, D2), f32)
    h1 = jnp.zeros((BP, D2), f32)
    acc = jnp.zeros((BP, D2), f32)

    # static unroll over the small, compile-time padded length
    for t in range(T):
        # layer 0: input projection precomputed; only the recurrent matmul is
        # on the serial chain.  gh1 depends only on h1_{t-1} so it overlaps.
        gi0 = gi0_all[t * BP:(t + 1) * BP, :]                               # (BP, 3*D2), 8-aligned slice
        gh0 = jnp.dot(h0, whh0, preferred_element_type=f32) + bhh0          # (BP, 3*D2)  [serial]
        gh1 = jnp.dot(h1, whh1, preferred_element_type=f32) + bhh1          # (BP, 3*D2)  [off-chain]

        # r/z gates together via a single tanh (sigmoid(x) = 0.5*tanh(0.5x)+0.5)
        rz0 = 0.5 * jnp.tanh(0.5 * (gi0[:, :2 * D2] + gh0[:, :2 * D2])) + 0.5
        r0 = rz0[:, :D2]
        z0 = rz0[:, D2:]
        n0 = jnp.tanh(gi0[:, 2 * D2:] + r0 * gh0[:, 2 * D2:])
        h0 = n0 + z0 * (h0 - n0)

        gi1 = jnp.dot(h0, wih1, preferred_element_type=f32) + bih1          # (BP, 3*D2)  [serial]
        rz1 = 0.5 * jnp.tanh(0.5 * (gi1[:, :2 * D2] + gh1[:, :2 * D2])) + 0.5
        r1 = rz1[:, :D2]
        z1 = rz1[:, D2:]
        n1 = jnp.tanh(gi1[:, 2 * D2:] + r1 * gh1[:, 2 * D2:])
        h1 = n1 + z1 * (h1 - n1)

        # pack/pad semantics: padded (suffix) positions contribute exactly 0
        m_t = (lengths > t).astype(f32)                                     # (BP, 1)
        acc = acc + h1 * m_t

    # torch.mean over pad_packed_sequence output divides by max(lengths)
    text_out = acc * invt_ref[...]                                          # (BP, D2)

    # ---- concat_mlp without a lane-axis concat: cw1 split into text/action halves ----
    c = jnp.maximum(jnp.dot(text_out, cw1t_ref[...].astype(f32),
                            preferred_element_type=f32) + c_act + cb1_ref[...], 0.0)
    out_ref[...] = jnp.dot(c, cw2_ref[...].astype(f32),
                           preferred_element_type=f32) + cb2_ref[...]


# ------------------------------ wrapper ---------------------------------------
def _full_spec(shape):
    n = len(shape)
    return pl.BlockSpec(shape, lambda i, _n=n: (0,) * _n)


def prepare_params(p):
    """Derive kernel-ready weights: fused emb@W_ih0 table (lane-padded to 128),
    split cw1, bf16 storage for all weight matrices (biases stay f32)."""
    bf16 = jnp.bfloat16
    ew0 = jnp.zeros((VOCAB_PAD, 3 * D2), jnp.float32).at[:VOCAB].set(p["emb"] @ p["wih0"])
    return {
        "ew0": ew0.astype(bf16),                        # (128, 3*D2) fused gather/proj table
        "bih0": p["bih0"],
        "whh0": p["whh0"].astype(bf16), "bhh0": p["bhh0"],
        "wih1": p["wih1"].astype(bf16), "bih1": p["bih1"],
        "whh1": p["whh1"].astype(bf16), "bhh1": p["bhh1"],
        "aw1": p["aw1"].astype(bf16), "ab1": p["ab1"],
        "aw2": p["aw2"].astype(bf16), "ab2": p["ab2"],
        "cw1t": p["cw1"][:D2, :].astype(bf16),
        "cw1a": p["cw1"][D2:, :].astype(bf16),
        "cb1": p["cb1"],
        "cw2": p["cw2"].astype(bf16), "cb2": p["cb2"],
    }


@jax.jit
def learn_forward(actions, lang_tokens, lengths, kp):
    # pad the batch to the 8-row sublane tile (padded rows: zeros, length 0)
    actions_p = jnp.zeros((BP, N_ACT), jnp.float32).at[:B].set(actions)
    tokens_p = jnp.zeros((BP, T), jnp.int32).at[:B].set(lang_tokens.astype(jnp.int32))
    lengths_p = jnp.zeros((BP, 1), jnp.int32).at[:B, 0].set(lengths.astype(jnp.int32))
    # time-major flatten with stride BP so each per-step slice is 8-aligned
    tokens_tm = tokens_p.T.reshape(T * BP, 1)                          # (T*BP, 1)
    inv_tmax = (1.0 / jnp.max(lengths).astype(jnp.float32)).reshape(1, 1)

    ins = [tokens_tm, lengths_p, inv_tmax, actions_p,
           kp["aw1"], kp["ab1"], kp["aw2"], kp["ab2"],
           kp["ew0"], kp["bih0"], kp["whh0"], kp["bhh0"],
           kp["wih1"], kp["bih1"], kp["whh1"], kp["bhh1"],
           kp["cw1t"], kp["cw1a"], kp["cb1"], kp["cw2"], kp["cb2"]]

    out_p = pl.pallas_call(
        learn_kernel,
        out_shape=jax.ShapeDtypeStruct((BP, N_CLASSES), jnp.float32),
        grid=(1,),
        in_specs=[_full_spec(x.shape) for x in ins],
        out_specs=pl.BlockSpec((BP, N_CLASSES), lambda i: (0, 0)),
        compiler_params=pltpu.CompilerParams(dimension_semantics=("arbitrary",)),
    )(*ins)
    return out_p[:B]


# -------------------------- deterministic params -------------------------------
def init_params(key):
    ks = jax.random.split(key, 16)

    def uni(k, shape, fan_in):
        bound = 1.0 / np.sqrt(fan_in)
        return jax.random.uniform(k, shape, jnp.float32, -bound, bound)

    # nn.init.xavier_uniform_ on the embedding
    xav = np.sqrt(6.0 / (VOCAB + EMB))
    emb = jax.random.uniform(ks[0], (VOCAB, EMB), jnp.float32, -xav, xav)

    return {
        "emb": emb,
        # act_mlp = MLP(N_ACT, D1): Linear -> ReLU -> Dropout(eval) -> Linear
        "aw1": uni(ks[1], (N_ACT, MLP_HID), N_ACT),
        "ab1": uni(ks[2], (1, MLP_HID), N_ACT),
        "aw2": uni(ks[3], (MLP_HID, D1), MLP_HID),
        "ab2": uni(ks[4], (1, D1), MLP_HID),
        # GRU layer 0 (input EMB) / layer 1 (input D2); gate order (r, z, n)
        "wih0": uni(ks[5], (EMB, 3 * D2), D2),
        "whh0": uni(ks[6], (D2, 3 * D2), D2),
        "bih0": uni(ks[7], (1, 3 * D2), D2),
        "bhh0": uni(ks[8], (1, 3 * D2), D2),
        "wih1": uni(ks[9], (D2, 3 * D2), D2),
        "whh1": uni(ks[10], (D2, 3 * D2), D2),
        "bih1": uni(ks[11], (1, 3 * D2), D2),
        "bhh1": uni(ks[12], (1, 3 * D2), D2),
        # concat_mlp = MLP(D1 + D2, 2, dropout=0.8)  (dropout: eval -> identity)
        "cw1": uni(ks[13], (D1 + D2, MLP_HID), D1 + D2),
        "cb1": uni(ks[14], (1, MLP_HID), D1 + D2),
        "cw2": uni(ks[15], (MLP_HID, N_CLASSES), MLP_HID),
        "cb2": jnp.zeros((1, N_CLASSES), jnp.float32),
    }


# ----------------------------- pure-JAX reference ------------------------------
def reference(actions, lang_tokens, lengths, kp):
    """Module-structured reference using the same (bf16-stored) weights, all math in f32."""
    f32 = jnp.float32
    ew0 = kp["ew0"].astype(f32)
    whh0 = kp["whh0"].astype(f32)
    wih1 = kp["wih1"].astype(f32)
    whh1 = kp["whh1"].astype(f32)

    h = jnp.maximum(actions @ kp["aw1"].astype(f32) + kp["ab1"], 0.0)
    ac_out = h @ kp["aw2"].astype(f32) + kp["ab2"]

    gi0_all = jnp.take(ew0, lang_tokens, axis=0) + kp["bih0"]          # (B, T, 3*D2)
    mask = (jnp.arange(T)[None, :] < lengths[:, None]).astype(f32)

    sig = jax.nn.sigmoid
    h0 = jnp.zeros((B, D2), f32)
    h1 = jnp.zeros((B, D2), f32)
    acc = jnp.zeros((B, D2), f32)
    for t in range(T):
        gi0 = gi0_all[:, t, :]
        gh0 = h0 @ whh0 + kp["bhh0"]
        r0 = sig(gi0[:, :D2] + gh0[:, :D2])
        z0 = sig(gi0[:, D2:2 * D2] + gh0[:, D2:2 * D2])
        n0 = jnp.tanh(gi0[:, 2 * D2:] + r0 * gh0[:, 2 * D2:])
        h0 = (1 - z0) * n0 + z0 * h0

        gi1 = h0 @ wih1 + kp["bih1"]
        gh1 = h1 @ whh1 + kp["bhh1"]
        r1 = sig(gi1[:, :D2] + gh1[:, :D2])
        z1 = sig(gi1[:, D2:2 * D2] + gh1[:, D2:2 * D2])
        n1 = jnp.tanh(gi1[:, 2 * D2:] + r1 * gh1[:, 2 * D2:])
        h1 = (1 - z1) * n1 + z1 * h1

        acc = acc + h1 * mask[:, t:t + 1]
    text_out = acc / jnp.max(lengths).astype(f32)

    c = jnp.maximum(text_out @ kp["cw1t"].astype(f32)
                    + ac_out @ kp["cw1a"].astype(f32) + kp["cb1"], 0.0)
    return c @ kp["cw2"].astype(f32) + kp["cb2"]


# ----------------------------------- main --------------------------------------
if __name__ == "__main__":
    key = jax.random.PRNGKey(0)
    kparam, ka, kl = jax.random.split(key, 3)

    params = init_params(kparam)
    kernel_params = prepare_params(params)

    actions = jax.random.uniform(ka, (B, N_ACT), jnp.float32)   # action-frequency vector
    lang_tokens = jax.random.randint(kl, (B, T), 0, VOCAB)      # 'onehot' token ids
    lengths = jnp.array([T, 5], dtype=jnp.int32)

    out = jax.block_until_ready(learn_forward(actions, lang_tokens, lengths, kernel_params))

    ref = reference(actions, lang_tokens, lengths, kernel_params)
    if not np.allclose(np.asarray(out), np.asarray(ref), rtol=2e-3, atol=2e-3):
        raise AssertionError("Pallas output does not match JAX reference")

    assert out.shape == (B, N_CLASSES) and out.dtype == jnp.float32
    print("KERNEL_OK")
</pallas_src>

<mosaic_0001>
module attributes {stable_mosaic.version = 11 : i64} {
  func.func @learn_kernel(%arg0: i32, %arg1: memref<64x1xi32, #tpu.memory_space<vmem>>, %arg2: memref<8x1xi32, #tpu.memory_space<vmem>>, %arg3: memref<1x1xf32, #tpu.memory_space<vmem>>, %arg4: memref<8x4xf32, #tpu.memory_space<vmem>>, %arg5: memref<4x128xbf16, #tpu.memory_space<vmem>>, %arg6: memref<1x128xf32, #tpu.memory_space<vmem>>, %arg7: memref<128x128xbf16, #tpu.memory_space<vmem>>, %arg8: memref<1x128xf32, #tpu.memory_space<vmem>>, %arg9: memref<128x384xbf16, #tpu.memory_space<vmem>>, %arg10: memref<1x384xf32, #tpu.memory_space<vmem>>, %arg11: memref<128x384xbf16, #tpu.memory_space<vmem>>, %arg12: memref<1x384xf32, #tpu.memory_space<vmem>>, %arg13: memref<128x384xbf16, #tpu.memory_space<vmem>>, %arg14: memref<1x384xf32, #tpu.memory_space<vmem>>, %arg15: memref<128x384xbf16, #tpu.memory_space<vmem>>, %arg16: memref<1x384xf32, #tpu.memory_space<vmem>>, %arg17: memref<128x128xbf16, #tpu.memory_space<vmem>>, %arg18: memref<128x128xbf16, #tpu.memory_space<vmem>>, %arg19: memref<1x128xf32, #tpu.memory_space<vmem>>, %arg20: memref<128x2xbf16, #tpu.memory_space<vmem>>, %arg21: memref<1x2xf32, #tpu.memory_space<vmem>>, %arg22: memref<8x2xf32, #tpu.memory_space<vmem>>) attributes {dimension_semantics = [#tpu.dimension_semantics<arbitrary>], iteration_bounds = array<i64: 1>, scalar_prefetch = 0 : i64, scratch_operands = 0 : i64, tpu.core_type = #tpu.core_type<tc>, window_params = [{pipeline_mode = #tpu.pipeline_mode<synchronous>, transform_indices = @transform_0, window_bounds = array<i64: 64, 1>}, {pipeline_mode = #tpu.pipeline_mode<synchronous>, transform_indices = @transform_1, window_bounds = array<i64: 8, 1>}, {pipeline_mode = #tpu.pipeline_mode<synchronous>, transform_indices = @transform_2, window_bounds = array<i64: 1, 1>}, {pipeline_mode = #tpu.pipeline_mode<synchronous>, transform_indices = @transform_3, window_bounds = array<i64: 8, 4>}, {pipeline_mode = #tpu.pipeline_mode<synchronous>, transform_indices = @transform_4, window_bounds = array<i64: 4, 128>}, {pipeline_mode = #tpu.pipeline_mode<synchronous>, transform_indices = @transform_5, window_bounds = array<i64: 1, 128>}, {pipeline_mode = #tpu.pipeline_mode<synchronous>, transform_indices = @transform_6, window_bounds = array<i64: 128, 128>}, {pipeline_mode = #tpu.pipeline_mode<synchronous>, transform_indices = @transform_7, window_bounds = array<i64: 1, 128>}, {pipeline_mode = #tpu.pipeline_mode<synchronous>, transform_indices = @transform_8, window_bounds = array<i64: 128, 384>}, {pipeline_mode = #tpu.pipeline_mode<synchronous>, transform_indices = @transform_9, window_bounds = array<i64: 1, 384>}, {pipeline_mode = #tpu.pipeline_mode<synchronous>, transform_indices = @transform_10, window_bounds = array<i64: 128, 384>}, {pipeline_mode = #tpu.pipeline_mode<synchronous>, transform_indices = @transform_11, window_bounds = array<i64: 1, 384>}, {pipeline_mode = #tpu.pipeline_mode<synchronous>, transform_indices = @transform_12, window_bounds = array<i64: 128, 384>}, {pipeline_mode = #tpu.pipeline_mode<synchronous>, transform_indices = @transform_13, window_bounds = array<i64: 1, 384>}, {pipeline_mode = #tpu.pipeline_mode<synchronous>, transform_indices = @transform_14, window_bounds = array<i64: 128, 384>}, {pipeline_mode = #tpu.pipeline_mode<synchronous>, transform_indices = @transform_15, window_bounds = array<i64: 1, 384>}, {pipeline_mode = #tpu.pipeline_mode<synchronous>, transform_indices = @transform_16, window_bounds = array<i64: 128, 128>}, {pipeline_mode = #tpu.pipeline_mode<synchronous>, transform_indices = @transform_17, window_bounds = array<i64: 128, 128>}, {pipeline_mode = #tpu.pipeline_mode<synchronous>, transform_indices = @transform_18, window_bounds = array<i64: 1, 128>}, {pipeline_mode = #tpu.pipeline_mode<synchronous>, transform_indices = @transform_19, window_bounds = array<i64: 128, 2>}, {pipeline_mode = #tpu.pipeline_mode<synchronous>, transform_indices = @transform_20, window_bounds = array<i64: 1, 2>}, {pipeline_mode = #tpu.pipeline_mode<synchronous>, transform_indices = @transform_21, window_bounds = array<i64: 8, 2>}]} {
    %c0 = arith.constant 0 : index
    %c0_0 = arith.constant 0 : index
    %0 = vector.load %arg4[%c0, %c0_0] : memref<8x4xf32, #tpu.memory_space<vmem>>, vector<8x4xf32>
    %c0_1 = arith.constant 0 : index
    %c0_2 = arith.constant 0 : index
    %1 = vector.load %arg5[%c0_1, %c0_2] : memref<4x128xbf16, #tpu.memory_space<vmem>>, vector<4x128xbf16>
    %2 = arith.extf %1 : vector<4x128xbf16> to vector<4x128xf32>
    %cst = arith.constant dense<0.000000e+00> : vector<8x128xf32>
    %3 = tpu.matmul %0, %2, %cst {dimension_numbers = #tpu.dot_dimension_numbers<[1], [0], [0], [1], [0, 0, 1, 1], [], []>} : vector<8x4xf32>, vector<4x128xf32>, vector<8x128xf32> -> vector<8x128xf32>
    %c0_3 = arith.constant 0 : index
    %c0_4 = arith.constant 0 : index
    %4 = vector.load %arg6[%c0_3, %c0_4] : memref<1x128xf32, #tpu.memory_space<vmem>>, vector<1x128xf32>
    %5 = vector.broadcast %4 : vector<1x128xf32> to vector<8x128xf32>
    %6 = arith.addf %3, %5 : vector<8x128xf32>
    %cst_5 = arith.constant 0.000000e+00 : f32
    %7 = vector.broadcast %cst_5 : f32 to vector<8x128xf32>
    %8 = arith.maximumf %6, %7 : vector<8x128xf32>
    %c0_6 = arith.constant 0 : index
    %c0_7 = arith.constant 0 : index
    %9 = vector.load %arg7[%c0_6, %c0_7] : memref<128x128xbf16, #tpu.memory_space<vmem>>, vector<128x128xbf16>
    %10 = arith.extf %9 : vector<128x128xbf16> to vector<128x128xf32>
    %cst_8 = arith.constant dense<0.000000e+00> : vector<8x128xf32>
    %11 = tpu.matmul %8, %10, %cst_8 {dimension_numbers = #tpu.dot_dimension_numbers<[1], [0], [0], [1], [0, 0, 1, 1], [], []>} : vector<8x128xf32>, vector<128x128xf32>, vector<8x128xf32> -> vector<8x128xf32>
    %c0_9 = arith.constant 0 : index
    %c0_10 = arith.constant 0 : index
    %12 = vector.load %arg8[%c0_9, %c0_10] : memref<1x128xf32, #tpu.memory_space<vmem>>, vector<1x128xf32>
    %13 = vector.broadcast %12 : vector<1x128xf32> to vector<8x128xf32>
    %14 = arith.addf %11, %13 : vector<8x128xf32>
    %c0_11 = arith.constant 0 : index
    %c0_12 = arith.constant 0 : index
    %15 = vector.load %arg18[%c0_11, %c0_12] : memref<128x128xbf16, #tpu.memory_space<vmem>>, vector<128x128xbf16>
    %16 = arith.extf %15 : vector<128x128xbf16> to vector<128x128xf32>
    %cst_13 = arith.constant dense<0.000000e+00> : vector<8x128xf32>
    %17 = tpu.matmul %14, %16, %cst_13 {dimension_numbers = #tpu.dot_dimension_numbers<[1], [0], [0], [1], [0, 0, 1, 1], [], []>} : vector<8x128xf32>, vector<128x128xf32>, vector<8x128xf32> -> vector<8x128xf32>
    %c0_14 = arith.constant 0 : index
    %c0_15 = arith.constant 0 : index
    %18 = vector.load %arg1[%c0_14, %c0_15] : memref<64x1xi32, #tpu.memory_space<vmem>>, vector<64x1xi32>
    %19 = tpu.iota {dimensions = array<i32: 1>} : vector<64x128xi32>
    %20 = vector.broadcast %18 : vector<64x1xi32> to vector<64x128xi32>
    %21 = arith.cmpi eq, %19, %20 : vector<64x128xi32>
    %22 = arith.extui %21 : vector<64x128xi1> to vector<64x128xi32>
    %23 = arith.sitofp %22 : vector<64x128xi32> to vector<64x128xf32>
    %24 = arith.truncf %23 : vector<64x128xf32> to vector<64x128xbf16>
    %c0_16 = arith.constant 0 : index
    %c0_17 = arith.constant 0 : index
    %25 = vector.load %arg9[%c0_16, %c0_17] : memref<128x384xbf16, #tpu.memory_space<vmem>>, vector<128x384xbf16>
    %cst_18 = arith.constant dense<0.000000e+00> : vector<64x384xf32>
    %26 = tpu.matmul %24, %25, %cst_18 {dimension_numbers = #tpu.dot_dimension_numbers<[1], [0], [0], [1], [0, 0, 1, 1], [], []>} : vector<64x128xbf16>, vector<128x384xbf16>, vector<64x384xf32> -> vector<64x384xf32>
    %c0_19 = arith.constant 0 : index
    %c0_20 = arith.constant 0 : index
    %27 = vector.load %arg10[%c0_19, %c0_20] : memref<1x384xf32, #tpu.memory_space<vmem>>, vector<1x384xf32>
    %28 = vector.broadcast %27 : vector<1x384xf32> to vector<64x384xf32>
    %29 = arith.addf %26, %28 : vector<64x384xf32>
    %c0_21 = arith.constant 0 : index
    %c0_22 = arith.constant 0 : index
    %30 = vector.load %arg2[%c0_21, %c0_22] : memref<8x1xi32, #tpu.memory_space<vmem>>, vector<8x1xi32>
    %c0_23 = arith.constant 0 : index
    %c0_24 = arith.constant 0 : index
    %31 = vector.load %arg11[%c0_23, %c0_24] : memref<128x384xbf16, #tpu.memory_space<vmem>>, vector<128x384xbf16>
    %32 = arith.extf %31 : vector<128x384xbf16> to vector<128x384xf32>
    %c0_25 = arith.constant 0 : index
    %c0_26 = arith.constant 0 : index
    %33 = vector.load %arg13[%c0_25, %c0_26] : memref<128x384xbf16, #tpu.memory_space<vmem>>, vector<128x384xbf16>
    %34 = arith.extf %33 : vector<128x384xbf16> to vector<128x384xf32>
    %c0_27 = arith.constant 0 : index
    %c0_28 = arith.constant 0 : index
    %35 = vector.load %arg15[%c0_27, %c0_28] : memref<128x384xbf16, #tpu.memory_space<vmem>>, vector<128x384xbf16>
    %36 = arith.extf %35 : vector<128x384xbf16> to vector<128x384xf32>
    %c0_29 = arith.constant 0 : index
    %c0_30 = arith.constant 0 : index
    %37 = vector.load %arg12[%c0_29, %c0_30] : memref<1x384xf32, #tpu.memory_space<vmem>>, vector<1x384xf32>
    %38 = vector.shape_cast %37 : vector<1x384xf32> to vector<1x384xf32>
    %39 = vector.broadcast %38 : vector<1x384xf32> to vector<8x384xf32>
    %c0_31 = arith.constant 0 : index
    %c0_32 = arith.constant 0 : index
    %40 = vector.load %arg14[%c0_31, %c0_32] : memref<1x384xf32, #tpu.memory_space<vmem>>, vector<1x384xf32>
    %41 = vector.shape_cast %40 : vector<1x384xf32> to vector<1x384xf32>
    %42 = vector.broadcast %41 : vector<1x384xf32> to vector<8x384xf32>
    %c0_33 = arith.constant 0 : index
    %c0_34 = arith.constant 0 : index
    %43 = vector.load %arg16[%c0_33, %c0_34] : memref<1x384xf32, #tpu.memory_space<vmem>>, vector<1x384xf32>
    %44 = vector.shape_cast %43 : vector<1x384xf32> to vector<1x384xf32>
    %45 = vector.broadcast %44 : vector<1x384xf32> to vector<8x384xf32>
    %cst_35 = arith.constant 0.000000e+00 : f32
    %46 = vector.broadcast %cst_35 : f32 to vector<8x128xf32>
    %cst_36 = arith.constant 0.000000e+00 : f32
    %47 = vector.broadcast %cst_36 : f32 to vector<8x128xf32>
    %cst_37 = arith.constant 0.000000e+00 : f32
    %48 = vector.broadcast %cst_37 : f32 to vector<8x128xf32>
    %49 = vector.extract_strided_slice %29 {offsets = [0, 0], sizes = [8, 384], strides = [1, 1]} : vector<64x384xf32> to vector<8x384xf32>
    %cst_38 = arith.constant dense<0.000000e+00> : vector<8x384xf32>
    %50 = tpu.matmul %46, %32, %cst_38 {dimension_numbers = #tpu.dot_dimension_numbers<[1], [0], [0], [1], [0, 0, 1, 1], [], []>} : vector<8x128xf32>, vector<128x384xf32>, vector<8x384xf32> -> vector<8x384xf32>
    %51 = arith.addf %50, %39 : vector<8x384xf32>
    %cst_39 = arith.constant dense<0.000000e+00> : vector<8x384xf32>
    %52 = tpu.matmul %47, %36, %cst_39 {dimension_numbers = #tpu.dot_dimension_numbers<[1], [0], [0], [1], [0, 0, 1, 1], [], []>} : vector<8x128xf32>, vector<128x384xf32>, vector<8x384xf32> -> vector<8x384xf32>
    %53 = arith.addf %52, %45 : vector<8x384xf32>
    %54 = vector.extract_strided_slice %49 {offsets = [0, 0], sizes = [8, 256], strides = [1, 1]} : vector<8x384xf32> to vector<8x256xf32>
    %55 = vector.extract_strided_slice %51 {offsets = [0, 0], sizes = [8, 256], strides = [1, 1]} : vector<8x384xf32> to vector<8x256xf32>
    %56 = arith.addf %54, %55 : vector<8x256xf32>
    %cst_40 = arith.constant 5.000000e-01 : f32
    %57 = vector.broadcast %cst_40 : f32 to vector<8x256xf32>
    %58 = arith.mulf %57, %56 : vector<8x256xf32>
    %59 = math.tanh %58 : vector<8x256xf32>
    %cst_41 = arith.constant 5.000000e-01 : f32
    %60 = vector.broadcast %cst_41 : f32 to vector<8x256xf32>
    %61 = arith.mulf %60, %59 : vector<8x256xf32>
    %cst_42 = arith.constant 5.000000e-01 : f32
    %62 = vector.broadcast %cst_42 : f32 to vector<8x256xf32>
    %63 = arith.addf %61, %62 : vector<8x256xf32>
    %64 = vector.extract_strided_slice %63 {offsets = [0, 0], sizes = [8, 128], strides = [1, 1]} : vector<8x256xf32> to vector<8x128xf32>
    %65 = vector.extract_strided_slice %63 {offsets = [0, 128], sizes = [8, 128], strides = [1, 1]} : vector<8x256xf32> to vector<8x128xf32>
    %66 = vector.extract_strided_slice %49 {offsets = [0, 256], sizes = [8, 128], strides = [1, 1]} : vector<8x384xf32> to vector<8x128xf32>
    %67 = vector.extract_strided_slice %51 {offsets = [0, 256], sizes = [8, 128], strides = [1, 1]} : vector<8x384xf32> to vector<8x128xf32>
    %68 = arith.mulf %64, %67 : vector<8x128xf32>
    %69 = arith.addf %66, %68 : vector<8x128xf32>
    %70 = math.tanh %69 : vector<8x128xf32>
    %71 = arith.subf %46, %70 : vector<8x128xf32>
    %72 = arith.mulf %65, %71 : vector<8x128xf32>
    %73 = arith.addf %70, %72 : vector<8x128xf32>
    %cst_43 = arith.constant dense<0.000000e+00> : vector<8x384xf32>
    %74 = tpu.matmul %73, %34, %cst_43 {dimension_numbers = #tpu.dot_dimension_numbers<[1], [0], [0], [1], [0, 0, 1, 1], [], []>} : vector<8x128xf32>, vector<128x384xf32>, vector<8x384xf32> -> vector<8x384xf32>
    %75 = arith.addf %74, %42 : vector<8x384xf32>
    %76 = vector.extract_strided_slice %75 {offsets = [0, 0], sizes = [8, 256], strides = [1, 1]} : vector<8x384xf32> to vector<8x256xf32>
    %77 = vector.extract_strided_slice %53 {offsets = [0, 0], sizes = [8, 256], strides = [1, 1]} : vector<8x384xf32> to vector<8x256xf32>
    %78 = arith.addf %76, %77 : vector<8x256xf32>
    %cst_44 = arith.constant 5.000000e-01 : f32
    %79 = vector.broadcast %cst_44 : f32 to vector<8x256xf32>
    %80 = arith.mulf %79, %78 : vector<8x256xf32>
    %81 = math.tanh %80 : vector<8x256xf32>
    %cst_45 = arith.constant 5.000000e-01 : f32
    %82 = vector.broadcast %cst_45 : f32 to vector<8x256xf32>
    %83 = arith.mulf %82, %81 : vector<8x256xf32>
    %cst_46 = arith.constant 5.000000e-01 : f32
    %84 = vector.broadcast %cst_46 : f32 to vector<8x256xf32>
    %85 = arith.addf %83, %84 : vector<8x256xf32>
    %86 = vector.extract_strided_slice %85 {offsets = [0, 0], sizes = [8, 128], strides = [1, 1]} : vector<8x256xf32> to vector<8x128xf32>
    %87 = vector.extract_strided_slice %85 {offsets = [0, 128], sizes = [8, 128], strides = [1, 1]} : vector<8x256xf32> to vector<8x128xf32>
    %88 = vector.extract_strided_slice %75 {offsets = [0, 256], sizes = [8, 128], strides = [1, 1]} : vector<8x384xf32> to vector<8x128xf32>
    %89 = vector.extract_strided_slice %53 {offsets = [0, 256], sizes = [8, 128], strides = [1, 1]} : vector<8x384xf32> to vector<8x128xf32>
    %90 = arith.mulf %86, %89 : vector<8x128xf32>
    %91 = arith.addf %88, %90 : vector<8x128xf32>
    %92 = math.tanh %91 : vector<8x128xf32>
    %93 = arith.subf %47, %92 : vector<8x128xf32>
    %94 = arith.mulf %87, %93 : vector<8x128xf32>
    %95 = arith.addf %92, %94 : vector<8x128xf32>
    %c0_i32 = arith.constant 0 : i32
    %96 = vector.broadcast %c0_i32 : i32 to vector<8x1xi32>
    %97 = arith.cmpi sgt, %30, %96 : vector<8x1xi32>
    %98 = arith.extui %97 : vector<8x1xi1> to vector<8x1xi32>
    %99 = arith.sitofp %98 : vector<8x1xi32> to vector<8x1xf32>
    %100 = vector.broadcast %99 : vector<8x1xf32> to vector<8x128xf32>
    %101 = arith.mulf %95, %100 : vector<8x128xf32>
    %102 = arith.addf %48, %101 : vector<8x128xf32>
    %103 = vector.extract_strided_slice %29 {offsets = [8, 0], sizes = [8, 384], strides = [1, 1]} : vector<64x384xf32> to vector<8x384xf32>
    %cst_47 = arith.constant dense<0.000000e+00> : vector<8x384xf32>
    %104 = tpu.matmul %73, %32, %cst_47 {dimension_numbers = #tpu.dot_dimension_numbers<[1], [0], [0], [1], [0, 0, 1, 1], [], []>} : vector<8x128xf32>, vector<128x384xf32>, vector<8x384xf32> -> vector<8x384xf32>
    %105 = arith.addf %104, %39 : vector<8x384xf32>
    %cst_48 = arith.constant dense<0.000000e+00> : vector<8x384xf32>
    %106 = tpu.matmul %95, %36, %cst_48 {dimension_numbers = #tpu.dot_dimension_numbers<[1], [0], [0], [1], [0, 0, 1, 1], [], []>} : vector<8x128xf32>, vector<128x384xf32>, vector<8x384xf32> -> vector<8x384xf32>
    %107 = arith.addf %106, %45 : vector<8x384xf32>
    %108 = vector.extract_strided_slice %103 {offsets = [0, 0], sizes = [8, 256], strides = [1, 1]} : vector<8x384xf32> to vector<8x256xf32>
    %109 = vector.extract_strided_slice %105 {offsets = [0, 0], sizes = [8, 256], strides = [1, 1]} : vector<8x384xf32> to vector<8x256xf32>
    %110 = arith.addf %108, %109 : vector<8x256xf32>
    %cst_49 = arith.constant 5.000000e-01 : f32
    %111 = vector.broadcast %cst_49 : f32 to vector<8x256xf32>
    %112 = arith.mulf %111, %110 : vector<8x256xf32>
    %113 = math.tanh %112 : vector<8x256xf32>
    %cst_50 = arith.constant 5.000000e-01 : f32
    %114 = vector.broadcast %cst_50 : f32 to vector<8x256xf32>
    %115 = arith.mulf %114, %113 : vector<8x256xf32>
    %cst_51 = arith.constant 5.000000e-01 : f32
    %116 = vector.broadcast %cst_51 : f32 to vector<8x256xf32>
    %117 = arith.addf %115, %116 : vector<8x256xf32>
    %118 = vector.extract_strided_slice %117 {offsets = [0, 0], sizes = [8, 128], strides = [1, 1]} : vector<8x256xf32> to vector<8x128xf32>
    %119 = vector.extract_strided_slice %117 {offsets = [0, 128], sizes = [8, 128], strides = [1, 1]} : vector<8x256xf32> to vector<8x128xf32>
    %120 = vector.extract_strided_slice %103 {offsets = [0, 256], sizes = [8, 128], strides = [1, 1]} : vector<8x384xf32> to vector<8x128xf32>
    %121 = vector.extract_strided_slice %105 {offsets = [0, 256], sizes = [8, 128], strides = [1, 1]} : vector<8x384xf32> to vector<8x128xf32>
    %122 = arith.mulf %118, %121 : vector<8x128xf32>
    %123 = arith.addf %120, %122 : vector<8x128xf32>
    %124 = math.tanh %123 : vector<8x128xf32>
    %125 = arith.subf %73, %124 : vector<8x128xf32>
    %126 = arith.mulf %119, %125 : vector<8x128xf32>
    %127 = arith.addf %124, %126 : vector<8x128xf32>
    %cst_52 = arith.constant dense<0.000000e+00> : vector<8x384xf32>
    %128 = tpu.matmul %127, %34, %cst_52 {dimension_numbers = #tpu.dot_dimension_numbers<[1], [0], [0], [1], [0, 0, 1, 1], [], []>} : vector<8x128xf32>, vector<128x384xf32>, vector<8x384xf32> -> vector<8x384xf32>
    %129 = arith.addf %128, %42 : vector<8x384xf32>
    %130 = vector.extract_strided_slice %129 {offsets = [0, 0], sizes = [8, 256], strides = [1, 1]} : vector<8x384xf32> to vector<8x256xf32>
    %131 = vector.extract_strided_slice %107 {offsets = [0, 0], sizes = [8, 256], strides = [1, 1]} : vector<8x384xf32> to vector<8x256xf32>
    %132 = arith.addf %130, %131 : vector<8x256xf32>
    %cst_53 = arith.constant 5.000000e-01 : f32
    %133 = vector.broadcast %cst_53 : f32 to vector<8x256xf32>
    %134 = arith.mulf %133, %132 : vector<8x256xf32>
    %135 = math.tanh %134 : vector<8x256xf32>
    %cst_54 = arith.constant 5.000000e-01 : f32
    %136 = vector.broadcast %cst_54 : f32 to vector<8x256xf32>
    %137 = arith.mulf %136, %135 : vector<8x256xf32>
    %cst_55 = arith.constant 5.000000e-01 : f32
    %138 = vector.broadcast %cst_55 : f32 to vector<8x256xf32>
    %139 = arith.addf %137, %138 : vector<8x256xf32>
    %140 = vector.extract_strided_slice %139 {offsets = [0, 0], sizes = [8, 128], strides = [1, 1]} : vector<8x256xf32> to vector<8x128xf32>
    %141 = vector.extract_strided_slice %139 {offsets = [0, 128], sizes = [8, 128], strides = [1, 1]} : vector<8x256xf32> to vector<8x128xf32>
    %142 = vector.extract_strided_slice %129 {offsets = [0, 256], sizes = [8, 128], strides = [1, 1]} : vector<8x384xf32> to vector<8x128xf32>
    %143 = vector.extract_strided_slice %107 {offsets = [0, 256], sizes = [8, 128], strides = [1, 1]} : vector<8x384xf32> to vector<8x128xf32>
    %144 = arith.mulf %140, %143 : vector<8x128xf32>
    %145 = arith.addf %142, %144 : vector<8x128xf32>
    %146 = math.tanh %145 : vector<8x128xf32>
    %147 = arith.subf %95, %146 : vector<8x128xf32>
    %148 = arith.mulf %141, %147 : vector<8x128xf32>
    %149 = arith.addf %146, %148 : vector<8x128xf32>
    %c1_i32 = arith.constant 1 : i32
    %150 = vector.broadcast %c1_i32 : i32 to vector<8x1xi32>
    %151 = arith.cmpi sgt, %30, %150 : vector<8x1xi32>
    %152 = arith.extui %151 : vector<8x1xi1> to vector<8x1xi32>
    %153 = arith.sitofp %152 : vector<8x1xi32> to vector<8x1xf32>
    %154 = vector.broadcast %153 : vector<8x1xf32> to vector<8x128xf32>
    %155 = arith.mulf %149, %154 : vector<8x128xf32>
    %156 = arith.addf %102, %155 : vector<8x128xf32>
    %157 = vector.extract_strided_slice %29 {offsets = [16, 0], sizes = [8, 384], strides = [1, 1]} : vector<64x384xf32> to vector<8x384xf32>
    %cst_56 = arith.constant dense<0.000000e+00> : vector<8x384xf32>
    %158 = tpu.matmul %127, %32, %cst_56 {dimension_numbers = #tpu.dot_dimension_numbers<[1], [0], [0], [1], [0, 0, 1, 1], [], []>} : vector<8x128xf32>, vector<128x384xf32>, vector<8x384xf32> -> vector<8x384xf32>
    %159 = arith.addf %158, %39 : vector<8x384xf32>
    %cst_57 = arith.constant dense<0.000000e+00> : vector<8x384xf32>
    %160 = tpu.matmul %149, %36, %cst_57 {dimension_numbers = #tpu.dot_dimension_numbers<[1], [0], [0], [1], [0, 0, 1, 1], [], []>} : vector<8x128xf32>, vector<128x384xf32>, vector<8x384xf32> -> vector<8x384xf32>
    %161 = arith.addf %160, %45 : vector<8x384xf32>
    %162 = vector.extract_strided_slice %157 {offsets = [0, 0], sizes = [8, 256], strides = [1, 1]} : vector<8x384xf32> to vector<8x256xf32>
    %163 = vector.extract_strided_slice %159 {offsets = [0, 0], sizes = [8, 256], strides = [1, 1]} : vector<8x384xf32> to vector<8x256xf32>
    %164 = arith.addf %162, %163 : vector<8x256xf32>
    %cst_58 = arith.constant 5.000000e-01 : f32
    %165 = vector.broadcast %cst_58 : f32 to vector<8x256xf32>
    %166 = arith.mulf %165, %164 : vector<8x256xf32>
    %167 = math.tanh %166 : vector<8x256xf32>
    %cst_59 = arith.constant 5.000000e-01 : f32
    %168 = vector.broadcast %cst_59 : f32 to vector<8x256xf32>
    %169 = arith.mulf %168, %167 : vector<8x256xf32>
    %cst_60 = arith.constant 5.000000e-01 : f32
    %170 = vector.broadcast %cst_60 : f32 to vector<8x256xf32>
    %171 = arith.addf %169, %170 : vector<8x256xf32>
    %172 = vector.extract_strided_slice %171 {offsets = [0, 0], sizes = [8, 128], strides = [1, 1]} : vector<8x256xf32> to vector<8x128xf32>
    %173 = vector.extract_strided_slice %171 {offsets = [0, 128], sizes = [8, 128], strides = [1, 1]} : vector<8x256xf32> to vector<8x128xf32>
    %174 = vector.extract_strided_slice %157 {offsets = [0, 256], sizes = [8, 128], strides = [1, 1]} : vector<8x384xf32> to vector<8x128xf32>
    %175 = vector.extract_strided_slice %159 {offsets = [0, 256], sizes = [8, 128], strides = [1, 1]} : vector<8x384xf32> to vector<8x128xf32>
    %176 = arith.mulf %172, %175 : vector<8x128xf32>
    %177 = arith.addf %174, %176 : vector<8x128xf32>
    %178 = math.tanh %177 : vector<8x128xf32>
    %179 = arith.subf %127, %178 : vector<8x128xf32>
    %180 = arith.mulf %173, %179 : vector<8x128xf32>
    %181 = arith.addf %178, %180 : vector<8x128xf32>
    %cst_61 = arith.constant dense<0.000000e+00> : vector<8x384xf32>
    %182 = tpu.matmul %181, %34, %cst_61 {dimension_numbers = #tpu.dot_dimension_numbers<[1], [0], [0], [1], [0, 0, 1, 1], [], []>} : vector<8x128xf32>, vector<128x384xf32>, vector<8x384xf32> -> vector<8x384xf32>
    %183 = arith.addf %182, %42 : vector<8x384xf32>
    %184 = vector.extract_strided_slice %183 {offsets = [0, 0], sizes = [8, 256], strides = [1, 1]} : vector<8x384xf32> to vector<8x256xf32>
    %185 = vector.extract_strided_slice %161 {offsets = [0, 0], sizes = [8, 256], strides = [1, 1]} : vector<8x384xf32> to vector<8x256xf32>
    %186 = arith.addf %184, %185 : vector<8x256xf32>
    %cst_62 = arith.constant 5.000000e-01 : f32
    %187 = vector.broadcast %cst_62 : f32 to vector<8x256xf32>
    %188 = arith.mulf %187, %186 : vector<8x256xf32>
    %189 = math.tanh %188 : vector<8x256xf32>
    %cst_63 = arith.constant 5.000000e-01 : f32
    %190 = vector.broadcast %cst_63 : f32 to vector<8x256xf32>
    %191 = arith.mulf %190, %189 : vector<8x256xf32>
    %cst_64 = arith.constant 5.000000e-01 : f32
    %192 = vector.broadcast %cst_64 : f32 to vector<8x256xf32>
    %193 = arith.addf %191, %192 : vector<8x256xf32>
    %194 = vector.extract_strided_slice %193 {offsets = [0, 0], sizes = [8, 128], strides = [1, 1]} : vector<8x256xf32> to vector<8x128xf32>
    %195 = vector.extract_strided_slice %193 {offsets = [0, 128], sizes = [8, 128], strides = [1, 1]} : vector<8x256xf32> to vector<8x128xf32>
    %196 = vector.extract_strided_slice %183 {offsets = [0, 256], sizes = [8, 128], strides = [1, 1]} : vector<8x384xf32> to vector<8x128xf32>
    %197 = vector.extract_strided_slice %161 {offsets = [0, 256], sizes = [8, 128], strides = [1, 1]} : vector<8x384xf32> to vector<8x128xf32>
    %198 = arith.mulf %194, %197 : vector<8x128xf32>
    %199 = arith.addf %196, %198 : vector<8x128xf32>
    %200 = math.tanh %199 : vector<8x128xf32>
    %201 = arith.subf %149, %200 : vector<8x128xf32>
    %202 = arith.mulf %195, %201 : vector<8x128xf32>
    %203 = arith.addf %200, %202 : vector<8x128xf32>
    %c2_i32 = arith.constant 2 : i32
    %204 = vector.broadcast %c2_i32 : i32 to vector<8x1xi32>
    %205 = arith.cmpi sgt, %30, %204 : vector<8x1xi32>
    %206 = arith.extui %205 : vector<8x1xi1> to vector<8x1xi32>
    %207 = arith.sitofp %206 : vector<8x1xi32> to vector<8x1xf32>
    %208 = vector.broadcast %207 : vector<8x1xf32> to vector<8x128xf32>
    %209 = arith.mulf %203, %208 : vector<8x128xf32>
    %210 = arith.addf %156, %209 : vector<8x128xf32>
    %211 = vector.extract_strided_slice %29 {offsets = [24, 0], sizes = [8, 384], strides = [1, 1]} : vector<64x384xf32> to vector<8x384xf32>
    %cst_65 = arith.constant dense<0.000000e+00> : vector<8x384xf32>
    %212 = tpu.matmul %181, %32, %cst_65 {dimension_numbers = #tpu.dot_dimension_numbers<[1], [0], [0], [1], [0, 0, 1, 1], [], []>} : vector<8x128xf32>, vector<128x384xf32>, vector<8x384xf32> -> vector<8x384xf32>
    %213 = arith.addf %212, %39 : vector<8x384xf32>
    %cst_66 = arith.constant dense<0.000000e+00> : vector<8x384xf32>
    %214 = tpu.matmul %203, %36, %cst_66 {dimension_numbers = #tpu.dot_dimension_numbers<[1], [0], [0], [1], [0, 0, 1, 1], [], []>} : vector<8x128xf32>, vector<128x384xf32>, vector<8x384xf32> -> vector<8x384xf32>
    %215 = arith.addf %214, %45 : vector<8x384xf32>
    %216 = vector.extract_strided_slice %211 {offsets = [0, 0], sizes = [8, 256], strides = [1, 1]} : vector<8x384xf32> to vector<8x256xf32>
    %217 = vector.extract_strided_slice %213 {offsets = [0, 0], sizes = [8, 256], strides = [1, 1]} : vector<8x384xf32> to vector<8x256xf32>
    %218 = arith.addf %216, %217 : vector<8x256xf32>
    %cst_67 = arith.constant 5.000000e-01 : f32
    %219 = vector.broadcast %cst_67 : f32 to vector<8x256xf32>
    %220 = arith.mulf %219, %218 : vector<8x256xf32>
    %221 = math.tanh %220 : vector<8x256xf32>
    %cst_68 = arith.constant 5.000000e-01 : f32
    %222 = vector.broadcast %cst_68 : f32 to vector<8x256xf32>
    %223 = arith.mulf %222, %221 : vector<8x256xf32>
    %cst_69 = arith.constant 5.000000e-01 : f32
    %224 = vector.broadcast %cst_69 : f32 to vector<8x256xf32>
    %225 = arith.addf %223, %224 : vector<8x256xf32>
    %226 = vector.extract_strided_slice %225 {offsets = [0, 0], sizes = [8, 128], strides = [1, 1]} : vector<8x256xf32> to vector<8x128xf32>
    %227 = vector.extract_strided_slice %225 {offsets = [0, 128], sizes = [8, 128], strides = [1, 1]} : vector<8x256xf32> to vector<8x128xf32>
    %228 = vector.extract_strided_slice %211 {offsets = [0, 256], sizes = [8, 128], strides = [1, 1]} : vector<8x384xf32> to vector<8x128xf32>
    %229 = vector.extract_strided_slice %213 {offsets = [0, 256], sizes = [8, 128], strides = [1, 1]} : vector<8x384xf32> to vector<8x128xf32>
    %230 = arith.mulf %226, %229 : vector<8x128xf32>
    %231 = arith.addf %228, %230 : vector<8x128xf32>
    %232 = math.tanh %231 : vector<8x128xf32>
    %233 = arith.subf %181, %232 : vector<8x128xf32>
    %234 = arith.mulf %227, %233 : vector<8x128xf32>
    %235 = arith.addf %232, %234 : vector<8x128xf32>
    %cst_70 = arith.constant dense<0.000000e+00> : vector<8x384xf32>
    %236 = tpu.matmul %235, %34, %cst_70 {dimension_numbers = #tpu.dot_dimension_numbers<[1], [0], [0], [1], [0, 0, 1, 1], [], []>} : vector<8x128xf32>, vector<128x384xf32>, vector<8x384xf32> -> vector<8x384xf32>
    %237 = arith.addf %236, %42 : vector<8x384xf32>
    %238 = vector.extract_strided_slice %237 {offsets = [0, 0], sizes = [8, 256], strides = [1, 1]} : vector<8x384xf32> to vector<8x256xf32>
    %239 = vector.extract_strided_slice %215 {offsets = [0, 0], sizes = [8, 256], strides = [1, 1]} : vector<8x384xf32> to vector<8x256xf32>
    %240 = arith.addf %238, %239 : vector<8x256xf32>
    %cst_71 = arith.constant 5.000000e-01 : f32
    %241 = vector.broadcast %cst_71 : f32 to vector<8x256xf32>
    %242 = arith.mulf %241, %240 : vector<8x256xf32>
    %243 = math.tanh %242 : vector<8x256xf32>
    %cst_72 = arith.constant 5.000000e-01 : f32
    %244 = vector.broadcast %cst_72 : f32 to vector<8x256xf32>
    %245 = arith.mulf %244, %243 : vector<8x256xf32>
    %cst_73 = arith.constant 5.000000e-01 : f32
    %246 = vector.broadcast %cst_73 : f32 to vector<8x256xf32>
    %247 = arith.addf %245, %246 : vector<8x256xf32>
    %248 = vector.extract_strided_slice %247 {offsets = [0, 0], sizes = [8, 128], strides = [1, 1]} : vector<8x256xf32> to vector<8x128xf32>
    %249 = vector.extract_strided_slice %247 {offsets = [0, 128], sizes = [8, 128], strides = [1, 1]} : vector<8x256xf32> to vector<8x128xf32>
    %250 = vector.extract_strided_slice %237 {offsets = [0, 256], sizes = [8, 128], strides = [1, 1]} : vector<8x384xf32> to vector<8x128xf32>
    %251 = vector.extract_strided_slice %215 {offsets = [0, 256], sizes = [8, 128], strides = [1, 1]} : vector<8x384xf32> to vector<8x128xf32>
    %252 = arith.mulf %248, %251 : vector<8x128xf32>
    %253 = arith.addf %250, %252 : vector<8x128xf32>
    %254 = math.tanh %253 : vector<8x128xf32>
    %255 = arith.subf %203, %254 : vector<8x128xf32>
    %256 = arith.mulf %249, %255 : vector<8x128xf32>
    %257 = arith.addf %254, %256 : vector<8x128xf32>
    %c3_i32 = arith.constant 3 : i32
    %258 = vector.broadcast %c3_i32 : i32 to vector<8x1xi32>
    %259 = arith.cmpi sgt, %30, %258 : vector<8x1xi32>
    %260 = arith.extui %259 : vector<8x1xi1> to vector<8x1xi32>
    %261 = arith.sitofp %260 : vector<8x1xi32> to vector<8x1xf32>
    %262 = vector.broadcast %261 : vector<8x1xf32> to vector<8x128xf32>
    %263 = arith.mulf %257, %262 : vector<8x128xf32>
    %264 = arith.addf %210, %263 : vector<8x128xf32>
    %265 = vector.extract_strided_slice %29 {offsets = [32, 0], sizes = [8, 384], strides = [1, 1]} : vector<64x384xf32> to vector<8x384xf32>
    %cst_74 = arith.constant dense<0.000000e+00> : vector<8x384xf32>
    %266 = tpu.matmul %235, %32, %cst_74 {dimension_numbers = #tpu.dot_dimension_numbers<[1], [0], [0], [1], [0, 0, 1, 1], [], []>} : vector<8x128xf32>, vector<128x384xf32>, vector<8x384xf32> -> vector<8x384xf32>
    %267 = arith.addf %266, %39 : vector<8x384xf32>
    %cst_75 = arith.constant dense<0.000000e+00> : vector<8x384xf32>
    %268 = tpu.matmul %257, %36, %cst_75 {dimension_numbers = #tpu.dot_dimension_numbers<[1], [0], [0], [1], [0, 0, 1, 1], [], []>} : vector<8x128xf32>, vector<128x384xf32>, vector<8x384xf32> -> vector<8x384xf32>
    %269 = arith.addf %268, %45 : vector<8x384xf32>
    %270 = vector.extract_strided_slice %265 {offsets = [0, 0], sizes = [8, 256], strides = [1, 1]} : vector<8x384xf32> to vector<8x256xf32>
    %271 = vector.extract_strided_slice %267 {offsets = [0, 0], sizes = [8, 256], strides = [1, 1]} : vector<8x384xf32> to vector<8x256xf32>
    %272 = arith.addf %270, %271 : vector<8x256xf32>
    %cst_76 = arith.constant 5.000000e-01 : f32
    %273 = vector.broadcast %cst_76 : f32 to vector<8x256xf32>
    %274 = arith.mulf %273, %272 : vector<8x256xf32>
    %275 = math.tanh %274 : vector<8x256xf32>
    %cst_77 = arith.constant 5.000000e-01 : f32
    %276 = vector.broadcast %cst_77 : f32 to vector<8x256xf32>
    %277 = arith.mulf %276, %275 : vector<8x256xf32>
    %cst_78 = arith.constant 5.000000e-01 : f32
    %278 = vector.broadcast %cst_78 : f32 to vector<8x256xf32>
    %279 = arith.addf %277, %278 : vector<8x256xf32>
    %280 = vector.extract_strided_slice %279 {offsets = [0, 0], sizes = [8, 128], strides = [1, 1]} : vector<8x256xf32> to vector<8x128xf32>
    %281 = vector.extract_strided_slice %279 {offsets = [0, 128], sizes = [8, 128], strides = [1, 1]} : vector<8x256xf32> to vector<8x128xf32>
    %282 = vector.extract_strided_slice %265 {offsets = [0, 256], sizes = [8, 128], strides = [1, 1]} : vector<8x384xf32> to vector<8x128xf32>
    %283 = vector.extract_strided_slice %267 {offsets = [0, 256], sizes = [8, 128], strides = [1, 1]} : vector<8x384xf32> to vector<8x128xf32>
    %284 = arith.mulf %280, %283 : vector<8x128xf32>
    %285 = arith.addf %282, %284 : vector<8x128xf32>
    %286 = math.tanh %285 : vector<8x128xf32>
    %287 = arith.subf %235, %286 : vector<8x128xf32>
    %288 = arith.mulf %281, %287 : vector<8x128xf32>
    %289 = arith.addf %286, %288 : vector<8x128xf32>
    %cst_79 = arith.constant dense<0.000000e+00> : vector<8x384xf32>
    %290 = tpu.matmul %289, %34, %cst_79 {dimension_numbers = #tpu.dot_dimension_numbers<[1], [0], [0], [1], [0, 0, 1, 1], [], []>} : vector<8x128xf32>, vector<128x384xf32>, vector<8x384xf32> -> vector<8x384xf32>
    %291 = arith.addf %290, %42 : vector<8x384xf32>
    %292 = vector.extract_strided_slice %291 {offsets = [0, 0], sizes = [8, 256], strides = [1, 1]} : vector<8x384xf32> to vector<8x256xf32>
    %293 = vector.extract_strided_slice %269 {offsets = [0, 0], sizes = [8, 256], strides = [1, 1]} : vector<8x384xf32> to vector<8x256xf32>
    %294 = arith.addf %292, %293 : vector<8x256xf32>
    %cst_80 = arith.constant 5.000000e-01 : f32
    %295 = vector.broadcast %cst_80 : f32 to vector<8x256xf32>
    %296 = arith.mulf %295, %294 : vector<8x256xf32>
    %297 = math.tanh %296 : vector<8x256xf32>
    %cst_81 = arith.constant 5.000000e-01 : f32
    %298 = vector.broadcast %cst_81 : f32 to vector<8x256xf32>
    %299 = arith.mulf %298, %297 : vector<8x256xf32>
    %cst_82 = arith.constant 5.000000e-01 : f32
    %300 = vector.broadcast %cst_82 : f32 to vector<8x256xf32>
    %301 = arith.addf %299, %300 : vector<8x256xf32>
    %302 = vector.extract_strided_slice %301 {offsets = [0, 0], sizes = [8, 128], strides = [1, 1]} : vector<8x256xf32> to vector<8x128xf32>
    %303 = vector.extract_strided_slice %301 {offsets = [0, 128], sizes = [8, 128], strides = [1, 1]} : vector<8x256xf32> to vector<8x128xf32>
    %304 = vector.extract_strided_slice %291 {offsets = [0, 256], sizes = [8, 128], strides = [1, 1]} : vector<8x384xf32> to vector<8x128xf32>
    %305 = vector.extract_strided_slice %269 {offsets = [0, 256], sizes = [8, 128], strides = [1, 1]} : vector<8x384xf32> to vector<8x128xf32>
    %306 = arith.mulf %302, %305 : vector<8x128xf32>
    %307 = arith.addf %304, %306 : vector<8x128xf32>
    %308 = math.tanh %307 : vector<8x128xf32>
    %309 = arith.subf %257, %308 : vector<8x128xf32>
    %310 = arith.mulf %303, %309 : vector<8x128xf32>
    %311 = arith.addf %308, %310 : vector<8x128xf32>
    %c4_i32 = arith.constant 4 : i32
    %312 = vector.broadcast %c4_i32 : i32 to vector<8x1xi32>
    %313 = arith.cmpi sgt, %30, %312 : vector<8x1xi32>
    %314 = arith.extui %313 : vector<8x1xi1> to vector<8x1xi32>
    %315 = arith.sitofp %314 : vector<8x1xi32> to vector<8x1xf32>
    %316 = vector.broadcast %315 : vector<8x1xf32> to vector<8x128xf32>
    %317 = arith.mulf %311, %316 : vector<8x128xf32>
    %318 = arith.addf %264, %317 : vector<8x128xf32>
    %319 = vector.extract_strided_slice %29 {offsets = [40, 0], sizes = [8, 384], strides = [1, 1]} : vector<64x384xf32> to vector<8x384xf32>
    %cst_83 = arith.constant dense<0.000000e+00> : vector<8x384xf32>
    %320 = tpu.matmul %289, %32, %cst_83 {dimension_numbers = #tpu.dot_dimension_numbers<[1], [0], [0], [1], [0, 0, 1, 1], [], []>} : vector<8x128xf32>, vector<128x384xf32>, vector<8x384xf32> -> vector<8x384xf32>
    %321 = arith.addf %320, %39 : vector<8x384xf32>
    %cst_84 = arith.constant dense<0.000000e+00> : vector<8x384xf32>
    %322 = tpu.matmul %311, %36, %cst_84 {dimension_numbers = #tpu.dot_dimension_numbers<[1], [0], [0], [1], [0, 0, 1, 1], [], []>} : vector<8x128xf32>, vector<128x384xf32>, vector<8x384xf32> -> vector<8x384xf32>
    %323 = arith.addf %322, %45 : vector<8x384xf32>
    %324 = vector.extract_strided_slice %319 {offsets = [0, 0], sizes = [8, 256], strides = [1, 1]} : vector<8x384xf32> to vector<8x256xf32>
    %325 = vector.extract_strided_slice %321 {offsets = [0, 0], sizes = [8, 256], strides = [1, 1]} : vector<8x384xf32> to vector<8x256xf32>
    %326 = arith.addf %324, %325 : vector<8x256xf32>
    %cst_85 = arith.constant 5.000000e-01 : f32
    %327 = vector.broadcast %cst_85 : f32 to vector<8x256xf32>
    %328 = arith.mulf %327, %326 : vector<8x256xf32>
    %329 = math.tanh %328 : vector<8x256xf32>
    %cst_86 = arith.constant 5.000000e-01 : f32
    %330 = vector.broadcast %cst_86 : f32 to vector<8x256xf32>
    %331 = arith.mulf %330, %329 : vector<8x256xf32>
    %cst_87 = arith.constant 5.000000e-01 : f32
    %332 = vector.broadcast %cst_87 : f32 to vector<8x256xf32>
    %333 = arith.addf %331, %332 : vector<8x256xf32>
    %334 = vector.extract_strided_slice %333 {offsets = [0, 0], sizes = [8, 128], strides = [1, 1]} : vector<8x256xf32> to vector<8x128xf32>
    %335 = vector.extract_strided_slice %333 {offsets = [0, 128], sizes = [8, 128], strides = [1, 1]} : vector<8x256xf32> to vector<8x128xf32>
    %336 = vector.extract_strided_slice %319 {offsets = [0, 256], sizes = [8, 128], strides = [1, 1]} : vector<8x384xf32> to vector<8x128xf32>
    %337 = vector.extract_strided_slice %321 {offsets = [0, 256], sizes = [8, 128], strides = [1, 1]} : vector<8x384xf32> to vector<8x128xf32>
    %338 = arith.mulf %334, %337 : vector<8x128xf32>
    %339 = arith.addf %336, %338 : vector<8x128xf32>
    %340 = math.tanh %339 : vector<8x128xf32>
    %341 = arith.subf %289, %340 : vector<8x128xf32>
    %342 = arith.mulf %335, %341 : vector<8x128xf32>
    %343 = arith.addf %340, %342 : vector<8x128xf32>
    %cst_88 = arith.constant dense<0.000000e+00> : vector<8x384xf32>
    %344 = tpu.matmul %343, %34, %cst_88 {dimension_numbers = #tpu.dot_dimension_numbers<[1], [0], [0], [1], [0, 0, 1, 1], [], []>} : vector<8x128xf32>, vector<128x384xf32>, vector<8x384xf32> -> vector<8x384xf32>
    %345 = arith.addf %344, %42 : vector<8x384xf32>
    %346 = vector.extract_strided_slice %345 {offsets = [0, 0], sizes = [8, 256], strides = [1, 1]} : vector<8x384xf32> to vector<8x256xf32>
    %347 = vector.extract_strided_slice %323 {offsets = [0, 0], sizes = [8, 256], strides = [1, 1]} : vector<8x384xf32> to vector<8x256xf32>
    %348 = arith.addf %346, %347 : vector<8x256xf32>
    %cst_89 = arith.constant 5.000000e-01 : f32
    %349 = vector.broadcast %cst_89 : f32 to vector<8x256xf32>
    %350 = arith.mulf %349, %348 : vector<8x256xf32>
    %351 = math.tanh %350 : vector<8x256xf32>
    %cst_90 = arith.constant 5.000000e-01 : f32
    %352 = vector.broadcast %cst_90 : f32 to vector<8x256xf32>
    %353 = arith.mulf %352, %351 : vector<8x256xf32>
    %cst_91 = arith.constant 5.000000e-01 : f32
    %354 = vector.broadcast %cst_91 : f32 to vector<8x256xf32>
    %355 = arith.addf %353, %354 : vector<8x256xf32>
    %356 = vector.extract_strided_slice %355 {offsets = [0, 0], sizes = [8, 128], strides = [1, 1]} : vector<8x256xf32> to vector<8x128xf32>
    %357 = vector.extract_strided_slice %355 {offsets = [0, 128], sizes = [8, 128], strides = [1, 1]} : vector<8x256xf32> to vector<8x128xf32>
    %358 = vector.extract_strided_slice %345 {offsets = [0, 256], sizes = [8, 128], strides = [1, 1]} : vector<8x384xf32> to vector<8x128xf32>
    %359 = vector.extract_strided_slice %323 {offsets = [0, 256], sizes = [8, 128], strides = [1, 1]} : vector<8x384xf32> to vector<8x128xf32>
    %360 = arith.mulf %356, %359 : vector<8x128xf32>
    %361 = arith.addf %358, %360 : vector<8x128xf32>
    %362 = math.tanh %361 : vector<8x128xf32>
    %363 = arith.subf %311, %362 : vector<8x128xf32>
    %364 = arith.mulf %357, %363 : vector<8x128xf32>
    %365 = arith.addf %362, %364 : vector<8x128xf32>
    %c5_i32 = arith.constant 5 : i32
    %366 = vector.broadcast %c5_i32 : i32 to vector<8x1xi32>
    %367 = arith.cmpi sgt, %30, %366 : vector<8x1xi32>
    %368 = arith.extui %367 : vector<8x1xi1> to vector<8x1xi32>
    %369 = arith.sitofp %368 : vector<8x1xi32> to vector<8x1xf32>
    %370 = vector.broadcast %369 : vector<8x1xf32> to vector<8x128xf32>
    %371 = arith.mulf %365, %370 : vector<8x128xf32>
    %372 = arith.addf %318, %371 : vector<8x128xf32>
    %373 = vector.extract_strided_slice %29 {offsets = [48, 0], sizes = [8, 384], strides = [1, 1]} : vector<64x384xf32> to vector<8x384xf32>
    %cst_92 = arith.constant dense<0.000000e+00> : vector<8x384xf32>
    %374 = tpu.matmul %343, %32, %cst_92 {dimension_numbers = #tpu.dot_dimension_numbers<[1], [0], [0], [1], [0, 0, 1, 1], [], []>} : vector<8x128xf32>, vector<128x384xf32>, vector<8x384xf32> -> vector<8x384xf32>
    %375 = arith.addf %374, %39 : vector<8x384xf32>
    %cst_93 = arith.constant dense<0.000000e+00> : vector<8x384xf32>
    %376 = tpu.matmul %365, %36, %cst_93 {dimension_numbers = #tpu.dot_dimension_numbers<[1], [0], [0], [1], [0, 0, 1, 1], [], []>} : vector<8x128xf32>, vector<128x384xf32>, vector<8x384xf32> -> vector<8x384xf32>
    %377 = arith.addf %376, %45 : vector<8x384xf32>
    %378 = vector.extract_strided_slice %373 {offsets = [0, 0], sizes = [8, 256], strides = [1, 1]} : vector<8x384xf32> to vector<8x256xf32>
    %379 = vector.extract_strided_slice %375 {offsets = [0, 0], sizes = [8, 256], strides = [1, 1]} : vector<8x384xf32> to vector<8x256xf32>
    %380 = arith.addf %378, %379 : vector<8x256xf32>
    %cst_94 = arith.constant 5.000000e-01 : f32
    %381 = vector.broadcast %cst_94 : f32 to vector<8x256xf32>
    %382 = arith.mulf %381, %380 : vector<8x256xf32>
    %383 = math.tanh %382 : vector<8x256xf32>
    %cst_95 = arith.constant 5.000000e-01 : f32
    %384 = vector.broadcast %cst_95 : f32 to vector<8x256xf32>
    %385 = arith.mulf %384, %383 : vector<8x256xf32>
    %cst_96 = arith.constant 5.000000e-01 : f32
    %386 = vector.broadcast %cst_96 : f32 to vector<8x256xf32>
    %387 = arith.addf %385, %386 : vector<8x256xf32>
    %388 = vector.extract_strided_slice %387 {offsets = [0, 0], sizes = [8, 128], strides = [1, 1]} : vector<8x256xf32> to vector<8x128xf32>
    %389 = vector.extract_strided_slice %387 {offsets = [0, 128], sizes = [8, 128], strides = [1, 1]} : vector<8x256xf32> to vector<8x128xf32>
    %390 = vector.extract_strided_slice %373 {offsets = [0, 256], sizes = [8, 128], strides = [1, 1]} : vector<8x384xf32> to vector<8x128xf32>
    %391 = vector.extract_strided_slice %375 {offsets = [0, 256], sizes = [8, 128], strides = [1, 1]} : vector<8x384xf32> to vector<8x128xf32>
    %392 = arith.mulf %388, %391 : vector<8x128xf32>
    %393 = arith.addf %390, %392 : vector<8x128xf32>
    %394 = math.tanh %393 : vector<8x128xf32>
    %395 = arith.subf %343, %394 : vector<8x128xf32>
    %396 = arith.mulf %389, %395 : vector<8x128xf32>
    %397 = arith.addf %394, %396 : vector<8x128xf32>
    %cst_97 = arith.constant dense<0.000000e+00> : vector<8x384xf32>
    %398 = tpu.matmul %397, %34, %cst_97 {dimension_numbers = #tpu.dot_dimension_numbers<[1], [0], [0], [1], [0, 0, 1, 1], [], []>} : vector<8x128xf32>, vector<128x384xf32>, vector<8x384xf32> -> vector<8x384xf32>
    %399 = arith.addf %398, %42 : vector<8x384xf32>
    %400 = vector.extract_strided_slice %399 {offsets = [0, 0], sizes = [8, 256], strides = [1, 1]} : vector<8x384xf32> to vector<8x256xf32>
    %401 = vector.extract_strided_slice %377 {offsets = [0, 0], sizes = [8, 256], strides = [1, 1]} : vector<8x384xf32> to vector<8x256xf32>
    %402 = arith.addf %400, %401 : vector<8x256xf32>
    %cst_98 = arith.constant 5.000000e-01 : f32
    %403 = vector.broadcast %cst_98 : f32 to vector<8x256xf32>
    %404 = arith.mulf %403, %402 : vector<8x256xf32>
    %405 = math.tanh %404 : vector<8x256xf32>
    %cst_99 = arith.constant 5.000000e-01 : f32
    %406 = vector.broadcast %cst_99 : f32 to vector<8x256xf32>
    %407 = arith.mulf %406, %405 : vector<8x256xf32>
    %cst_100 = arith.constant 5.000000e-01 : f32
    %408 = vector.broadcast %cst_100 : f32 to vector<8x256xf32>
    %409 = arith.addf %407, %408 : vector<8x256xf32>
    %410 = vector.extract_strided_slice %409 {offsets = [0, 0], sizes = [8, 128], strides = [1, 1]} : vector<8x256xf32> to vector<8x128xf32>
    %411 = vector.extract_strided_slice %409 {offsets = [0, 128], sizes = [8, 128], strides = [1, 1]} : vector<8x256xf32> to vector<8x128xf32>
    %412 = vector.extract_strided_slice %399 {offsets = [0, 256], sizes = [8, 128], strides = [1, 1]} : vector<8x384xf32> to vector<8x128xf32>
    %413 = vector.extract_strided_slice %377 {offsets = [0, 256], sizes = [8, 128], strides = [1, 1]} : vector<8x384xf32> to vector<8x128xf32>
    %414 = arith.mulf %410, %413 : vector<8x128xf32>
    %415 = arith.addf %412, %414 : vector<8x128xf32>
    %416 = math.tanh %415 : vector<8x128xf32>
    %417 = arith.subf %365, %416 : vector<8x128xf32>
    %418 = arith.mulf %411, %417 : vector<8x128xf32>
    %419 = arith.addf %416, %418 : vector<8x128xf32>
    %c6_i32 = arith.constant 6 : i32
    %420 = vector.broadcast %c6_i32 : i32 to vector<8x1xi32>
    %421 = arith.cmpi sgt, %30, %420 : vector<8x1xi32>
    %422 = arith.extui %421 : vector<8x1xi1> to vector<8x1xi32>
    %423 = arith.sitofp %422 : vector<8x1xi32> to vector<8x1xf32>
    %424 = vector.broadcast %423 : vector<8x1xf32> to vector<8x128xf32>
    %425 = arith.mulf %419, %424 : vector<8x128xf32>
    %426 = arith.addf %372, %425 : vector<8x128xf32>
    %427 = vector.extract_strided_slice %29 {offsets = [56, 0], sizes = [8, 384], strides = [1, 1]} : vector<64x384xf32> to vector<8x384xf32>
    %cst_101 = arith.constant dense<0.000000e+00> : vector<8x384xf32>
    %428 = tpu.matmul %397, %32, %cst_101 {dimension_numbers = #tpu.dot_dimension_numbers<[1], [0], [0], [1], [0, 0, 1, 1], [], []>} : vector<8x128xf32>, vector<128x384xf32>, vector<8x384xf32> -> vector<8x384xf32>
    %429 = arith.addf %428, %39 : vector<8x384xf32>
    %cst_102 = arith.constant dense<0.000000e+00> : vector<8x384xf32>
    %430 = tpu.matmul %419, %36, %cst_102 {dimension_numbers = #tpu.dot_dimension_numbers<[1], [0], [0], [1], [0, 0, 1, 1], [], []>} : vector<8x128xf32>, vector<128x384xf32>, vector<8x384xf32> -> vector<8x384xf32>
    %431 = arith.addf %430, %45 : vector<8x384xf32>
    %432 = vector.extract_strided_slice %427 {offsets = [0, 0], sizes = [8, 256], strides = [1, 1]} : vector<8x384xf32> to vector<8x256xf32>
    %433 = vector.extract_strided_slice %429 {offsets = [0, 0], sizes = [8, 256], strides = [1, 1]} : vector<8x384xf32> to vector<8x256xf32>
    %434 = arith.addf %432, %433 : vector<8x256xf32>
    %cst_103 = arith.constant 5.000000e-01 : f32
    %435 = vector.broadcast %cst_103 : f32 to vector<8x256xf32>
    %436 = arith.mulf %435, %434 : vector<8x256xf32>
    %437 = math.tanh %436 : vector<8x256xf32>
    %cst_104 = arith.constant 5.000000e-01 : f32
    %438 = vector.broadcast %cst_104 : f32 to vector<8x256xf32>
    %439 = arith.mulf %438, %437 : vector<8x256xf32>
    %cst_105 = arith.constant 5.000000e-01 : f32
    %440 = vector.broadcast %cst_105 : f32 to vector<8x256xf32>
    %441 = arith.addf %439, %440 : vector<8x256xf32>
    %442 = vector.extract_strided_slice %441 {offsets = [0, 0], sizes = [8, 128], strides = [1, 1]} : vector<8x256xf32> to vector<8x128xf32>
    %443 = vector.extract_strided_slice %441 {offsets = [0, 128], sizes = [8, 128], strides = [1, 1]} : vector<8x256xf32> to vector<8x128xf32>
    %444 = vector.extract_strided_slice %427 {offsets = [0, 256], sizes = [8, 128], strides = [1, 1]} : vector<8x384xf32> to vector<8x128xf32>
    %445 = vector.extract_strided_slice %429 {offsets = [0, 256], sizes = [8, 128], strides = [1, 1]} : vector<8x384xf32> to vector<8x128xf32>
    %446 = arith.mulf %442, %445 : vector<8x128xf32>
    %447 = arith.addf %444, %446 : vector<8x128xf32>
    %448 = math.tanh %447 : vector<8x128xf32>
    %449 = arith.subf %397, %448 : vector<8x128xf32>
    %450 = arith.mulf %443, %449 : vector<8x128xf32>
    %451 = arith.addf %448, %450 : vector<8x128xf32>
    %cst_106 = arith.constant dense<0.000000e+00> : vector<8x384xf32>
    %452 = tpu.matmul %451, %34, %cst_106 {dimension_numbers = #tpu.dot_dimension_numbers<[1], [0], [0], [1], [0, 0, 1, 1], [], []>} : vector<8x128xf32>, vector<128x384xf32>, vector<8x384xf32> -> vector<8x384xf32>
    %453 = arith.addf %452, %42 : vector<8x384xf32>
    %454 = vector.extract_strided_slice %453 {offsets = [0, 0], sizes = [8, 256], strides = [1, 1]} : vector<8x384xf32> to vector<8x256xf32>
    %455 = vector.extract_strided_slice %431 {offsets = [0, 0], sizes = [8, 256], strides = [1, 1]} : vector<8x384xf32> to vector<8x256xf32>
    %456 = arith.addf %454, %455 : vector<8x256xf32>
    %cst_107 = arith.constant 5.000000e-01 : f32
    %457 = vector.broadcast %cst_107 : f32 to vector<8x256xf32>
    %458 = arith.mulf %457, %456 : vector<8x256xf32>
    %459 = math.tanh %458 : vector<8x256xf32>
    %cst_108 = arith.constant 5.000000e-01 : f32
    %460 = vector.broadcast %cst_108 : f32 to vector<8x256xf32>
    %461 = arith.mulf %460, %459 : vector<8x256xf32>
    %cst_109 = arith.constant 5.000000e-01 : f32
    %462 = vector.broadcast %cst_109 : f32 to vector<8x256xf32>
    %463 = arith.addf %461, %462 : vector<8x256xf32>
    %464 = vector.extract_strided_slice %463 {offsets = [0, 0], sizes = [8, 128], strides = [1, 1]} : vector<8x256xf32> to vector<8x128xf32>
    %465 = vector.extract_strided_slice %463 {offsets = [0, 128], sizes = [8, 128], strides = [1, 1]} : vector<8x256xf32> to vector<8x128xf32>
    %466 = vector.extract_strided_slice %453 {offsets = [0, 256], sizes = [8, 128], strides = [1, 1]} : vector<8x384xf32> to vector<8x128xf32>
    %467 = vector.extract_strided_slice %431 {offsets = [0, 256], sizes = [8, 128], strides = [1, 1]} : vector<8x384xf32> to vector<8x128xf32>
    %468 = arith.mulf %464, %467 : vector<8x128xf32>
    %469 = arith.addf %466, %468 : vector<8x128xf32>
    %470 = math.tanh %469 : vector<8x128xf32>
    %471 = arith.subf %419, %470 : vector<8x128xf32>
    %472 = arith.mulf %465, %471 : vector<8x128xf32>
    %473 = arith.addf %470, %472 : vector<8x128xf32>
    %c7_i32 = arith.constant 7 : i32
    %474 = vector.broadcast %c7_i32 : i32 to vector<8x1xi32>
    %475 = arith.cmpi sgt, %30, %474 : vector<8x1xi32>
    %476 = arith.extui %475 : vector<8x1xi1> to vector<8x1xi32>
    %477 = arith.sitofp %476 : vector<8x1xi32> to vector<8x1xf32>
    %478 = vector.broadcast %477 : vector<8x1xf32> to vector<8x128xf32>
    %479 = arith.mulf %473, %478 : vector<8x128xf32>
    %480 = arith.addf %426, %479 : vector<8x128xf32>
    %c0_110 = arith.constant 0 : index
    %c0_111 = arith.constant 0 : index
    %481 = vector.load %arg3[%c0_110, %c0_111] : memref<1x1xf32, #tpu.memory_space<vmem>>, vector<1x1xf32>
    %482 = vector.broadcast %481 : vector<1x1xf32> to vector<8x128xf32>
    %483 = arith.mulf %480, %482 : vector<8x128xf32>
    %c0_112 = arith.constant 0 : index
    %c0_113 = arith.constant 0 : index
    %484 = vector.load %arg17[%c0_112, %c0_113] : memref<128x128xbf16, #tpu.memory_space<vmem>>, vector<128x128xbf16>
    %485 = arith.extf %484 : vector<128x128xbf16> to vector<128x128xf32>
    %cst_114 = arith.constant dense<0.000000e+00> : vector<8x128xf32>
    %486 = tpu.matmul %483, %485, %cst_114 {dimension_numbers = #tpu.dot_dimension_numbers<[1], [0], [0], [1], [0, 0, 1, 1], [], []>} : vector<8x128xf32>, vector<128x128xf32>, vector<8x128xf32> -> vector<8x128xf32>
    %487 = arith.addf %486, %17 : vector<8x128xf32>
    %c0_115 = arith.constant 0 : index
    %c0_116 = arith.constant 0 : index
    %488 = vector.load %arg19[%c0_115, %c0_116] : memref<1x128xf32, #tpu.memory_space<vmem>>, vector<1x128xf32>
    %489 = vector.broadcast %488 : vector<1x128xf32> to vector<8x128xf32>
    %490 = arith.addf %487, %489 : vector<8x128xf32>
    %cst_117 = arith.constant 0.000000e+00 : f32
    %491 = vector.broadcast %cst_117 : f32 to vector<8x128xf32>
    %492 = arith.maximumf %490, %491 : vector<8x128xf32>
    %c0_118 = arith.constant 0 : index
    %c0_119 = arith.constant 0 : index
    %493 = vector.load %arg20[%c0_118, %c0_119] : memref<128x2xbf16, #tpu.memory_space<vmem>>, vector<128x2xbf16>
    %494 = arith.extf %493 : vector<128x2xbf16> to vector<128x2xf32>
    %cst_120 = arith.constant dense<0.000000e+00> : vector<8x2xf32>
    %495 = tpu.matmul %492, %494, %cst_120 {dimension_numbers = #tpu.dot_dimension_numbers<[1], [0], [0], [1], [0, 0, 1, 1], [], []>} : vector<8x128xf32>, vector<128x2xf32>, vector<8x2xf32> -> vector<8x2xf32>
    %c0_121 = arith.constant 0 : index
    %c0_122 = arith.constant 0 : index
    %496 = vector.load %arg21[%c0_121, %c0_122] : memref<1x2xf32, #tpu.memory_space<vmem>>, vector<1x2xf32>
    %497 = vector.broadcast %496 : vector<1x2xf32> to vector<8x2xf32>
    %498 = arith.addf %495, %497 : vector<8x2xf32>
    %c0_123 = arith.constant 0 : index
    %c0_124 = arith.constant 0 : index
    %499 = vector.load %arg22[%c0_123, %c0_124] : memref<8x2xf32, #tpu.memory_space<vmem>>, vector<8x2xf32>
    tpu.vector_store %arg22[%c0_123, %c0_124], %498 {strides = array<i32>} : memref<8x2xf32, #tpu.memory_space<vmem>>, vector<8x2xf32>,
    return
  }
  func.func @transform_0(%arg0: i32) -> (i32, i32) {
    %c0_i32 = arith.constant 0 : i32
    %c0_i32_0 = arith.constant 0 : i32
    %c0_i32_1 = arith.constant 0 : i32
    return %c0_i32, %c0_i32_0 : i32, i32
  }
  func.func @transform_1(%arg0: i32) -> (i32, i32) {
    %c0_i32 = arith.constant 0 : i32
    %c0_i32_0 = arith.constant 0 : i32
    %c0_i32_1 = arith.constant 0 : i32
    return %c0_i32, %c0_i32_0 : i32, i32
  }
  func.func @transform_2(%arg0: i32) -> (i32, i32) {
    %c0_i32 = arith.constant 0 : i32
    %c0_i32_0 = arith.constant 0 : i32
    %c0_i32_1 = arith.constant 0 : i32
    return %c0_i32, %c0_i32_0 : i32, i32
  }
  func.func @transform_3(%arg0: i32) -> (i32, i32) {
    %c0_i32 = arith.constant 0 : i32
    %c0_i32_0 = arith.constant 0 : i32
    %c0_i32_1 = arith.constant 0 : i32
    return %c0_i32, %c0_i32_0 : i32, i32
  }
  func.func @transform_4(%arg0: i32) -> (i32, i32) {
    %c0_i32 = arith.constant 0 : i32
    %c0_i32_0 = arith.constant 0 : i32
    %c0_i32_1 = arith.constant 0 : i32
    return %c0_i32, %c0_i32_0 : i32, i32
  }
  func.func @transform_5(%arg0: i32) -> (i32, i32) {
    %c0_i32 = arith.constant 0 : i32
    %c0_i32_0 = arith.constant 0 : i32
    %c0_i32_1 = arith.constant 0 : i32
    return %c0_i32, %c0_i32_0 : i32, i32
  }
  func.func @transform_6(%arg0: i32) -> (i32, i32) {
    %c0_i32 = arith.constant 0 : i32
    %c0_i32_0 = arith.constant 0 : i32
    %c0_i32_1 = arith.constant 0 : i32
    return %c0_i32, %c0_i32_0 : i32, i32
  }
  func.func @transform_7(%arg0: i32) -> (i32, i32) {
    %c0_i32 = arith.constant 0 : i32
    %c0_i32_0 = arith.constant 0 : i32
    %c0_i32_1 = arith.constant 0 : i32
    return %c0_i32, %c0_i32_0 : i32, i32
  }
  func.func @transform_8(%arg0: i32) -> (i32, i32) {
    %c0_i32 = arith.constant 0 : i32
    %c0_i32_0 = arith.constant 0 : i32
    %c0_i32_1 = arith.constant 0 : i32
    return %c0_i32, %c0_i32_0 : i32, i32
  }
  func.func @transform_9(%arg0: i32) -> (i32, i32) {
    %c0_i32 = arith.constant 0 : i32
    %c0_i32_0 = arith.constant 0 : i32
    %c0_i32_1 = arith.constant 0 : i32
    return %c0_i32, %c0_i32_0 : i32, i32
  }
  func.func @transform_10(%arg0: i32) -> (i32, i32) {
    %c0_i32 = arith.constant 0 : i32
    %c0_i32_0 = arith.constant 0 : i32
    %c0_i32_1 = arith.constant 0 : i32
    return %c0_i32, %c0_i32_0 : i32, i32
  }
  func.func @transform_11(%arg0: i32) -> (i32, i32) {
    %c0_i32 = arith.constant 0 : i32
    %c0_i32_0 = arith.constant 0 : i32
    %c0_i32_1 = arith.constant 0 : i32
    return %c0_i32, %c0_i32_0 : i32, i32
  }
  func.func @transform_12(%arg0: i32) -> (i32, i32) {
    %c0_i32 = arith.constant 0 : i32
    %c0_i32_0 = arith.constant 0 : i32
    %c0_i32_1 = arith.constant 0 : i32
    return %c0_i32, %c0_i32_0 : i32, i32
  }
  func.func @transform_13(%arg0: i32) -> (i32, i32) {
    %c0_i32 = arith.constant 0 : i32
    %c0_i32_0 = arith.constant 0 : i32
    %c0_i32_1 = arith.constant 0 : i32
    return %c0_i32, %c0_i32_0 : i32, i32
  }
  func.func @transform_14(%arg0: i32) -> (i32, i32) {
    %c0_i32 = arith.constant 0 : i32
    %c0_i32_0 = arith.constant 0 : i32
    %c0_i32_1 = arith.constant 0 : i32
    return %c0_i32, %c0_i32_0 : i32, i32
  }
  func.func @transform_15(%arg0: i32) -> (i32, i32) {
    %c0_i32 = arith.constant 0 : i32
    %c0_i32_0 = arith.constant 0 : i32
    %c0_i32_1 = arith.constant 0 : i32
    return %c0_i32, %c0_i32_0 : i32, i32
  }
  func.func @transform_16(%arg0: i32) -> (i32, i32) {
    %c0_i32 = arith.constant 0 : i32
    %c0_i32_0 = arith.constant 0 : i32
    %c0_i32_1 = arith.constant 0 : i32
    return %c0_i32, %c0_i32_0 : i32, i32
  }
  func.func @transform_17(%arg0: i32) -> (i32, i32) {
    %c0_i32 = arith.constant 0 : i32
    %c0_i32_0 = arith.constant 0 : i32
    %c0_i32_1 = arith.constant 0 : i32
    return %c0_i32, %c0_i32_0 : i32, i32
  }
  func.func @transform_18(%arg0: i32) -> (i32, i32) {
    %c0_i32 = arith.constant 0 : i32
    %c0_i32_0 = arith.constant 0 : i32
    %c0_i32_1 = arith.constant 0 : i32
    return %c0_i32, %c0_i32_0 : i32, i32
  }
  func.func @transform_19(%arg0: i32) -> (i32, i32) {
    %c0_i32 = arith.constant 0 : i32
    %c0_i32_0 = arith.constant 0 : i32
    %c0_i32_1 = arith.constant 0 : i32
    return %c0_i32, %c0_i32_0 : i32, i32
  }
  func.func @transform_20(%arg0: i32) -> (i32, i32) {
    %c0_i32 = arith.constant 0 : i32
    %c0_i32_0 = arith.constant 0 : i32
    %c0_i32_1 = arith.constant 0 : i32
    return %c0_i32, %c0_i32_0 : i32, i32
  }
  func.func @transform_21(%arg0: i32) -> (i32, i32) {
    %c0_i32 = arith.constant 0 : i32
    %c0_i32_0 = arith.constant 0 : i32
    %c0_i32_1 = arith.constant 0 : i32
    return %c0_i32, %c0_i32_0 : i32, i32
  }
}

</mosaic_0001>

<bundles_post_ra>
// kernel: learn_forward.1
= control target key start
LH: loop header
LB: loop body
LE: loop exit
PB: predicated region body
PF: predicated region fallthrough
CT: control target
= control target key end

     0   :  { %s9746_s0 = inlined_call_operand.vmem [shape: s32[64,1], index: 0, kind: input, shape index: {}]   ;;  %s9747_s1 = inlined_call_operand.vmem [shape: s32[8,1], index: 1, kind: input, shape index: {}]   ;;  %s9748_s2 = inlined_call_operand.<no memory space> [shape: f32[1,1], index: 2, kind: input, shape index: {}]   ;;  %s9749_s3 = inlined_call_operand.vmem [shape: f32[8,4], index: 3, kind: input, shape index: {}]   ;;  %s9750_s4 = inlined_call_operand.vmem [shape: bf16[4,128], index: 4, kind: input, shape index: {}]   ;;  %s9751_s5 = inlined_call_operand.vmem [shape: f32[1,128], index: 5, kind: input, shape index: {}]   ;;  %s9752_s6 = inlined_call_operand.hbm [shape: bf16[128,128], index: 6, kind: input, shape index: {}]   ;;  %s9753_s7 = inlined_call_operand.vmem [shape: f32[1,128], index: 7, kind: input, shape index: {}]   ;;  %s9754_s8 = inlined_call_operand.vmem [shape: bf16[128,384], index: 8, kind: input, shape index: {}]   ;;  %s9755_s9 = inlined_call_operand.vmem [shape: f32[1,384], index: 9, kind: input, shape index: {}]   ;;  %s9756_s10 = inlined_call_operand.hbm [shape: bf16[128,384], index: 10, kind: input, shape index: {}]   ;;  %s9757_s11 = inlined_call_operand.vmem [shape: f32[1,384], index: 11, kind: input, shape index: {}]   ;;  %s9758_s12 = inlined_call_operand.hbm [shape: bf16[128,384], index: 12, kind: input, shape index: {}]   ;;  %s9759_s13 = inlined_call_operand.vmem [shape: f32[1,384], index: 13, kind: input, shape index: {}]   ;;  %s9760_s14 = inlined_call_operand.hbm [shape: bf16[128,384], index: 14, kind: input, shape index: {}]   ;;  %s9761_s15 = inlined_call_operand.vmem [shape: f32[1,384], index: 15, kind: input, shape index: {}]   ;;  %s9762_s16 = inlined_call_operand.hbm [shape: bf16[128,128], index: 16, kind: input, shape index: {}]   ;;  %s9763_s17 = inlined_call_operand.hbm [shape: bf16[128,128], index: 17, kind: input, shape index: {}]   ;;  %s9764_s18 = inlined_call_operand.vmem [shape: f32[1,128], index: 18, kind: input, shape index: {}]   ;;  %s9765_s19 = inlined_call_operand.vmem [shape: bf16[128,2], index: 19, kind: input, shape index: {}]   ;;  %s9766_s20 = inlined_call_operand.vmem [shape: f32[1,2], index: 20, kind: input, shape index: {}]   ;;  %s9767_s21 = inlined_call_operand.vmem [shape: f32[8,2], index: 21, kind: output, shape index: {}]  }
   0x1   :  { %10093 = sst [smem:[#allocation187_spill]] %s9746_s0 }
   0x2   :  { %10094 = sst [smem:[#allocation188_spill]] %s9747_s1 }
   0x3   :  { %10095 = sst [smem:[#allocation189_spill]] %s9748_s2 }
   0x4   :  { %10096 = sst [smem:[#allocation190_spill]] %s9749_s3 }
   0x5   :  { %10097 = sst [smem:[#allocation191_spill]] %s9750_s4 }
   0x6   :  { %10098 = sst [smem:[#allocation192_spill]] %s9751_s5 }
   0x7   :  { %s10099_s26 = sld [smem:[#allocation189_spill]] }
   0xd   :  { %v26_v0 = vstv %s10099_s26 }
   0xe   :  { %27 = vst [vmem:[#allocation2] sm:$0x1] %v26_v0 }
   0xf   :  { %28 = vsyncpa [#allocation4], 0 }
  0x10   :  { %29 = vsyncpa [#allocation6], 0 }
  0x11   :  { %30 = vsyncpa [#allocation9], 0 }
  0x12   :  { %31 = vsyncpa [#allocation12], 0  ;;  %s7078_s27 = smov [#allocation5]  }
  0x13   :  { %s67_s3 = sshll.u32 %s7078_s27, 4  ;;  %s68_s3 = int_to_ptr.vmem [resolvable:$true] %s67_s3 }
  0x14   :  { %s6958_s28 = scalar_lea.vmem %s68_s3, 3072  ;;  %p6963_p1 = scmp.lt.s32.totalorder %s68_s3, %s68_s3 }
  0x15   :  { %p6959_p0 = scmp.ne.s32.totalorder %s68_s3, %s6958_s28  ;;  %p6964_p2 = scmp.lt.s32.totalorder %s6958_s28, %s6958_s28 }
  0x17   :  { %p6965_p3 = por %p6964_p2, %p6963_p1 }
  0x19   :  { %p6966_p4 = pnand %p6965_p3, %p6959_p0 }
  0x1b   :  { %6969 = shalt.err (!%p6966_p4)
}
  0x1c   :  { %s7079_s29 = smov 192   ;;  %s7080_s0 = smov 12  }
  0x1d   :  { %73 = dma.hbm_to_vmem [thread:$0]  %s9756_s10, 3072, %s68_s3, [#allocation6], %s7079_s29, %s7079_s29, %s7080_s0  }
  0x1e   :  { %s7081_s5 = smov [#allocation8]   ;;  %s7082_s23 = smov [#allocation3]  }
  0x1f   :  { %s95_s22 = sshll.u32 %s7081_s5, 4  ;;  %s49_s1 = sshll.u32 %s7082_s23, 4  ;;  %s96_s22 = int_to_ptr.vmem [resolvable:$true] %s95_s22  ;;  %s50_s1 = int_to_ptr.vmem [resolvable:$true] %s49_s1 }
  0x20   :  { %s6978_s24 = scalar_lea.vmem %s96_s22, 3072  ;;  %p6983_p6 = scmp.lt.s32.totalorder %s96_s22, %s96_s22 }
  0x21   :  { %p6979_p5 = scmp.ne.s32.totalorder %s96_s22, %s6978_s24  ;;  %p6984_p7 = scmp.lt.s32.totalorder %s6978_s24, %s6978_s24 }
  0x23   :  { %p6985_p8 = por %p6984_p7, %p6983_p6 }
  0x25   :  { %p6986_p9 = pnand %p6985_p8, %p6979_p5 }
  0x27   :  { %6989 = shalt.err (!%p6986_p9)
}
  0x28   :  { %101 = dma.hbm_to_vmem [thread:$0]  %s9760_s14, 3072, %s96_s22, [#allocation9], %s7079_s29, %s7079_s29, %s7080_s0  }
  0x29   :  { %s6998_s10 = scalar_lea.vmem %s50_s1, 1024  ;;  %p7003_p11 = scmp.lt.s32.totalorder %s50_s1, %s50_s1 }
  0x2a   :  { %p6999_p10 = scmp.ne.s32.totalorder %s50_s1, %s6998_s10  ;;  %p7004_p12 = scmp.lt.s32.totalorder %s6998_s10, %s6998_s10 }
  0x2c   :  { %p7005_p13 = por %p7004_p12, %p7003_p11 }
  0x2e   :  { %p7006_p0 = pnand %p7005_p13, %p6999_p10 }
  0x30   :  { %7009 = shalt.err (!%p7006_p0)
}
  0x31   :  { %s7083_s26 = smov 64   ;;  %s7084_s27 = smov 4  }
  0x32   :  { %55 = dma.hbm_to_vmem [thread:$0]  %s9752_s6, 1024, %s50_s1, [#allocation4], %s7083_s26, %s7083_s26, %s7084_s27  }
  0x33   :  { %s7085_s4 = smov [#allocation7]   ;;  %s7086_s14 = smov [#allocation10]  }
  0x34   :  { %s81_s30 = sshll.u32 %s7085_s4, 4  ;;  %s109_s5 = sshll.u32 %s7086_s14, 4  ;;  %s82_s30 = int_to_ptr.vmem [resolvable:$true] %s81_s30  ;;  %s110_s5 = int_to_ptr.vmem [resolvable:$true] %s109_s5 }
  0x35   :  { %s7018_s22 = scalar_lea.vmem %s82_s30, 3072  ;;  %p7023_p2 = scmp.lt.s32.totalorder %s82_s30, %s82_s30 }
  0x36   :  { %p7019_p1 = scmp.ne.s32.totalorder %s82_s30, %s7018_s22  ;;  %p7024_p3 = scmp.lt.s32.totalorder %s7018_s22, %s7018_s22 }
  0x38   :  { %p7025_p4 = por %p7024_p3, %p7023_p2 }
  0x3a   :  { %p7026_p5 = pnand %p7025_p4, %p7019_p1 }
  0x3c   :  { %7029 = shalt.err (!%p7026_p5)
}
  0x3d   :  { %87 = dma.hbm_to_vmem [thread:$0]  %s9758_s12, 3072, %s82_s30, [#allocation6], %s7079_s29, %s7079_s29, %s7080_s0  }
  0x3e   :  { %s7038_s6 = scalar_lea.vmem %s110_s5, 1024  ;;  %p7043_p7 = scmp.lt.s32.totalorder %s110_s5, %s110_s5 }
  0x3f   :  { %p7039_p6 = scmp.ne.s32.totalorder %s110_s5, %s7038_s6  ;;  %p7044_p8 = scmp.lt.s32.totalorder %s7038_s6, %s7038_s6 }
  0x41   :  { %p7045_p9 = por %p7044_p8, %p7043_p7 }
  0x43   :  { %p7046_p10 = pnand %p7045_p9, %p7039_p6 }
  0x45   :  { %7049 = shalt.err (!%p7046_p10)
}
  0x46   :  { %115 = dma.hbm_to_vmem [thread:$0]  %s9762_s16, 1024, %s110_s5, [#allocation9], %s7083_s26, %s7083_s26, %s7084_s27  }
  0x47   :  { %s7087_s25 = smov [#allocation11]  }
  0x48   :  { %s121_s10 = sshll.u32 %s7087_s25, 4  ;;  %s122_s10 = int_to_ptr.vmem [resolvable:$true] %s121_s10 }
  0x49   :  { %s7058_s3 = scalar_lea.vmem %s122_s10, 1024  ;;  %p7063_p12 = scmp.lt.s32.totalorder %s122_s10, %s122_s10 }
  0x4a   :  { %p7059_p11 = scmp.ne.s32.totalorder %s122_s10, %s7058_s3  ;;  %p7064_p13 = scmp.lt.s32.totalorder %s7058_s3, %s7058_s3 }
  0x4c   :  { %p7065_p0 = por %p7064_p13, %p7063_p12 }
  0x4e   :  { %p7066_p1 = pnand %p7065_p0, %p7059_p11 }
  0x50   :  { %7069 = shalt.err (!%p7066_p1)
}
  0x51   :  { %127 = dma.hbm_to_vmem [thread:$0]  %s9763_s17, 1024, %s122_s10, [#allocation12], %s7083_s26, %s7083_s26, %s7084_s27  }
  0x52   :  { %7070 = dma.done.wait [#allocation4], 1024  }
  0x53   :  { %7071 = vsyncadd [#allocation4], 4294966272 }
  0x54   :  { %7072 = dma.done.wait [#allocation6], 6144  }
  0x55   :  { %7073 = vsyncadd [#allocation6], 4294961152 }
  0x56   :  { %7074 = dma.done.wait [#allocation9], 4096  }
  0x57   :  { %7075 = vsyncadd [#allocation9], 4294963200 }
  0x58   :  { %7076 = dma.done.wait [#allocation12], 1024  }
  0x59   :  { %7077 = vsyncadd [#allocation12], 4294966272  ;;  %v9779_v1 = vmov 0.0   ;;  %vm7089_vm0 = vmmov 0   ;;  %s10100_s0 = sld [smem:[#allocation191_spill]]  ;;  %vm167_vm1 = vcmask 1043456  }
  0x5a   :  { %5792 = vmatprep.subr.mxu0 %v9779_v1  ;;  %5794 = vmatprep.mubr.msk.f32.mxu0 %vm7089_vm0, %v9779_v1  ;;  %v5280_v3 = vld [vmem:[#allocation3 + $0x38] sm:$0xff]   ;;  %s10101_s28 = sld [smem:[#allocation190_spill]]  ;;  %vm163_vm2 = vcmask 31744   ;;  %v5279_v8 = vld [vmem:[#allocation3 + $0x30] sm:$0xff]   ;;  %v5278_v10 = vld [vmem:[#allocation3 + $0x28] sm:$0xff]   ;;  %v7090_v31 = vmov 0  }
  0x5b   :  { %5797 = vmatprep.subr.mxu1 %v9779_v1  ;;  %5829 = vmatprep.mubr.msk.f32.mxu1 %vm7089_vm0, %v9779_v1  ;;  %v5176_v6 = vunpack.c.l.bf16 %v5280_v3  ;;  %v5177_v7 = vunpack.c.h.bf16 %v5280_v3  ;;  %v5173_v9 = vunpack.c.h.bf16 %v5279_v8  ;;  %v5172_v11 = vunpack.c.l.bf16 %v5279_v8  ;;  %v5277_v12 = vld [vmem:[#allocation3 + $0x20] sm:$0xff]   ;;  %v5276_v15 = vld [vmem:[#allocation3 + $0x18] sm:$0xff]   ;;  %v5275_v19 = vld [vmem:[#allocation3 + $0x10] sm:$0xff]   ;;  %s10102_s14 = sld [smem:[#allocation187_spill]] }
  0x5c   :  { %v5169_v13 = vunpack.c.h.bf16 %v5278_v10  ;;  %v5168_v14 = vunpack.c.l.bf16 %v5278_v10  ;;  %v5165_v16 = vunpack.c.h.bf16 %v5277_v12  ;;  %v5164_v17 = vunpack.c.l.bf16 %v5277_v12  ;;  %v5274_v22 = vld [vmem:[#allocation3 + $0x8] sm:$0xff]   ;;  %v5147_v26 = vld [vmem:[#allocation3] sm:$0xff]   ;;  %6815 = vset.pattern.permute.xlu0 %v7090_v31  ;;  %6816 = vset.pattern.permute.xlu1 %v7090_v31  ;;  %s10103_s10 = sld [smem:[#allocation188_spill]]  ;;  %v5287_v48 = vld [vmem:[#allocation11 + $0x38] sm:$0xff]  }
  0x5d   :  { %5798 = vmatpush3.msra.mxu1 %v5177_v7  ;;  %v5161_v18 = vunpack.c.h.bf16 %v5276_v15  ;;  %v5160_v20 = vunpack.c.l.bf16 %v5276_v15  ;;  %v5157_v21 = vunpack.c.h.bf16 %v5275_v19  ;;  %v5156_v23 = vunpack.c.l.bf16 %v5275_v19  ;;  %v6824_v35 = vld [vmem:[%s9754_s8 + $0xac] ss:$12 sps:$4 sm:$0xff]   ;;  %v5143_v50 = vld [vmem:[#allocation2] ss:$0 sm:$0xff]  ;;  %v5284_v59 = vld [vmem:[#allocation11 + $0x20] sm:$0xff]   ;;  %s10104_s5 = sld [smem:[#allocation192_spill]] }
  0x5e   :  { %5799 = vmatprep.subr.mxu1 %v9779_v1  ;;  %v5153_v24 = vunpack.c.h.bf16 %v5274_v22  ;;  %v5152_v25 = vunpack.c.l.bf16 %v5274_v22  ;;  %v5149_v27 = vunpack.c.h.bf16 %v5147_v26  ;;  %v5148_v28 = vunpack.c.l.bf16 %v5147_v26  ;;  %v5286_v53 = vld [vmem:[#allocation11 + $0x30] sm:$0xff]   ;;  %v5285_v56 = vld [vmem:[#allocation11 + $0x28] sm:$0xff]   ;;  %v5283_v62 = vld [vmem:[#allocation11 + $0x18] sm:$0xff]  }
  0x5f   :  { %v154_v2 = vld [vmem:[%s10100_s0] sm:$0x3]  ;;  %5800 = vmatpush3.msra.mxu1 %v5176_v6  ;;  %v5209_v51 = vunpack.c.h.bf16 %v5287_v48  ;;  %v5208_v52 = vunpack.c.l.bf16 %v5287_v48  ;;  %v5205_v54 = vunpack.c.h.bf16 %v5286_v53  ;;  %v5204_v55 = vunpack.c.l.bf16 %v5286_v53  ;;  %v6828_v19 = vld [vmem:[%s9754_s8 + $0x78] ss:$12 sps:$4 sm:$0xff]  }
  0x60   :  { %v155_v4 = vunpack.c.l.bf16 %v154_v2  ;;  %v153_v5 = vld [vmem:[%s10101_s28] sm:$0xff]  ;;  %5801 = vmatprep.subr.mxu1 %v9779_v1  ;;  %v5201_v57 = vunpack.c.h.bf16 %v5285_v56  ;;  %v5200_v58 = vunpack.c.l.bf16 %v5285_v56  ;;  %v5197_v60 = vunpack.c.h.bf16 %v5284_v59  ;;  %v5282_v2 = vld [vmem:[#allocation11 + $0x10] sm:$0xff]  }
  0x61   :  { %5802 = vmatpush3.msra.mxu1 %v5173_v9  ;;  %v453_v29 = vld [vmem:[%s10102_s14] sm:$0xff]  ;;  %v455_v30 = vld [vmem:[%s10102_s14 + $0x10] sm:$0xff]  ;;  %v454_v32 = vld [vmem:[%s10102_s14 + $0x8] sm:$0xff]  ;;  %v5196_v61 = vunpack.c.l.bf16 %v5284_v59  ;;  %v5193_v63 = vunpack.c.h.bf16 %v5283_v62  ;;  %v5192_v0 = vunpack.c.l.bf16 %v5283_v62  ;;  %v5189_v3 = vunpack.c.h.bf16 %v5282_v2 }
  0x62   :  { %5793 = vmatpush3.msk.msra.mxu0 %vm167_vm1, %v155_v4  ;;  %5803 = vmatprep.subr.mxu1 %v9779_v1  ;;  %v456_v33 = vld [vmem:[%s10102_s14 + $0x18] sm:$0xff]  ;;  %v830_v34 = vld [vmem:[%s10103_s10] sm:$0xff]  ;;  %v458_v37 = vld [vmem:[%s10102_s14 + $0x28] sm:$0xff]  ;;  %v5188_v4 = vunpack.c.l.bf16 %v5282_v2 }
  0x63   :  { %5795 = vmatmul.mubr.msk.f32.vlgmr.msra.gmra.mxu0 %vm163_vm2, %v153_v5  ;;  %5832 = vmatprep.subr.mxu0 %v9779_v1  ;;  %v457_v36 = vld [vmem:[%s10102_s14 + $0x20] sm:$0xff]  ;;  %vm1577_vm3 = vcmp.gt.s32.totalorder %v830_v34, 0  ;;  %vm2042_vm4 = vcmp.gt.s32.totalorder %v830_v34, 1  ;;  %v459_v38 = vld [vmem:[%s10102_s14 + $0x30] sm:$0xff]  ;;  %v460_v41 = vld [vmem:[%s10102_s14 + $0x38] sm:$0xff]  ;;  %vm2507_vm5 = vcmp.gt.s32.totalorder %v830_v34, 2 }
  0x64   :  { %5864 = vmatprep.mubr.msk.f32.mxu0 %vm7089_vm0, %v9779_v1  ;;  %5804 = vmatpush3.msra.mxu1 %v5172_v11  ;;  %v5135_v39 = vsel %vm1577_vm3, 1.0, %v9779_v1  ;;  %v5136_v40 = vsel %vm2042_vm4, 1.0, %v9779_v1  ;;  %v5137_v43 = vsel %vm2507_vm5, 1.0, %v9779_v1  ;;  %vm2972_vm6 = vcmp.gt.s32.totalorder %v830_v34, 3  ;;  %v5281_v5 = vld [vmem:[#allocation11 + $0x8] sm:$0xff]   ;;  %v7324_v8 = vld [vmem:[#allocation11] sm:$0xff]  }
  0x65   :  { %5805 = vmatprep.subr.mxu1 %v9779_v1  ;;  %464 = vperm.xlu0 %6815, %v453_v29   ;;  %v6817_v42 = vpack.i.bf16 %v5136_v40, %v5135_v39  ;;  %vm3437_vm7 = vcmp.gt.s32.totalorder %v830_v34, 4  ;;  %v5138_v44 = vsel %vm2972_vm6, 1.0, %v9779_v1  ;;  %vm3902_vm8 = vcmp.gt.s32.totalorder %v830_v34, 5  ;;  %v5083_v10 = vld [vmem:[%s10104_s5] ss:$0 sm:$0xff]  ;;  %v849_v56 = vld [vmem:[#allocation5 + $0x6c] sm:$0xff] }
  0x66   :  { %5806 = vmatpush3.msra.mxu1 %v5169_v13  ;;  %470 = vperm.xlu1 %6816, %v455_v30   ;;  %v5139_v45 = vsel %vm3437_vm7, 1.0, %v9779_v1  ;;  %vm4367_vm9 = vcmp.gt.s32.totalorder %v830_v34, 6  ;;  %v5140_v46 = vsel %vm3902_vm8, 1.0, %v9779_v1  ;;  %vm4832_vm10 = vcmp.gt.s32.totalorder %v830_v34, 7  ;;  %v6836_v22 = vld [vmem:[%s9754_s8 + $0x4c] ss:$12 sps:$4 sm:$0xff]  }
  0x67   :  { %5807 = vmatprep.subr.mxu1 %v9779_v1  ;;  %v5141_v47 = vsel %vm4367_vm9, 1.0, %v9779_v1  ;;  %v5142_v49 = vsel %vm4832_vm10, 1.0, %v9779_v1  ;;  %5833 = vmatpush3.msra.mxu0 %v5209_v51  ;;  %v5185_v6 = vunpack.c.h.bf16 %v5281_v5  ;;  %v5184_v7 = vunpack.c.l.bf16 %v5281_v5  ;;  %v6840_v29 = vld [vmem:[%s9754_s8 + $0x18] ss:$12 sps:$4 sm:$0xff]  }
  0x68   :  { %5808 = vmatpush3.msra.mxu1 %v5168_v14  ;;  %5834 = vmatprep.subr.mxu0 %v9779_v1  ;;  %v5181_v9 = vunpack.c.h.bf16 %v7324_v8  ;;  %v6822_v14 = vld [vmem:[%s9754_s8 + $0xa8] ss:$12 sps:$4 sm:$0xff]   ;;  %v6851_v39 = vld [vmem:[%s9754_s8 + $0x38] ss:$12 sps:$4 sm:$0xff]  }
  0x69   :  { %5809 = vmatprep.subr.mxu1 %v9779_v1  ;;  %467 = vperm.xlu0 %6815, %v454_v32   ;;  %v6845_v32 = vld [vmem:[%s9754_s8 + $0x4] ss:$12 sps:$4 sm:$0xff]   ;;  %v861_v34 = vld [vmem:[#allocation5 + $0xb4] sm:$0xff] }
  0x6a   :  { %5810 = vmatpush3.msra.mxu1 %v5165_v16  ;;  %473 = vperm.xlu1 %6816, %v456_v33   ;;  %v6827_v16 = vld [vmem:[%s9754_s8 + $0x94] ss:$12 sps:$4 sm:$0xff]   ;;  %v7389_v40 = vunpack.c.l.bf16 %v861_v34 }
  0x6b   :  { %5811 = vmatprep.subr.mxu1 %v9779_v1  ;;  %5835 = vmatpush3.msra.mxu0 %v5208_v52  ;;  %v851_v52 = vld [vmem:[#allocation5 + $0x78] sm:$0xff] }
  0x6c   :  { %5812 = vmatpush3.msra.mxu1 %v5164_v17  ;;  %5836 = vmatprep.subr.mxu0 %v9779_v1  ;;  %v6825_v17 = vld [vmem:[%s9754_s8 + $0x90] ss:$12 sps:$4 sm:$0xff]   ;;  %10108 = vst [vmem:[#allocation18_spill] sm:$0xff] %v7389_v40 }
  0x6d   :  { %5813 = vmatprep.subr.mxu1 %v9779_v1  ;;  %476 = vperm.xlu0 %6815, %v457_v36  }
  0x6e   :  { %5814 = vmatpush3.msra.mxu1 %v5161_v18  ;;  %479 = vperm.xlu1 %6816, %v458_v37   ;;  %v6830_v18 = vld [vmem:[%s9754_s8 + $0x7c] ss:$12 sps:$4 sm:$0xff]   ;;  %v7383_v37 = vunpack.c.h.bf16 %v861_v34  ;;  %v5086_v34 = vld [vmem:[%s9753_s7] ss:$0 sm:$0xff] }
  0x6f   :  { %5815 = vmatprep.subr.mxu1 %v9779_v1  ;;  %5837 = vmatpush3.msra.mxu0 %v5205_v54 }
  0x70   :  { %5816 = vmatpush3.msra.mxu1 %v5160_v20  ;;  %5838 = vmatprep.subr.mxu0 %v9779_v1  ;;  %v6833_v20 = vld [vmem:[%s9754_s8 + $0x64] ss:$12 sps:$4 sm:$0xff]   ;;  %10105 = vst [vmem:[#allocation17_spill] sm:$0xff] %v7383_v37 }
  0x71   :  { %5817 = vmatprep.subr.mxu1 %v9779_v1  ;;  %482 = vperm.xlu0 %6815, %v459_v38   ;;  %v859_v38 = vld [vmem:[#allocation5 + $0xa8] sm:$0xff] }
  0x72   :  { %5818 = vmatpush3.msra.mxu1 %v5157_v21  ;;  %485 = vperm.xlu1 %6816, %v460_v41   ;;  %v6831_v21 = vld [vmem:[%s9754_s8 + $0x60] ss:$12 sps:$4 sm:$0xff]  }
  0x73   :  { %5819 = vmatprep.subr.mxu1 %v9779_v1  ;;  %5839 = vmatpush3.msra.mxu0 %v5204_v55  ;;  %v857_v41 = vld [vmem:[#allocation5 + $0x9c] sm:$0xff] }
  0x74   :  { %5820 = vmatpush3.msra.mxu1 %v5156_v23  ;;  %5840 = vmatprep.subr.mxu0 %v9779_v1  ;;  %v6834_v23 = vld [vmem:[%s9754_s8 + $0x48] ss:$12 sps:$4 sm:$0xff]   ;;  %v7402_v48 = vunpack.c.l.bf16 %v857_v41 }
  0x75   :  { %5821 = vmatprep.subr.mxu1 %v9779_v1  ;;  %6818 = vperm.xlu0 %6815, %v6817_v42   ;;  %v7392_v42 = vunpack.c.h.bf16 %v859_v38 }
  0x76   :  { %5822 = vmatpush3.msra.mxu1 %v5153_v24  ;;  %2512 = vperm.xlu1 %6816, %v5137_v43   ;;  %v6839_v24 = vld [vmem:[%s9754_s8 + $0x34] ss:$12 sps:$4 sm:$0xff]   ;;  %v7394_v43 = vunpack.c.l.bf16 %v859_v38  ;;  %10112 = vst [vmem:[#allocation22_spill] sm:$0xff] %v7402_v48  ;;  %v6847_v38 = vld [vmem:[%s9754_s8 + $0x98] ss:$12 sps:$4 sm:$0xff]  }
  0x77   :  { %5823 = vmatprep.subr.mxu1 %v9779_v1  ;;  %5841 = vmatpush3.msra.mxu0 %v5201_v57  ;;  %10109 = vst [vmem:[#allocation19_spill] sm:$0xff] %v7392_v42  ;;  %v7424_v57 = vunpack.c.h.bf16 %v851_v52 }
  0x78   :  { %5824 = vmatpush3.msra.mxu1 %v5152_v25  ;;  %5842 = vmatprep.subr.mxu0 %v9779_v1  ;;  %v6837_v25 = vld [vmem:[%s9754_s8 + $0x30] ss:$12 sps:$4 sm:$0xff]   ;;  %10110 = vst [vmem:[#allocation20_spill] sm:$0xff] %v7394_v43 }
  0x79   :  { %5825 = vmatprep.subr.mxu1 %v9779_v1  ;;  %2977 = vperm.xlu0 %6815, %v5138_v44   ;;  %10119 = vst [vmem:[#allocation27_spill] sm:$0xff] %v7424_v57 }
  0x7a   :  { %5826 = vmatpush3.msra.mxu1 %v5149_v27  ;;  %3442 = vperm.xlu1 %6816, %v5139_v45   ;;  %v6842_v27 = vld [vmem:[%s9754_s8 + $0x1c] ss:$12 sps:$4 sm:$0xff]   ;;  %v855_v45 = vld [vmem:[#allocation5 + $0x90] sm:$0xff] }
  0x7b   :  { %5827 = vmatprep.subr.mxu1 %v9779_v1  ;;  %5843 = vmatpush3.msra.mxu0 %v5200_v58  ;;  %v7411_v51 = vunpack.c.l.bf16 %v855_v45  ;;  %v7427_v58 = vunpack.c.l.bf16 %v851_v52  ;;  %v6852_v52 = vld [vmem:[%s9754_s8 + $0x20] ss:$12 sps:$4 sm:$0xff]  }
  0x7c   :  { %5828 = vmatpush3.msra.mxu1 %v5148_v28  ;;  %5844 = vmatprep.subr.mxu0 %v9779_v1  ;;  %v461_v28 = vlaneseq }
  0x7d   :  { %692 = vmatprep.subr.bf16.mxu1 %v6824_v35  ;;  %3907 = vperm.xlu0 %6815, %v5140_v46   ;;  %v6843_v35 = vld [vmem:[%s9754_s8] ss:$12 sps:$4 sm:$0xff]   ;;  %v7091_v46 = vmov 1.0|1.0   ;;  %10114 = vst [vmem:[#allocation24_spill] sm:$0xff] %v7411_v51  ;;  %10120 = vst [vmem:[#allocation28_spill] sm:$0xff] %v7427_v58 }
  0x7e   :  { %4372 = vperm.xlu1 %6816, %v5141_v47   ;;  %5845 = vmatpush3.msra.mxu0 %v5197_v60  ;;  %v7373_v30 = vand.u32 127, %v461_v28  ;;  %v7399_v47 = vunpack.c.h.bf16 %v857_v41  ;;  %v847_v60 = vld [vmem:[#allocation5 + $0x60] sm:$0xff] }
  0x7f   :  { %5846 = vmatprep.subr.mxu0 %v9779_v1  ;;  %v7442_v2 = vunpack.c.h.bf16 %v847_v60 }
  0x80   :  { %5847 = vmatpush3.msra.mxu0 %v5196_v61  ;;  %10111 = vst [vmem:[#allocation21_spill] sm:$0xff] %v7399_v47  ;;  %v7433_v61 = vunpack.c.h.bf16 %v849_v56 }
  0x81   :  { %4837 = vperm.xlu0 %6815, %v5142_v49   ;;  %5848 = vmatprep.subr.mxu0 %v9779_v1  ;;  %v853_v49 = vld [vmem:[#allocation5 + $0x84] sm:$0xff]  ;;  %10123 = vst [vmem:[#allocation31_spill] sm:$0xff] %v7442_v2 }
  0x82   :  { %4849 = vperm.xlu1 %6816, %v5143_v50   ;;  %5849 = vmatpush3.msra.mxu0 %v5193_v63  ;;  %v7408_v50 = vunpack.c.h.bf16 %v855_v45  ;;  %v7414_v53 = vunpack.c.h.bf16 %v853_v49  ;;  %v7421_v55 = vunpack.c.l.bf16 %v853_v49  ;;  %10121 = vst [vmem:[#allocation29_spill] sm:$0xff] %v7433_v61  ;;  %v7436_v63 = vunpack.c.l.bf16 %v849_v56  ;;  %v6849_v45 = vld [vmem:[%s9754_s8 + $0x68] ss:$12 sps:$4 sm:$0xff]   ;;  %v6850_v49 = vld [vmem:[%s9754_s8 + $0x50] ss:$12 sps:$4 sm:$0xff]  }
  0x83   :  { %5850 = vmatprep.subr.mxu0 %v9779_v1  ;;  %v7548_v56 = vshrl.u32 %v461_v28, 7 }
  0x84   :  { %5851 = vmatpush3.msra.mxu0 %v5192_v0  ;;  %10113 = vst [vmem:[#allocation23_spill] sm:$0xff] %v7408_v50  ;;  %10115 = vst [vmem:[#allocation25_spill] sm:$0xff] %v7414_v53  ;;  %v845_v0 = vld [vmem:[#allocation5 + $0x54] sm:$0xff] }
  0x85   :  { %5852 = vmatprep.subr.mxu0 %v9779_v1  ;;  %10118 = vst [vmem:[#allocation26_spill] sm:$0xff] %v7421_v55  ;;  %10122 = vst [vmem:[#allocation30_spill] sm:$0xff] %v7436_v63  ;;  %v7448_v5 = vunpack.c.h.bf16 %v845_v0 }
  0x86   :  { %5853 = vmatpush3.msra.mxu0 %v5189_v3  ;;  %v7445_v3 = vunpack.c.l.bf16 %v847_v60  ;;  %v862_v60 = vld [vmem:[#allocation5 + $0xb0] ss:$12 sps:$4 sm:$0xff]  }
  0x87   :  { %5854 = vmatprep.subr.mxu0 %v9779_v1  ;;  %10125 = vst [vmem:[#allocation33_spill] sm:$0xff] %v7448_v5  ;;  %v7564_v28 = vunpack.c.h.bf16 %v862_v60 }
  0x88   :  { %5855 = vmatpush3.msra.mxu0 %v5188_v4  ;;  %10124 = vst [vmem:[#allocation32_spill] sm:$0xff] %v7445_v3  ;;  %v843_v4 = vld [vmem:[#allocation5 + $0x48] sm:$0xff] }
  0x89   :  { %5856 = vmatprep.subr.mxu0 %v9779_v1  ;;  %10146 = vst [vmem:[#allocation50_spill] sm:$0xff] %v7564_v28 }
  0x8a   :  { %5857 = vmatpush3.msra.mxu0 %v5185_v6 }
  0x8b   :  { %5858 = vmatprep.subr.mxu0 %v9779_v1 }
  0x8c   :  { %5859 = vmatpush3.msra.mxu0 %v5184_v7  ;;  %v7455_v7 = vunpack.c.l.bf16 %v845_v0  ;;  %v7559_v0 = vld [vmem:[%s9755_s9] sm:$0x7] }
  0x8d   :  { %5860 = vmatprep.subr.mxu0 %v9779_v1 }
  0x8e   :  { %5861 = vmatpush3.msra.mxu0 %v5181_v9  ;;  %10128 = vst [vmem:[#allocation34_spill] sm:$0xff] %v7455_v7  ;;  %v841_v9 = vld [vmem:[#allocation5 + $0x3c] sm:$0xff] }
  0x8f   :  { %5862 = vmatprep.subr.mxu0 %v9779_v1 }
  0xe0   :  { %v465_v26 = vpop.permute.xlu0 %464 }
  0xe1   :  { %v471_v36 = vpop.permute.xlu1 %470  ;;  %vm487_vm11 = vcmp.eq.s32.totalorder %v7373_v30, %v465_v26  ;;  %v833_v26 = vld [vmem:[#allocation5 + $0xc] sm:$0xff] }
  0xe2   :  { %vm489_vm14 = vcmp.eq.s32.totalorder %v7373_v30, %v471_v36 }
  0xe4   :  { %v468_v33 = vpop.permute.xlu0 %467 }
  0xe5   :  { %vm488_vm12 = vcmp.eq.s32.totalorder %v7373_v30, %v468_v33  ;;  %v474_v44 = vpop.permute.xlu1 %473 }
  0xe6   :  { %vm7385_vm13 = vmpackc.low %vm488_vm12, %vm487_vm11  ;;  %vm490_vm15 = vcmp.eq.s32.totalorder %v7373_v30, %v474_v44  ;;  %v6848_v44 = vld [vmem:[%s9754_s8 + $0x80] ss:$12 sps:$4 sm:$0xff]  }
  0xe7   :  { %vm7416_vm1 = vmpackc.low %vm490_vm15, %vm489_vm14 }
  0xe8   :  { %v477_v62 = vpop.permute.xlu0 %476 }
  0xe9   :  { %v480_v59 = vpop.permute.xlu1 %479  ;;  %vm491_vm2 = vcmp.eq.s32.totalorder %v7373_v30, %v477_v62  ;;  %v7554_v62 = vsub.s32 0, %v7548_v56 }
  0xea   :  { %vm492_vm3 = vcmp.eq.s32.totalorder %v7373_v30, %v480_v59  ;;  %v6853_v59 = vld [vmem:[%s9754_s8 + $0x8] ss:$12 sps:$4 sm:$0xff]  }
  0xeb   :  { %vm7450_vm4 = vmpackc.low %vm492_vm3, %vm491_vm2  ;;  %10145 = vst [vmem:[#allocation49_spill] sm:$0xff] %v7554_v62 }
 0x123   :  { %v237_v11 = vpop.f32.mrf.mxu0 }
 0x124   :  { %v238_v12 = vadd.f32 %v5083_v10, %v237_v11  ;;  %v7458_v10 = vunpack.c.h.bf16 %v843_v4  ;;  %v7461_v11 = vunpack.c.l.bf16 %v843_v4  ;;  %v7562_v4 = vsub.s32 1, %v7548_v56 }
 0x125   :  { %v5796_v13 = vpop.f32.mrf.mxu0 }
 0x126   :  { %v241_v15 = vmax.f32 %v238_v12, 0.0  ;;  %10129 = vst [vmem:[#allocation35_spill] sm:$0xff] %v7458_v10  ;;  %10130 = vst [vmem:[#allocation36_spill] sm:$0xff] %v7461_v11  ;;  %v486_v12 = vpop.permute.xlu1 %485  ;;  %v839_v13 = vld [vmem:[#allocation5 + $0x30] sm:$0xff] }
 0x127   :  { %vm494_vm6 = vcmp.eq.s32.totalorder %v7373_v30, %v486_v12  ;;  %v858_v12 = vld [vmem:[#allocation5 + $0x98] ss:$12 sps:$4 sm:$0xff]  }
 0x128   :  { %5830 = vmatmul.mubr.f32.vlgmr.msra.gmra.mxu1 %v241_v15  ;;  %v483_v15 = vpop.permute.xlu0 %482  ;;  %v7595_v54 = vunpack.c.l.bf16 %v858_v12 }
 0x129   :  { %693 = vmatpush1.bf16.msra.mxu1 %v6822_v14  ;;  %724 = vmatprep.mubr.bf16.mxu1 %v7090_v31  ;;  %v7467_v14 = vunpack.c.h.bf16 %v841_v9  ;;  %vm493_vm5 = vcmp.eq.s32.totalorder %v7373_v30, %v483_v15  ;;  %v7512_v30 = vunpack.c.l.bf16 %v833_v26  ;;  %v7573_v15 = vunpack.c.l.bf16 %v862_v60 }
 0x12a   :  { %694 = vmatprep.subr.bf16.mxu1 %v6827_v16  ;;  %v7470_v16 = vunpack.c.l.bf16 %v841_v9  ;;  %vm7484_vm7 = vmpackc.low %vm494_vm6, %vm493_vm5  ;;  %10150 = vst [vmem:[#allocation54_spill] sm:$0xff] %v7595_v54 }
 0x12b   :  { %10131 = vst [vmem:[#allocation37_spill] sm:$0xff] %v7467_v14  ;;  %10142 = vst [vmem:[#allocation46_spill] sm:$0xff] %v7512_v30 }
 0x12c   :  { %10132 = vst [vmem:[#allocation38_spill] sm:$0xff] %v7470_v16  ;;  %10147 = vst [vmem:[#allocation51_spill] sm:$0xff] %v7573_v15 }
 0x12d   :  { %695 = vmatpush1.bf16.msra.mxu1 %v6825_v17  ;;  %v837_v17 = vld [vmem:[#allocation5 + $0x24] sm:$0xff] }
 0x12e   :  { %696 = vmatprep.subr.bf16.mxu1 %v6830_v18  ;;  %v7476_v18 = vunpack.c.h.bf16 %v839_v13 }
 0x130   :  { %10133 = vst [vmem:[#allocation39_spill] sm:$0xff] %v7476_v18 }
 0x131   :  { %697 = vmatpush1.bf16.msra.mxu1 %v6828_v19  ;;  %v7479_v19 = vunpack.c.l.bf16 %v839_v13  ;;  %v7571_v13 = vrot.slane %v7559_v0, %v7554_v62 }
 0x132   :  { %698 = vmatprep.subr.bf16.mxu1 %v6833_v20  ;;  %v7482_v20 = vunpack.c.h.bf16 %v837_v17 }
 0x133   :  { %10134 = vst [vmem:[#allocation40_spill] sm:$0xff] %v7479_v19 }
 0x134   :  { %10135 = vst [vmem:[#allocation41_spill] sm:$0xff] %v7482_v20 }
 0x135   :  { %699 = vmatpush1.bf16.msra.mxu1 %v6831_v21 }
 0x136   :  { %700 = vmatprep.subr.bf16.mxu1 %v6836_v22  ;;  %v835_v22 = vld [vmem:[#allocation5 + $0x18] sm:$0xff] }
 0x139   :  { %701 = vmatpush1.bf16.msra.mxu1 %v6834_v23  ;;  %v7499_v23 = vunpack.c.h.bf16 %v835_v22 }
 0x13a   :  { %702 = vmatprep.subr.bf16.mxu1 %v6839_v24  ;;  %v5180_v24 = vunpack.c.l.bf16 %v7324_v8  ;;  %v831_v8 = vld [vmem:[#allocation5] sm:$0xff] }
 0x13b   :  { %10139 = vst [vmem:[#allocation43_spill] sm:$0xff] %v7499_v23  ;;  %v7517_v33 = vunpack.c.l.bf16 %v831_v8 }
 0x13c   :  { %5863 = vmatpush3.msra.mxu0 %v5180_v24  ;;  %v7588_v24 = vunpack.c.h.bf16 %v858_v12 }
 0x13d   :  { %703 = vmatpush1.bf16.msra.mxu1 %v6837_v25  ;;  %v7502_v25 = vunpack.c.l.bf16 %v835_v22  ;;  %10144 = vst [vmem:[#allocation48_spill] sm:$0xff] %v7517_v33  ;;  %v7582_v22 = vrot.slane %v7559_v0, %v7562_v4 }
 0x13e   :  { %704 = vmatprep.subr.bf16.mxu1 %v6842_v27  ;;  %v6846_v27 = vld [vmem:[%s9754_s8 + $0xb0] ss:$12 sps:$4 sm:$0xff]   ;;  %10148 = vst [vmem:[#allocation52_spill] sm:$0xff] %v7588_v24 }
 0x13f   :  { %10140 = vst [vmem:[#allocation44_spill] sm:$0xff] %v7502_v25  ;;  %5867 = vmatprep.subr.bf16.mxu0 %v6846_v27 }
 0x141   :  { %705 = vmatpush1.bf16.msra.mxu1 %v6840_v29  ;;  %v7508_v29 = vunpack.c.h.bf16 %v833_v26 }
 0x142   :  { %706 = vmatprep.subr.bf16.mxu1 %v6845_v32  ;;  %v7514_v32 = vunpack.c.h.bf16 %v831_v8 }
 0x143   :  { %10141 = vst [vmem:[#allocation45_spill] sm:$0xff] %v7508_v29 }
 0x144   :  { %10143 = vst [vmem:[#allocation47_spill] sm:$0xff] %v7514_v32 }
 0x145   :  { %707 = vmatpush1.bf16.msra.mxu1 %v6843_v35 }
 0x146   :  { %1122 = vmatprep.subr.mxu1 %v7383_v37 }
 0x148   :  { %5120 = vmatmul.mubr.msk.bf16.vlgmr.msra.gmra.mxu1 %vm7385_vm13, %v7091_v46 }
 0x149   :  { %1123 = vmatpush1.msra.mxu1 %v7389_v40  ;;  %734 = vmatprep.mubr.bf16.mxu1 %v7090_v31 }
 0x14a   :  { %1124 = vmatprep.subr.mxu1 %v7392_v42 }
 0x14b   :  { %1125 = vmatpush1.msra.mxu1 %v7394_v43 }
 0x14c   :  { %1126 = vmatprep.subr.mxu1 %v7399_v47 }
 0x14d   :  { %1127 = vmatpush1.msra.mxu1 %v7402_v48 }
 0x14e   :  { %1128 = vmatprep.subr.mxu1 %v7408_v50 }
 0x14f   :  { %1129 = vmatpush1.msra.mxu1 %v7411_v51 }
 0x150   :  { %5122 = vmatmul.mubr.msk.bf16.gmra.mxu1 %vm7416_vm1, %v7091_v46  ;;  %1130 = vmatprep.subr.mxu1 %v7414_v53 }
 0x151   :  { %1131 = vmatpush1.msra.mxu1 %v7421_v55  ;;  %744 = vmatprep.mubr.bf16.mxu1 %v7090_v31 }
 0x152   :  { %1132 = vmatprep.subr.mxu1 %v7424_v57 }
 0x153   :  { %1133 = vmatpush1.msra.mxu1 %v7427_v58 }
 0x154   :  { %1134 = vmatprep.subr.mxu1 %v7433_v61 }
 0x155   :  { %1135 = vmatpush1.msra.mxu1 %v7436_v63 }
 0x156   :  { %1136 = vmatprep.subr.mxu1 %v7442_v2 }
 0x157   :  { %1137 = vmatpush1.msra.mxu1 %v7445_v3 }
 0x158   :  { %5124 = vmatmul.mubr.msk.bf16.gmra.mxu1 %vm7450_vm4, %v7091_v46  ;;  %1138 = vmatprep.subr.mxu1 %v7448_v5 }
 0x159   :  { %1139 = vmatpush1.msra.mxu1 %v7455_v7  ;;  %754 = vmatprep.mubr.bf16.mxu1 %v7090_v31  ;;  %v7489_v31 = vunpack.c.l.bf16 %v837_v17 }
 0x15a   :  { %1140 = vmatprep.subr.mxu1 %v7458_v10 }
 0x15b   :  { %1141 = vmatpush1.msra.mxu1 %v7461_v11  ;;  %10138 = vst [vmem:[#allocation42_spill] sm:$0xff] %v7489_v31 }
 0x15c   :  { %1142 = vmatprep.subr.mxu1 %v7467_v14 }
 0x15d   :  { %1143 = vmatpush1.msra.mxu1 %v7470_v16 }
 0x15e   :  { %1144 = vmatprep.subr.mxu1 %v7476_v18 }
 0x15f   :  { %1145 = vmatpush1.msra.mxu1 %v7479_v19 }
 0x160   :  { %5126 = vmatmul.mubr.msk.bf16.gmra.mxu1 %vm7484_vm7, %v7091_v46  ;;  %1146 = vmatprep.subr.mxu1 %v7482_v20 }
 0x161   :  { %1147 = vmatpush1.msra.mxu1 %v7489_v31  ;;  %1186 = vmatprep.mubr.f32.mxu1 %v9779_v1 }
 0x162   :  { %1148 = vmatprep.subr.mxu1 %v7499_v23  ;;  %v917_v23 = vld [vmem:[#allocation7 + $0x24] sm:$0xff] }
 0x163   :  { %1149 = vmatpush1.msra.mxu1 %v7502_v25 }
 0x164   :  { %1150 = vmatprep.subr.mxu1 %v7508_v29 }
 0x165   :  { %1151 = vmatpush1.msra.mxu1 %v7512_v30  ;;  %v1015_v30 = vld [vmem:[#allocation8 + $0x90] sm:$0xff] }
 0x166   :  { %1152 = vmatprep.subr.mxu1 %v7514_v32 }
 0x167   :  { %1153 = vmatpush1.msra.mxu1 %v7517_v33  ;;  %v1017_v33 = vld [vmem:[#allocation8 + $0x9c] sm:$0xff] }
 0x168   :  { %1187 = vmatmul.mubr.f32.vlgmr.msra.gmra.mxu1 %v9779_v1 }
 0x169   :  { %1327 = vmatprep.mubr.f32.mxu1 %v9779_v1 }
 0x1e8   :  { %v347_v35 = vpop.f32.mrf.mxu1 }
 0x1e9   :  { %v348_v36 = vadd.f32 %v5086_v34, %v347_v35 }
 0x1ea   :  { %v5831_v41 = vpop.f32.mrf.mxu1 }
 0x1eb   :  { %5865 = vmatmul.mubr.f32.vlgmr.msra.gmra.mxu0 %v348_v36 }
 0x1ec   :  { %5868 = vmatpush3.bf16.msra.mxu0 %v6846_v27  ;;  %5883 = vmatprep.mubr.msk.bf16.mxu0 %vm7385_vm13, %v7091_v46  ;;  %v854_v27 = vld [vmem:[#allocation5 + $0x80] ss:$12 sps:$4 sm:$0xff]  }
 0x1ed   :  { %5869 = vmatprep.subr.bf16.mxu0 %v6847_v38  ;;  %v7602_v35 = vunpack.c.h.bf16 %v854_v27 }
 0x1ef   :  { %10152 = vst [vmem:[#allocation56_spill] sm:$0xff] %v7602_v35 }
 0x1f0   :  { %5870 = vmatpush3.bf16.msra.mxu0 %v6847_v38  ;;  %v850_v38 = vld [vmem:[#allocation5 + $0x68] ss:$12 sps:$4 sm:$0xff]  }
 0x1f1   :  { %5871 = vmatprep.subr.bf16.mxu0 %v6848_v44 }
 0x1f4   :  { %5872 = vmatpush3.bf16.msra.mxu0 %v6848_v44  ;;  %v7609_v44 = vunpack.c.l.bf16 %v854_v27 }
 0x1f5   :  { %5873 = vmatprep.subr.bf16.mxu0 %v6849_v45 }
 0x1f6   :  { %10154 = vst [vmem:[#allocation58_spill] sm:$0xff] %v7609_v44 }
 0x1f8   :  { %5874 = vmatpush3.bf16.msra.mxu0 %v6849_v45 }
 0x1f9   :  { %5875 = vmatprep.subr.bf16.mxu0 %v6850_v49 }
 0x1fc   :  { %5876 = vmatpush3.bf16.msra.mxu0 %v6850_v49 }
 0x1fd   :  { %5877 = vmatprep.subr.bf16.mxu0 %v6851_v39 }
 0x200   :  { %5878 = vmatpush3.bf16.msra.mxu0 %v6851_v39  ;;  %v7619_v39 = vunpack.c.h.bf16 %v850_v38 }
 0x201   :  { %5879 = vmatprep.subr.bf16.mxu0 %v6852_v52 }
 0x202   :  { %10156 = vst [vmem:[#allocation60_spill] sm:$0xff] %v7619_v39 }
 0x204   :  { %5880 = vmatpush3.bf16.msra.mxu0 %v6852_v52 }
 0x205   :  { %5881 = vmatprep.subr.bf16.mxu0 %v6853_v59 }
 0x208   :  { %5882 = vmatpush3.bf16.msra.mxu0 %v6853_v59  ;;  %v7566_v9 = vpop.f32.mrf.mxu1  ;;  %v846_v59 = vld [vmem:[#allocation5 + $0x50] ss:$12 sps:$4 sm:$0xff]  }
 0x209   :  { %5891 = vmatprep.subr.mxu0 %v9779_v1 }
 0x20a   :  { %v7575_v17 = vpop.f32.mrf.mxu1 }
 0x20b   :  { %5884 = vmatmul.mubr.msk.bf16.vlgmr.msra.gmra.mxu0 %vm7416_vm1, %v7091_v46 }
 0x20c   :  { %5887 = vmatprep.mubr.msk.bf16.mxu0 %vm7450_vm4, %v7091_v46  ;;  %5892 = vmatpush3.msra.mxu0 %v7564_v28  ;;  %v730_v26 = vpop.f32.mrf.mxu1 }
 0x20d   :  { %5893 = vmatprep.subr.mxu0 %v9779_v1  ;;  %v7592_v8 = vadd.f32 %v730_v26, %v7571_v13  ;;  %v7635_v26 = vunpack.c.h.bf16 %v846_v59 }
 0x20e   :  { %5894 = vmatpush3.msra.mxu0 %v7573_v15  ;;  %v732_v34 = vpop.f32.mrf.mxu1 }
 0x20f   :  { %10149 = vst [vmem:[#allocation53_spill] sm:$0xff] %v7592_v8  ;;  %5895 = vmatprep.subr.mxu0 %v9779_v1  ;;  %v7599_v6 = vadd.f32 %v732_v34, %v7582_v22  ;;  %10160 = vst [vmem:[#allocation64_spill] sm:$0xff] %v7635_v26  ;;  %v842_v34 = vld [vmem:[#allocation5 + $0x38] ss:$12 sps:$4 sm:$0xff]   ;;  %v1022_v8 = vld [vmem:[#allocation8 + $0xb0] ss:$12 sps:$4 sm:$0xff]  }
 0x210   :  { %5896 = vmatpush3.msra.mxu0 %v7588_v24  ;;  %v736_v36 = vpop.f32.mrf.mxu1  ;;  %v7703_v32 = vunpack.c.h.bf16 %v1022_v8 }
 0x211   :  { %10151 = vst [vmem:[#allocation55_spill] sm:$0xff] %v7599_v6  ;;  %5897 = vmatprep.subr.mxu0 %v9779_v1  ;;  %v7606_v41 = vadd.f32 %v736_v36, %v7571_v13 }
 0x212   :  { %5898 = vmatpush3.msra.mxu0 %v7595_v54  ;;  %v738_v45 = vpop.f32.mrf.mxu1  ;;  %10179 = vst [vmem:[#allocation83_spill] sm:$0xff] %v7703_v32 }
 0x213   :  { %10153 = vst [vmem:[#allocation57_spill] sm:$0xff] %v7606_v41  ;;  %5888 = vmatmul.mubr.msk.bf16.gmra.mxu0 %vm7484_vm7, %v7091_v46  ;;  %5899 = vmatprep.subr.mxu0 %v9779_v1  ;;  %v7616_v49 = vadd.f32 %v738_v45, %v7582_v22  ;;  %v7628_v46 = vunpack.c.l.bf16 %v850_v38  ;;  %v7642_v38 = vunpack.c.l.bf16 %v846_v59  ;;  %v7656_v59 = vunpack.c.l.bf16 %v842_v34  ;;  %v834_v41 = vld [vmem:[#allocation5 + $0x8] ss:$12 sps:$4 sm:$0xff]  }
 0x214   :  { %5900 = vmatpush3.msra.mxu0 %v7602_v35  ;;  %5923 = vmatprep.mubr.msk.f32.mxu0 %vm7089_vm0, %v9779_v1  ;;  %v740_v52 = vpop.f32.mrf.mxu1 }
 0x215   :  { %10155 = vst [vmem:[#allocation59_spill] sm:$0xff] %v7616_v49  ;;  %5901 = vmatprep.subr.mxu0 %v9779_v1  ;;  %v7625_v60 = vadd.f32 %v740_v52, %v7571_v13  ;;  %10158 = vst [vmem:[#allocation62_spill] sm:$0xff] %v7628_v46 }
 0x216   :  { %5902 = vmatpush3.msra.mxu0 %v7609_v44  ;;  %v742_v21 = vpop.f32.mrf.mxu1  ;;  %10162 = vst [vmem:[#allocation66_spill] sm:$0xff] %v7642_v38  ;;  %10166 = vst [vmem:[#allocation70_spill] sm:$0xff] %v7656_v59 }
 0x217   :  { %10157 = vst [vmem:[#allocation61_spill] sm:$0xff] %v7625_v60  ;;  %5903 = vmatprep.subr.mxu0 %v9779_v1  ;;  %v7632_v12 = vadd.f32 %v742_v21, %v7582_v22  ;;  %v7649_v21 = vunpack.c.h.bf16 %v842_v34  ;;  %v838_v60 = vld [vmem:[#allocation5 + $0x20] ss:$12 sps:$4 sm:$0xff]  }
 0x218   :  { %5904 = vmatpush3.msra.mxu0 %v7619_v39  ;;  %v746_v27 = vpop.f32.mrf.mxu1  ;;  %v7670_v34 = vunpack.c.l.bf16 %v838_v60 }
 0x219   :  { %10159 = vst [vmem:[#allocation63_spill] sm:$0xff] %v7632_v12  ;;  %5905 = vmatprep.subr.mxu0 %v9779_v1  ;;  %v7639_v36 = vadd.f32 %v746_v27, %v7571_v13  ;;  %10164 = vst [vmem:[#allocation68_spill] sm:$0xff] %v7649_v21 }
 0x21a   :  { %5906 = vmatpush3.msra.mxu0 %v7628_v46  ;;  %v748_v45 = vpop.f32.mrf.mxu1  ;;  %10170 = vst [vmem:[#allocation74_spill] sm:$0xff] %v7670_v34 }
 0x21b   :  { %10161 = vst [vmem:[#allocation65_spill] sm:$0xff] %v7639_v36  ;;  %5907 = vmatprep.subr.mxu0 %v9779_v1  ;;  %v7646_v52 = vadd.f32 %v748_v45, %v7582_v22 }
 0x21c   :  { %5908 = vmatpush3.msra.mxu0 %v7635_v26  ;;  %v750_v12 = vpop.f32.mrf.mxu1 }
 0x21d   :  { %10163 = vst [vmem:[#allocation67_spill] sm:$0xff] %v7646_v52  ;;  %5909 = vmatprep.subr.mxu0 %v9779_v1  ;;  %v7653_v27 = vadd.f32 %v750_v12, %v7571_v13  ;;  %v7663_v52 = vunpack.c.h.bf16 %v838_v60  ;;  %v7684_v60 = vunpack.c.l.bf16 %v834_v41 }
 0x21e   :  { %5910 = vmatpush3.msra.mxu0 %v7642_v38  ;;  %v752_v36 = vpop.f32.mrf.mxu1 }
 0x21f   :  { %10165 = vst [vmem:[#allocation69_spill] sm:$0xff] %v7653_v27  ;;  %5911 = vmatprep.subr.mxu0 %v9779_v1  ;;  %v7660_v45 = vadd.f32 %v752_v36, %v7582_v22  ;;  %10168 = vst [vmem:[#allocation72_spill] sm:$0xff] %v7663_v52 }
 0x220   :  { %5912 = vmatpush3.msra.mxu0 %v7649_v21  ;;  %v756_v49 = vpop.f32.mrf.mxu1  ;;  %10174 = vst [vmem:[#allocation78_spill] sm:$0xff] %v7684_v60 }
 0x221   :  { %10167 = vst [vmem:[#allocation71_spill] sm:$0xff] %v7660_v45  ;;  %5913 = vmatprep.subr.mxu0 %v9779_v1  ;;  %v7667_v12 = vadd.f32 %v756_v49, %v7571_v13  ;;  %v7677_v45 = vunpack.c.h.bf16 %v834_v41  ;;  %v1021_v41 = vld [vmem:[#allocation8 + $0xb4] sm:$0xff] }
 0x222   :  { %5914 = vmatpush3.msra.mxu0 %v7656_v59  ;;  %v758_v27 = vpop.f32.mrf.mxu1 }
 0x223   :  { %10169 = vst [vmem:[#allocation73_spill] sm:$0xff] %v7667_v12  ;;  %5915 = vmatprep.subr.mxu0 %v9779_v1  ;;  %v7674_v36 = vadd.f32 %v758_v27, %v7582_v22  ;;  %10172 = vst [vmem:[#allocation76_spill] sm:$0xff] %v7677_v45  ;;  %v7699_v12 = vunpack.c.l.bf16 %v1021_v41 }
 0x224   :  { %5916 = vmatpush3.msra.mxu0 %v7663_v52  ;;  %v760_v6 = vpop.f32.mrf.mxu1 }
 0x225   :  { %10171 = vst [vmem:[#allocation75_spill] sm:$0xff] %v7674_v36  ;;  %5917 = vmatprep.subr.mxu0 %v9779_v1  ;;  %v7681_v49 = vadd.f32 %v760_v6, %v7571_v13  ;;  %v7697_v36 = vunpack.c.h.bf16 %v1021_v41  ;;  %10177 = vst [vmem:[#allocation81_spill] sm:$0xff] %v7699_v12  ;;  %v7714_v41 = vunpack.c.l.bf16 %v1017_v33 }
 0x226   :  { %5918 = vmatpush3.msra.mxu0 %v7670_v34  ;;  %v762_v27 = vpop.f32.mrf.mxu1  ;;  %v7720_v34 = vunpack.c.h.bf16 %v1015_v30 }
 0x227   :  { %10173 = vst [vmem:[#allocation77_spill] sm:$0xff] %v7681_v49  ;;  %5919 = vmatprep.subr.mxu0 %v9779_v1  ;;  %v7693_v6 = vadd.f32 %v762_v27, %v7582_v22  ;;  %v1019_v49 = vld [vmem:[#allocation8 + $0xa8] sm:$0xff]  ;;  %10176 = vst [vmem:[#allocation80_spill] sm:$0xff] %v7697_v36  ;;  %v1018_v27 = vld [vmem:[#allocation8 + $0x98] ss:$12 sps:$4 sm:$0xff]   ;;  %1263 = vmatprep.subr.mxu1 %v7697_v36 }
 0x228   :  { %5920 = vmatpush3.msra.mxu0 %v7677_v45  ;;  %v7705_v45 = vunpack.c.l.bf16 %v1019_v49  ;;  %1264 = vmatpush1.msra.mxu1 %v7699_v12  ;;  %10183 = vst [vmem:[#allocation87_spill] sm:$0xff] %v7714_v41  ;;  %v7716_v29 = vunpack.c.h.bf16 %v1018_v27  ;;  %10186 = vst [vmem:[#allocation89_spill] sm:$0xff] %v7720_v34  ;;  %v993_v12 = vld [vmem:[#allocation8 + $0xc] sm:$0xff]  ;;  %v994_v36 = vld [vmem:[#allocation8 + $0x8] ss:$12 sps:$4 sm:$0xff]  }
 0x229   :  { %5921 = vmatprep.subr.mxu0 %v9779_v1  ;;  %10175 = vst [vmem:[#allocation79_spill] sm:$0xff] %v7693_v6  ;;  %v7708_v6 = vunpack.c.h.bf16 %v1017_v33  ;;  %v7730_v33 = vunpack.c.l.bf16 %v1015_v30  ;;  %v7839_v25 = vunpack.c.h.bf16 %v994_v36 }
 0x22a   :  { %5922 = vmatpush3.msra.mxu0 %v7684_v60  ;;  %v7701_v60 = vunpack.c.h.bf16 %v1019_v49  ;;  %10180 = vst [vmem:[#allocation84_spill] sm:$0xff] %v7705_v45  ;;  %10184 = vst [vmem:[#allocation88_spill] sm:$0xff] %v7716_v29  ;;  %v10185_v49 = vmov 0.0  }
 0x22b   :  { %5924 = vmatmul.mubr.f32.vlgmr.msra.gmra.mxu0 %v9779_v1  ;;  %5926 = vmatprep.subr.mxu0 %v9779_v1  ;;  %10181 = vst [vmem:[#allocation85_spill] sm:$0xff] %v7708_v6  ;;  %10187 = vst [vmem:[#allocation90_spill] sm:$0xff] %v7730_v33 }
 0x22c   :  { %5958 = vmatprep.mubr.msk.f32.mxu0 %vm7089_vm0, %v9779_v1  ;;  %10178 = vst [vmem:[#allocation82_spill] sm:$0xff] %v7701_v60  ;;  %v7710_v1 = vunpack.c.l.bf16 %v1022_v8  ;;  %5927 = vmatpush3.msra.mxu0 %v7703_v32  ;;  %v1013_v8 = vld [vmem:[#allocation8 + $0x84] sm:$0xff]  ;;  %v1014_v32 = vld [vmem:[#allocation8 + $0x80] ss:$12 sps:$4 sm:$0xff]   ;;  %10222 = vst [vmem:[#allocation125_spill] sm:$0xff] %v7839_v25 }
 0x22d   :  { %1265 = vmatprep.subr.mxu1 %v7701_v60  ;;  %5928 = vmatprep.subr.mxu0 %v10185_v49  ;;  %v7732_v60 = vunpack.c.h.bf16 %v1013_v8 }
 0x22e   :  { %10182 = vst [vmem:[#allocation86_spill] sm:$0xff] %v7710_v1  ;;  %1266 = vmatpush1.msra.mxu1 %v7705_v45  ;;  %5929 = vmatpush3.msra.mxu0 %v7710_v1  ;;  %v7734_v45 = vunpack.c.l.bf16 %v1018_v27  ;;  %v1011_v1 = vld [vmem:[#allocation8 + $0x78] sm:$0xff]  ;;  %v1009_v27 = vld [vmem:[#allocation8 + $0x6c] sm:$0xff] }
 0x22f   :  { %1267 = vmatprep.subr.mxu1 %v7708_v6  ;;  %5930 = vmatprep.subr.mxu0 %v10185_v49  ;;  %10188 = vst [vmem:[#allocation91_spill] sm:$0xff] %v7732_v60  ;;  %v7737_v6 = vunpack.c.l.bf16 %v1013_v8  ;;  %v7747_v30 = vunpack.c.l.bf16 %v1011_v1  ;;  %v7751_v8 = vunpack.c.h.bf16 %v1009_v27 }
 0x230   :  { %1268 = vmatpush1.msra.mxu1 %v7714_v41  ;;  %5931 = vmatpush3.msra.mxu0 %v7716_v29  ;;  %10189 = vst [vmem:[#allocation92_spill] sm:$0xff] %v7734_v45  ;;  %v7743_v29 = vunpack.c.h.bf16 %v1014_v32  ;;  %v998_v41 = vld [vmem:[#allocation8 + $0x20] ss:$12 sps:$4 sm:$0xff]  }
 0x231   :  { %1269 = vmatprep.subr.mxu1 %v7720_v34  ;;  %5932 = vmatprep.subr.mxu0 %v10185_v49  ;;  %10190 = vst [vmem:[#allocation93_spill] sm:$0xff] %v7737_v6  ;;  %v7741_v34 = vunpack.c.h.bf16 %v1011_v1  ;;  %10193 = vst [vmem:[#allocation96_spill] sm:$0xff] %v7747_v30 }
 0x232   :  { %1270 = vmatpush1.msra.mxu1 %v7730_v33  ;;  %5933 = vmatpush3.msra.mxu0 %v7734_v45  ;;  %10192 = vst [vmem:[#allocation95_spill] sm:$0xff] %v7743_v29  ;;  %10194 = vst [vmem:[#allocation97_spill] sm:$0xff] %v7751_v8  ;;  %v7757_v45 = vunpack.c.l.bf16 %v1009_v27  ;;  %v1010_v33 = vld [vmem:[#allocation8 + $0x68] ss:$12 sps:$4 sm:$0xff]  }
 0x233   :  { %1271 = vmatprep.subr.mxu1 %v7732_v60  ;;  %10191 = vst [vmem:[#allocation94_spill] sm:$0xff] %v7741_v34  ;;  %5934 = vmatprep.subr.mxu0 %v10185_v49  ;;  %v7753_v60 = vunpack.c.l.bf16 %v1014_v32 }
 0x234   :  { %1272 = vmatpush1.msra.mxu1 %v7737_v6  ;;  %5935 = vmatpush3.msra.mxu0 %v7743_v29  ;;  %10196 = vst [vmem:[#allocation99_spill] sm:$0xff] %v7757_v45  ;;  %v1007_v6 = vld [vmem:[#allocation8 + $0x60] sm:$0xff]  ;;  %v1006_v29 = vld [vmem:[#allocation8 + $0x50] ss:$12 sps:$4 sm:$0xff]  }
 0x235   :  { %1273 = vmatprep.subr.mxu1 %v7741_v34  ;;  %10195 = vst [vmem:[#allocation98_spill] sm:$0xff] %v7753_v60  ;;  %5936 = vmatprep.subr.mxu0 %v10185_v49  ;;  %v7761_v1 = vunpack.c.h.bf16 %v1007_v6  ;;  %v7763_v34 = vunpack.c.h.bf16 %v1010_v33  ;;  %v7767_v32 = vunpack.c.l.bf16 %v1007_v6 }
 0x236   :  { %1274 = vmatpush1.msra.mxu1 %v7747_v30  ;;  %5937 = vmatpush3.msra.mxu0 %v7753_v60  ;;  %v1005_v30 = vld [vmem:[#allocation8 + $0x54] sm:$0xff] }
 0x237   :  { %1275 = vmatprep.subr.mxu1 %v7751_v8  ;;  %10197 = vst [vmem:[#allocation100_spill] sm:$0xff] %v7761_v1  ;;  %10198 = vst [vmem:[#allocation101_spill] sm:$0xff] %v7763_v34  ;;  %5938 = vmatprep.subr.mxu0 %v10185_v49  ;;  %v7771_v27 = vunpack.c.h.bf16 %v1005_v30  ;;  %v7773_v8 = vunpack.c.l.bf16 %v1010_v33  ;;  %v7777_v60 = vunpack.c.l.bf16 %v1005_v30 }
 0x238   :  { %1276 = vmatpush1.msra.mxu1 %v7757_v45  ;;  %10199 = vst [vmem:[#allocation102_spill] sm:$0xff] %v7767_v32  ;;  %5939 = vmatpush3.msra.mxu0 %v7763_v34  ;;  %v1003_v45 = vld [vmem:[#allocation8 + $0x48] sm:$0xff]  ;;  %v1002_v34 = vld [vmem:[#allocation8 + $0x38] ss:$12 sps:$4 sm:$0xff]  }
 0x239   :  { %1277 = vmatprep.subr.mxu1 %v7761_v1  ;;  %10200 = vst [vmem:[#allocation103_spill] sm:$0xff] %v7771_v27  ;;  %10201 = vst [vmem:[#allocation104_spill] sm:$0xff] %v7773_v8  ;;  %5940 = vmatprep.subr.mxu0 %v10185_v49  ;;  %v7781_v6 = vunpack.c.h.bf16 %v1003_v45  ;;  %v7783_v1 = vunpack.c.h.bf16 %v1006_v29  ;;  %v7787_v33 = vunpack.c.l.bf16 %v1003_v45 }
 0x23a   :  { %1278 = vmatpush1.msra.mxu1 %v7767_v32  ;;  %10202 = vst [vmem:[#allocation105_spill] sm:$0xff] %v7777_v60  ;;  %5941 = vmatpush3.msra.mxu0 %v7773_v8  ;;  %v1001_v32 = vld [vmem:[#allocation8 + $0x3c] sm:$0xff] }
 0x23b   :  { %1279 = vmatprep.subr.mxu1 %v7771_v27  ;;  %10203 = vst [vmem:[#allocation106_spill] sm:$0xff] %v7781_v6  ;;  %10204 = vst [vmem:[#allocation107_spill] sm:$0xff] %v7783_v1  ;;  %5942 = vmatprep.subr.mxu0 %v10185_v49  ;;  %v7791_v30 = vunpack.c.h.bf16 %v1001_v32  ;;  %v7793_v27 = vunpack.c.l.bf16 %v1006_v29  ;;  %v7797_v8 = vunpack.c.l.bf16 %v1001_v32 }
 0x23c   :  { %1280 = vmatpush1.msra.mxu1 %v7777_v60  ;;  %10205 = vst [vmem:[#allocation108_spill] sm:$0xff] %v7787_v33  ;;  %5943 = vmatpush3.msra.mxu0 %v7783_v1  ;;  %v999_v60 = vld [vmem:[#allocation8 + $0x30] sm:$0xff]  ;;  %v995_v1 = vld [vmem:[#allocation8 + $0x18] sm:$0xff] }
 0x23d   :  { %1281 = vmatprep.subr.mxu1 %v7781_v6  ;;  %10206 = vst [vmem:[#allocation109_spill] sm:$0xff] %v7791_v30  ;;  %10207 = vst [vmem:[#allocation110_spill] sm:$0xff] %v7793_v27  ;;  %5944 = vmatprep.subr.mxu0 %v10185_v49  ;;  %v7801_v45 = vunpack.c.h.bf16 %v999_v60  ;;  %v7803_v6 = vunpack.c.h.bf16 %v1002_v34  ;;  %v7807_v29 = vunpack.c.l.bf16 %v999_v60  ;;  %v7819_v60 = vunpack.c.h.bf16 %v995_v1 }
 0x23e   :  { %1282 = vmatpush1.msra.mxu1 %v7787_v33  ;;  %10208 = vst [vmem:[#allocation111_spill] sm:$0xff] %v7797_v8  ;;  %5945 = vmatpush3.msra.mxu0 %v7793_v27  ;;  %v997_v33 = vld [vmem:[#allocation8 + $0x24] sm:$0xff] }
 0x23f   :  { %1283 = vmatprep.subr.mxu1 %v7791_v30  ;;  %10209 = vst [vmem:[#allocation112_spill] sm:$0xff] %v7801_v45  ;;  %10210 = vst [vmem:[#allocation113_spill] sm:$0xff] %v7803_v6  ;;  %5946 = vmatprep.subr.mxu0 %v10185_v49  ;;  %v7811_v32 = vunpack.c.h.bf16 %v997_v33  ;;  %v7813_v30 = vunpack.c.l.bf16 %v1002_v34  ;;  %v7815_v27 = vunpack.c.l.bf16 %v997_v33  ;;  %v7827_v34 = vunpack.c.h.bf16 %v993_v12 }
 0x240   :  { %1284 = vmatpush1.msra.mxu1 %v7797_v8  ;;  %10211 = vst [vmem:[#allocation114_spill] sm:$0xff] %v7807_v29  ;;  %5947 = vmatpush3.msra.mxu0 %v7803_v6  ;;  %10215 = vst [vmem:[#allocation118_spill] sm:$0xff] %v7819_v60  ;;  %v7821_v8 = vunpack.c.h.bf16 %v998_v41  ;;  %v991_v6 = vld [vmem:[#allocation8] sm:$0xff]  ;;  %v7829_v33 = vunpack.c.l.bf16 %v998_v41 }
 0x241   :  { %1285 = vmatprep.subr.mxu1 %v7801_v45  ;;  %10212 = vst [vmem:[#allocation115_spill] sm:$0xff] %v7811_v32  ;;  %10213 = vst [vmem:[#allocation116_spill] sm:$0xff] %v7813_v30  ;;  %5948 = vmatprep.subr.mxu0 %v10185_v49  ;;  %v7823_v45 = vunpack.c.l.bf16 %v995_v1  ;;  %v7837_v1 = vunpack.c.h.bf16 %v991_v6  ;;  %v7843_v41 = vunpack.c.l.bf16 %v991_v6 }
 0x242   :  { %10214 = vst [vmem:[#allocation117_spill] sm:$0xff] %v7815_v27  ;;  %1286 = vmatpush1.msra.mxu1 %v7807_v29  ;;  %10216 = vst [vmem:[#allocation119_spill] sm:$0xff] %v7821_v8  ;;  %5949 = vmatpush3.msra.mxu0 %v7813_v30  ;;  %v7833_v29 = vunpack.c.l.bf16 %v993_v12  ;;  %v7847_v12 = vunpack.c.l.bf16 %v994_v36  ;;  %v919_v30 = vld [vmem:[#allocation7 + $0x30] sm:$0xff] }
 0x243   :  { %10217 = vst [vmem:[#allocation120_spill] sm:$0xff] %v7823_v45  ;;  %1287 = vmatprep.subr.mxu1 %v7811_v32  ;;  %10218 = vst [vmem:[#allocation121_spill] sm:$0xff] %v7827_v34  ;;  %5950 = vmatprep.subr.mxu0 %v10185_v49  ;;  %v941_v32 = vld [vmem:[#allocation7 + $0xb4] sm:$0xff] }
 0x244   :  { %10219 = vst [vmem:[#allocation122_spill] sm:$0xff] %v7829_v33  ;;  %1288 = vmatpush1.msra.mxu1 %v7815_v27  ;;  %10220 = vst [vmem:[#allocation123_spill] sm:$0xff] %v7833_v29  ;;  %5951 = vmatpush3.msra.mxu0 %v7821_v8  ;;  %v939_v27 = vld [vmem:[#allocation7 + $0xa8] sm:$0xff]  ;;  %v7851_v8 = vunpack.c.h.bf16 %v941_v32  ;;  %v7855_v6 = vunpack.c.l.bf16 %v941_v32 }
 0x245   :  { %1289 = vmatprep.subr.mxu1 %v7819_v60  ;;  %10221 = vst [vmem:[#allocation124_spill] sm:$0xff] %v7837_v1  ;;  %5952 = vmatprep.subr.mxu0 %v10185_v49  ;;  %10223 = vst [vmem:[#allocation126_spill] sm:$0xff] %v7843_v41  ;;  %v942_v60 = vld [vmem:[#allocation7 + $0xb0] ss:$12 sps:$4 sm:$0xff]  }
 0x246   :  { %1290 = vmatpush1.msra.mxu1 %v7823_v45  ;;  %5953 = vmatpush3.msra.mxu0 %v7829_v33  ;;  %10224 = vst [vmem:[#allocation127_spill] sm:$0xff] %v7847_v12  ;;  %10225 = vst [vmem:[#allocation128_spill] sm:$0xff] %v7851_v8  ;;  %v937_v45 = vld [vmem:[#allocation7 + $0x9c] sm:$0xff]  ;;  %v7859_v36 = vunpack.c.h.bf16 %v942_v60  ;;  %v7869_v32 = vunpack.c.l.bf16 %v942_v60  ;;  %v935_v60 = vld [vmem:[#allocation7 + $0x90] sm:$0xff] }
 0x247   :  { %1291 = vmatprep.subr.mxu1 %v7827_v34  ;;  %5954 = vmatprep.subr.mxu0 %v10185_v49  ;;  %10226 = vst [vmem:[#allocation129_spill] sm:$0xff] %v7855_v6  ;;  %v7861_v34 = vunpack.c.h.bf16 %v939_v27 }
 0x248   :  { %1292 = vmatpush1.msra.mxu1 %v7833_v29  ;;  %5955 = vmatpush3.msra.mxu0 %v7839_v25  ;;  %10227 = vst [vmem:[#allocation130_spill] sm:$0xff] %v7859_v36  ;;  %v7865_v29 = vunpack.c.l.bf16 %v939_v27  ;;  %10230 = vst [vmem:[#allocation133_spill] sm:$0xff] %v7869_v32  ;;  %v7875_v25 = vunpack.c.l.bf16 %v937_v45 }
 0x249   :  { %1293 = vmatprep.subr.mxu1 %v7837_v1  ;;  %5956 = vmatprep.subr.mxu0 %v10185_v49  ;;  %10228 = vst [vmem:[#allocation131_spill] sm:$0xff] %v7861_v34  ;;  %v938_v1 = vld [vmem:[#allocation7 + $0x98] ss:$12 sps:$4 sm:$0xff]  }
 0x24a   :  { %1294 = vmatpush1.msra.mxu1 %v7843_v41  ;;  %5957 = vmatpush3.msra.mxu0 %v7847_v12  ;;  %10229 = vst [vmem:[#allocation132_spill] sm:$0xff] %v7865_v29  ;;  %v7871_v41 = vunpack.c.h.bf16 %v937_v45  ;;  %10232 = vst [vmem:[#allocation135_spill] sm:$0xff] %v7875_v25  ;;  %v7879_v27 = vunpack.c.h.bf16 %v938_v1  ;;  %v7889_v45 = vunpack.c.l.bf16 %v935_v60 }
 0x24b   :  { %1328 = vmatmul.mubr.f32.vlgmr.msra.gmra.mxu1 %v10185_v49  ;;  %1420 = vmatprep.subr.mxu1 %v7851_v8  ;;  %v7885_v8 = vunpack.c.h.bf16 %v935_v60  ;;  %v931_v60 = vld [vmem:[#allocation7 + $0x78] sm:$0xff] }
 0x24c   :  { %5961 = vmatprep.subr.mxu0 %v10185_v49  ;;  %10231 = vst [vmem:[#allocation134_spill] sm:$0xff] %v7871_v41  ;;  %5959 = vmatmul.mubr.f32.vlgmr.msra.gmra.mxu0 %v10185_v49  ;;  %10233 = vst [vmem:[#allocation136_spill] sm:$0xff] %v7879_v27 }
 0x24d   :  { %1421 = vmatpush1.msra.mxu1 %v7855_v6  ;;  %5962 = vmatpush3.msra.mxu0 %v7859_v36  ;;  %10234 = vst [vmem:[#allocation137_spill] sm:$0xff] %v7885_v8  ;;  %10235 = vst [vmem:[#allocation138_spill] sm:$0xff] %v7889_v45  ;;  %v933_v36 = vld [vmem:[#allocation7 + $0x84] sm:$0xff] }
 0x24e   :  { %1422 = vmatprep.subr.mxu1 %v7861_v34  ;;  %5963 = vmatprep.subr.mxu0 %v10185_v49  ;;  %v7891_v34 = vunpack.c.l.bf16 %v938_v1  ;;  %v7905_v1 = vunpack.c.h.bf16 %v931_v60 }
 0x24f   :  { %1423 = vmatpush1.msra.mxu1 %v7865_v29  ;;  %5964 = vmatpush3.msra.mxu0 %v7869_v32  ;;  %v7895_v29 = vunpack.c.h.bf16 %v933_v36  ;;  %v934_v32 = vld [vmem:[#allocation7 + $0x80] ss:$12 sps:$4 sm:$0xff]  }
 0x250   :  { %1424 = vmatprep.subr.mxu1 %v7871_v41  ;;  %5965 = vmatprep.subr.mxu0 %v10185_v49  ;;  %10236 = vst [vmem:[#allocation139_spill] sm:$0xff] %v7891_v34  ;;  %v7899_v41 = vunpack.c.l.bf16 %v933_v36  ;;  %v7901_v6 = vunpack.c.h.bf16 %v934_v32  ;;  %10240 = vst [vmem:[#allocation143_spill] sm:$0xff] %v7905_v1 }
 0x251   :  { %1425 = vmatpush1.msra.mxu1 %v7875_v25  ;;  %5966 = vmatpush3.msra.mxu0 %v7879_v27  ;;  %10237 = vst [vmem:[#allocation140_spill] sm:$0xff] %v7895_v29  ;;  %v7911_v27 = vunpack.c.l.bf16 %v934_v32 }
 0x252   :  { %1426 = vmatprep.subr.mxu1 %v7885_v8  ;;  %5967 = vmatprep.subr.mxu0 %v10185_v49  ;;  %10238 = vst [vmem:[#allocation141_spill] sm:$0xff] %v7899_v41  ;;  %10239 = vst [vmem:[#allocation142_spill] sm:$0xff] %v7901_v6  ;;  %v7909_v8 = vunpack.c.l.bf16 %v931_v60  ;;  %v927_v60 = vld [vmem:[#allocation7 + $0x60] sm:$0xff] }
 0x253   :  { %1427 = vmatpush1.msra.mxu1 %v7889_v45  ;;  %5968 = vmatpush3.msra.mxu0 %v7891_v34  ;;  %10242 = vst [vmem:[#allocation145_spill] sm:$0xff] %v7911_v27  ;;  %v929_v45 = vld [vmem:[#allocation7 + $0x6c] sm:$0xff]  ;;  %v930_v34 = vld [vmem:[#allocation7 + $0x68] ss:$12 sps:$4 sm:$0xff]   ;;  %v7925_v32 = vunpack.c.h.bf16 %v927_v60 }
 0x254   :  { %1428 = vmatprep.subr.mxu1 %v7895_v29  ;;  %5969 = vmatprep.subr.mxu0 %v10185_v49  ;;  %10241 = vst [vmem:[#allocation144_spill] sm:$0xff] %v7909_v8  ;;  %v7915_v36 = vunpack.c.h.bf16 %v929_v45  ;;  %v7919_v29 = vunpack.c.l.bf16 %v929_v45  ;;  %v7921_v25 = vunpack.c.h.bf16 %v930_v34  ;;  %v926_v45 = vld [vmem:[#allocation7 + $0x50] ss:$12 sps:$4 sm:$0xff]  }
 0x255   :  { %1429 = vmatpush1.msra.mxu1 %v7899_v41  ;;  %5970 = vmatpush3.msra.mxu0 %v7901_v6  ;;  %10246 = vst [vmem:[#allocation149_spill] sm:$0xff] %v7925_v32  ;;  %v7931_v6 = vunpack.c.l.bf16 %v930_v34  ;;  %v923_v41 = vld [vmem:[#allocation7 + $0x48] sm:$0xff]  ;;  %v7939_v12 = vunpack.c.h.bf16 %v926_v45 }
 0x256   :  { %1430 = vmatprep.subr.mxu1 %v7905_v1  ;;  %10243 = vst [vmem:[#allocation146_spill] sm:$0xff] %v7915_v36  ;;  %5971 = vmatprep.subr.mxu0 %v10185_v49  ;;  %10244 = vst [vmem:[#allocation147_spill] sm:$0xff] %v7919_v29  ;;  %v7929_v1 = vunpack.c.l.bf16 %v927_v60  ;;  %v7941_v33 = vunpack.c.h.bf16 %v923_v41  ;;  %v7945_v34 = vunpack.c.l.bf16 %v923_v41  ;;  %v922_v60 = vld [vmem:[#allocation7 + $0x38] ss:$12 sps:$4 sm:$0xff]  }
 0x257   :  { %1431 = vmatpush1.msra.mxu1 %v7909_v8  ;;  %10245 = vst [vmem:[#allocation148_spill] sm:$0xff] %v7921_v25  ;;  %5972 = vmatpush3.msra.mxu0 %v7911_v27  ;;  %10248 = vst [vmem:[#allocation151_spill] sm:$0xff] %v7931_v6  ;;  %v925_v8 = vld [vmem:[#allocation7 + $0x54] sm:$0xff]  ;;  %v7959_v41 = vunpack.c.h.bf16 %v922_v60 }
 0x258   :  { %1432 = vmatprep.subr.mxu1 %v7915_v36  ;;  %5973 = vmatprep.subr.mxu0 %v10185_v49  ;;  %10247 = vst [vmem:[#allocation150_spill] sm:$0xff] %v7929_v1  ;;  %v7935_v27 = vunpack.c.h.bf16 %v925_v8  ;;  %v7937_v36 = vunpack.c.l.bf16 %v925_v8  ;;  %10251 = vst [vmem:[#allocation154_spill] sm:$0xff] %v7939_v12 }
 0x259   :  { %1433 = vmatpush1.msra.mxu1 %v7919_v29  ;;  %5974 = vmatpush3.msra.mxu0 %v7921_v25  ;;  %10252 = vst [vmem:[#allocation155_spill] sm:$0xff] %v7941_v33  ;;  %v921_v29 = vld [vmem:[#allocation7 + $0x3c] sm:$0xff]  ;;  %10253 = vst [vmem:[#allocation156_spill] sm:$0xff] %v7945_v34 }
 0x25a   :  { %1434 = vmatprep.subr.mxu1 %v7925_v32  ;;  %10249 = vst [vmem:[#allocation152_spill] sm:$0xff] %v7935_v27  ;;  %10250 = vst [vmem:[#allocation153_spill] sm:$0xff] %v7937_v36  ;;  %5975 = vmatprep.subr.mxu0 %v10185_v49  ;;  %v7949_v32 = vunpack.c.l.bf16 %v926_v45  ;;  %v7951_v8 = vunpack.c.h.bf16 %v921_v29  ;;  %v7955_v25 = vunpack.c.l.bf16 %v921_v29  ;;  %v7965_v45 = vunpack.c.l.bf16 %v919_v30 }
 0x25b   :  { %1435 = vmatpush1.msra.mxu1 %v7929_v1  ;;  %5976 = vmatpush3.msra.mxu0 %v7931_v6  ;;  %10257 = vst [vmem:[#allocation160_spill] sm:$0xff] %v7959_v41  ;;  %v7961_v6 = vunpack.c.h.bf16 %v919_v30  ;;  %v915_v1 = vld [vmem:[#allocation7 + $0x18] sm:$0xff]  ;;  %v7969_v29 = vunpack.c.l.bf16 %v922_v60 }
 0x25c   :  { %1436 = vmatprep.subr.mxu1 %v7935_v27  ;;  %10254 = vst [vmem:[#allocation157_spill] sm:$0xff] %v7949_v32  ;;  %10255 = vst [vmem:[#allocation158_spill] sm:$0xff] %v7951_v8  ;;  %5977 = vmatprep.subr.mxu0 %v10185_v49  ;;  %v918_v27 = vld [vmem:[#allocation7 + $0x20] ss:$12 sps:$4 sm:$0xff]   ;;  %v7985_v60 = vunpack.c.l.bf16 %v915_v1 }
 0x25d   :  { %1437 = vmatpush1.msra.mxu1 %v7937_v36  ;;  %10256 = vst [vmem:[#allocation159_spill] sm:$0xff] %v7955_v25  ;;  %5978 = vmatpush3.msra.mxu0 %v7939_v12  ;;  %10258 = vst [vmem:[#allocation161_spill] sm:$0xff] %v7961_v6  ;;  %v7971_v12 = vunpack.c.h.bf16 %v917_v23  ;;  %v913_v36 = vld [vmem:[#allocation7 + $0xc] sm:$0xff]  ;;  %v7979_v30 = vunpack.c.h.bf16 %v918_v27 }
 0x25e   :  { %1438 = vmatprep.subr.mxu1 %v7941_v33  ;;  %5979 = vmatprep.subr.mxu0 %v10185_v49  ;;  %10259 = vst [vmem:[#allocation162_spill] sm:$0xff] %v7965_v45  ;;  %10260 = vst [vmem:[#allocation163_spill] sm:$0xff] %v7969_v29  ;;  %v7975_v33 = vunpack.c.l.bf16 %v917_v23  ;;  %v7989_v23 = vunpack.c.l.bf16 %v918_v27 }
 0x25f   :  { %1439 = vmatpush1.msra.mxu1 %v7945_v34  ;;  %5980 = vmatpush3.msra.mxu0 %v7949_v32  ;;  %10261 = vst [vmem:[#allocation164_spill] sm:$0xff] %v7971_v12  ;;  %10263 = vst [vmem:[#allocation166_spill] sm:$0xff] %v7979_v30  ;;  %v7981_v32 = vunpack.c.h.bf16 %v915_v1  ;;  %v911_v34 = vld [vmem:[#allocation7] sm:$0xff] }
 0x260   :  { %1440 = vmatprep.subr.mxu1 %v7951_v8  ;;  %5981 = vmatprep.subr.mxu0 %v10185_v49  ;;  %10262 = vst [vmem:[#allocation165_spill] sm:$0xff] %v7975_v33  ;;  %10265 = vst [vmem:[#allocation168_spill] sm:$0xff] %v7985_v60  ;;  %v914_v8 = vld [vmem:[#allocation7 + $0x8] ss:$12 sps:$4 sm:$0xff]   ;;  %v8005_v27 = vunpack.c.l.bf16 %v911_v34 }
 0x261   :  { %1441 = vmatpush1.msra.mxu1 %v7955_v25  ;;  %5982 = vmatpush3.msra.mxu0 %v7959_v41  ;;  %10264 = vst [vmem:[#allocation167_spill] sm:$0xff] %v7981_v32  ;;  %10266 = vst [vmem:[#allocation169_spill] sm:$0xff] %v7989_v23  ;;  %v7991_v41 = vunpack.c.h.bf16 %v913_v36  ;;  %v7999_v1 = vunpack.c.h.bf16 %v914_v8 }
 0x262   :  { %1442 = vmatprep.subr.mxu1 %v7961_v6  ;;  %5983 = vmatprep.subr.mxu0 %v10185_v49  ;;  %v7995_v6 = vunpack.c.l.bf16 %v913_v36  ;;  %10271 = vst [vmem:[#allocation174_spill] sm:$0xff] %v8005_v27  ;;  %v8009_v36 = vunpack.c.l.bf16 %v914_v8 }
 0x263   :  { %1443 = vmatpush1.msra.mxu1 %v7965_v45  ;;  %5984 = vmatpush3.msra.mxu0 %v7969_v29  ;;  %10267 = vst [vmem:[#allocation170_spill] sm:$0xff] %v7991_v41  ;;  %10269 = vst [vmem:[#allocation172_spill] sm:$0xff] %v7999_v1  ;;  %v8001_v45 = vunpack.c.h.bf16 %v911_v34 }
 0x264   :  { %1444 = vmatprep.subr.mxu1 %v7971_v12  ;;  %5985 = vmatprep.subr.mxu0 %v10185_v49  ;;  %10268 = vst [vmem:[#allocation171_spill] sm:$0xff] %v7995_v6  ;;  %10272 = vst [vmem:[#allocation175_spill] sm:$0xff] %v8009_v36 }
 0x265   :  { %1445 = vmatpush1.msra.mxu1 %v7975_v33  ;;  %5986 = vmatpush3.msra.mxu0 %v7979_v30  ;;  %10270 = vst [vmem:[#allocation173_spill] sm:$0xff] %v8001_v45 }
 0x266   :  { %1446 = vmatprep.subr.mxu1 %v7981_v32  ;;  %5987 = vmatprep.subr.mxu0 %v10185_v49 }
 0x267   :  { %1447 = vmatpush1.msra.mxu1 %v7985_v60  ;;  %5988 = vmatpush3.msra.mxu0 %v7989_v23 }
 0x268   :  { %1448 = vmatprep.subr.mxu1 %v7991_v41  ;;  %5989 = vmatprep.subr.mxu0 %v10185_v49  ;;  %v727_v41 = vadd.f32 %v7566_v9, %v7571_v13 }
 0x269   :  { %1449 = vmatpush1.msra.mxu1 %v7995_v6  ;;  %5990 = vmatpush3.msra.mxu0 %v7999_v1  ;;  %v1188_v6 = vpop.f32.mrf.mxu1 }
 0x26a   :  { %1450 = vmatprep.subr.mxu1 %v8001_v45  ;;  %5991 = vmatprep.subr.mxu0 %v10185_v49  ;;  %v8026_v45 = vsub.s32 2, %v7548_v56 }
 0x26b   :  { %1451 = vmatpush1.msra.mxu1 %v8005_v27  ;;  %5992 = vmatpush3.msra.mxu0 %v8009_v36  ;;  %v1071_v27 = vld [vmem:[%s9757_s11] sm:$0x7] }
 0x26c   :  { %1484 = vmatprep.mubr.f32.mxu1 %v10185_v49  ;;  %5993 = vmatprep.mubr.msk.f32.mxu0 %vm7089_vm0, %v10185_v49  ;;  %v8032_v36 = vrot.slane %v1071_v27, %v7554_v62  ;;  %v560_v1 = vrot.slane %v7559_v0, %v8026_v45 }
 0x26d   :  { %1587 = vmatprep.subr.mxu1 %v7383_v37  ;;  %5996 = vmatprep.subr.mxu0 %v10185_v49 }
 0x2ab   :  { %v8023_v34 = vpop.f32.mrf.mxu0 }
 0x2ac   :  { %10273 = vst [vmem:[#allocation176_spill] sm:$0xff] %v8023_v34 }
 0x2ad   :  { %v5866_v8 = vpop.f32.mrf.mxu0 }
 0x2ae   :  { %v1189_v8 = vadd.f32 %v1188_v6, %v8032_v36 }
 0x2b0   :  { %v1404_v60 = vadd.f32 %v1189_v8, %v727_v41  ;;  %v8054_v41 = vrot.slane %v1071_v27, %v7562_v4 }
 0x2b2   :  { %v1406_v29 = vmul.f32 0.5, %v1404_v60 }
 0x2b4   :  { %6854 = vtanh.f32 %v1406_v29 }
 0x2c1   :  { %v6855_v8 = vpop.eup %6854 }
 0x2c2   :  { %v1410_v29 = vmul.f32 0.5, %v6855_v8  ;;  %v10290_v8 = vld [vmem:[#allocation78_spill] sm:$0xff] }
 0x2cb   :  { %v5885_v37 = vpop.f32.mrf.mxu0 }
 0x2cc   :  { %v8039_v34 = vadd.f32 %v5885_v37, %v560_v1 }
 0x2cd   :  { %v799_v56 = vpop.f32.mrf.mxu0 }
 0x2ce   :  { %10274 = vst [vmem:[#allocation177_spill] sm:$0xff] %v8039_v34 }
 0x2cf   :  { %v5886_v23 = vpop.f32.mrf.mxu0 }
 0x2d0   :  { %v8041_v32 = vadd.f32 %v5886_v23, %v560_v1  ;;  %v1190_v23 = vpop.f32.mrf.mxu1 }
 0x2d1   :  { %v802_v30 = vpop.f32.mrf.mxu0 }
 0x2d2   :  { %10275 = vst [vmem:[#allocation178_spill] sm:$0xff] %v8041_v32  ;;  %v8043_v33 = vadd.f32 %v802_v30, %v560_v1  ;;  %v729_v30 = vadd.f32 %v7575_v17, %v7582_v22 }
 0x2d3   :  { %v5889_v12 = vpop.f32.mrf.mxu0 }
 0x2d4   :  { %10276 = vst [vmem:[#allocation179_spill] sm:$0xff] %v8043_v33  ;;  %v8045_v0 = vadd.f32 %v5889_v12, %v560_v1  ;;  %v1191_v12 = vadd.f32 %v1190_v23, %v8054_v41 }
 0x2d5   :  { %v815_v25 = vpop.f32.mrf.mxu0 }
 0x2d6   :  { %10277 = vst [vmem:[#allocation180_spill] sm:$0xff] %v8045_v0  ;;  %v8047_v62 = vadd.f32 %v815_v25, %v560_v1  ;;  %v1405_v60 = vadd.f32 %v1191_v12, %v729_v30  ;;  %v8060_v0 = vrot.slane %v1071_v27, %v8026_v45  ;;  %v10285_v27 = vld [vmem:[#allocation45_spill] sm:$0xff] }
 0x2d7   :  { %v5890_v9 = vpop.f32.mrf.mxu0 }
 0x2d8   :  { %10278 = vst [vmem:[#allocation181_spill] sm:$0xff] %v8047_v62  ;;  %v8049_v13 = vadd.f32 %v5890_v9, %v560_v1  ;;  %v1407_v25 = vmul.f32 0.5, %v1405_v60  ;;  %10281 = vst [vmem:[#allocation184_spill] sm:$0xff] %v8060_v0  ;;  %v800_v62 = vadd.f32 %v799_v56, %v560_v1  ;;  %v10287_v56 = vld [vmem:[#allocation76_spill] sm:$0xff] }
 0x2d9   :  { %v818_v37 = vpop.f32.mrf.mxu0 }
 0x2da   :  { %10279 = vst [vmem:[#allocation182_spill] sm:$0xff] %v8049_v13  ;;  %v8051_v6 = vadd.f32 %v818_v37, %v560_v1  ;;  %6856 = vtanh.f32 %v1407_v25  ;;  %v1412_v13 = vadd.f32 0.5, %v1410_v29  ;;  %v10284_v1 = vld [vmem:[#allocation74_spill] sm:$0xff] }
 0x2dc   :  { %10280 = vst [vmem:[#allocation183_spill] sm:$0xff] %v8051_v6 }
 0x2e7   :  { %v6857_v17 = vpop.eup %6856 }
 0x2e8   :  { %v1411_v22 = vmul.f32 0.5, %v6857_v17  ;;  %v10293_v17 = vld [vmem:[#allocation83_spill] sm:$0xff] }
 0x2ea   :  { %v1413_v30 = vadd.f32 0.5, %v1411_v22  ;;  %v10294_v22 = vld [vmem:[#allocation82_spill] sm:$0xff] }
 0x2eb   :  { %v1259_v9 = vpop.f32.mrf.mxu0 }
 0x2ec   :  { %v1260_v37 = vadd.f32 %v1259_v9, %v8060_v0  ;;  %v10291_v9 = vld [vmem:[#allocation80_spill] sm:$0xff] }
 0x2ed   :  { %v5925_v6 = vpop.f32.mrf.mxu0 }
 0x2ee   :  { %v1414_v32 = vmul.f32 %v1412_v13, %v1260_v37  ;;  %v10288_v13 = vld [vmem:[#allocation47_spill] sm:$0xff]  ;;  %v10289_v6 = vld [vmem:[#allocation48_spill] sm:$0xff]  ;;  %v10292_v37 = vld [vmem:[#allocation81_spill] sm:$0xff] }
 0x2f0   :  { %v1415_v34 = vadd.f32 %v1414_v32, %v800_v62  ;;  %v10282_v62 = vld [vmem:[#allocation43_spill] sm:$0xff]  ;;  %v10283_v32 = vld [vmem:[#allocation44_spill] sm:$0xff] }
 0x2f2   :  { %6858 = vtanh.f32 %v1415_v34  ;;  %v10286_v34 = vld [vmem:[#allocation46_spill] sm:$0xff] }
 0x2ff   :  { %v6859_v23 = vpop.eup %6858 }
 0x300   :  { %v1417_v12 = vsub.f32 0.0, %v6859_v23 }
 0x302   :  { %v1418_v60 = vmul.f32 %v1417_v12, %v1413_v30  ;;  %v10296_v30 = vld [vmem:[#allocation86_spill] sm:$0xff]  ;;  %v10297_v12 = vld [vmem:[#allocation85_spill] sm:$0xff] }
 0x304   :  { %v8063_v33 = vadd.f32 %v6859_v23, %v1418_v60  ;;  %v10295_v23 = vld [vmem:[#allocation84_spill] sm:$0xff]  ;;  %v10298_v60 = vld [vmem:[#allocation87_spill] sm:$0xff] }
 0x306   :  { %1485 = vmatmul.mubr.f32.vlgmr.msra.gmra.mxu1 %v8063_v33  ;;  %5994 = vmatmul.mubr.f32.vlgmr.msra.gmra.mxu0 %v8063_v33 }
 0x307   :  { %1588 = vmatpush1.msra.mxu1 %v7389_v40  ;;  %5997 = vmatpush3.msra.mxu0 %v7564_v28 }
 0x308   :  { %1589 = vmatprep.subr.mxu1 %v7392_v42  ;;  %5998 = vmatprep.subr.mxu0 %v10185_v49 }
 0x309   :  { %1590 = vmatpush1.msra.mxu1 %v7394_v43  ;;  %5999 = vmatpush3.msra.mxu0 %v7573_v15 }
 0x30a   :  { %1591 = vmatprep.subr.mxu1 %v7399_v47  ;;  %6000 = vmatprep.subr.mxu0 %v10185_v49 }
 0x30b   :  { %1592 = vmatpush1.msra.mxu1 %v7402_v48  ;;  %6001 = vmatpush3.msra.mxu0 %v7588_v24 }
 0x30c   :  { %1593 = vmatprep.subr.mxu1 %v7408_v50  ;;  %6002 = vmatprep.subr.mxu0 %v10185_v49  ;;  %v8132_v25 = vpop.f32.mrf.mxu0 }
 0x30d   :  { %1594 = vmatpush1.msra.mxu1 %v7411_v51  ;;  %6003 = vmatpush3.msra.mxu0 %v7595_v54 }
 0x30e   :  { %1595 = vmatprep.subr.mxu1 %v7414_v53  ;;  %6004 = vmatprep.subr.mxu0 %v10185_v49  ;;  %v5960_v29 = vpop.f32.mrf.mxu0 }
 0x30f   :  { %1596 = vmatpush1.msra.mxu1 %v7421_v55  ;;  %6005 = vmatpush3.msra.mxu0 %v7602_v35  ;;  %v10299_v29 = vld [vmem:[#allocation88_spill] sm:$0xff] }
 0x310   :  { %1597 = vmatprep.subr.mxu1 %v7424_v57  ;;  %6006 = vmatprep.subr.mxu0 %v10185_v49 }
 0x311   :  { %1598 = vmatpush1.msra.mxu1 %v7427_v58  ;;  %6007 = vmatpush3.msra.mxu0 %v7609_v44 }
 0x312   :  { %1599 = vmatprep.subr.mxu1 %v7433_v61  ;;  %6008 = vmatprep.subr.mxu0 %v10185_v49 }
 0x313   :  { %1600 = vmatpush1.msra.mxu1 %v7436_v63  ;;  %6009 = vmatpush3.msra.mxu0 %v7619_v39 }
 0x314   :  { %1601 = vmatprep.subr.mxu1 %v7442_v2  ;;  %6010 = vmatprep.subr.mxu0 %v10185_v49 }
 0x315   :  { %1602 = vmatpush1.msra.mxu1 %v7445_v3  ;;  %6011 = vmatpush3.msra.mxu0 %v7628_v46 }
 0x316   :  { %1603 = vmatprep.subr.mxu1 %v7448_v5  ;;  %6012 = vmatprep.subr.mxu0 %v10185_v49 }
 0x317   :  { %1604 = vmatpush1.msra.mxu1 %v7455_v7  ;;  %6013 = vmatpush3.msra.mxu0 %v7635_v26 }
 0x318   :  { %1605 = vmatprep.subr.mxu1 %v7458_v10  ;;  %6014 = vmatprep.subr.mxu0 %v10185_v49 }
 0x319   :  { %1606 = vmatpush1.msra.mxu1 %v7461_v11  ;;  %6015 = vmatpush3.msra.mxu0 %v7642_v38 }
 0x31a   :  { %1607 = vmatprep.subr.mxu1 %v7467_v14  ;;  %6016 = vmatprep.subr.mxu0 %v10185_v49 }
 0x31b   :  { %1608 = vmatpush1.msra.mxu1 %v7470_v16  ;;  %6017 = vmatpush3.msra.mxu0 %v7649_v21 }
 0x31c   :  { %1609 = vmatprep.subr.mxu1 %v7476_v18  ;;  %6018 = vmatprep.subr.mxu0 %v10185_v49 }
 0x31d   :  { %1610 = vmatpush1.msra.mxu1 %v7479_v19  ;;  %6019 = vmatpush3.msra.mxu0 %v7656_v59 }
 0x31e   :  { %1611 = vmatprep.subr.mxu1 %v7482_v20  ;;  %6020 = vmatprep.subr.mxu0 %v10185_v49 }
 0x31f   :  { %1612 = vmatpush1.msra.mxu1 %v7489_v31  ;;  %6021 = vmatpush3.msra.mxu0 %v7663_v52 }
 0x320   :  { %1613 = vmatprep.subr.mxu1 %v10282_v62  ;;  %6022 = vmatprep.subr.mxu0 %v10185_v49 }
 0x321   :  { %1614 = vmatpush1.msra.mxu1 %v10283_v32  ;;  %6023 = vmatpush3.msra.mxu0 %v10284_v1 }
 0x322   :  { %1615 = vmatprep.subr.mxu1 %v10285_v27  ;;  %6024 = vmatprep.subr.mxu0 %v10185_v49 }
 0x323   :  { %1616 = vmatpush1.msra.mxu1 %v10286_v34  ;;  %6025 = vmatpush3.msra.mxu0 %v10287_v56 }
 0x324   :  { %1617 = vmatprep.subr.mxu1 %v10288_v13  ;;  %6026 = vmatprep.subr.mxu0 %v10185_v49 }
 0x325   :  { %1618 = vmatpush1.msra.mxu1 %v10289_v6  ;;  %1651 = vmatprep.mubr.f32.mxu1 %v10185_v49 }
 0x326   :  { %6027 = vmatpush3.msra.mxu0 %v10290_v8  ;;  %6028 = vmatprep.mubr.msk.f32.mxu0 %vm7089_vm0, %v10185_v49 }
 0x327   :  { %1652 = vmatmul.mubr.f32.vlgmr.msra.gmra.mxu1 %v8063_v33  ;;  %6029 = vmatmul.mubr.f32.vlgmr.msra.gmra.mxu0 %v8063_v33 }
 0x328   :  { %1728 = vmatprep.subr.mxu1 %v10291_v9  ;;  %6031 = vmatprep.subr.mxu0 %v10185_v49  ;;  %v10300_v9 = vld [vmem:[#allocation89_spill] sm:$0xff] }
 0x329   :  { %1729 = vmatpush1.msra.mxu1 %v10292_v37  ;;  %6032 = vmatpush3.msra.mxu0 %v10293_v17  ;;  %v10301_v17 = vld [vmem:[#allocation90_spill] sm:$0xff]  ;;  %v10303_v37 = vld [vmem:[#allocation91_spill] sm:$0xff] }
 0x32a   :  { %1730 = vmatprep.subr.mxu1 %v10294_v22  ;;  %6033 = vmatprep.subr.mxu0 %v10185_v49  ;;  %v10302_v22 = vld [vmem:[#allocation92_spill] sm:$0xff] }
 0x32b   :  { %1731 = vmatpush1.msra.mxu1 %v10295_v23  ;;  %6034 = vmatpush3.msra.mxu0 %v10296_v30  ;;  %v10304_v30 = vld [vmem:[#allocation93_spill] sm:$0xff]  ;;  %v10306_v23 = vld [vmem:[#allocation94_spill] sm:$0xff] }
 0x32c   :  { %1732 = vmatprep.subr.mxu1 %v10297_v12  ;;  %6035 = vmatprep.subr.mxu0 %v10185_v49  ;;  %v10305_v12 = vld [vmem:[#allocation95_spill] sm:$0xff] }
 0x32d   :  { %1733 = vmatpush1.msra.mxu1 %v10298_v60  ;;  %6036 = vmatpush3.msra.mxu0 %v10299_v29  ;;  %v10307_v29 = vld [vmem:[#allocation96_spill] sm:$0xff]  ;;  %v10309_v60 = vld [vmem:[#allocation97_spill] sm:$0xff] }
 0x32e   :  { %1734 = vmatprep.subr.mxu1 %v10300_v9  ;;  %6037 = vmatprep.subr.mxu0 %v10185_v49  ;;  %v10308_v9 = vld [vmem:[#allocation98_spill] sm:$0xff] }
 0x32f   :  { %1735 = vmatpush1.msra.mxu1 %v10301_v17  ;;  %6038 = vmatpush3.msra.mxu0 %v10302_v22  ;;  %v10310_v22 = vld [vmem:[#allocation99_spill] sm:$0xff]  ;;  %v10312_v17 = vld [vmem:[#allocation100_spill] sm:$0xff] }
 0x330   :  { %1736 = vmatprep.subr.mxu1 %v10303_v37  ;;  %6039 = vmatprep.subr.mxu0 %v10185_v49  ;;  %v10311_v37 = vld [vmem:[#allocation101_spill] sm:$0xff] }
 0x331   :  { %1737 = vmatpush1.msra.mxu1 %v10304_v30  ;;  %6040 = vmatpush3.msra.mxu0 %v10305_v12  ;;  %v10313_v12 = vld [vmem:[#allocation102_spill] sm:$0xff]  ;;  %v10315_v30 = vld [vmem:[#allocation103_spill] sm:$0xff] }
 0x332   :  { %1738 = vmatprep.subr.mxu1 %v10306_v23  ;;  %6041 = vmatprep.subr.mxu0 %v10185_v49  ;;  %v10314_v23 = vld [vmem:[#allocation104_spill] sm:$0xff] }
 0x333   :  { %1739 = vmatpush1.msra.mxu1 %v10307_v29  ;;  %6042 = vmatpush3.msra.mxu0 %v10308_v9  ;;  %v10316_v9 = vld [vmem:[#allocation105_spill] sm:$0xff]  ;;  %v10318_v29 = vld [vmem:[#allocation106_spill] sm:$0xff] }
 0x334   :  { %1740 = vmatprep.subr.mxu1 %v10309_v60  ;;  %6043 = vmatprep.subr.mxu0 %v10185_v49  ;;  %v10317_v60 = vld [vmem:[#allocation107_spill] sm:$0xff] }
 0x335   :  { %1741 = vmatpush1.msra.mxu1 %v10310_v22  ;;  %6044 = vmatpush3.msra.mxu0 %v10311_v37  ;;  %v10319_v37 = vld [vmem:[#allocation108_spill] sm:$0xff]  ;;  %v10321_v22 = vld [vmem:[#allocation109_spill] sm:$0xff] }
 0x336   :  { %1742 = vmatprep.subr.mxu1 %v10312_v17  ;;  %6045 = vmatprep.subr.mxu0 %v10185_v49  ;;  %v10320_v17 = vld [vmem:[#allocation110_spill] sm:$0xff] }
 0x337   :  { %1743 = vmatpush1.msra.mxu1 %v10313_v12  ;;  %6046 = vmatpush3.msra.mxu0 %v10314_v23  ;;  %v10322_v23 = vld [vmem:[#allocation111_spill] sm:$0xff]  ;;  %v10324_v12 = vld [vmem:[#allocation112_spill] sm:$0xff] }
 0x338   :  { %1744 = vmatprep.subr.mxu1 %v10315_v30  ;;  %6047 = vmatprep.subr.mxu0 %v10185_v49  ;;  %v10323_v30 = vld [vmem:[#allocation113_spill] sm:$0xff] }
 0x339   :  { %1745 = vmatpush1.msra.mxu1 %v10316_v9  ;;  %6048 = vmatpush3.msra.mxu0 %v10317_v60  ;;  %v10325_v60 = vld [vmem:[#allocation114_spill] sm:$0xff]  ;;  %v10327_v9 = vld [vmem:[#allocation115_spill] sm:$0xff] }
 0x33a   :  { %1746 = vmatprep.subr.mxu1 %v10318_v29  ;;  %6049 = vmatprep.subr.mxu0 %v10185_v49  ;;  %v10326_v29 = vld [vmem:[#allocation116_spill] sm:$0xff] }
 0x33b   :  { %1747 = vmatpush1.msra.mxu1 %v10319_v37  ;;  %6050 = vmatpush3.msra.mxu0 %v10320_v17  ;;  %v10328_v17 = vld [vmem:[#allocation117_spill] sm:$0xff]  ;;  %v10330_v37 = vld [vmem:[#allocation118_spill] sm:$0xff] }
 0x33c   :  { %1748 = vmatprep.subr.mxu1 %v10321_v22  ;;  %6051 = vmatprep.subr.mxu0 %v10185_v49  ;;  %v10329_v22 = vld [vmem:[#allocation119_spill] sm:$0xff] }
 0x33d   :  { %1749 = vmatpush1.msra.mxu1 %v10322_v23  ;;  %6052 = vmatpush3.msra.mxu0 %v10323_v30  ;;  %v10331_v30 = vld [vmem:[#allocation120_spill] sm:$0xff]  ;;  %v10333_v23 = vld [vmem:[#allocation121_spill] sm:$0xff] }
 0x33e   :  { %1750 = vmatprep.subr.mxu1 %v10324_v12  ;;  %6053 = vmatprep.subr.mxu0 %v10185_v49  ;;  %v10332_v12 = vld [vmem:[#allocation122_spill] sm:$0xff] }
 0x33f   :  { %1751 = vmatpush1.msra.mxu1 %v10325_v60  ;;  %6054 = vmatpush3.msra.mxu0 %v10326_v29  ;;  %v10334_v29 = vld [vmem:[#allocation123_spill] sm:$0xff]  ;;  %v10336_v60 = vld [vmem:[#allocation124_spill] sm:$0xff] }
 0x340   :  { %1752 = vmatprep.subr.mxu1 %v10327_v9  ;;  %6055 = vmatprep.subr.mxu0 %v10185_v49  ;;  %v10335_v9 = vld [vmem:[#allocation125_spill] sm:$0xff] }
 0x341   :  { %1753 = vmatpush1.msra.mxu1 %v10328_v17  ;;  %6056 = vmatpush3.msra.mxu0 %v10329_v22  ;;  %v10337_v22 = vld [vmem:[#allocation126_spill] sm:$0xff] }
 0x342   :  { %1754 = vmatprep.subr.mxu1 %v10330_v37  ;;  %6057 = vmatprep.subr.mxu0 %v10185_v49  ;;  %v10338_v37 = vld [vmem:[#allocation127_spill] sm:$0xff] }
 0x343   :  { %1755 = vmatpush1.msra.mxu1 %v10331_v30  ;;  %6058 = vmatpush3.msra.mxu0 %v10332_v12 }
 0x344   :  { %1756 = vmatprep.subr.mxu1 %v10333_v23  ;;  %6059 = vmatprep.subr.mxu0 %v10185_v49  ;;  %v10339_v23 = vld [vmem:[#allocation128_spill] sm:$0xff] }
 0x345   :  { %1757 = vmatpush1.msra.mxu1 %v10334_v29  ;;  %6060 = vmatpush3.msra.mxu0 %v10335_v9  ;;  %v1105_v9 = vld [vmem:[%s9761_s15] sm:$0x7] }
 0x346   :  { %1758 = vmatprep.subr.mxu1 %v10336_v60  ;;  %6061 = vmatprep.subr.mxu0 %v10185_v49  ;;  %v1329_v60 = vpop.f32.mrf.mxu1  ;;  %v10340_v29 = vld [vmem:[#allocation49_spill] sm:$0xff]  ;;  %v8223_v32 = vrot.slane %v1105_v9, %v7562_v4 }
 0x347   :  { %1759 = vmatpush1.msra.mxu1 %v10337_v22  ;;  %6062 = vmatpush3.msra.mxu0 %v10338_v37  ;;  %v1088_v22 = vld [vmem:[%s9759_s13] sm:$0x7]  ;;  %v8212_v37 = vrot.slane %v1105_v9, %v10340_v29 }
 0x348   :  { %1792 = vmatprep.mubr.f32.mxu1 %v10185_v49  ;;  %6063 = vmatprep.mubr.msk.f32.mxu0 %vm7089_vm0, %v10185_v49  ;;  %v8215_v12 = vrot.slane %v1088_v22, %v10340_v29  ;;  %v1331_v30 = vpop.f32.mrf.mxu1  ;;  %v8220_v27 = vrot.slane %v1088_v22, %v7562_v4  ;;  %10343 = vst [vmem:[#allocation186_spill] sm:$0xff] %v8223_v32 }
 0x349   :  { %1885 = vmatprep.subr.mxu1 %v10339_v23  ;;  %6066 = vmatprep.subr.mxu0 %v10185_v49  ;;  %v1330_v8 = vadd.f32 %v1329_v60, %v8212_v37  ;;  %v1332_v62 = vadd.f32 %v1331_v30, %v8223_v32  ;;  %v8228_v60 = vrot.slane %v1105_v9, %v8026_v45  ;;  %v10344_v32 = vld [vmem:[#allocation53_spill] sm:$0xff] }
 0x34a   :  { %10341 = vst [vmem:[#allocation49_spill] sm:$0xff] %v8215_v12  ;;  %10342 = vst [vmem:[#allocation185_spill] sm:$0xff] %v8220_v27 }
 0x3c6   :  { %v1486_v17 = vpop.f32.mrf.mxu1  ;;  %v1557_v23 = vpop.f32.mrf.mxu0 }
 0x3c7   :  { %v1487_v6 = vadd.f32 %v1486_v17, %v8215_v12 }
 0x3c8   :  { %v5995_v13 = vpop.f32.mrf.mxu0  ;;  %v1488_v1 = vpop.f32.mrf.mxu1 }
 0x3c9   :  { %v1561_v56 = vadd.f32 %v1487_v6, %v1330_v8  ;;  %v1489_v29 = vadd.f32 %v1488_v1, %v8220_v27  ;;  %v1401_v6 = vadd.f32 %v8132_v25, %v8228_v60 }
 0x3cb   :  { %v1563_v34 = vmul.f32 0.5, %v1561_v56  ;;  %v1562_v52 = vadd.f32 %v1489_v29, %v1332_v62  ;;  %v8231_v56 = vrot.slane %v1088_v22, %v8026_v45 }
 0x3cd   :  { %6860 = vtanh.f32 %v1563_v34  ;;  %v1564_v17 = vmul.f32 0.5, %v1562_v52  ;;  %v1558_v4 = vadd.f32 %v1557_v23, %v8231_v56 }
 0x3cf   :  { %6862 = vtanh.f32 %v1564_v17 }
 0x3da   :  { %v6861_v13 = vpop.eup %6860 }
 0x3db   :  { %v1567_v34 = vmul.f32 0.5, %v6861_v13 }
 0x3dc   :  { %v6863_v29 = vpop.eup %6862 }
 0x3dd   :  { %v1569_v8 = vadd.f32 0.5, %v1567_v34  ;;  %v1568_v13 = vmul.f32 0.5, %v6863_v29 }
 0x3df   :  { %v1571_v1 = vmul.f32 %v1569_v8, %v1401_v6  ;;  %v1570_v34 = vadd.f32 0.5, %v1568_v13  ;;  %v10353_v13 = vld [vmem:[#allocation135_spill] sm:$0xff] }
 0x3e1   :  { %v1572_v27 = vadd.f32 %v1571_v1, %v1558_v4  ;;  %v10347_v1 = vld [vmem:[#allocation129_spill] sm:$0xff] }
 0x3e3   :  { %6864 = vtanh.f32 %v1572_v27  ;;  %v10346_v27 = vld [vmem:[#allocation55_spill] sm:$0xff] }
 0x3e7   :  { %v1653_v62 = vpop.f32.mrf.mxu1  ;;  %v1724_v30 = vpop.f32.mrf.mxu0 }
 0x3e8   :  { %v1654_v9 = vadd.f32 %v1653_v62, %v8032_v36  ;;  %v10349_v62 = vld [vmem:[#allocation131_spill] sm:$0xff] }
 0x3e9   :  { %v6030_v52 = vpop.f32.mrf.mxu0  ;;  %v1655_v12 = vpop.f32.mrf.mxu1 }
 0x3ea   :  { %v1869_v45 = vadd.f32 %v1654_v9, %v10344_v32  ;;  %v1656_v23 = vadd.f32 %v1655_v12, %v8054_v41  ;;  %v10348_v32 = vld [vmem:[#allocation130_spill] sm:$0xff]  ;;  %v10350_v52 = vld [vmem:[#allocation132_spill] sm:$0xff]  ;;  %v10351_v12 = vld [vmem:[#allocation133_spill] sm:$0xff] }
 0x3ec   :  { %v1871_v22 = vmul.f32 0.5, %v1869_v45  ;;  %v1870_v4 = vadd.f32 %v1656_v23, %v10346_v27  ;;  %v10352_v45 = vld [vmem:[#allocation134_spill] sm:$0xff]  ;;  %v10357_v27 = vld [vmem:[#allocation139_spill] sm:$0xff] }
 0x3ee   :  { %6866 = vtanh.f32 %v1871_v22  ;;  %v1872_v9 = vmul.f32 0.5, %v1870_v4  ;;  %v10358_v4 = vld [vmem:[#allocation140_spill] sm:$0xff] }
 0x3f0   :  { %v6865_v25 = vpop.eup %6864  ;;  %6868 = vtanh.f32 %v1872_v9  ;;  %v10363_v9 = vld [vmem:[#allocation144_spill] sm:$0xff] }
 0x3f1   :  { %v1574_v17 = vsub.f32 0.0, %v6865_v25 }
 0x3f3   :  { %v1575_v6 = vmul.f32 %v1574_v17, %v1570_v34  ;;  %v10355_v34 = vld [vmem:[#allocation137_spill] sm:$0xff]  ;;  %v1725_v17 = vadd.f32 %v1724_v30, %v8060_v0  ;;  %v10362_v30 = vld [vmem:[#allocation179_spill] sm:$0xff] }
 0x3f4   :  { %v10364_v0 = vld [vmem:[#allocation145_spill] sm:$0xff] }
 0x3f5   :  { %v8239_v8 = vadd.f32 %v6865_v25, %v1575_v6  ;;  %v10354_v25 = vld [vmem:[#allocation136_spill] sm:$0xff]  ;;  %v10356_v6 = vld [vmem:[#allocation138_spill] sm:$0xff] }
 0x3f7   :  { %10345 = vst [vmem:[#allocation53_spill] sm:$0xff] %v8239_v8  ;;  %1793 = vmatmul.mubr.f32.vlgmr.msra.gmra.mxu1 %v8239_v8  ;;  %6064 = vmatmul.mubr.f32.vlgmr.msra.gmra.mxu0 %v8239_v8 }
 0x3f8   :  { %1886 = vmatpush1.msra.mxu1 %v10347_v1  ;;  %6067 = vmatpush3.msra.mxu0 %v10348_v32 }
 0x3f9   :  { %1887 = vmatprep.subr.mxu1 %v10349_v62  ;;  %6068 = vmatprep.subr.mxu0 %v10185_v49 }
 0x3fa   :  { %1888 = vmatpush1.msra.mxu1 %v10350_v52  ;;  %6069 = vmatpush3.msra.mxu0 %v10351_v12 }
 0x3fb   :  { %v6867_v29 = vpop.eup %6866  ;;  %1889 = vmatprep.subr.mxu1 %v10352_v45  ;;  %6070 = vmatprep.subr.mxu0 %v10185_v49 }
 0x3fc   :  { %v1875_v22 = vmul.f32 0.5, %v6867_v29  ;;  %1890 = vmatpush1.msra.mxu1 %v10353_v13  ;;  %6071 = vmatpush3.msra.mxu0 %v10354_v25  ;;  %v10359_v13 = vld [vmem:[#allocation141_spill] sm:$0xff]  ;;  %v10360_v25 = vld [vmem:[#allocation142_spill] sm:$0xff] }
 0x3fd   :  { %1891 = vmatprep.subr.mxu1 %v10355_v34  ;;  %6072 = vmatprep.subr.mxu0 %v10185_v49  ;;  %v10361_v34 = vld [vmem:[#allocation143_spill] sm:$0xff] }
 0x3fe   :  { %v1877_v23 = vadd.f32 0.5, %v1875_v22  ;;  %1892 = vmatpush1.msra.mxu1 %v10356_v6  ;;  %6073 = vmatpush3.msra.mxu0 %v10357_v27  ;;  %v10365_v27 = vld [vmem:[#allocation146_spill] sm:$0xff] }
 0x3ff   :  { %1893 = vmatprep.subr.mxu1 %v10358_v4  ;;  %6074 = vmatprep.subr.mxu0 %v10185_v49  ;;  %v10392_v4 = vld [vmem:[#allocation173_spill] sm:$0xff] }
 0x400   :  { %v1879_v29 = vmul.f32 %v1877_v23, %v1725_v17  ;;  %1894 = vmatpush1.msra.mxu1 %v10359_v13  ;;  %6075 = vmatpush3.msra.mxu0 %v10360_v25  ;;  %v10366_v17 = vld [vmem:[#allocation147_spill] sm:$0xff]  ;;  %v10367_v23 = vld [vmem:[#allocation148_spill] sm:$0xff]  ;;  %v10368_v25 = vld [vmem:[#allocation149_spill] sm:$0xff] }
 0x401   :  { %1895 = vmatprep.subr.mxu1 %v10361_v34  ;;  %6076 = vmatprep.subr.mxu0 %v10185_v49  ;;  %v10369_v34 = vld [vmem:[#allocation150_spill] sm:$0xff]  ;;  %v10386_v13 = vld [vmem:[#allocation167_spill] sm:$0xff] }
 0x402   :  { %v1880_v22 = vadd.f32 %v1879_v29, %v10362_v30  ;;  %1896 = vmatpush1.msra.mxu1 %v10363_v9  ;;  %6077 = vmatpush3.msra.mxu0 %v10364_v0  ;;  %v10370_v29 = vld [vmem:[#allocation151_spill] sm:$0xff]  ;;  %v10371_v30 = vld [vmem:[#allocation152_spill] sm:$0xff]  ;;  %v10373_v0 = vld [vmem:[#allocation154_spill] sm:$0xff] }
 0x403   :  { %1897 = vmatprep.subr.mxu1 %v10365_v27  ;;  %6078 = vmatprep.subr.mxu0 %v10185_v49  ;;  %v10372_v27 = vld [vmem:[#allocation153_spill] sm:$0xff]  ;;  %v10382_v9 = vld [vmem:[#allocation163_spill] sm:$0xff] }
 0x404   :  { %6870 = vtanh.f32 %v1880_v22  ;;  %1898 = vmatpush1.msra.mxu1 %v10366_v17  ;;  %6079 = vmatpush3.msra.mxu0 %v10367_v23  ;;  %v10374_v22 = vld [vmem:[#allocation155_spill] sm:$0xff]  ;;  %v10375_v23 = vld [vmem:[#allocation156_spill] sm:$0xff]  ;;  %v6869_v17 = vpop.eup %6868 }
 0x405   :  { %1899 = vmatprep.subr.mxu1 %v10368_v25  ;;  %6080 = vmatprep.subr.mxu0 %v10185_v49  ;;  %v10376_v25 = vld [vmem:[#allocation157_spill] sm:$0xff] }
 0x406   :  { %1900 = vmatpush1.msra.mxu1 %v10369_v34  ;;  %6081 = vmatpush3.msra.mxu0 %v10370_v29  ;;  %v10377_v34 = vld [vmem:[#allocation158_spill] sm:$0xff]  ;;  %v10379_v29 = vld [vmem:[#allocation160_spill] sm:$0xff] }
 0x407   :  { %1901 = vmatprep.subr.mxu1 %v10371_v30  ;;  %6082 = vmatprep.subr.mxu0 %v10185_v49  ;;  %v10378_v30 = vld [vmem:[#allocation159_spill] sm:$0xff] }
 0x408   :  { %1902 = vmatpush1.msra.mxu1 %v10372_v27  ;;  %6083 = vmatpush3.msra.mxu0 %v10373_v0  ;;  %v10380_v27 = vld [vmem:[#allocation161_spill] sm:$0xff]  ;;  %v10381_v0 = vld [vmem:[#allocation162_spill] sm:$0xff] }
 0x409   :  { %1903 = vmatprep.subr.mxu1 %v10374_v22  ;;  %6084 = vmatprep.subr.mxu0 %v10185_v49  ;;  %v1876_v22 = vmul.f32 0.5, %v6869_v17 }
 0x40a   :  { %1904 = vmatpush1.msra.mxu1 %v10375_v23  ;;  %6085 = vmatpush3.msra.mxu0 %v10376_v25  ;;  %v10383_v23 = vld [vmem:[#allocation164_spill] sm:$0xff]  ;;  %v10385_v25 = vld [vmem:[#allocation166_spill] sm:$0xff] }
 0x40b   :  { %1905 = vmatprep.subr.mxu1 %v10377_v34  ;;  %6086 = vmatprep.subr.mxu0 %v10185_v49  ;;  %v10384_v34 = vld [vmem:[#allocation165_spill] sm:$0xff] }
 0x40c   :  { %1906 = vmatpush1.msra.mxu1 %v10378_v30  ;;  %6087 = vmatpush3.msra.mxu0 %v10379_v29  ;;  %v10387_v29 = vld [vmem:[#allocation168_spill] sm:$0xff] }
 0x40d   :  { %1907 = vmatprep.subr.mxu1 %v10380_v27  ;;  %6088 = vmatprep.subr.mxu0 %v10185_v49  ;;  %v1878_v27 = vadd.f32 0.5, %v1876_v22 }
 0x40e   :  { %1908 = vmatpush1.msra.mxu1 %v10381_v0  ;;  %6089 = vmatpush3.msra.mxu0 %v10382_v9  ;;  %v10388_v0 = vld [vmem:[#allocation169_spill] sm:$0xff]  ;;  %v10389_v9 = vld [vmem:[#allocation170_spill] sm:$0xff] }
 0x40f   :  { %1909 = vmatprep.subr.mxu1 %v10383_v23  ;;  %6090 = vmatprep.subr.mxu0 %v10185_v49 }
 0x410   :  { %1910 = vmatpush1.msra.mxu1 %v10384_v34  ;;  %6091 = vmatpush3.msra.mxu0 %v10385_v25  ;;  %v10390_v34 = vld [vmem:[#allocation171_spill] sm:$0xff]  ;;  %v10391_v25 = vld [vmem:[#allocation172_spill] sm:$0xff] }
 0x411   :  { %v6871_v30 = vpop.eup %6870  ;;  %1911 = vmatprep.subr.mxu1 %v10386_v13  ;;  %6092 = vmatprep.subr.mxu0 %v10185_v49 }
 0x412   :  { %v1882_v17 = vsub.f32 %v8063_v33, %v6871_v30  ;;  %1912 = vmatpush1.msra.mxu1 %v10387_v29  ;;  %6093 = vmatpush3.msra.mxu0 %v10388_v0  ;;  %v10393_v33 = vld [vmem:[#allocation174_spill] sm:$0xff]  ;;  %v10394_v0 = vld [vmem:[#allocation175_spill] sm:$0xff] }
 0x413   :  { %1913 = vmatprep.subr.mxu1 %v10389_v9  ;;  %6094 = vmatprep.subr.mxu0 %v10185_v49 }
 0x414   :  { %v1883_v23 = vmul.f32 %v1882_v17, %v1878_v27  ;;  %1914 = vmatpush1.msra.mxu1 %v10390_v34  ;;  %6095 = vmatpush3.msra.mxu0 %v10391_v25  ;;  %v10395_v27 = vld [vmem:[#allocation17_spill] sm:$0xff]  ;;  %v10398_v17 = vld [vmem:[#allocation44_spill] sm:$0xff] }
 0x415   :  { %1915 = vmatprep.subr.mxu1 %v10392_v4  ;;  %6096 = vmatprep.subr.mxu0 %v10185_v49 }
 0x416   :  { %v8307_v22 = vadd.f32 %v6871_v30, %v1883_v23  ;;  %1916 = vmatpush1.msra.mxu1 %v10393_v33  ;;  %1949 = vmatprep.mubr.f32.mxu1 %v10185_v49  ;;  %v10396_v23 = vld [vmem:[#allocation72_spill] sm:$0xff]  ;;  %v10397_v30 = vld [vmem:[#allocation43_spill] sm:$0xff] }
 0x417   :  { %6097 = vmatpush3.msra.mxu0 %v10394_v0  ;;  %6098 = vmatprep.mubr.msk.f32.mxu0 %vm7089_vm0, %v10185_v49 }
 0x418   :  { %1950 = vmatmul.mubr.f32.vlgmr.msra.gmra.mxu1 %v8307_v22  ;;  %6099 = vmatmul.mubr.f32.vlgmr.msra.gmra.mxu0 %v8307_v22 }
 0x419   :  { %2052 = vmatprep.subr.mxu1 %v10395_v27  ;;  %6101 = vmatprep.subr.mxu0 %v10185_v49 }
 0x41a   :  { %2053 = vmatpush1.msra.mxu1 %v7389_v40  ;;  %6102 = vmatpush3.msra.mxu0 %v7564_v28 }
 0x41b   :  { %2054 = vmatprep.subr.mxu1 %v7392_v42  ;;  %6103 = vmatprep.subr.mxu0 %v10185_v49 }
 0x41c   :  { %2055 = vmatpush1.msra.mxu1 %v7394_v43  ;;  %6104 = vmatpush3.msra.mxu0 %v7573_v15 }
 0x41d   :  { %2056 = vmatprep.subr.mxu1 %v7399_v47  ;;  %6105 = vmatprep.subr.mxu0 %v10185_v49 }
 0x41e   :  { %2057 = vmatpush1.msra.mxu1 %v7402_v48  ;;  %6106 = vmatpush3.msra.mxu0 %v7588_v24 }
 0x41f   :  { %2058 = vmatprep.subr.mxu1 %v7408_v50  ;;  %6107 = vmatprep.subr.mxu0 %v10185_v49 }
 0x420   :  { %2059 = vmatpush1.msra.mxu1 %v7411_v51  ;;  %6108 = vmatpush3.msra.mxu0 %v7595_v54 }
 0x421   :  { %2060 = vmatprep.subr.mxu1 %v7414_v53  ;;  %6109 = vmatprep.subr.mxu0 %v10185_v49 }
 0x422   :  { %2061 = vmatpush1.msra.mxu1 %v7421_v55  ;;  %6110 = vmatpush3.msra.mxu0 %v7602_v35 }
 0x423   :  { %2062 = vmatprep.subr.mxu1 %v7424_v57  ;;  %6111 = vmatprep.subr.mxu0 %v10185_v49 }
 0x424   :  { %2063 = vmatpush1.msra.mxu1 %v7427_v58  ;;  %6112 = vmatpush3.msra.mxu0 %v7609_v44 }
 0x425   :  { %2064 = vmatprep.subr.mxu1 %v7433_v61  ;;  %6113 = vmatprep.subr.mxu0 %v10185_v49 }
 0x426   :  { %2065 = vmatpush1.msra.mxu1 %v7436_v63  ;;  %6114 = vmatpush3.msra.mxu0 %v7619_v39 }
 0x427   :  { %2066 = vmatprep.subr.mxu1 %v7442_v2  ;;  %6115 = vmatprep.subr.mxu0 %v10185_v49 }
 0x428   :  { %2067 = vmatpush1.msra.mxu1 %v7445_v3  ;;  %6116 = vmatpush3.msra.mxu0 %v7628_v46 }
 0x429   :  { %2068 = vmatprep.subr.mxu1 %v7448_v5  ;;  %6117 = vmatprep.subr.mxu0 %v10185_v49 }
 0x42a   :  { %2069 = vmatpush1.msra.mxu1 %v7455_v7  ;;  %6118 = vmatpush3.msra.mxu0 %v7635_v26  ;;  %v10456_v26 = vld [vmem:[#allocation185_spill] sm:$0xff] }
 0x42b   :  { %2070 = vmatprep.subr.mxu1 %v7458_v10  ;;  %6119 = vmatprep.subr.mxu0 %v10185_v49 }
 0x42c   :  { %2071 = vmatpush1.msra.mxu1 %v7461_v11  ;;  %6120 = vmatpush3.msra.mxu0 %v7642_v38 }
 0x42d   :  { %2072 = vmatprep.subr.mxu1 %v7467_v14  ;;  %6121 = vmatprep.subr.mxu0 %v10185_v49 }
 0x42e   :  { %2073 = vmatpush1.msra.mxu1 %v7470_v16  ;;  %6122 = vmatpush3.msra.mxu0 %v7649_v21  ;;  %v10400_v21 = vld [vmem:[#allocation45_spill] sm:$0xff] }
 0x42f   :  { %2074 = vmatprep.subr.mxu1 %v7476_v18  ;;  %6123 = vmatprep.subr.mxu0 %v10185_v49  ;;  %v10399_v18 = vld [vmem:[#allocation74_spill] sm:$0xff] }
 0x430   :  { %2075 = vmatpush1.msra.mxu1 %v7479_v19  ;;  %6124 = vmatpush3.msra.mxu0 %v7656_v59  ;;  %v10401_v59 = vld [vmem:[#allocation46_spill] sm:$0xff]  ;;  %v10403_v19 = vld [vmem:[#allocation47_spill] sm:$0xff] }
 0x431   :  { %2076 = vmatprep.subr.mxu1 %v7482_v20  ;;  %6125 = vmatprep.subr.mxu0 %v10185_v49  ;;  %v10402_v20 = vld [vmem:[#allocation76_spill] sm:$0xff] }
 0x432   :  { %2077 = vmatpush1.msra.mxu1 %v7489_v31  ;;  %6126 = vmatpush3.msra.mxu0 %v10396_v23  ;;  %v10404_v23 = vld [vmem:[#allocation48_spill] sm:$0xff]  ;;  %v10415_v31 = vld [vmem:[#allocation89_spill] sm:$0xff] }
 0x433   :  { %2078 = vmatprep.subr.mxu1 %v10397_v30  ;;  %6127 = vmatprep.subr.mxu0 %v10185_v49  ;;  %v10405_v30 = vld [vmem:[#allocation78_spill] sm:$0xff] }
 0x434   :  { %2079 = vmatpush1.msra.mxu1 %v10398_v17  ;;  %6128 = vmatpush3.msra.mxu0 %v10399_v18  ;;  %v10412_v18 = vld [vmem:[#allocation85_spill] sm:$0xff]  ;;  %v10413_v17 = vld [vmem:[#allocation87_spill] sm:$0xff] }
 0x435   :  { %2080 = vmatprep.subr.mxu1 %v10400_v21  ;;  %6129 = vmatprep.subr.mxu0 %v10185_v49  ;;  %v10411_v21 = vld [vmem:[#allocation86_spill] sm:$0xff] }
 0x436   :  { %2081 = vmatpush1.msra.mxu1 %v10401_v59  ;;  %6130 = vmatpush3.msra.mxu0 %v10402_v20  ;;  %v10406_v59 = vld [vmem:[#allocation80_spill] sm:$0xff]  ;;  %v10408_v20 = vld [vmem:[#allocation83_spill] sm:$0xff] }
 0x437   :  { %2082 = vmatprep.subr.mxu1 %v10403_v19  ;;  %6131 = vmatprep.subr.mxu0 %v10185_v49  ;;  %v10407_v19 = vld [vmem:[#allocation81_spill] sm:$0xff] }
 0x438   :  { %2083 = vmatpush1.msra.mxu1 %v10404_v23  ;;  %2116 = vmatprep.mubr.f32.mxu1 %v10185_v49  ;;  %v10409_v23 = vld [vmem:[#allocation82_spill] sm:$0xff] }
 0x439   :  { %6132 = vmatpush3.msra.mxu0 %v10405_v30  ;;  %6133 = vmatprep.mubr.msk.f32.mxu0 %vm7089_vm0, %v10185_v49  ;;  %v10410_v30 = vld [vmem:[#allocation84_spill] sm:$0xff] }
 0x43a   :  { %2117 = vmatmul.mubr.f32.vlgmr.msra.gmra.mxu1 %v8307_v22  ;;  %6134 = vmatmul.mubr.f32.vlgmr.msra.gmra.mxu0 %v8307_v22 }
 0x43b   :  { %2193 = vmatprep.subr.mxu1 %v10406_v59  ;;  %6136 = vmatprep.subr.mxu0 %v10185_v49  ;;  %v10414_v59 = vld [vmem:[#allocation88_spill] sm:$0xff] }
 0x43c   :  { %2194 = vmatpush1.msra.mxu1 %v10407_v19  ;;  %6137 = vmatpush3.msra.mxu0 %v10408_v20  ;;  %v10416_v20 = vld [vmem:[#allocation90_spill] sm:$0xff]  ;;  %v10418_v19 = vld [vmem:[#allocation91_spill] sm:$0xff] }
 0x43d   :  { %2195 = vmatprep.subr.mxu1 %v10409_v23  ;;  %6138 = vmatprep.subr.mxu0 %v10185_v49  ;;  %v10417_v23 = vld [vmem:[#allocation92_spill] sm:$0xff] }
 0x43e   :  { %2196 = vmatpush1.msra.mxu1 %v10410_v30  ;;  %6139 = vmatpush3.msra.mxu0 %v10411_v21  ;;  %v10419_v21 = vld [vmem:[#allocation93_spill] sm:$0xff]  ;;  %v10421_v30 = vld [vmem:[#allocation94_spill] sm:$0xff] }
 0x43f   :  { %2197 = vmatprep.subr.mxu1 %v10412_v18  ;;  %6140 = vmatprep.subr.mxu0 %v10185_v49  ;;  %v10420_v18 = vld [vmem:[#allocation95_spill] sm:$0xff] }
 0x440   :  { %2198 = vmatpush1.msra.mxu1 %v10413_v17  ;;  %6141 = vmatpush3.msra.mxu0 %v10414_v59  ;;  %v10422_v59 = vld [vmem:[#allocation96_spill] sm:$0xff]  ;;  %v10424_v17 = vld [vmem:[#allocation97_spill] sm:$0xff] }
 0x441   :  { %2199 = vmatprep.subr.mxu1 %v10415_v31  ;;  %6142 = vmatprep.subr.mxu0 %v10185_v49  ;;  %v10423_v31 = vld [vmem:[#allocation98_spill] sm:$0xff] }
 0x442   :  { %2200 = vmatpush1.msra.mxu1 %v10416_v20  ;;  %6143 = vmatpush3.msra.mxu0 %v10417_v23  ;;  %v10425_v23 = vld [vmem:[#allocation99_spill] sm:$0xff]  ;;  %v10427_v20 = vld [vmem:[#allocation100_spill] sm:$0xff] }
 0x443   :  { %2201 = vmatprep.subr.mxu1 %v10418_v19  ;;  %6144 = vmatprep.subr.mxu0 %v10185_v49  ;;  %v10426_v19 = vld [vmem:[#allocation101_spill] sm:$0xff] }
 0x444   :  { %2202 = vmatpush1.msra.mxu1 %v10419_v21  ;;  %6145 = vmatpush3.msra.mxu0 %v10420_v18  ;;  %v10428_v18 = vld [vmem:[#allocation102_spill] sm:$0xff]  ;;  %v10430_v21 = vld [vmem:[#allocation103_spill] sm:$0xff] }
 0x445   :  { %2203 = vmatprep.subr.mxu1 %v10421_v30  ;;  %6146 = vmatprep.subr.mxu0 %v10185_v49  ;;  %v10429_v30 = vld [vmem:[#allocation104_spill] sm:$0xff] }
 0x446   :  { %2204 = vmatpush1.msra.mxu1 %v10422_v59  ;;  %6147 = vmatpush3.msra.mxu0 %v10423_v31  ;;  %v10431_v31 = vld [vmem:[#allocation105_spill] sm:$0xff]  ;;  %v10433_v59 = vld [vmem:[#allocation106_spill] sm:$0xff] }
 0x447   :  { %2205 = vmatprep.subr.mxu1 %v10424_v17  ;;  %6148 = vmatprep.subr.mxu0 %v10185_v49  ;;  %v10432_v17 = vld [vmem:[#allocation107_spill] sm:$0xff] }
 0x448   :  { %2206 = vmatpush1.msra.mxu1 %v10425_v23  ;;  %6149 = vmatpush3.msra.mxu0 %v10426_v19  ;;  %v10434_v19 = vld [vmem:[#allocation108_spill] sm:$0xff]  ;;  %v10436_v23 = vld [vmem:[#allocation109_spill] sm:$0xff] }
 0x449   :  { %2207 = vmatprep.subr.mxu1 %v10427_v20  ;;  %6150 = vmatprep.subr.mxu0 %v10185_v49  ;;  %v10435_v20 = vld [vmem:[#allocation110_spill] sm:$0xff] }
 0x44a   :  { %2208 = vmatpush1.msra.mxu1 %v10428_v18  ;;  %6151 = vmatpush3.msra.mxu0 %v10429_v30  ;;  %v10437_v30 = vld [vmem:[#allocation111_spill] sm:$0xff]  ;;  %v10439_v18 = vld [vmem:[#allocation112_spill] sm:$0xff] }
 0x44b   :  { %2209 = vmatprep.subr.mxu1 %v10430_v21  ;;  %6152 = vmatprep.subr.mxu0 %v10185_v49  ;;  %v10438_v21 = vld [vmem:[#allocation113_spill] sm:$0xff] }
 0x44c   :  { %2210 = vmatpush1.msra.mxu1 %v10431_v31  ;;  %6153 = vmatpush3.msra.mxu0 %v10432_v17  ;;  %v10440_v17 = vld [vmem:[#allocation114_spill] sm:$0xff]  ;;  %v10442_v31 = vld [vmem:[#allocation115_spill] sm:$0xff] }
 0x44d   :  { %2211 = vmatprep.subr.mxu1 %v10433_v59  ;;  %6154 = vmatprep.subr.mxu0 %v10185_v49  ;;  %v10441_v59 = vld [vmem:[#allocation116_spill] sm:$0xff] }
 0x44e   :  { %2212 = vmatpush1.msra.mxu1 %v10434_v19  ;;  %6155 = vmatpush3.msra.mxu0 %v10435_v20  ;;  %v10443_v20 = vld [vmem:[#allocation117_spill] sm:$0xff]  ;;  %v10445_v19 = vld [vmem:[#allocation118_spill] sm:$0xff] }
 0x44f   :  { %2213 = vmatprep.subr.mxu1 %v10436_v23  ;;  %6156 = vmatprep.subr.mxu0 %v10185_v49  ;;  %v10444_v23 = vld [vmem:[#allocation119_spill] sm:$0xff] }
 0x450   :  { %2214 = vmatpush1.msra.mxu1 %v10437_v30  ;;  %6157 = vmatpush3.msra.mxu0 %v10438_v21  ;;  %v10446_v21 = vld [vmem:[#allocation120_spill] sm:$0xff]  ;;  %v10448_v30 = vld [vmem:[#allocation121_spill] sm:$0xff] }
 0x451   :  { %2215 = vmatprep.subr.mxu1 %v10439_v18  ;;  %6158 = vmatprep.subr.mxu0 %v10185_v49  ;;  %v10447_v18 = vld [vmem:[#allocation122_spill] sm:$0xff] }
 0x452   :  { %2216 = vmatpush1.msra.mxu1 %v10440_v17  ;;  %6159 = vmatpush3.msra.mxu0 %v10441_v59  ;;  %v10449_v59 = vld [vmem:[#allocation123_spill] sm:$0xff]  ;;  %v10451_v17 = vld [vmem:[#allocation124_spill] sm:$0xff] }
 0x453   :  { %2217 = vmatprep.subr.mxu1 %v10442_v31  ;;  %6160 = vmatprep.subr.mxu0 %v10185_v49  ;;  %v10450_v31 = vld [vmem:[#allocation125_spill] sm:$0xff] }
 0x454   :  { %2218 = vmatpush1.msra.mxu1 %v10443_v20  ;;  %6161 = vmatpush3.msra.mxu0 %v10444_v23  ;;  %v10452_v23 = vld [vmem:[#allocation126_spill] sm:$0xff] }
 0x455   :  { %2219 = vmatprep.subr.mxu1 %v10445_v19  ;;  %6162 = vmatprep.subr.mxu0 %v10185_v49  ;;  %v10453_v19 = vld [vmem:[#allocation127_spill] sm:$0xff] }
 0x456   :  { %2220 = vmatpush1.msra.mxu1 %v10446_v21  ;;  %6163 = vmatpush3.msra.mxu0 %v10447_v18 }
 0x457   :  { %2221 = vmatprep.subr.mxu1 %v10448_v30  ;;  %6164 = vmatprep.subr.mxu0 %v10185_v49  ;;  %v10454_v30 = vld [vmem:[#allocation128_spill] sm:$0xff] }
 0x458   :  { %2222 = vmatpush1.msra.mxu1 %v10449_v59  ;;  %6165 = vmatpush3.msra.mxu0 %v10450_v31 }
 0x459   :  { %2223 = vmatprep.subr.mxu1 %v10451_v17  ;;  %6166 = vmatprep.subr.mxu0 %v10185_v49 }
 0x45a   :  { %2224 = vmatpush1.msra.mxu1 %v10452_v23  ;;  %6167 = vmatpush3.msra.mxu0 %v10453_v19  ;;  %v10455_v23 = vld [vmem:[#allocation49_spill] sm:$0xff] }
 0x45b   :  { %2257 = vmatprep.mubr.f32.mxu1 %v10185_v49  ;;  %6168 = vmatprep.mubr.msk.f32.mxu0 %vm7089_vm0, %v10185_v49 }
 0x45c   :  { %2350 = vmatprep.subr.mxu1 %v10454_v30  ;;  %6171 = vmatprep.subr.mxu0 %v10185_v49  ;;  %v10457_v30 = vld [vmem:[#allocation186_spill] sm:$0xff] }
 0x4b7   :  { %v1865_v59 = vpop.f32.mrf.mxu0  ;;  %v1794_v31 = vpop.f32.mrf.mxu1 }
 0x4b8   :  { %v1795_v16 = vadd.f32 %v1794_v31, %v8212_v37  ;;  %v1866_v39 = vadd.f32 %v1865_v59, %v8228_v60 }
 0x4b9   :  { %v6065_v18 = vpop.f32.mrf.mxu0  ;;  %v1796_v21 = vpop.f32.mrf.mxu1 }
 0x4ba   :  { %v1797_v5 = vadd.f32 %v1796_v21, %v10457_v30  ;;  %v10458_v21 = vld [vmem:[#allocation57_spill] sm:$0xff] }
 0x4d8   :  { %v1951_v17 = vpop.f32.mrf.mxu1  ;;  %v2022_v20 = vpop.f32.mrf.mxu0 }
 0x4d9   :  { %v1952_v14 = vadd.f32 %v1951_v17, %v10455_v23  ;;  %v2023_v31 = vadd.f32 %v2022_v20, %v8231_v56 }
 0x4da   :  { %v6100_v19 = vpop.f32.mrf.mxu0  ;;  %v1953_v10 = vpop.f32.mrf.mxu1 }
 0x4db   :  { %v2026_v38 = vadd.f32 %v1952_v14, %v1795_v16  ;;  %v1954_v7 = vadd.f32 %v1953_v10, %v10456_v26 }
 0x4dd   :  { %v2028_v11 = vmul.f32 0.5, %v2026_v38  ;;  %v2027_v46 = vadd.f32 %v1954_v7, %v1797_v5 }
 0x4df   :  { %6872 = vtanh.f32 %v2028_v11  ;;  %v2029_v3 = vmul.f32 0.5, %v2027_v46 }
 0x4e1   :  { %6874 = vtanh.f32 %v2029_v3 }
 0x4ec   :  { %v6873_v18 = vpop.eup %6872 }
 0x4ed   :  { %v2032_v2 = vmul.f32 0.5, %v6873_v18 }
 0x4ee   :  { %v6875_v10 = vpop.eup %6874 }
 0x4ef   :  { %v2034_v63 = vadd.f32 0.5, %v2032_v2  ;;  %v2033_v7 = vmul.f32 0.5, %v6875_v10  ;;  %v10462_v10 = vld [vmem:[#allocation136_spill] sm:$0xff] }
 0x4f1   :  { %v2036_v17 = vmul.f32 %v2034_v63, %v1866_v39  ;;  %v2035_v2 = vadd.f32 0.5, %v2033_v7  ;;  %v10465_v7 = vld [vmem:[#allocation184_spill] sm:$0xff] }
 0x4f3   :  { %v2037_v19 = vadd.f32 %v2036_v17, %v2023_v31  ;;  %v10460_v31 = vld [vmem:[#allocation59_spill] sm:$0xff] }
 0x4f5   :  { %6876 = vtanh.f32 %v2037_v19 }
 0x4fa   :  { %v2118_v14 = vpop.f32.mrf.mxu1  ;;  %v2189_v11 = vpop.f32.mrf.mxu0 }
 0x4fb   :  { %v2119_v16 = vadd.f32 %v2118_v14, %v8032_v36 }
 0x4fc   :  { %v6135_v38 = vpop.f32.mrf.mxu0  ;;  %v2120_v59 = vpop.f32.mrf.mxu1 }
 0x4fd   :  { %v2334_v5 = vadd.f32 %v2119_v16, %v10458_v21  ;;  %v2121_v63 = vadd.f32 %v2120_v59, %v8054_v41  ;;  %v10461_v16 = vld [vmem:[#allocation135_spill] sm:$0xff]  ;;  %v10463_v21 = vld [vmem:[#allocation137_spill] sm:$0xff]  ;;  %v10466_v59 = vld [vmem:[#allocation140_spill] sm:$0xff] }
 0x4ff   :  { %v2336_v46 = vmul.f32 0.5, %v2334_v5  ;;  %v2335_v17 = vadd.f32 %v2121_v63, %v10460_v31  ;;  %v10464_v5 = vld [vmem:[#allocation139_spill] sm:$0xff]  ;;  %v10470_v31 = vld [vmem:[#allocation144_spill] sm:$0xff] }
 0x501   :  { %6878 = vtanh.f32 %v2336_v46  ;;  %v2337_v19 = vmul.f32 0.5, %v2335_v17  ;;  %v2190_v46 = vadd.f32 %v2189_v11, %v10465_v7  ;;  %v10471_v17 = vld [vmem:[#allocation145_spill] sm:$0xff] }
 0x502   :  { %v6877_v18 = vpop.eup %6876  ;;  %v10472_v11 = vld [vmem:[#allocation177_spill] sm:$0xff] }
 0x503   :  { %v2039_v3 = vsub.f32 %v8239_v8, %v6877_v18  ;;  %6880 = vtanh.f32 %v2337_v19  ;;  %v10473_v19 = vld [vmem:[#allocation146_spill] sm:$0xff]  ;;  %v10475_v8 = vld [vmem:[#allocation148_spill] sm:$0xff] }
 0x505   :  { %v2040_v20 = vmul.f32 %v2039_v3, %v2035_v2  ;;  %v10467_v2 = vld [vmem:[#allocation141_spill] sm:$0xff]  ;;  %v10468_v3 = vld [vmem:[#allocation142_spill] sm:$0xff] }
 0x507   :  { %v8464_v39 = vadd.f32 %v6877_v18, %v2040_v20  ;;  %v10469_v20 = vld [vmem:[#allocation143_spill] sm:$0xff] }
 0x509   :  { %10459 = vst [vmem:[#allocation55_spill] sm:$0xff] %v8464_v39  ;;  %2258 = vmatmul.mubr.f32.vlgmr.msra.gmra.mxu1 %v8464_v39  ;;  %6169 = vmatmul.mubr.f32.vlgmr.msra.gmra.mxu0 %v8464_v39 }
 0x50a   :  { %2351 = vmatpush1.msra.mxu1 %v10347_v1  ;;  %6172 = vmatpush3.msra.mxu0 %v10348_v32 }
 0x50b   :  { %2352 = vmatprep.subr.mxu1 %v10349_v62  ;;  %6173 = vmatprep.subr.mxu0 %v10185_v49 }
 0x50c   :  { %2353 = vmatpush1.msra.mxu1 %v10350_v52  ;;  %6174 = vmatpush3.msra.mxu0 %v10351_v12 }
 0x50d   :  { %2354 = vmatprep.subr.mxu1 %v10352_v45  ;;  %6175 = vmatprep.subr.mxu0 %v10185_v49 }
 0x50e   :  { %v6879_v14 = vpop.eup %6878  ;;  %2355 = vmatpush1.msra.mxu1 %v10461_v16  ;;  %6176 = vmatpush3.msra.mxu0 %v10462_v10 }
 0x50f   :  { %v2340_v38 = vmul.f32 0.5, %v6879_v14  ;;  %2356 = vmatprep.subr.mxu1 %v10463_v21  ;;  %6177 = vmatprep.subr.mxu0 %v10185_v49 }
 0x510   :  { %2357 = vmatpush1.msra.mxu1 %v10356_v6  ;;  %6178 = vmatpush3.msra.mxu0 %v10464_v5 }
 0x511   :  { %v2342_v18 = vadd.f32 0.5, %v2340_v38  ;;  %2358 = vmatprep.subr.mxu1 %v10466_v59  ;;  %6179 = vmatprep.subr.mxu0 %v10185_v49  ;;  %v10474_v38 = vld [vmem:[#allocation147_spill] sm:$0xff] }
 0x512   :  { %2359 = vmatpush1.msra.mxu1 %v10467_v2  ;;  %6180 = vmatpush3.msra.mxu0 %v10468_v3 }
 0x513   :  { %v2344_v63 = vmul.f32 %v2342_v18, %v2190_v46  ;;  %2360 = vmatprep.subr.mxu1 %v10469_v20  ;;  %6181 = vmatprep.subr.mxu0 %v10185_v49  ;;  %v10476_v46 = vld [vmem:[#allocation149_spill] sm:$0xff]  ;;  %v10477_v18 = vld [vmem:[#allocation150_spill] sm:$0xff] }
 0x514   :  { %2361 = vmatpush1.msra.mxu1 %v10470_v31  ;;  %6182 = vmatpush3.msra.mxu0 %v10471_v17  ;;  %v10478_v31 = vld [vmem:[#allocation151_spill] sm:$0xff]  ;;  %v10479_v17 = vld [vmem:[#allocation152_spill] sm:$0xff] }
 0x515   :  { %v2345_v14 = vadd.f32 %v2344_v63, %v10472_v11  ;;  %2362 = vmatprep.subr.mxu1 %v10473_v19  ;;  %6183 = vmatprep.subr.mxu0 %v10185_v49  ;;  %v10480_v63 = vld [vmem:[#allocation153_spill] sm:$0xff]  ;;  %v10481_v11 = vld [vmem:[#allocation154_spill] sm:$0xff]  ;;  %v10491_v19 = vld [vmem:[#allocation164_spill] sm:$0xff] }
 0x516   :  { %2363 = vmatpush1.msra.mxu1 %v10474_v38  ;;  %6184 = vmatpush3.msra.mxu0 %v10475_v8  ;;  %v10482_v38 = vld [vmem:[#allocation155_spill] sm:$0xff]  ;;  %v10485_v8 = vld [vmem:[#allocation158_spill] sm:$0xff] }
 0x517   :  { %6882 = vtanh.f32 %v2345_v14  ;;  %2364 = vmatprep.subr.mxu1 %v10476_v46  ;;  %6185 = vmatprep.subr.mxu0 %v10185_v49  ;;  %v10483_v14 = vld [vmem:[#allocation156_spill] sm:$0xff]  ;;  %v10484_v46 = vld [vmem:[#allocation157_spill] sm:$0xff] }
 0x518   :  { %2365 = vmatpush1.msra.mxu1 %v10477_v18  ;;  %6186 = vmatpush3.msra.mxu0 %v10478_v31  ;;  %v6881_v31 = vpop.eup %6880  ;;  %v10487_v18 = vld [vmem:[#allocation160_spill] sm:$0xff] }
 0x519   :  { %2366 = vmatprep.subr.mxu1 %v10479_v17  ;;  %6187 = vmatprep.subr.mxu0 %v10185_v49  ;;  %v10486_v17 = vld [vmem:[#allocation159_spill] sm:$0xff] }
 0x51a   :  { %2367 = vmatpush1.msra.mxu1 %v10480_v63  ;;  %6188 = vmatpush3.msra.mxu0 %v10481_v11  ;;  %v10488_v63 = vld [vmem:[#allocation161_spill] sm:$0xff]  ;;  %v10490_v11 = vld [vmem:[#allocation163_spill] sm:$0xff] }
 0x51b   :  { %2368 = vmatprep.subr.mxu1 %v10482_v38  ;;  %6189 = vmatprep.subr.mxu0 %v10185_v49  ;;  %v10489_v38 = vld [vmem:[#allocation162_spill] sm:$0xff] }
 0x51c   :  { %2369 = vmatpush1.msra.mxu1 %v10483_v14  ;;  %6190 = vmatpush3.msra.mxu0 %v10484_v46  ;;  %v2341_v14 = vmul.f32 0.5, %v6881_v31  ;;  %v10493_v46 = vld [vmem:[#allocation166_spill] sm:$0xff] }
 0x51d   :  { %2370 = vmatprep.subr.mxu1 %v10485_v8  ;;  %6191 = vmatprep.subr.mxu0 %v10185_v49  ;;  %v10492_v8 = vld [vmem:[#allocation165_spill] sm:$0xff] }
 0x51e   :  { %2371 = vmatpush1.msra.mxu1 %v10486_v17  ;;  %6192 = vmatpush3.msra.mxu0 %v10487_v18  ;;  %v10494_v18 = vld [vmem:[#allocation169_spill] sm:$0xff] }
 0x51f   :  { %2372 = vmatprep.subr.mxu1 %v10488_v63  ;;  %6193 = vmatprep.subr.mxu0 %v10185_v49 }
 0x520   :  { %2373 = vmatpush1.msra.mxu1 %v10489_v38  ;;  %6194 = vmatpush3.msra.mxu0 %v10490_v11  ;;  %v2343_v38 = vadd.f32 0.5, %v2341_v14 }
 0x521   :  { %2374 = vmatprep.subr.mxu1 %v10491_v19  ;;  %6195 = vmatprep.subr.mxu0 %v10185_v49 }
 0x522   :  { %2375 = vmatpush1.msra.mxu1 %v10492_v8  ;;  %6196 = vmatpush3.msra.mxu0 %v10493_v46 }
 0x523   :  { %2376 = vmatprep.subr.mxu1 %v10386_v13  ;;  %6197 = vmatprep.subr.mxu0 %v10185_v49 }
 0x524   :  { %v6883_v63 = vpop.eup %6882  ;;  %2377 = vmatpush1.msra.mxu1 %v10387_v29  ;;  %6198 = vmatpush3.msra.mxu0 %v10494_v18 }
 0x525   :  { %v2347_v31 = vsub.f32 %v8307_v22, %v6883_v63  ;;  %2378 = vmatprep.subr.mxu1 %v10389_v9  ;;  %6199 = vmatprep.subr.mxu0 %v10185_v49  ;;  %v10495_v22 = vld [vmem:[#allocation30_spill] sm:$0xff] }
 0x526   :  { %2379 = vmatpush1.msra.mxu1 %v10390_v34  ;;  %6200 = vmatpush3.msra.mxu0 %v10391_v25 }
 0x527   :  { %v2348_v46 = vmul.f32 %v2347_v31, %v2343_v38  ;;  %2380 = vmatprep.subr.mxu1 %v10392_v4  ;;  %6201 = vmatprep.subr.mxu0 %v10185_v49  ;;  %v10496_v38 = vld [vmem:[#allocation60_spill] sm:$0xff]  ;;  %v10499_v31 = vld [vmem:[#allocation62_spill] sm:$0xff] }
 0x528   :  { %2381 = vmatpush1.msra.mxu1 %v10393_v33  ;;  %6202 = vmatpush3.msra.mxu0 %v10394_v0 }
 0x529   :  { %v8534_v14 = vadd.f32 %v6883_v63, %v2348_v46  ;;  %2414 = vmatprep.mubr.f32.mxu1 %v10185_v49  ;;  %6203 = vmatprep.mubr.msk.f32.mxu0 %vm7089_vm0, %v10185_v49  ;;  %v10497_v46 = vld [vmem:[#allocation31_spill] sm:$0xff]  ;;  %v10498_v63 = vld [vmem:[#allocation32_spill] sm:$0xff] }
 0x52a   :  { %2517 = vmatprep.subr.mxu1 %v10395_v27  ;;  %6206 = vmatprep.subr.mxu0 %v10185_v49 }
 0x52b   :  { %2415 = vmatmul.mubr.f32.vlgmr.msra.gmra.mxu1 %v8534_v14  ;;  %6204 = vmatmul.mubr.f32.vlgmr.msra.gmra.mxu0 %v8534_v14 }
 0x52c   :  { %2518 = vmatpush1.msra.mxu1 %v7389_v40  ;;  %6207 = vmatpush3.msra.mxu0 %v7564_v28 }
 0x52d   :  { %2519 = vmatprep.subr.mxu1 %v7392_v42  ;;  %6208 = vmatprep.subr.mxu0 %v10185_v49 }
 0x52e   :  { %2520 = vmatpush1.msra.mxu1 %v7394_v43  ;;  %6209 = vmatpush3.msra.mxu0 %v7573_v15 }
 0x52f   :  { %2521 = vmatprep.subr.mxu1 %v7399_v47  ;;  %6210 = vmatprep.subr.mxu0 %v10185_v49 }
 0x530   :  { %2522 = vmatpush1.msra.mxu1 %v7402_v48  ;;  %6211 = vmatpush3.msra.mxu0 %v7588_v24 }
 0x531   :  { %2523 = vmatprep.subr.mxu1 %v7408_v50  ;;  %6212 = vmatprep.subr.mxu0 %v10185_v49 }
 0x532   :  { %2524 = vmatpush1.msra.mxu1 %v7411_v51  ;;  %6213 = vmatpush3.msra.mxu0 %v7595_v54 }
 0x533   :  { %2525 = vmatprep.subr.mxu1 %v7414_v53  ;;  %6214 = vmatprep.subr.mxu0 %v10185_v49 }
 0x534   :  { %2526 = vmatpush1.msra.mxu1 %v7421_v55  ;;  %6215 = vmatpush3.msra.mxu0 %v7602_v35 }
 0x535   :  { %2527 = vmatprep.subr.mxu1 %v7424_v57  ;;  %6216 = vmatprep.subr.mxu0 %v10185_v49  ;;  %v10500_v57 = vld [vmem:[#allocation33_spill] sm:$0xff] }
 0x536   :  { %2528 = vmatpush1.msra.mxu1 %v7427_v58  ;;  %6217 = vmatpush3.msra.mxu0 %v7609_v44  ;;  %v10501_v44 = vld [vmem:[#allocation34_spill] sm:$0xff]  ;;  %v10503_v58 = vld [vmem:[#allocation35_spill] sm:$0xff] }
 0x537   :  { %2529 = vmatprep.subr.mxu1 %v7433_v61  ;;  %6218 = vmatprep.subr.mxu0 %v10185_v49  ;;  %v10502_v61 = vld [vmem:[#allocation64_spill] sm:$0xff] }
 0x538   :  { %2530 = vmatpush1.msra.mxu1 %v10495_v22  ;;  %6219 = vmatpush3.msra.mxu0 %v10496_v38  ;;  %v10504_v38 = vld [vmem:[#allocation36_spill] sm:$0xff]  ;;  %v10506_v22 = vld [vmem:[#allocation37_spill] sm:$0xff] }
 0x539   :  { %2531 = vmatprep.subr.mxu1 %v10497_v46  ;;  %6220 = vmatprep.subr.mxu0 %v10185_v49  ;;  %v10505_v46 = vld [vmem:[#allocation66_spill] sm:$0xff] }
 0x53a   :  { %2532 = vmatpush1.msra.mxu1 %v10498_v63  ;;  %6221 = vmatpush3.msra.mxu0 %v10499_v31  ;;  %v10507_v31 = vld [vmem:[#allocation38_spill] sm:$0xff]  ;;  %v10509_v63 = vld [vmem:[#allocation39_spill] sm:$0xff] }
 0x53b   :  { %2533 = vmatprep.subr.mxu1 %v10500_v57  ;;  %6222 = vmatprep.subr.mxu0 %v10185_v49  ;;  %v10508_v57 = vld [vmem:[#allocation68_spill] sm:$0xff] }
 0x53c   :  { %2534 = vmatpush1.msra.mxu1 %v10501_v44  ;;  %6223 = vmatpush3.msra.mxu0 %v10502_v61  ;;  %v10510_v61 = vld [vmem:[#allocation40_spill] sm:$0xff]  ;;  %v10512_v44 = vld [vmem:[#allocation41_spill] sm:$0xff] }
 0x53d   :  { %2535 = vmatprep.subr.mxu1 %v10503_v58  ;;  %6224 = vmatprep.subr.mxu0 %v10185_v49  ;;  %v10511_v58 = vld [vmem:[#allocation70_spill] sm:$0xff] }
 0x53e   :  { %2536 = vmatpush1.msra.mxu1 %v10504_v38  ;;  %6225 = vmatpush3.msra.mxu0 %v10505_v46  ;;  %v10513_v46 = vld [vmem:[#allocation42_spill] sm:$0xff]  ;;  %v10515_v38 = vld [vmem:[#allocation43_spill] sm:$0xff] }
 0x53f   :  { %2537 = vmatprep.subr.mxu1 %v10506_v22  ;;  %6226 = vmatprep.subr.mxu0 %v10185_v49  ;;  %v10514_v22 = vld [vmem:[#allocation72_spill] sm:$0xff] }
 0x540   :  { %2538 = vmatpush1.msra.mxu1 %v10507_v31  ;;  %6227 = vmatpush3.msra.mxu0 %v10508_v57  ;;  %v10516_v57 = vld [vmem:[#allocation44_spill] sm:$0xff]  ;;  %v10518_v31 = vld [vmem:[#allocation45_spill] sm:$0xff] }
 0x541   :  { %2539 = vmatprep.subr.mxu1 %v10509_v63  ;;  %6228 = vmatprep.subr.mxu0 %v10185_v49  ;;  %v10517_v63 = vld [vmem:[#allocation74_spill] sm:$0xff] }
 0x542   :  { %2540 = vmatpush1.msra.mxu1 %v10510_v61  ;;  %6229 = vmatpush3.msra.mxu0 %v10511_v58  ;;  %v10519_v58 = vld [vmem:[#allocation46_spill] sm:$0xff]  ;;  %v10521_v61 = vld [vmem:[#allocation47_spill] sm:$0xff] }
 0x543   :  { %2541 = vmatprep.subr.mxu1 %v10512_v44  ;;  %6230 = vmatprep.subr.mxu0 %v10185_v49  ;;  %v10520_v44 = vld [vmem:[#allocation76_spill] sm:$0xff] }
 0x544   :  { %2542 = vmatpush1.msra.mxu1 %v10513_v46  ;;  %6231 = vmatpush3.msra.mxu0 %v10514_v22  ;;  %v10522_v22 = vld [vmem:[#allocation48_spill] sm:$0xff]  ;;  %v10533_v46 = vld [vmem:[#allocation89_spill] sm:$0xff] }
 0x545   :  { %2543 = vmatprep.subr.mxu1 %v10515_v38  ;;  %6232 = vmatprep.subr.mxu0 %v10185_v49  ;;  %v10523_v38 = vld [vmem:[#allocation78_spill] sm:$0xff] }
 0x546   :  { %2544 = vmatpush1.msra.mxu1 %v10516_v57  ;;  %6233 = vmatpush3.msra.mxu0 %v10517_v63  ;;  %v10530_v63 = vld [vmem:[#allocation85_spill] sm:$0xff]  ;;  %v10531_v57 = vld [vmem:[#allocation87_spill] sm:$0xff] }
 0x547   :  { %2545 = vmatprep.subr.mxu1 %v10518_v31  ;;  %6234 = vmatprep.subr.mxu0 %v10185_v49  ;;  %v10529_v31 = vld [vmem:[#allocation86_spill] sm:$0xff] }
 0x548   :  { %2546 = vmatpush1.msra.mxu1 %v10519_v58  ;;  %6235 = vmatpush3.msra.mxu0 %v10520_v44  ;;  %v10524_v58 = vld [vmem:[#allocation80_spill] sm:$0xff]  ;;  %v10526_v44 = vld [vmem:[#allocation83_spill] sm:$0xff] }
 0x549   :  { %2547 = vmatprep.subr.mxu1 %v10521_v61  ;;  %6236 = vmatprep.subr.mxu0 %v10185_v49  ;;  %v10525_v61 = vld [vmem:[#allocation81_spill] sm:$0xff] }
 0x54a   :  { %2548 = vmatpush1.msra.mxu1 %v10522_v22  ;;  %2581 = vmatprep.mubr.f32.mxu1 %v10185_v49  ;;  %v10527_v22 = vld [vmem:[#allocation82_spill] sm:$0xff] }
 0x54b   :  { %6237 = vmatpush3.msra.mxu0 %v10523_v38  ;;  %6238 = vmatprep.mubr.msk.f32.mxu0 %vm7089_vm0, %v10185_v49  ;;  %v10528_v38 = vld [vmem:[#allocation84_spill] sm:$0xff] }
 0x54c   :  { %2582 = vmatmul.mubr.f32.vlgmr.msra.gmra.mxu1 %v8534_v14  ;;  %6239 = vmatmul.mubr.f32.vlgmr.msra.gmra.mxu0 %v8534_v14 }
 0x54d   :  { %2658 = vmatprep.subr.mxu1 %v10524_v58  ;;  %6241 = vmatprep.subr.mxu0 %v10185_v49  ;;  %v10532_v58 = vld [vmem:[#allocation88_spill] sm:$0xff] }
 0x54e   :  { %2659 = vmatpush1.msra.mxu1 %v10525_v61  ;;  %6242 = vmatpush3.msra.mxu0 %v10526_v44  ;;  %v10534_v44 = vld [vmem:[#allocation90_spill] sm:$0xff]  ;;  %v10536_v61 = vld [vmem:[#allocation91_spill] sm:$0xff] }
 0x54f   :  { %2660 = vmatprep.subr.mxu1 %v10527_v22  ;;  %6243 = vmatprep.subr.mxu0 %v10185_v49  ;;  %v10535_v22 = vld [vmem:[#allocation92_spill] sm:$0xff] }
 0x550   :  { %2661 = vmatpush1.msra.mxu1 %v10528_v38  ;;  %6244 = vmatpush3.msra.mxu0 %v10529_v31  ;;  %v10537_v31 = vld [vmem:[#allocation93_spill] sm:$0xff]  ;;  %v10539_v38 = vld [vmem:[#allocation94_spill] sm:$0xff] }
 0x551   :  { %2662 = vmatprep.subr.mxu1 %v10530_v63  ;;  %6245 = vmatprep.subr.mxu0 %v10185_v49  ;;  %v10538_v63 = vld [vmem:[#allocation95_spill] sm:$0xff] }
 0x552   :  { %2663 = vmatpush1.msra.mxu1 %v10531_v57  ;;  %6246 = vmatpush3.msra.mxu0 %v10532_v58  ;;  %v10540_v58 = vld [vmem:[#allocation96_spill] sm:$0xff]  ;;  %v10542_v57 = vld [vmem:[#allocation97_spill] sm:$0xff] }
 0x553   :  { %2664 = vmatprep.subr.mxu1 %v10533_v46  ;;  %6247 = vmatprep.subr.mxu0 %v10185_v49  ;;  %v10541_v46 = vld [vmem:[#allocation98_spill] sm:$0xff] }
 0x554   :  { %2665 = vmatpush1.msra.mxu1 %v10534_v44  ;;  %6248 = vmatpush3.msra.mxu0 %v10535_v22  ;;  %v10543_v22 = vld [vmem:[#allocation99_spill] sm:$0xff]  ;;  %v10545_v44 = vld [vmem:[#allocation100_spill] sm:$0xff] }
 0x555   :  { %2666 = vmatprep.subr.mxu1 %v10536_v61  ;;  %6249 = vmatprep.subr.mxu0 %v10185_v49  ;;  %v10544_v61 = vld [vmem:[#allocation101_spill] sm:$0xff] }
 0x556   :  { %2667 = vmatpush1.msra.mxu1 %v10537_v31  ;;  %6250 = vmatpush3.msra.mxu0 %v10538_v63  ;;  %v10546_v63 = vld [vmem:[#allocation102_spill] sm:$0xff]  ;;  %v10548_v31 = vld [vmem:[#allocation103_spill] sm:$0xff] }
 0x557   :  { %2668 = vmatprep.subr.mxu1 %v10539_v38  ;;  %6251 = vmatprep.subr.mxu0 %v10185_v49  ;;  %v10547_v38 = vld [vmem:[#allocation104_spill] sm:$0xff] }
 0x558   :  { %2669 = vmatpush1.msra.mxu1 %v10540_v58  ;;  %6252 = vmatpush3.msra.mxu0 %v10541_v46  ;;  %v10549_v46 = vld [vmem:[#allocation105_spill] sm:$0xff]  ;;  %v10551_v58 = vld [vmem:[#allocation106_spill] sm:$0xff] }
 0x559   :  { %2670 = vmatprep.subr.mxu1 %v10542_v57  ;;  %6253 = vmatprep.subr.mxu0 %v10185_v49  ;;  %v10550_v57 = vld [vmem:[#allocation107_spill] sm:$0xff] }
 0x55a   :  { %2671 = vmatpush1.msra.mxu1 %v10543_v22  ;;  %6254 = vmatpush3.msra.mxu0 %v10544_v61  ;;  %v10552_v61 = vld [vmem:[#allocation108_spill] sm:$0xff]  ;;  %v10554_v22 = vld [vmem:[#allocation109_spill] sm:$0xff] }
 0x55b   :  { %2672 = vmatprep.subr.mxu1 %v10545_v44  ;;  %6255 = vmatprep.subr.mxu0 %v10185_v49  ;;  %v10553_v44 = vld [vmem:[#allocation110_spill] sm:$0xff] }
 0x55c   :  { %2673 = vmatpush1.msra.mxu1 %v10546_v63  ;;  %6256 = vmatpush3.msra.mxu0 %v10547_v38  ;;  %v10555_v38 = vld [vmem:[#allocation111_spill] sm:$0xff]  ;;  %v10557_v63 = vld [vmem:[#allocation112_spill] sm:$0xff] }
 0x55d   :  { %2674 = vmatprep.subr.mxu1 %v10548_v31  ;;  %6257 = vmatprep.subr.mxu0 %v10185_v49  ;;  %v10556_v31 = vld [vmem:[#allocation113_spill] sm:$0xff] }
 0x55e   :  { %2675 = vmatpush1.msra.mxu1 %v10549_v46  ;;  %6258 = vmatpush3.msra.mxu0 %v10550_v57  ;;  %v10558_v57 = vld [vmem:[#allocation114_spill] sm:$0xff]  ;;  %v10560_v46 = vld [vmem:[#allocation115_spill] sm:$0xff] }
 0x55f   :  { %2676 = vmatprep.subr.mxu1 %v10551_v58  ;;  %6259 = vmatprep.subr.mxu0 %v10185_v49  ;;  %v10559_v58 = vld [vmem:[#allocation116_spill] sm:$0xff] }
 0x560   :  { %2677 = vmatpush1.msra.mxu1 %v10552_v61  ;;  %6260 = vmatpush3.msra.mxu0 %v10553_v44  ;;  %v10561_v44 = vld [vmem:[#allocation117_spill] sm:$0xff]  ;;  %v10563_v61 = vld [vmem:[#allocation118_spill] sm:$0xff] }
 0x561   :  { %2678 = vmatprep.subr.mxu1 %v10554_v22  ;;  %6261 = vmatprep.subr.mxu0 %v10185_v49  ;;  %v10562_v22 = vld [vmem:[#allocation119_spill] sm:$0xff] }
 0x562   :  { %2679 = vmatpush1.msra.mxu1 %v10555_v38  ;;  %6262 = vmatpush3.msra.mxu0 %v10556_v31  ;;  %v10564_v31 = vld [vmem:[#allocation120_spill] sm:$0xff]  ;;  %v10566_v38 = vld [vmem:[#allocation121_spill] sm:$0xff] }
 0x563   :  { %2680 = vmatprep.subr.mxu1 %v10557_v63  ;;  %6263 = vmatprep.subr.mxu0 %v10185_v49  ;;  %v10565_v63 = vld [vmem:[#allocation122_spill] sm:$0xff] }
 0x564   :  { %2681 = vmatpush1.msra.mxu1 %v10558_v57  ;;  %6264 = vmatpush3.msra.mxu0 %v10559_v58  ;;  %v10567_v58 = vld [vmem:[#allocation123_spill] sm:$0xff]  ;;  %v10569_v57 = vld [vmem:[#allocation124_spill] sm:$0xff] }
 0x565   :  { %2682 = vmatprep.subr.mxu1 %v10560_v46  ;;  %6265 = vmatprep.subr.mxu0 %v10185_v49  ;;  %v10568_v46 = vld [vmem:[#allocation125_spill] sm:$0xff] }
 0x566   :  { %2683 = vmatpush1.msra.mxu1 %v10561_v44  ;;  %6266 = vmatpush3.msra.mxu0 %v10562_v22  ;;  %v10570_v22 = vld [vmem:[#allocation126_spill] sm:$0xff] }
 0x567   :  { %2684 = vmatprep.subr.mxu1 %v10563_v61  ;;  %6267 = vmatprep.subr.mxu0 %v10185_v49  ;;  %v10571_v61 = vld [vmem:[#allocation127_spill] sm:$0xff] }
 0x568   :  { %2685 = vmatpush1.msra.mxu1 %v10564_v31  ;;  %6268 = vmatpush3.msra.mxu0 %v10565_v63 }
 0x569   :  { %2686 = vmatprep.subr.mxu1 %v10566_v38  ;;  %6269 = vmatprep.subr.mxu0 %v10185_v49  ;;  %v10572_v38 = vld [vmem:[#allocation128_spill] sm:$0xff] }
 0x56a   :  { %2687 = vmatpush1.msra.mxu1 %v10567_v58  ;;  %6270 = vmatpush3.msra.mxu0 %v10568_v46 }
 0x56b   :  { %2688 = vmatprep.subr.mxu1 %v10569_v57  ;;  %6271 = vmatprep.subr.mxu0 %v10185_v49 }
 0x56c   :  { %2689 = vmatpush1.msra.mxu1 %v10570_v22  ;;  %6272 = vmatpush3.msra.mxu0 %v10571_v61 }
 0x56d   :  { %2722 = vmatprep.mubr.f32.mxu1 %v10185_v49  ;;  %6273 = vmatprep.mubr.msk.f32.mxu0 %vm7089_vm0, %v10185_v49 }
 0x56e   :  { %2815 = vmatprep.subr.mxu1 %v10572_v38  ;;  %6276 = vmatprep.subr.mxu0 %v10185_v49 }
 0x5c9   :  { %v2330_v58 = vpop.f32.mrf.mxu0  ;;  %v2259_v46 = vpop.f32.mrf.mxu1 }
 0x5ca   :  { %v2260_v35 = vadd.f32 %v2259_v46, %v8212_v37  ;;  %v2331_v47 = vadd.f32 %v2330_v58, %v8228_v60 }
 0x5cb   :  { %v6170_v63 = vpop.f32.mrf.mxu0  ;;  %v2261_v31 = vpop.f32.mrf.mxu1 }
 0x5cc   :  { %v2262_v38 = vadd.f32 %v2261_v31, %v10457_v30  ;;  %v10573_v31 = vld [vmem:[#allocation61_spill] sm:$0xff] }
 0x5eb   :  { %v2416_v57 = vpop.f32.mrf.mxu1  ;;  %v2487_v44 = vpop.f32.mrf.mxu0 }
 0x5ec   :  { %v2417_v22 = vadd.f32 %v2416_v57, %v10455_v23  ;;  %v2488_v46 = vadd.f32 %v2487_v44, %v8231_v56 }
 0x5ed   :  { %v6205_v61 = vpop.f32.mrf.mxu0  ;;  %v2418_v54 = vpop.f32.mrf.mxu1 }
 0x5ee   :  { %v2491_v55 = vadd.f32 %v2417_v22, %v2260_v35  ;;  %v2419_v51 = vadd.f32 %v2418_v54, %v10456_v26 }
 0x5f0   :  { %v2493_v53 = vmul.f32 0.5, %v2491_v55  ;;  %v2492_v50 = vadd.f32 %v2419_v51, %v2262_v38 }
 0x5f2   :  { %6884 = vtanh.f32 %v2493_v53  ;;  %v2494_v24 = vmul.f32 0.5, %v2492_v50 }
 0x5f4   :  { %6886 = vtanh.f32 %v2494_v24 }
 0x5ff   :  { %v6885_v63 = vpop.eup %6884 }
 0x600   :  { %v2497_v48 = vmul.f32 0.5, %v6885_v63 }
 0x601   :  { %v6887_v22 = vpop.eup %6886 }
 0x602   :  { %v2499_v15 = vadd.f32 0.5, %v2497_v48  ;;  %v2498_v38 = vmul.f32 0.5, %v6887_v22 }
 0x604   :  { %v2501_v57 = vmul.f32 %v2499_v15, %v2331_v47  ;;  %v2500_v48 = vadd.f32 0.5, %v2498_v38  ;;  %v10578_v38 = vld [vmem:[#allocation145_spill] sm:$0xff] }
 0x606   :  { %v2502_v61 = vadd.f32 %v2501_v57, %v2488_v46  ;;  %v10575_v46 = vld [vmem:[#allocation63_spill] sm:$0xff] }
 0x608   :  { %6888 = vtanh.f32 %v2502_v61 }
 0x60c   :  { %v2583_v55 = vpop.f32.mrf.mxu1  ;;  %v2654_v53 = vpop.f32.mrf.mxu0 }
 0x60d   :  { %v2584_v35 = vadd.f32 %v2583_v55, %v8032_v36 }
 0x60e   :  { %v6240_v54 = vpop.f32.mrf.mxu0  ;;  %v2585_v63 = vpop.f32.mrf.mxu1 }
 0x60f   :  { %v2799_v51 = vadd.f32 %v2584_v35, %v10573_v31  ;;  %v2586_v47 = vadd.f32 %v2585_v63, %v8054_v41  ;;  %v2655_v54 = vadd.f32 %v2654_v53, %v10465_v7  ;;  %v10576_v53 = vld [vmem:[#allocation178_spill] sm:$0xff] }
 0x610   :  { %v10579_v63 = vld [vmem:[#allocation146_spill] sm:$0xff] }
 0x611   :  { %v2801_v50 = vmul.f32 0.5, %v2799_v51  ;;  %v2800_v57 = vadd.f32 %v2586_v47, %v10575_v46  ;;  %v10583_v47 = vld [vmem:[#allocation150_spill] sm:$0xff]  ;;  %v10585_v46 = vld [vmem:[#allocation152_spill] sm:$0xff] }
 0x613   :  { %6890 = vtanh.f32 %v2801_v50  ;;  %v2802_v61 = vmul.f32 0.5, %v2800_v57  ;;  %v10577_v50 = vld [vmem:[#allocation144_spill] sm:$0xff]  ;;  %v10586_v57 = vld [vmem:[#allocation153_spill] sm:$0xff] }
 0x615   :  { %v6889_v58 = vpop.eup %6888  ;;  %6892 = vtanh.f32 %v2802_v61  ;;  %v10587_v61 = vld [vmem:[#allocation154_spill] sm:$0xff] }
 0x616   :  { %v2504_v24 = vsub.f32 %v8464_v39, %v6889_v58 }
 0x618   :  { %v2505_v15 = vmul.f32 %v2504_v24, %v2500_v48  ;;  %v10581_v48 = vld [vmem:[#allocation148_spill] sm:$0xff]  ;;  %v10582_v24 = vld [vmem:[#allocation149_spill] sm:$0xff] }
 0x61a   :  { %v8689_v44 = vadd.f32 %v6889_v58, %v2505_v15  ;;  %v10580_v58 = vld [vmem:[#allocation147_spill] sm:$0xff] }
 0x61b   :  { %v10584_v15 = vld [vmem:[#allocation151_spill] sm:$0xff] }
 0x61c   :  { %10574 = vst [vmem:[#allocation129_spill] sm:$0xff] %v8689_v44  ;;  %2723 = vmatmul.mubr.f32.vlgmr.msra.gmra.mxu1 %v8689_v44  ;;  %6274 = vmatmul.mubr.f32.vlgmr.msra.gmra.mxu0 %v8689_v44 }
 0x61d   :  { %2816 = vmatpush1.msra.mxu1 %v10347_v1  ;;  %6277 = vmatpush3.msra.mxu0 %v10348_v32 }
 0x61e   :  { %2817 = vmatprep.subr.mxu1 %v10349_v62  ;;  %6278 = vmatprep.subr.mxu0 %v10185_v49 }
 0x61f   :  { %2818 = vmatpush1.msra.mxu1 %v10350_v52  ;;  %6279 = vmatpush3.msra.mxu0 %v10351_v12 }
 0x620   :  { %v6891_v55 = vpop.eup %6890  ;;  %2819 = vmatprep.subr.mxu1 %v10352_v45  ;;  %6280 = vmatprep.subr.mxu0 %v10185_v49 }
 0x621   :  { %v2805_v35 = vmul.f32 0.5, %v6891_v55  ;;  %2820 = vmatpush1.msra.mxu1 %v10461_v16  ;;  %6281 = vmatpush3.msra.mxu0 %v10462_v10  ;;  %v10588_v55 = vld [vmem:[#allocation155_spill] sm:$0xff] }
 0x622   :  { %2821 = vmatprep.subr.mxu1 %v10463_v21  ;;  %6282 = vmatprep.subr.mxu0 %v10185_v49 }
 0x623   :  { %v2807_v22 = vadd.f32 0.5, %v2805_v35  ;;  %2822 = vmatpush1.msra.mxu1 %v10356_v6  ;;  %6283 = vmatpush3.msra.mxu0 %v10464_v5  ;;  %v10589_v35 = vld [vmem:[#allocation156_spill] sm:$0xff] }
 0x624   :  { %2823 = vmatprep.subr.mxu1 %v10466_v59  ;;  %6284 = vmatprep.subr.mxu0 %v10185_v49 }
 0x625   :  { %v2809_v31 = vmul.f32 %v2807_v22, %v2655_v54  ;;  %2824 = vmatpush1.msra.mxu1 %v10467_v2  ;;  %6285 = vmatpush3.msra.mxu0 %v10468_v3  ;;  %v10590_v54 = vld [vmem:[#allocation157_spill] sm:$0xff]  ;;  %v6893_v22 = vpop.eup %6892 }
 0x626   :  { %2825 = vmatprep.subr.mxu1 %v10469_v20  ;;  %6286 = vmatprep.subr.mxu0 %v10185_v49  ;;  %v2806_v39 = vmul.f32 0.5, %v6893_v22 }
 0x627   :  { %v2810_v51 = vadd.f32 %v2809_v31, %v10576_v53  ;;  %2826 = vmatpush1.msra.mxu1 %v10577_v50  ;;  %6287 = vmatpush3.msra.mxu0 %v10578_v38  ;;  %v10591_v31 = vld [vmem:[#allocation158_spill] sm:$0xff]  ;;  %v10592_v53 = vld [vmem:[#allocation160_spill] sm:$0xff] }
 0x628   :  { %2827 = vmatprep.subr.mxu1 %v10579_v63  ;;  %6288 = vmatprep.subr.mxu0 %v10185_v49 }
 0x629   :  { %6894 = vtanh.f32 %v2810_v51  ;;  %2828 = vmatpush1.msra.mxu1 %v10580_v58  ;;  %6289 = vmatpush3.msra.mxu0 %v10581_v48  ;;  %v10593_v51 = vld [vmem:[#allocation161_spill] sm:$0xff] }
 0x62a   :  { %2829 = vmatprep.subr.mxu1 %v10582_v24  ;;  %6290 = vmatprep.subr.mxu0 %v10185_v49 }
 0x62b   :  { %2830 = vmatpush1.msra.mxu1 %v10583_v47  ;;  %6291 = vmatpush3.msra.mxu0 %v10584_v15 }
 0x62c   :  { %2831 = vmatprep.subr.mxu1 %v10585_v46  ;;  %6292 = vmatprep.subr.mxu0 %v10185_v49 }
 0x62d   :  { %2832 = vmatpush1.msra.mxu1 %v10586_v57  ;;  %6293 = vmatpush3.msra.mxu0 %v10587_v61 }
 0x62e   :  { %2833 = vmatprep.subr.mxu1 %v10588_v55  ;;  %6294 = vmatprep.subr.mxu0 %v10185_v49  ;;  %v10594_v55 = vld [vmem:[#allocation162_spill] sm:$0xff] }
 0x62f   :  { %2834 = vmatpush1.msra.mxu1 %v10589_v35  ;;  %6295 = vmatpush3.msra.mxu0 %v10590_v54 }
 0x630   :  { %2835 = vmatprep.subr.mxu1 %v10591_v31  ;;  %6296 = vmatprep.subr.mxu0 %v10185_v49  ;;  %v10595_v31 = vld [vmem:[#allocation166_spill] sm:$0xff] }
 0x631   :  { %2836 = vmatpush1.msra.mxu1 %v10486_v17  ;;  %6297 = vmatpush3.msra.mxu0 %v10592_v53 }
 0x632   :  { %2837 = vmatprep.subr.mxu1 %v10593_v51  ;;  %6298 = vmatprep.subr.mxu0 %v10185_v49  ;;  %v2808_v51 = vadd.f32 0.5, %v2806_v39 }
 0x633   :  { %2838 = vmatpush1.msra.mxu1 %v10594_v55  ;;  %6299 = vmatpush3.msra.mxu0 %v10490_v11 }
 0x634   :  { %2839 = vmatprep.subr.mxu1 %v10491_v19  ;;  %6300 = vmatprep.subr.mxu0 %v10185_v49 }
 0x635   :  { %2840 = vmatpush1.msra.mxu1 %v10492_v8  ;;  %6301 = vmatpush3.msra.mxu0 %v10595_v31 }
 0x636   :  { %v6895_v17 = vpop.eup %6894  ;;  %2841 = vmatprep.subr.mxu1 %v10386_v13  ;;  %6302 = vmatprep.subr.mxu0 %v10185_v49 }
 0x637   :  { %v2812_v22 = vsub.f32 %v8534_v14, %v6895_v17  ;;  %2842 = vmatpush1.msra.mxu1 %v10387_v29  ;;  %6303 = vmatpush3.msra.mxu0 %v10494_v18  ;;  %v10599_v14 = vld [vmem:[#allocation22_spill] sm:$0xff] }
 0x638   :  { %2843 = vmatprep.subr.mxu1 %v10389_v9  ;;  %6304 = vmatprep.subr.mxu0 %v10185_v49 }
 0x639   :  { %v2813_v19 = vmul.f32 %v2812_v22, %v2808_v51  ;;  %2844 = vmatpush1.msra.mxu1 %v10390_v34  ;;  %6305 = vmatpush3.msra.mxu0 %v10391_v25  ;;  %v10600_v51 = vld [vmem:[#allocation52_spill] sm:$0xff]  ;;  %v10601_v22 = vld [vmem:[#allocation23_spill] sm:$0xff] }
 0x63a   :  { %2845 = vmatprep.subr.mxu1 %v10392_v4  ;;  %6306 = vmatprep.subr.mxu0 %v10185_v49 }
 0x63b   :  { %v8757_v39 = vadd.f32 %v6895_v17, %v2813_v19  ;;  %2846 = vmatpush1.msra.mxu1 %v10393_v33  ;;  %2879 = vmatprep.mubr.f32.mxu1 %v10185_v49  ;;  %v10597_v17 = vld [vmem:[#allocation51_spill] sm:$0xff]  ;;  %v10598_v19 = vld [vmem:[#allocation21_spill] sm:$0xff] }
 0x63c   :  { %6307 = vmatpush3.msra.mxu0 %v10394_v0  ;;  %6308 = vmatprep.mubr.msk.f32.mxu0 %vm7089_vm0, %v10185_v49 }
 0x63d   :  { %10596 = vst [vmem:[#allocation130_spill] sm:$0xff] %v8757_v39  ;;  %2880 = vmatmul.mubr.f32.vlgmr.msra.gmra.mxu1 %v8757_v39  ;;  %6309 = vmatmul.mubr.f32.vlgmr.msra.gmra.mxu0 %v8757_v39 }
 0x63e   :  { %2982 = vmatprep.subr.mxu1 %v10395_v27  ;;  %6311 = vmatprep.subr.mxu0 %v10185_v49 }
 0x63f   :  { %2983 = vmatpush1.msra.mxu1 %v7389_v40  ;;  %6312 = vmatpush3.msra.mxu0 %v7564_v28  ;;  %v10602_v28 = vld [vmem:[#allocation24_spill] sm:$0xff]  ;;  %v10604_v40 = vld [vmem:[#allocation25_spill] sm:$0xff] }
 0x640   :  { %2984 = vmatprep.subr.mxu1 %v7392_v42  ;;  %6313 = vmatprep.subr.mxu0 %v10185_v49  ;;  %v10603_v42 = vld [vmem:[#allocation54_spill] sm:$0xff] }
 0x641   :  { %2985 = vmatpush1.msra.mxu1 %v7394_v43  ;;  %6314 = vmatpush3.msra.mxu0 %v10597_v17  ;;  %v10605_v17 = vld [vmem:[#allocation26_spill] sm:$0xff]  ;;  %v10607_v43 = vld [vmem:[#allocation27_spill] sm:$0xff] }
 0x642   :  { %2986 = vmatprep.subr.mxu1 %v10598_v19  ;;  %6315 = vmatprep.subr.mxu0 %v10185_v49  ;;  %v10606_v19 = vld [vmem:[#allocation56_spill] sm:$0xff] }
 0x643   :  { %2987 = vmatpush1.msra.mxu1 %v10599_v14  ;;  %6316 = vmatpush3.msra.mxu0 %v10600_v51  ;;  %v10608_v51 = vld [vmem:[#allocation28_spill] sm:$0xff]  ;;  %v10610_v14 = vld [vmem:[#allocation29_spill] sm:$0xff] }
 0x644   :  { %2988 = vmatprep.subr.mxu1 %v10601_v22  ;;  %6317 = vmatprep.subr.mxu0 %v10185_v49  ;;  %v10609_v22 = vld [vmem:[#allocation58_spill] sm:$0xff] }
 0x645   :  { %2989 = vmatpush1.msra.mxu1 %v10602_v28  ;;  %6318 = vmatpush3.msra.mxu0 %v10603_v42  ;;  %v10611_v42 = vld [vmem:[#allocation30_spill] sm:$0xff]  ;;  %v10613_v28 = vld [vmem:[#allocation31_spill] sm:$0xff] }
 0x646   :  { %2990 = vmatprep.subr.mxu1 %v10604_v40  ;;  %6319 = vmatprep.subr.mxu0 %v10185_v49  ;;  %v10612_v40 = vld [vmem:[#allocation60_spill] sm:$0xff] }
 0x647   :  { %2991 = vmatpush1.msra.mxu1 %v10605_v17  ;;  %6320 = vmatpush3.msra.mxu0 %v10606_v19  ;;  %v10614_v19 = vld [vmem:[#allocation32_spill] sm:$0xff]  ;;  %v10616_v17 = vld [vmem:[#allocation33_spill] sm:$0xff] }
 0x648   :  { %2992 = vmatprep.subr.mxu1 %v10607_v43  ;;  %6321 = vmatprep.subr.mxu0 %v10185_v49  ;;  %v10615_v43 = vld [vmem:[#allocation62_spill] sm:$0xff] }
 0x649   :  { %2993 = vmatpush1.msra.mxu1 %v10608_v51  ;;  %6322 = vmatpush3.msra.mxu0 %v10609_v22  ;;  %v10617_v22 = vld [vmem:[#allocation34_spill] sm:$0xff]  ;;  %v10619_v51 = vld [vmem:[#allocation35_spill] sm:$0xff] }
 0x64a   :  { %2994 = vmatprep.subr.mxu1 %v10610_v14  ;;  %6323 = vmatprep.subr.mxu0 %v10185_v49  ;;  %v10618_v14 = vld [vmem:[#allocation64_spill] sm:$0xff] }
 0x64b   :  { %2995 = vmatpush1.msra.mxu1 %v10611_v42  ;;  %6324 = vmatpush3.msra.mxu0 %v10612_v40  ;;  %v10620_v40 = vld [vmem:[#allocation36_spill] sm:$0xff]  ;;  %v10622_v42 = vld [vmem:[#allocation37_spill] sm:$0xff] }
 0x64c   :  { %2996 = vmatprep.subr.mxu1 %v10613_v28  ;;  %6325 = vmatprep.subr.mxu0 %v10185_v49  ;;  %v10621_v28 = vld [vmem:[#allocation66_spill] sm:$0xff] }
 0x64d   :  { %2997 = vmatpush1.msra.mxu1 %v10614_v19  ;;  %6326 = vmatpush3.msra.mxu0 %v10615_v43  ;;  %v10623_v43 = vld [vmem:[#allocation38_spill] sm:$0xff]  ;;  %v10625_v19 = vld [vmem:[#allocation39_spill] sm:$0xff] }
 0x64e   :  { %2998 = vmatprep.subr.mxu1 %v10616_v17  ;;  %6327 = vmatprep.subr.mxu0 %v10185_v49  ;;  %v10624_v17 = vld [vmem:[#allocation68_spill] sm:$0xff] }
 0x64f   :  { %2999 = vmatpush1.msra.mxu1 %v10617_v22  ;;  %6328 = vmatpush3.msra.mxu0 %v10618_v14  ;;  %v10626_v14 = vld [vmem:[#allocation40_spill] sm:$0xff]  ;;  %v10628_v22 = vld [vmem:[#allocation41_spill] sm:$0xff] }
 0x650   :  { %3000 = vmatprep.subr.mxu1 %v10619_v51  ;;  %6329 = vmatprep.subr.mxu0 %v10185_v49  ;;  %v10627_v51 = vld [vmem:[#allocation70_spill] sm:$0xff] }
 0x651   :  { %3001 = vmatpush1.msra.mxu1 %v10620_v40  ;;  %6330 = vmatpush3.msra.mxu0 %v10621_v28  ;;  %v10629_v28 = vld [vmem:[#allocation42_spill] sm:$0xff]  ;;  %v10631_v40 = vld [vmem:[#allocation43_spill] sm:$0xff] }
 0x652   :  { %3002 = vmatprep.subr.mxu1 %v10622_v42  ;;  %6331 = vmatprep.subr.mxu0 %v10185_v49  ;;  %v10630_v42 = vld [vmem:[#allocation72_spill] sm:$0xff] }
 0x653   :  { %3003 = vmatpush1.msra.mxu1 %v10623_v43  ;;  %6332 = vmatpush3.msra.mxu0 %v10624_v17  ;;  %v10632_v17 = vld [vmem:[#allocation44_spill] sm:$0xff]  ;;  %v10634_v43 = vld [vmem:[#allocation45_spill] sm:$0xff] }
 0x654   :  { %3004 = vmatprep.subr.mxu1 %v10625_v19  ;;  %6333 = vmatprep.subr.mxu0 %v10185_v49  ;;  %v10633_v19 = vld [vmem:[#allocation74_spill] sm:$0xff] }
 0x655   :  { %3005 = vmatpush1.msra.mxu1 %v10626_v14  ;;  %6334 = vmatpush3.msra.mxu0 %v10627_v51  ;;  %v10635_v51 = vld [vmem:[#allocation46_spill] sm:$0xff]  ;;  %v10637_v14 = vld [vmem:[#allocation47_spill] sm:$0xff] }
 0x656   :  { %3006 = vmatprep.subr.mxu1 %v10628_v22  ;;  %6335 = vmatprep.subr.mxu0 %v10185_v49  ;;  %v10636_v22 = vld [vmem:[#allocation76_spill] sm:$0xff] }
 0x657   :  { %3007 = vmatpush1.msra.mxu1 %v10629_v28  ;;  %6336 = vmatpush3.msra.mxu0 %v10630_v42  ;;  %v10638_v42 = vld [vmem:[#allocation48_spill] sm:$0xff]  ;;  %v10649_v28 = vld [vmem:[#allocation89_spill] sm:$0xff] }
 0x658   :  { %3008 = vmatprep.subr.mxu1 %v10631_v40  ;;  %6337 = vmatprep.subr.mxu0 %v10185_v49  ;;  %v10639_v40 = vld [vmem:[#allocation78_spill] sm:$0xff] }
 0x659   :  { %3009 = vmatpush1.msra.mxu1 %v10632_v17  ;;  %6338 = vmatpush3.msra.mxu0 %v10633_v19  ;;  %v10646_v19 = vld [vmem:[#allocation85_spill] sm:$0xff]  ;;  %v10647_v17 = vld [vmem:[#allocation87_spill] sm:$0xff] }
 0x65a   :  { %3010 = vmatprep.subr.mxu1 %v10634_v43  ;;  %6339 = vmatprep.subr.mxu0 %v10185_v49  ;;  %v10645_v43 = vld [vmem:[#allocation86_spill] sm:$0xff] }
 0x65b   :  { %3011 = vmatpush1.msra.mxu1 %v10635_v51  ;;  %6340 = vmatpush3.msra.mxu0 %v10636_v22  ;;  %v10640_v51 = vld [vmem:[#allocation80_spill] sm:$0xff]  ;;  %v10642_v22 = vld [vmem:[#allocation83_spill] sm:$0xff] }
 0x65c   :  { %3012 = vmatprep.subr.mxu1 %v10637_v14  ;;  %6341 = vmatprep.subr.mxu0 %v10185_v49  ;;  %v10641_v14 = vld [vmem:[#allocation81_spill] sm:$0xff] }
 0x65d   :  { %3013 = vmatpush1.msra.mxu1 %v10638_v42  ;;  %3046 = vmatprep.mubr.f32.mxu1 %v10185_v49  ;;  %v10643_v42 = vld [vmem:[#allocation82_spill] sm:$0xff] }
 0x65e   :  { %6342 = vmatpush3.msra.mxu0 %v10639_v40  ;;  %6343 = vmatprep.mubr.msk.f32.mxu0 %vm7089_vm0, %v10185_v49  ;;  %v10644_v40 = vld [vmem:[#allocation84_spill] sm:$0xff] }
 0x65f   :  { %3047 = vmatmul.mubr.f32.vlgmr.msra.gmra.mxu1 %v8757_v39  ;;  %6344 = vmatmul.mubr.f32.vlgmr.msra.gmra.mxu0 %v8757_v39 }
 0x660   :  { %3123 = vmatprep.subr.mxu1 %v10640_v51  ;;  %6346 = vmatprep.subr.mxu0 %v10185_v49  ;;  %v10648_v51 = vld [vmem:[#allocation88_spill] sm:$0xff] }
 0x661   :  { %3124 = vmatpush1.msra.mxu1 %v10641_v14  ;;  %6347 = vmatpush3.msra.mxu0 %v10642_v22  ;;  %v10650_v22 = vld [vmem:[#allocation90_spill] sm:$0xff]  ;;  %v10652_v14 = vld [vmem:[#allocation91_spill] sm:$0xff] }
 0x662   :  { %3125 = vmatprep.subr.mxu1 %v10643_v42  ;;  %6348 = vmatprep.subr.mxu0 %v10185_v49  ;;  %v10651_v42 = vld [vmem:[#allocation92_spill] sm:$0xff] }
 0x663   :  { %3126 = vmatpush1.msra.mxu1 %v10644_v40  ;;  %6349 = vmatpush3.msra.mxu0 %v10645_v43  ;;  %v10653_v43 = vld [vmem:[#allocation93_spill] sm:$0xff]  ;;  %v10655_v40 = vld [vmem:[#allocation94_spill] sm:$0xff] }
 0x664   :  { %3127 = vmatprep.subr.mxu1 %v10646_v19  ;;  %6350 = vmatprep.subr.mxu0 %v10185_v49  ;;  %v10654_v19 = vld [vmem:[#allocation95_spill] sm:$0xff] }
 0x665   :  { %3128 = vmatpush1.msra.mxu1 %v10647_v17  ;;  %6351 = vmatpush3.msra.mxu0 %v10648_v51  ;;  %v10656_v51 = vld [vmem:[#allocation96_spill] sm:$0xff]  ;;  %v10658_v17 = vld [vmem:[#allocation97_spill] sm:$0xff] }
 0x666   :  { %3129 = vmatprep.subr.mxu1 %v10649_v28  ;;  %6352 = vmatprep.subr.mxu0 %v10185_v49  ;;  %v10657_v28 = vld [vmem:[#allocation98_spill] sm:$0xff] }
 0x667   :  { %3130 = vmatpush1.msra.mxu1 %v10650_v22  ;;  %6353 = vmatpush3.msra.mxu0 %v10651_v42  ;;  %v10659_v42 = vld [vmem:[#allocation99_spill] sm:$0xff]  ;;  %v10661_v22 = vld [vmem:[#allocation100_spill] sm:$0xff] }
 0x668   :  { %3131 = vmatprep.subr.mxu1 %v10652_v14  ;;  %6354 = vmatprep.subr.mxu0 %v10185_v49  ;;  %v10660_v14 = vld [vmem:[#allocation101_spill] sm:$0xff] }
 0x669   :  { %3132 = vmatpush1.msra.mxu1 %v10653_v43  ;;  %6355 = vmatpush3.msra.mxu0 %v10654_v19  ;;  %v10662_v19 = vld [vmem:[#allocation102_spill] sm:$0xff]  ;;  %v10664_v43 = vld [vmem:[#allocation103_spill] sm:$0xff] }
 0x66a   :  { %3133 = vmatprep.subr.mxu1 %v10655_v40  ;;  %6356 = vmatprep.subr.mxu0 %v10185_v49  ;;  %v10663_v40 = vld [vmem:[#allocation104_spill] sm:$0xff] }
 0x66b   :  { %3134 = vmatpush1.msra.mxu1 %v10656_v51  ;;  %6357 = vmatpush3.msra.mxu0 %v10657_v28  ;;  %v10665_v28 = vld [vmem:[#allocation105_spill] sm:$0xff]  ;;  %v10667_v51 = vld [vmem:[#allocation106_spill] sm:$0xff] }
 0x66c   :  { %3135 = vmatprep.subr.mxu1 %v10658_v17  ;;  %6358 = vmatprep.subr.mxu0 %v10185_v49  ;;  %v10666_v17 = vld [vmem:[#allocation107_spill] sm:$0xff] }
 0x66d   :  { %3136 = vmatpush1.msra.mxu1 %v10659_v42  ;;  %6359 = vmatpush3.msra.mxu0 %v10660_v14  ;;  %v10668_v14 = vld [vmem:[#allocation108_spill] sm:$0xff]  ;;  %v10670_v42 = vld [vmem:[#allocation109_spill] sm:$0xff] }
 0x66e   :  { %3137 = vmatprep.subr.mxu1 %v10661_v22  ;;  %6360 = vmatprep.subr.mxu0 %v10185_v49  ;;  %v10669_v22 = vld [vmem:[#allocation110_spill] sm:$0xff] }
 0x66f   :  { %3138 = vmatpush1.msra.mxu1 %v10662_v19  ;;  %6361 = vmatpush3.msra.mxu0 %v10663_v40  ;;  %v10671_v40 = vld [vmem:[#allocation111_spill] sm:$0xff]  ;;  %v10673_v19 = vld [vmem:[#allocation112_spill] sm:$0xff] }
 0x670   :  { %3139 = vmatprep.subr.mxu1 %v10664_v43  ;;  %6362 = vmatprep.subr.mxu0 %v10185_v49  ;;  %v10672_v43 = vld [vmem:[#allocation113_spill] sm:$0xff] }
 0x671   :  { %3140 = vmatpush1.msra.mxu1 %v10665_v28  ;;  %6363 = vmatpush3.msra.mxu0 %v10666_v17  ;;  %v10674_v17 = vld [vmem:[#allocation114_spill] sm:$0xff]  ;;  %v10676_v28 = vld [vmem:[#allocation115_spill] sm:$0xff] }
 0x672   :  { %3141 = vmatprep.subr.mxu1 %v10667_v51  ;;  %6364 = vmatprep.subr.mxu0 %v10185_v49  ;;  %v10675_v51 = vld [vmem:[#allocation116_spill] sm:$0xff] }
 0x673   :  { %3142 = vmatpush1.msra.mxu1 %v10668_v14  ;;  %6365 = vmatpush3.msra.mxu0 %v10669_v22  ;;  %v10677_v22 = vld [vmem:[#allocation117_spill] sm:$0xff]  ;;  %v10679_v14 = vld [vmem:[#allocation118_spill] sm:$0xff] }
 0x674   :  { %3143 = vmatprep.subr.mxu1 %v10670_v42  ;;  %6366 = vmatprep.subr.mxu0 %v10185_v49  ;;  %v10678_v42 = vld [vmem:[#allocation119_spill] sm:$0xff] }
 0x675   :  { %3144 = vmatpush1.msra.mxu1 %v10671_v40  ;;  %6367 = vmatpush3.msra.mxu0 %v10672_v43  ;;  %v10680_v43 = vld [vmem:[#allocation120_spill] sm:$0xff]  ;;  %v10682_v40 = vld [vmem:[#allocation121_spill] sm:$0xff] }
 0x676   :  { %3145 = vmatprep.subr.mxu1 %v10673_v19  ;;  %6368 = vmatprep.subr.mxu0 %v10185_v49  ;;  %v10681_v19 = vld [vmem:[#allocation122_spill] sm:$0xff] }
 0x677   :  { %3146 = vmatpush1.msra.mxu1 %v10674_v17  ;;  %6369 = vmatpush3.msra.mxu0 %v10675_v51  ;;  %v10683_v51 = vld [vmem:[#allocation123_spill] sm:$0xff]  ;;  %v10685_v17 = vld [vmem:[#allocation124_spill] sm:$0xff] }
 0x678   :  { %3147 = vmatprep.subr.mxu1 %v10676_v28  ;;  %6370 = vmatprep.subr.mxu0 %v10185_v49  ;;  %v10684_v28 = vld [vmem:[#allocation125_spill] sm:$0xff] }
 0x679   :  { %3148 = vmatpush1.msra.mxu1 %v10677_v22  ;;  %6371 = vmatpush3.msra.mxu0 %v10678_v42  ;;  %v10686_v42 = vld [vmem:[#allocation126_spill] sm:$0xff] }
 0x67a   :  { %3149 = vmatprep.subr.mxu1 %v10679_v14  ;;  %6372 = vmatprep.subr.mxu0 %v10185_v49  ;;  %v10687_v14 = vld [vmem:[#allocation127_spill] sm:$0xff] }
 0x67b   :  { %3150 = vmatpush1.msra.mxu1 %v10680_v43  ;;  %6373 = vmatpush3.msra.mxu0 %v10681_v19 }
 0x67c   :  { %3151 = vmatprep.subr.mxu1 %v10682_v40  ;;  %6374 = vmatprep.subr.mxu0 %v10185_v49  ;;  %v10688_v40 = vld [vmem:[#allocation128_spill] sm:$0xff] }
 0x67d   :  { %3152 = vmatpush1.msra.mxu1 %v10683_v51  ;;  %6375 = vmatpush3.msra.mxu0 %v10684_v28 }
 0x67e   :  { %3153 = vmatprep.subr.mxu1 %v10685_v17  ;;  %6376 = vmatprep.subr.mxu0 %v10185_v49 }
 0x67f   :  { %3154 = vmatpush1.msra.mxu1 %v10686_v42  ;;  %6377 = vmatpush3.msra.mxu0 %v10687_v14 }
 0x680   :  { %3187 = vmatprep.mubr.f32.mxu1 %v10185_v49  ;;  %6378 = vmatprep.mubr.msk.f32.mxu0 %vm7089_vm0, %v10185_v49 }
 0x681   :  { %3280 = vmatprep.subr.mxu1 %v10688_v40  ;;  %6381 = vmatprep.subr.mxu0 %v10185_v49 }
 0x6dc   :  { %v2795_v51 = vpop.f32.mrf.mxu0  ;;  %v2724_v28 = vpop.f32.mrf.mxu1 }
 0x6dd   :  { %v2725_v27 = vadd.f32 %v2724_v28, %v8212_v37  ;;  %v2796_v18 = vadd.f32 %v2795_v51, %v8228_v60 }
 0x6de   :  { %v6275_v19 = vpop.f32.mrf.mxu0  ;;  %v2726_v43 = vpop.f32.mrf.mxu1 }
 0x6df   :  { %v2727_v40 = vadd.f32 %v2726_v43, %v10457_v30  ;;  %v10689_v43 = vld [vmem:[#allocation65_spill] sm:$0xff] }
 0x6fd   :  { %v2881_v17 = vpop.f32.mrf.mxu1  ;;  %v2952_v22 = vpop.f32.mrf.mxu0 }
 0x6fe   :  { %v2882_v42 = vadd.f32 %v2881_v17, %v10455_v23  ;;  %v2953_v28 = vadd.f32 %v2952_v22, %v8231_v56 }
 0x6ff   :  { %v6310_v14 = vpop.f32.mrf.mxu0  ;;  %v2883_v4 = vpop.f32.mrf.mxu1 }
 0x700   :  { %v2956_v0 = vadd.f32 %v2882_v42, %v2725_v27  ;;  %v2884_v25 = vadd.f32 %v2883_v4, %v10456_v26 }
 0x702   :  { %v2958_v33 = vmul.f32 0.5, %v2956_v0  ;;  %v2957_v34 = vadd.f32 %v2884_v25, %v2727_v40 }
 0x704   :  { %6896 = vtanh.f32 %v2958_v33  ;;  %v2959_v9 = vmul.f32 0.5, %v2957_v34 }
 0x706   :  { %6898 = vtanh.f32 %v2959_v9 }
 0x711   :  { %v6897_v19 = vpop.eup %6896 }
 0x712   :  { %v2962_v39 = vmul.f32 0.5, %v6897_v19 }
 0x713   :  { %v6899_v4 = vpop.eup %6898 }
 0x714   :  { %v2964_v29 = vadd.f32 0.5, %v2962_v39  ;;  %v2963_v25 = vmul.f32 0.5, %v6899_v4 }
 0x716   :  { %v2966_v17 = vmul.f32 %v2964_v29, %v2796_v18  ;;  %v2965_v39 = vadd.f32 0.5, %v2963_v25  ;;  %v10693_v25 = vld [vmem:[#allocation155_spill] sm:$0xff] }
 0x718   :  { %v2967_v14 = vadd.f32 %v2966_v17, %v2953_v28  ;;  %v10691_v28 = vld [vmem:[#allocation67_spill] sm:$0xff] }
 0x71a   :  { %6900 = vtanh.f32 %v2967_v14 }
 0x71f   :  { %v3048_v42 = vpop.f32.mrf.mxu1  ;;  %v3119_v0 = vpop.f32.mrf.mxu0 }
 0x720   :  { %v3049_v33 = vadd.f32 %v3048_v42, %v8032_v36  ;;  %v3120_v4 = vadd.f32 %v3119_v0, %v10465_v7  ;;  %v10692_v0 = vld [vmem:[#allocation181_spill] sm:$0xff] }
 0x721   :  { %v6345_v27 = vpop.f32.mrf.mxu0  ;;  %v3050_v51 = vpop.f32.mrf.mxu1 }
 0x722   :  { %v3264_v40 = vadd.f32 %v3049_v33, %v10689_v43  ;;  %v3051_v29 = vadd.f32 %v3050_v51, %v8054_v41  ;;  %v10695_v51 = vld [vmem:[#allocation159_spill] sm:$0xff] }
 0x724   :  { %v3266_v34 = vmul.f32 0.5, %v3264_v40  ;;  %v3265_v17 = vadd.f32 %v3051_v29, %v10691_v28  ;;  %v10697_v29 = vld [vmem:[#allocation164_spill] sm:$0xff] }
 0x725   :  { %v10698_v28 = vld [vmem:[#allocation168_spill] sm:$0xff] }
 0x726   :  { %6902 = vtanh.f32 %v3266_v34  ;;  %v3267_v14 = vmul.f32 0.5, %v3265_v17  ;;  %v10694_v34 = vld [vmem:[#allocation158_spill] sm:$0xff]  ;;  %v10699_v17 = vld [vmem:[#allocation169_spill] sm:$0xff] }
 0x727   :  { %v6901_v19 = vpop.eup %6900 }
 0x728   :  { %v2969_v9 = vsub.f32 %v8689_v44, %v6901_v19  ;;  %6904 = vtanh.f32 %v3267_v14  ;;  %v10706_v44 = vld [vmem:[#allocation175_spill] sm:$0xff] }
 0x72a   :  { %v2970_v18 = vmul.f32 %v2969_v9, %v2965_v39  ;;  %v10696_v39 = vld [vmem:[#allocation161_spill] sm:$0xff] }
 0x72c   :  { %v8914_v22 = vadd.f32 %v6901_v19, %v2970_v18 }
 0x72e   :  { %10690 = vst [vmem:[#allocation131_spill] sm:$0xff] %v8914_v22  ;;  %3188 = vmatmul.mubr.f32.vlgmr.msra.gmra.mxu1 %v8914_v22  ;;  %6379 = vmatmul.mubr.f32.vlgmr.msra.gmra.mxu0 %v8914_v22 }
 0x72f   :  { %3281 = vmatpush1.msra.mxu1 %v10347_v1  ;;  %6382 = vmatpush3.msra.mxu0 %v10348_v32 }
 0x730   :  { %3282 = vmatprep.subr.mxu1 %v10349_v62  ;;  %6383 = vmatprep.subr.mxu0 %v10185_v49 }
 0x731   :  { %3283 = vmatpush1.msra.mxu1 %v10350_v52  ;;  %6384 = vmatpush3.msra.mxu0 %v10351_v12 }
 0x732   :  { %3284 = vmatprep.subr.mxu1 %v10352_v45  ;;  %6385 = vmatprep.subr.mxu0 %v10185_v49 }
 0x733   :  { %v6903_v42 = vpop.eup %6902  ;;  %3285 = vmatpush1.msra.mxu1 %v10461_v16  ;;  %6386 = vmatpush3.msra.mxu0 %v10462_v10 }
 0x734   :  { %v3270_v33 = vmul.f32 0.5, %v6903_v42  ;;  %3286 = vmatprep.subr.mxu1 %v10463_v21  ;;  %6387 = vmatprep.subr.mxu0 %v10185_v49  ;;  %v10700_v42 = vld [vmem:[#allocation130_spill] sm:$0xff] }
 0x735   :  { %3287 = vmatpush1.msra.mxu1 %v10356_v6  ;;  %6388 = vmatpush3.msra.mxu0 %v10464_v5  ;;  %v6905_v19 = vpop.eup %6904 }
 0x736   :  { %v3272_v27 = vadd.f32 0.5, %v3270_v33  ;;  %3288 = vmatprep.subr.mxu1 %v10466_v59  ;;  %6389 = vmatprep.subr.mxu0 %v10185_v49  ;;  %v3271_v9 = vmul.f32 0.5, %v6905_v19  ;;  %v10705_v19 = vld [vmem:[#allocation174_spill] sm:$0xff] }
 0x737   :  { %3289 = vmatpush1.msra.mxu1 %v10467_v2  ;;  %6390 = vmatpush3.msra.mxu0 %v10468_v3 }
 0x738   :  { %v3274_v43 = vmul.f32 %v3272_v27, %v3120_v4  ;;  %3290 = vmatprep.subr.mxu1 %v10469_v20  ;;  %6391 = vmatprep.subr.mxu0 %v10185_v49  ;;  %v3273_v14 = vadd.f32 0.5, %v3271_v9  ;;  %v10701_v4 = vld [vmem:[#allocation170_spill] sm:$0xff]  ;;  %v10702_v27 = vld [vmem:[#allocation171_spill] sm:$0xff] }
 0x739   :  { %3291 = vmatpush1.msra.mxu1 %v10577_v50  ;;  %6392 = vmatpush3.msra.mxu0 %v10578_v38 }
 0x73a   :  { %v3275_v40 = vadd.f32 %v3274_v43, %v10692_v0  ;;  %3292 = vmatprep.subr.mxu1 %v10579_v63  ;;  %6393 = vmatprep.subr.mxu0 %v10185_v49  ;;  %v10703_v43 = vld [vmem:[#allocation172_spill] sm:$0xff] }
 0x73b   :  { %3293 = vmatpush1.msra.mxu1 %v10580_v58  ;;  %6394 = vmatpush3.msra.mxu0 %v10581_v48 }
 0x73c   :  { %6906 = vtanh.f32 %v3275_v40  ;;  %3294 = vmatprep.subr.mxu1 %v10582_v24  ;;  %6395 = vmatprep.subr.mxu0 %v10185_v49  ;;  %v10704_v40 = vld [vmem:[#allocation173_spill] sm:$0xff] }
 0x73d   :  { %3295 = vmatpush1.msra.mxu1 %v10583_v47  ;;  %6396 = vmatpush3.msra.mxu0 %v10584_v15 }
 0x73e   :  { %3296 = vmatprep.subr.mxu1 %v10585_v46  ;;  %6397 = vmatprep.subr.mxu0 %v10185_v49 }
 0x73f   :  { %3297 = vmatpush1.msra.mxu1 %v10586_v57  ;;  %6398 = vmatpush3.msra.mxu0 %v10587_v61 }
 0x740   :  { %3298 = vmatprep.subr.mxu1 %v10693_v25  ;;  %6399 = vmatprep.subr.mxu0 %v10185_v49 }
 0x741   :  { %3299 = vmatpush1.msra.mxu1 %v10589_v35  ;;  %6400 = vmatpush3.msra.mxu0 %v10590_v54 }
 0x742   :  { %3300 = vmatprep.subr.mxu1 %v10694_v34  ;;  %6401 = vmatprep.subr.mxu0 %v10185_v49 }
 0x743   :  { %3301 = vmatpush1.msra.mxu1 %v10695_v51  ;;  %6402 = vmatpush3.msra.mxu0 %v10592_v53 }
 0x744   :  { %3302 = vmatprep.subr.mxu1 %v10696_v39  ;;  %6403 = vmatprep.subr.mxu0 %v10185_v49 }
 0x745   :  { %3303 = vmatpush1.msra.mxu1 %v10594_v55  ;;  %6404 = vmatpush3.msra.mxu0 %v10490_v11 }
 0x746   :  { %3304 = vmatprep.subr.mxu1 %v10697_v29  ;;  %6405 = vmatprep.subr.mxu0 %v10185_v49 }
 0x747   :  { %3305 = vmatpush1.msra.mxu1 %v10492_v8  ;;  %6406 = vmatpush3.msra.mxu0 %v10595_v31 }
 0x748   :  { %3306 = vmatprep.subr.mxu1 %v10386_v13  ;;  %6407 = vmatprep.subr.mxu0 %v10185_v49 }
 0x749   :  { %v6907_v18 = vpop.eup %6906  ;;  %3307 = vmatpush1.msra.mxu1 %v10698_v28  ;;  %6408 = vmatpush3.msra.mxu0 %v10699_v17 }
 0x74a   :  { %v3277_v33 = vsub.f32 %v10700_v42, %v6907_v18  ;;  %3308 = vmatprep.subr.mxu1 %v10701_v4  ;;  %6409 = vmatprep.subr.mxu0 %v10185_v49  ;;  %v10708_v42 = vld [vmem:[#allocation17_spill] sm:$0xff] }
 0x74b   :  { %3309 = vmatpush1.msra.mxu1 %v10702_v27  ;;  %6410 = vmatpush3.msra.mxu0 %v10703_v43  ;;  %v10717_v43 = vld [vmem:[#allocation23_spill] sm:$0xff] }
 0x74c   :  { %v3278_v0 = vmul.f32 %v3277_v33, %v3273_v14  ;;  %3310 = vmatprep.subr.mxu1 %v10704_v40  ;;  %6411 = vmatprep.subr.mxu0 %v10185_v49  ;;  %v10709_v14 = vld [vmem:[#allocation18_spill] sm:$0xff]  ;;  %v10716_v40 = vld [vmem:[#allocation52_spill] sm:$0xff] }
 0x74d   :  { %3311 = vmatpush1.msra.mxu1 %v10705_v19  ;;  %6412 = vmatpush3.msra.mxu0 %v10706_v44  ;;  %v10710_v33 = vld [vmem:[#allocation50_spill] sm:$0xff]  ;;  %v10711_v44 = vld [vmem:[#allocation19_spill] sm:$0xff]  ;;  %v10714_v19 = vld [vmem:[#allocation21_spill] sm:$0xff] }
 0x74e   :  { %v8984_v9 = vadd.f32 %v6907_v18, %v3278_v0  ;;  %3344 = vmatprep.mubr.f32.mxu1 %v10185_v49  ;;  %6413 = vmatprep.mubr.msk.f32.mxu0 %vm7089_vm0, %v10185_v49  ;;  %v10712_v18 = vld [vmem:[#allocation20_spill] sm:$0xff]  ;;  %v10713_v0 = vld [vmem:[#allocation51_spill] sm:$0xff] }
 0x74f   :  { %3447 = vmatprep.subr.mxu1 %v10708_v42  ;;  %6416 = vmatprep.subr.mxu0 %v10185_v49  ;;  %v10715_v42 = vld [vmem:[#allocation22_spill] sm:$0xff] }
 0x750   :  { %10707 = vst [vmem:[#allocation132_spill] sm:$0xff] %v8984_v9  ;;  %3345 = vmatmul.mubr.f32.vlgmr.msra.gmra.mxu1 %v8984_v9  ;;  %6414 = vmatmul.mubr.f32.vlgmr.msra.gmra.mxu0 %v8984_v9 }
 0x751   :  { %3448 = vmatpush1.msra.mxu1 %v10709_v14  ;;  %6417 = vmatpush3.msra.mxu0 %v10710_v33  ;;  %v10718_v33 = vld [vmem:[#allocation24_spill] sm:$0xff]  ;;  %v10720_v14 = vld [vmem:[#allocation25_spill] sm:$0xff] }
 0x752   :  { %3449 = vmatprep.subr.mxu1 %v10711_v44  ;;  %6418 = vmatprep.subr.mxu0 %v10185_v49  ;;  %v10719_v44 = vld [vmem:[#allocation54_spill] sm:$0xff] }
 0x753   :  { %3450 = vmatpush1.msra.mxu1 %v10712_v18  ;;  %6419 = vmatpush3.msra.mxu0 %v10713_v0  ;;  %v10721_v0 = vld [vmem:[#allocation26_spill] sm:$0xff]  ;;  %v10723_v18 = vld [vmem:[#allocation27_spill] sm:$0xff] }
 0x754   :  { %3451 = vmatprep.subr.mxu1 %v10714_v19  ;;  %6420 = vmatprep.subr.mxu0 %v10185_v49  ;;  %v10722_v19 = vld [vmem:[#allocation56_spill] sm:$0xff] }
 0x755   :  { %3452 = vmatpush1.msra.mxu1 %v10715_v42  ;;  %6421 = vmatpush3.msra.mxu0 %v10716_v40  ;;  %v10724_v40 = vld [vmem:[#allocation28_spill] sm:$0xff]  ;;  %v10726_v42 = vld [vmem:[#allocation29_spill] sm:$0xff] }
 0x756   :  { %3453 = vmatprep.subr.mxu1 %v10717_v43  ;;  %6422 = vmatprep.subr.mxu0 %v10185_v49  ;;  %v10725_v43 = vld [vmem:[#allocation58_spill] sm:$0xff] }
 0x757   :  { %3454 = vmatpush1.msra.mxu1 %v10718_v33  ;;  %6423 = vmatpush3.msra.mxu0 %v10719_v44  ;;  %v10727_v44 = vld [vmem:[#allocation30_spill] sm:$0xff]  ;;  %v10729_v33 = vld [vmem:[#allocation31_spill] sm:$0xff] }
 0x758   :  { %3455 = vmatprep.subr.mxu1 %v10720_v14  ;;  %6424 = vmatprep.subr.mxu0 %v10185_v49  ;;  %v10728_v14 = vld [vmem:[#allocation60_spill] sm:$0xff] }
 0x759   :  { %3456 = vmatpush1.msra.mxu1 %v10721_v0  ;;  %6425 = vmatpush3.msra.mxu0 %v10722_v19  ;;  %v10730_v19 = vld [vmem:[#allocation32_spill] sm:$0xff]  ;;  %v10732_v0 = vld [vmem:[#allocation33_spill] sm:$0xff] }
 0x75a   :  { %3457 = vmatprep.subr.mxu1 %v10723_v18  ;;  %6426 = vmatprep.subr.mxu0 %v10185_v49  ;;  %v10731_v18 = vld [vmem:[#allocation62_spill] sm:$0xff] }
 0x75b   :  { %3458 = vmatpush1.msra.mxu1 %v10724_v40  ;;  %6427 = vmatpush3.msra.mxu0 %v10725_v43  ;;  %v10733_v43 = vld [vmem:[#allocation34_spill] sm:$0xff]  ;;  %v10735_v40 = vld [vmem:[#allocation35_spill] sm:$0xff] }
 0x75c   :  { %3459 = vmatprep.subr.mxu1 %v10726_v42  ;;  %6428 = vmatprep.subr.mxu0 %v10185_v49  ;;  %v10734_v42 = vld [vmem:[#allocation64_spill] sm:$0xff] }
 0x75d   :  { %3460 = vmatpush1.msra.mxu1 %v10727_v44  ;;  %6429 = vmatpush3.msra.mxu0 %v10728_v14  ;;  %v10736_v14 = vld [vmem:[#allocation36_spill] sm:$0xff]  ;;  %v10738_v44 = vld [vmem:[#allocation37_spill] sm:$0xff] }
 0x75e   :  { %3461 = vmatprep.subr.mxu1 %v10729_v33  ;;  %6430 = vmatprep.subr.mxu0 %v10185_v49  ;;  %v10737_v33 = vld [vmem:[#allocation66_spill] sm:$0xff] }
 0x75f   :  { %3462 = vmatpush1.msra.mxu1 %v10730_v19  ;;  %6431 = vmatpush3.msra.mxu0 %v10731_v18  ;;  %v10739_v18 = vld [vmem:[#allocation38_spill] sm:$0xff]  ;;  %v10741_v19 = vld [vmem:[#allocation39_spill] sm:$0xff] }
 0x760   :  { %3463 = vmatprep.subr.mxu1 %v10732_v0  ;;  %6432 = vmatprep.subr.mxu0 %v10185_v49  ;;  %v10740_v0 = vld [vmem:[#allocation68_spill] sm:$0xff] }
 0x761   :  { %3464 = vmatpush1.msra.mxu1 %v10733_v43  ;;  %6433 = vmatpush3.msra.mxu0 %v10734_v42  ;;  %v10742_v42 = vld [vmem:[#allocation40_spill] sm:$0xff]  ;;  %v10744_v43 = vld [vmem:[#allocation41_spill] sm:$0xff] }
 0x762   :  { %3465 = vmatprep.subr.mxu1 %v10735_v40  ;;  %6434 = vmatprep.subr.mxu0 %v10185_v49  ;;  %v10743_v40 = vld [vmem:[#allocation70_spill] sm:$0xff] }
 0x763   :  { %3466 = vmatpush1.msra.mxu1 %v10736_v14  ;;  %6435 = vmatpush3.msra.mxu0 %v10737_v33  ;;  %v10745_v33 = vld [vmem:[#allocation42_spill] sm:$0xff]  ;;  %v10747_v14 = vld [vmem:[#allocation43_spill] sm:$0xff] }
 0x764   :  { %3467 = vmatprep.subr.mxu1 %v10738_v44  ;;  %6436 = vmatprep.subr.mxu0 %v10185_v49  ;;  %v10746_v44 = vld [vmem:[#allocation72_spill] sm:$0xff] }
 0x765   :  { %3468 = vmatpush1.msra.mxu1 %v10739_v18  ;;  %6437 = vmatpush3.msra.mxu0 %v10740_v0  ;;  %v10748_v0 = vld [vmem:[#allocation44_spill] sm:$0xff]  ;;  %v10750_v18 = vld [vmem:[#allocation45_spill] sm:$0xff] }
 0x766   :  { %3469 = vmatprep.subr.mxu1 %v10741_v19  ;;  %6438 = vmatprep.subr.mxu0 %v10185_v49  ;;  %v10749_v19 = vld [vmem:[#allocation74_spill] sm:$0xff] }
 0x767   :  { %3470 = vmatpush1.msra.mxu1 %v10742_v42  ;;  %6439 = vmatpush3.msra.mxu0 %v10743_v40  ;;  %v10751_v40 = vld [vmem:[#allocation46_spill] sm:$0xff]  ;;  %v10753_v42 = vld [vmem:[#allocation47_spill] sm:$0xff] }
 0x768   :  { %3471 = vmatprep.subr.mxu1 %v10744_v43  ;;  %6440 = vmatprep.subr.mxu0 %v10185_v49  ;;  %v10752_v43 = vld [vmem:[#allocation76_spill] sm:$0xff] }
 0x769   :  { %3472 = vmatpush1.msra.mxu1 %v10745_v33  ;;  %6441 = vmatpush3.msra.mxu0 %v10746_v44  ;;  %v10754_v44 = vld [vmem:[#allocation48_spill] sm:$0xff]  ;;  %v10765_v33 = vld [vmem:[#allocation89_spill] sm:$0xff] }
 0x76a   :  { %3473 = vmatprep.subr.mxu1 %v10747_v14  ;;  %6442 = vmatprep.subr.mxu0 %v10185_v49  ;;  %v10755_v14 = vld [vmem:[#allocation78_spill] sm:$0xff] }
 0x76b   :  { %3474 = vmatpush1.msra.mxu1 %v10748_v0  ;;  %6443 = vmatpush3.msra.mxu0 %v10749_v19  ;;  %v10762_v19 = vld [vmem:[#allocation85_spill] sm:$0xff]  ;;  %v10763_v0 = vld [vmem:[#allocation87_spill] sm:$0xff] }
 0x76c   :  { %3475 = vmatprep.subr.mxu1 %v10750_v18  ;;  %6444 = vmatprep.subr.mxu0 %v10185_v49  ;;  %v10761_v18 = vld [vmem:[#allocation86_spill] sm:$0xff] }
 0x76d   :  { %3476 = vmatpush1.msra.mxu1 %v10751_v40  ;;  %6445 = vmatpush3.msra.mxu0 %v10752_v43  ;;  %v10756_v40 = vld [vmem:[#allocation80_spill] sm:$0xff]  ;;  %v10758_v43 = vld [vmem:[#allocation83_spill] sm:$0xff] }
 0x76e   :  { %3477 = vmatprep.subr.mxu1 %v10753_v42  ;;  %6446 = vmatprep.subr.mxu0 %v10185_v49  ;;  %v10757_v42 = vld [vmem:[#allocation81_spill] sm:$0xff] }
 0x76f   :  { %3478 = vmatpush1.msra.mxu1 %v10754_v44  ;;  %3511 = vmatprep.mubr.f32.mxu1 %v10185_v49  ;;  %v10759_v44 = vld [vmem:[#allocation82_spill] sm:$0xff] }
 0x770   :  { %6447 = vmatpush3.msra.mxu0 %v10755_v14  ;;  %6448 = vmatprep.mubr.msk.f32.mxu0 %vm7089_vm0, %v10185_v49  ;;  %v10760_v14 = vld [vmem:[#allocation84_spill] sm:$0xff] }
 0x771   :  { %3512 = vmatmul.mubr.f32.vlgmr.msra.gmra.mxu1 %v8984_v9  ;;  %6449 = vmatmul.mubr.f32.vlgmr.msra.gmra.mxu0 %v8984_v9 }
 0x772   :  { %3588 = vmatprep.subr.mxu1 %v10756_v40  ;;  %6451 = vmatprep.subr.mxu0 %v10185_v49  ;;  %v10764_v40 = vld [vmem:[#allocation88_spill] sm:$0xff] }
 0x773   :  { %3589 = vmatpush1.msra.mxu1 %v10757_v42  ;;  %6452 = vmatpush3.msra.mxu0 %v10758_v43  ;;  %v10766_v43 = vld [vmem:[#allocation90_spill] sm:$0xff]  ;;  %v10768_v42 = vld [vmem:[#allocation91_spill] sm:$0xff] }
 0x774   :  { %3590 = vmatprep.subr.mxu1 %v10759_v44  ;;  %6453 = vmatprep.subr.mxu0 %v10185_v49  ;;  %v10767_v44 = vld [vmem:[#allocation92_spill] sm:$0xff] }
 0x775   :  { %3591 = vmatpush1.msra.mxu1 %v10760_v14  ;;  %6454 = vmatpush3.msra.mxu0 %v10761_v18  ;;  %v10769_v18 = vld [vmem:[#allocation93_spill] sm:$0xff]  ;;  %v10771_v14 = vld [vmem:[#allocation94_spill] sm:$0xff] }
 0x776   :  { %3592 = vmatprep.subr.mxu1 %v10762_v19  ;;  %6455 = vmatprep.subr.mxu0 %v10185_v49  ;;  %v10770_v19 = vld [vmem:[#allocation95_spill] sm:$0xff] }
 0x777   :  { %3593 = vmatpush1.msra.mxu1 %v10763_v0  ;;  %6456 = vmatpush3.msra.mxu0 %v10764_v40  ;;  %v10772_v40 = vld [vmem:[#allocation96_spill] sm:$0xff]  ;;  %v10774_v0 = vld [vmem:[#allocation97_spill] sm:$0xff] }
 0x778   :  { %3594 = vmatprep.subr.mxu1 %v10765_v33  ;;  %6457 = vmatprep.subr.mxu0 %v10185_v49  ;;  %v10773_v33 = vld [vmem:[#allocation98_spill] sm:$0xff] }
 0x779   :  { %3595 = vmatpush1.msra.mxu1 %v10766_v43  ;;  %6458 = vmatpush3.msra.mxu0 %v10767_v44  ;;  %v10775_v44 = vld [vmem:[#allocation99_spill] sm:$0xff]  ;;  %v10777_v43 = vld [vmem:[#allocation100_spill] sm:$0xff] }
 0x77a   :  { %3596 = vmatprep.subr.mxu1 %v10768_v42  ;;  %6459 = vmatprep.subr.mxu0 %v10185_v49  ;;  %v10776_v42 = vld [vmem:[#allocation101_spill] sm:$0xff] }
 0x77b   :  { %3597 = vmatpush1.msra.mxu1 %v10769_v18  ;;  %6460 = vmatpush3.msra.mxu0 %v10770_v19  ;;  %v10778_v19 = vld [vmem:[#allocation102_spill] sm:$0xff]  ;;  %v10780_v18 = vld [vmem:[#allocation103_spill] sm:$0xff] }
 0x77c   :  { %3598 = vmatprep.subr.mxu1 %v10771_v14  ;;  %6461 = vmatprep.subr.mxu0 %v10185_v49  ;;  %v10779_v14 = vld [vmem:[#allocation104_spill] sm:$0xff] }
 0x77d   :  { %3599 = vmatpush1.msra.mxu1 %v10772_v40  ;;  %6462 = vmatpush3.msra.mxu0 %v10773_v33  ;;  %v10781_v33 = vld [vmem:[#allocation105_spill] sm:$0xff]  ;;  %v10783_v40 = vld [vmem:[#allocation106_spill] sm:$0xff] }
 0x77e   :  { %3600 = vmatprep.subr.mxu1 %v10774_v0  ;;  %6463 = vmatprep.subr.mxu0 %v10185_v49  ;;  %v10782_v0 = vld [vmem:[#allocation107_spill] sm:$0xff] }
 0x77f   :  { %3601 = vmatpush1.msra.mxu1 %v10775_v44  ;;  %6464 = vmatpush3.msra.mxu0 %v10776_v42  ;;  %v10784_v42 = vld [vmem:[#allocation108_spill] sm:$0xff]  ;;  %v10786_v44 = vld [vmem:[#allocation109_spill] sm:$0xff] }
 0x780   :  { %3602 = vmatprep.subr.mxu1 %v10777_v43  ;;  %6465 = vmatprep.subr.mxu0 %v10185_v49  ;;  %v10785_v43 = vld [vmem:[#allocation110_spill] sm:$0xff] }
 0x781   :  { %3603 = vmatpush1.msra.mxu1 %v10778_v19  ;;  %6466 = vmatpush3.msra.mxu0 %v10779_v14  ;;  %v10787_v14 = vld [vmem:[#allocation111_spill] sm:$0xff]  ;;  %v10789_v19 = vld [vmem:[#allocation112_spill] sm:$0xff] }
 0x782   :  { %3604 = vmatprep.subr.mxu1 %v10780_v18  ;;  %6467 = vmatprep.subr.mxu0 %v10185_v49  ;;  %v10788_v18 = vld [vmem:[#allocation113_spill] sm:$0xff] }
 0x783   :  { %3605 = vmatpush1.msra.mxu1 %v10781_v33  ;;  %6468 = vmatpush3.msra.mxu0 %v10782_v0  ;;  %v10790_v0 = vld [vmem:[#allocation114_spill] sm:$0xff]  ;;  %v10792_v33 = vld [vmem:[#allocation115_spill] sm:$0xff] }
 0x784   :  { %3606 = vmatprep.subr.mxu1 %v10783_v40  ;;  %6469 = vmatprep.subr.mxu0 %v10185_v49  ;;  %v10791_v40 = vld [vmem:[#allocation116_spill] sm:$0xff] }
 0x785   :  { %3607 = vmatpush1.msra.mxu1 %v10784_v42  ;;  %6470 = vmatpush3.msra.mxu0 %v10785_v43  ;;  %v10793_v43 = vld [vmem:[#allocation117_spill] sm:$0xff]  ;;  %v10795_v42 = vld [vmem:[#allocation118_spill] sm:$0xff] }
 0x786   :  { %3608 = vmatprep.subr.mxu1 %v10786_v44  ;;  %6471 = vmatprep.subr.mxu0 %v10185_v49  ;;  %v10794_v44 = vld [vmem:[#allocation119_spill] sm:$0xff] }
 0x787   :  { %3609 = vmatpush1.msra.mxu1 %v10787_v14  ;;  %6472 = vmatpush3.msra.mxu0 %v10788_v18  ;;  %v10796_v18 = vld [vmem:[#allocation120_spill] sm:$0xff]  ;;  %v10798_v14 = vld [vmem:[#allocation121_spill] sm:$0xff] }
 0x788   :  { %3610 = vmatprep.subr.mxu1 %v10789_v19  ;;  %6473 = vmatprep.subr.mxu0 %v10185_v49  ;;  %v10797_v19 = vld [vmem:[#allocation122_spill] sm:$0xff] }
 0x789   :  { %3611 = vmatpush1.msra.mxu1 %v10790_v0  ;;  %6474 = vmatpush3.msra.mxu0 %v10791_v40  ;;  %v10799_v40 = vld [vmem:[#allocation123_spill] sm:$0xff]  ;;  %v10801_v0 = vld [vmem:[#allocation124_spill] sm:$0xff] }
 0x78a   :  { %3612 = vmatprep.subr.mxu1 %v10792_v33  ;;  %6475 = vmatprep.subr.mxu0 %v10185_v49  ;;  %v10800_v33 = vld [vmem:[#allocation125_spill] sm:$0xff] }
 0x78b   :  { %3613 = vmatpush1.msra.mxu1 %v10793_v43  ;;  %6476 = vmatpush3.msra.mxu0 %v10794_v44  ;;  %v10802_v44 = vld [vmem:[#allocation126_spill] sm:$0xff] }
 0x78c   :  { %3614 = vmatprep.subr.mxu1 %v10795_v42  ;;  %6477 = vmatprep.subr.mxu0 %v10185_v49  ;;  %v10803_v42 = vld [vmem:[#allocation127_spill] sm:$0xff] }
 0x78d   :  { %3615 = vmatpush1.msra.mxu1 %v10796_v18  ;;  %6478 = vmatpush3.msra.mxu0 %v10797_v19 }
 0x78e   :  { %3616 = vmatprep.subr.mxu1 %v10798_v14  ;;  %6479 = vmatprep.subr.mxu0 %v10185_v49  ;;  %v10804_v14 = vld [vmem:[#allocation128_spill] sm:$0xff] }
 0x78f   :  { %3617 = vmatpush1.msra.mxu1 %v10799_v40  ;;  %6480 = vmatpush3.msra.mxu0 %v10800_v33 }
 0x790   :  { %3618 = vmatprep.subr.mxu1 %v10801_v0  ;;  %6481 = vmatprep.subr.mxu0 %v10185_v49 }
 0x791   :  { %3619 = vmatpush1.msra.mxu1 %v10802_v44  ;;  %6482 = vmatpush3.msra.mxu0 %v10803_v42 }
 0x792   :  { %3652 = vmatprep.mubr.f32.mxu1 %v10185_v49  ;;  %6483 = vmatprep.mubr.msk.f32.mxu0 %vm7089_vm0, %v10185_v49 }
 0x793   :  { %3745 = vmatprep.subr.mxu1 %v10804_v14  ;;  %6486 = vmatprep.subr.mxu0 %v10185_v49 }
 0x7ee   :  { %v3260_v40 = vpop.f32.mrf.mxu0  ;;  %v3189_v33 = vpop.f32.mrf.mxu1 }
 0x7ef   :  { %v3190_v27 = vadd.f32 %v3189_v33, %v8212_v37  ;;  %v3261_v29 = vadd.f32 %v3260_v40, %v8228_v60 }
 0x7f0   :  { %v6380_v19 = vpop.f32.mrf.mxu0  ;;  %v3191_v18 = vpop.f32.mrf.mxu1 }
 0x7f1   :  { %v3192_v14 = vadd.f32 %v3191_v18, %v10457_v30  ;;  %v10805_v18 = vld [vmem:[#allocation69_spill] sm:$0xff] }
 0x810   :  { %v3346_v0 = vpop.f32.mrf.mxu1  ;;  %v3417_v43 = vpop.f32.mrf.mxu0 }
 0x811   :  { %v3347_v44 = vadd.f32 %v3346_v0, %v10455_v23  ;;  %v3418_v33 = vadd.f32 %v3417_v43, %v8231_v56 }
 0x812   :  { %v6415_v42 = vpop.f32.mrf.mxu0  ;;  %v3348_v28 = vpop.f32.mrf.mxu1 }
 0x813   :  { %v3421_v4 = vadd.f32 %v3347_v44, %v3190_v27  ;;  %v3349_v9 = vadd.f32 %v3348_v28, %v10456_v26 }
 0x815   :  { %v3423_v17 = vmul.f32 0.5, %v3421_v4  ;;  %v3422_v13 = vadd.f32 %v3349_v9, %v3192_v14 }
 0x817   :  { %6908 = vtanh.f32 %v3423_v17  ;;  %v3424_v31 = vmul.f32 0.5, %v3422_v13 }
 0x819   :  { %6910 = vtanh.f32 %v3424_v31 }
 0x824   :  { %v6909_v19 = vpop.eup %6908 }
 0x825   :  { %v3427_v8 = vmul.f32 0.5, %v6909_v19 }
 0x826   :  { %v6911_v27 = vpop.eup %6910 }
 0x827   :  { %v3429_v11 = vadd.f32 0.5, %v3427_v8  ;;  %v3428_v14 = vmul.f32 0.5, %v6911_v27 }
 0x829   :  { %v3431_v0 = vmul.f32 %v3429_v11, %v3261_v29  ;;  %v3430_v8 = vadd.f32 0.5, %v3428_v14 }
 0x82b   :  { %v3432_v42 = vadd.f32 %v3431_v0, %v3418_v33  ;;  %v10807_v33 = vld [vmem:[#allocation71_spill] sm:$0xff] }
 0x82d   :  { %6912 = vtanh.f32 %v3432_v42 }
 0x831   :  { %v3513_v44 = vpop.f32.mrf.mxu1  ;;  %v3584_v17 = vpop.f32.mrf.mxu0 }
 0x832   :  { %v3514_v4 = vadd.f32 %v3513_v44, %v8032_v36 }
 0x833   :  { %v6450_v28 = vpop.f32.mrf.mxu0  ;;  %v3515_v19 = vpop.f32.mrf.mxu1 }
 0x834   :  { %v3729_v9 = vadd.f32 %v3514_v4, %v10805_v18  ;;  %v3516_v11 = vadd.f32 %v3515_v19, %v8054_v41  ;;  %v3585_v28 = vadd.f32 %v3584_v17, %v10465_v7  ;;  %v10808_v17 = vld [vmem:[#allocation183_spill] sm:$0xff] }
 0x835   :  { %v10809_v19 = vld [vmem:[#allocation163_spill] sm:$0xff] }
 0x836   :  { %v3731_v13 = vmul.f32 0.5, %v3729_v9  ;;  %v3730_v0 = vadd.f32 %v3516_v11, %v10807_v33 }
 0x838   :  { %6914 = vtanh.f32 %v3731_v13  ;;  %v3732_v42 = vmul.f32 0.5, %v3730_v0  ;;  %v10814_v0 = vld [vmem:[#allocation132_spill] sm:$0xff] }
 0x83a   :  { %v6913_v40 = vpop.eup %6912  ;;  %6916 = vtanh.f32 %v3732_v42 }
 0x83b   :  { %v3434_v31 = vsub.f32 %v8914_v22, %v6913_v40  ;;  %v10828_v22 = vld [vmem:[#allocation20_spill] sm:$0xff] }
 0x83d   :  { %v3435_v29 = vmul.f32 %v3434_v31, %v3430_v8  ;;  %v10811_v8 = vld [vmem:[#allocation165_spill] sm:$0xff]  ;;  %v10812_v31 = vld [vmem:[#allocation166_spill] sm:$0xff] }
 0x83f   :  { %v9139_v43 = vadd.f32 %v6913_v40, %v3435_v29  ;;  %v10810_v40 = vld [vmem:[#allocation164_spill] sm:$0xff]  ;;  %v10813_v29 = vld [vmem:[#allocation167_spill] sm:$0xff] }
 0x841   :  { %10806 = vst [vmem:[#allocation133_spill] sm:$0xff] %v9139_v43  ;;  %3653 = vmatmul.mubr.f32.vlgmr.msra.gmra.mxu1 %v9139_v43  ;;  %6484 = vmatmul.mubr.f32.vlgmr.msra.gmra.mxu0 %v9139_v43 }
 0x842   :  { %3746 = vmatpush1.msra.mxu1 %v10347_v1  ;;  %6487 = vmatpush3.msra.mxu0 %v10348_v32 }
 0x843   :  { %3747 = vmatprep.subr.mxu1 %v10349_v62  ;;  %6488 = vmatprep.subr.mxu0 %v10185_v49 }
 0x844   :  { %3748 = vmatpush1.msra.mxu1 %v10350_v52  ;;  %6489 = vmatpush3.msra.mxu0 %v10351_v12 }
 0x845   :  { %v6915_v44 = vpop.eup %6914  ;;  %3749 = vmatprep.subr.mxu1 %v10352_v45  ;;  %6490 = vmatprep.subr.mxu0 %v10185_v49 }
 0x846   :  { %v3735_v4 = vmul.f32 0.5, %v6915_v44  ;;  %3750 = vmatpush1.msra.mxu1 %v10461_v16  ;;  %6491 = vmatpush3.msra.mxu0 %v10462_v10  ;;  %v10815_v44 = vld [vmem:[#allocation168_spill] sm:$0xff] }
 0x847   :  { %3751 = vmatprep.subr.mxu1 %v10463_v21  ;;  %6492 = vmatprep.subr.mxu0 %v10185_v49  ;;  %v6917_v13 = vpop.eup %6916 }
 0x848   :  { %v3737_v27 = vadd.f32 0.5, %v3735_v4  ;;  %3752 = vmatpush1.msra.mxu1 %v10356_v6  ;;  %6493 = vmatpush3.msra.mxu0 %v10464_v5  ;;  %v3736_v14 = vmul.f32 0.5, %v6917_v13  ;;  %v10816_v4 = vld [vmem:[#allocation169_spill] sm:$0xff] }
 0x849   :  { %3753 = vmatprep.subr.mxu1 %v10466_v59  ;;  %6494 = vmatprep.subr.mxu0 %v10185_v49 }
 0x84a   :  { %v3739_v18 = vmul.f32 %v3737_v27, %v3585_v28  ;;  %3754 = vmatpush1.msra.mxu1 %v10467_v2  ;;  %6495 = vmatpush3.msra.mxu0 %v10468_v3  ;;  %v3738_v33 = vadd.f32 0.5, %v3736_v14  ;;  %v10817_v28 = vld [vmem:[#allocation170_spill] sm:$0xff] }
 0x84b   :  { %3755 = vmatprep.subr.mxu1 %v10469_v20  ;;  %6496 = vmatprep.subr.mxu0 %v10185_v49  ;;  %v10822_v14 = vld [vmem:[#allocation174_spill] sm:$0xff] }
 0x84c   :  { %v3740_v9 = vadd.f32 %v3739_v18, %v10808_v17  ;;  %3756 = vmatpush1.msra.mxu1 %v10577_v50  ;;  %6497 = vmatpush3.msra.mxu0 %v10578_v38  ;;  %v10818_v18 = vld [vmem:[#allocation171_spill] sm:$0xff]  ;;  %v10819_v17 = vld [vmem:[#allocation172_spill] sm:$0xff] }
 0x84d   :  { %3757 = vmatprep.subr.mxu1 %v10579_v63  ;;  %6498 = vmatprep.subr.mxu0 %v10185_v49 }
 0x84e   :  { %6918 = vtanh.f32 %v3740_v9  ;;  %3758 = vmatpush1.msra.mxu1 %v10580_v58  ;;  %6499 = vmatpush3.msra.mxu0 %v10581_v48  ;;  %v10820_v9 = vld [vmem:[#allocation173_spill] sm:$0xff] }
 0x84f   :  { %3759 = vmatprep.subr.mxu1 %v10582_v24  ;;  %6500 = vmatprep.subr.mxu0 %v10185_v49 }
 0x850   :  { %3760 = vmatpush1.msra.mxu1 %v10583_v47  ;;  %6501 = vmatpush3.msra.mxu0 %v10584_v15 }
 0x851   :  { %3761 = vmatprep.subr.mxu1 %v10585_v46  ;;  %6502 = vmatprep.subr.mxu0 %v10185_v49 }
 0x852   :  { %3762 = vmatpush1.msra.mxu1 %v10586_v57  ;;  %6503 = vmatpush3.msra.mxu0 %v10587_v61 }
 0x853   :  { %3763 = vmatprep.subr.mxu1 %v10693_v25  ;;  %6504 = vmatprep.subr.mxu0 %v10185_v49 }
 0x854   :  { %3764 = vmatpush1.msra.mxu1 %v10589_v35  ;;  %6505 = vmatpush3.msra.mxu0 %v10590_v54 }
 0x855   :  { %3765 = vmatprep.subr.mxu1 %v10694_v34  ;;  %6506 = vmatprep.subr.mxu0 %v10185_v49 }
 0x856   :  { %3766 = vmatpush1.msra.mxu1 %v10695_v51  ;;  %6507 = vmatpush3.msra.mxu0 %v10592_v53 }
 0x857   :  { %3767 = vmatprep.subr.mxu1 %v10696_v39  ;;  %6508 = vmatprep.subr.mxu0 %v10185_v49 }
 0x858   :  { %3768 = vmatpush1.msra.mxu1 %v10594_v55  ;;  %6509 = vmatpush3.msra.mxu0 %v10809_v19 }
 0x859   :  { %3769 = vmatprep.subr.mxu1 %v10810_v40  ;;  %6510 = vmatprep.subr.mxu0 %v10185_v49 }
 0x85a   :  { %3770 = vmatpush1.msra.mxu1 %v10811_v8  ;;  %6511 = vmatpush3.msra.mxu0 %v10812_v31 }
 0x85b   :  { %v6919_v11 = vpop.eup %6918  ;;  %3771 = vmatprep.subr.mxu1 %v10813_v29  ;;  %6512 = vmatprep.subr.mxu0 %v10185_v49 }
 0x85c   :  { %v3742_v42 = vsub.f32 %v10814_v0, %v6919_v11  ;;  %3772 = vmatpush1.msra.mxu1 %v10815_v44  ;;  %6513 = vmatpush3.msra.mxu0 %v10816_v4  ;;  %v10823_v0 = vld [vmem:[#allocation175_spill] sm:$0xff] }
 0x85d   :  { %3773 = vmatprep.subr.mxu1 %v10817_v28  ;;  %6514 = vmatprep.subr.mxu0 %v10185_v49 }
 0x85e   :  { %v3743_v27 = vmul.f32 %v3742_v42, %v3738_v33  ;;  %3774 = vmatpush1.msra.mxu1 %v10818_v18  ;;  %6515 = vmatpush3.msra.mxu0 %v10819_v17  ;;  %v10824_v33 = vld [vmem:[#allocation17_spill] sm:$0xff]  ;;  %v10825_v42 = vld [vmem:[#allocation18_spill] sm:$0xff]  ;;  %v10833_v17 = vld [vmem:[#allocation23_spill] sm:$0xff] }
 0x85f   :  { %3775 = vmatprep.subr.mxu1 %v10820_v9  ;;  %6516 = vmatprep.subr.mxu0 %v10185_v49  ;;  %v10831_v9 = vld [vmem:[#allocation22_spill] sm:$0xff] }
 0x860   :  { %v9207_v13 = vadd.f32 %v6919_v11, %v3743_v27  ;;  %3776 = vmatpush1.msra.mxu1 %v10822_v14  ;;  %3809 = vmatprep.mubr.f32.mxu1 %v10185_v49  ;;  %v10826_v11 = vld [vmem:[#allocation50_spill] sm:$0xff]  ;;  %v10827_v27 = vld [vmem:[#allocation19_spill] sm:$0xff]  ;;  %v10830_v14 = vld [vmem:[#allocation21_spill] sm:$0xff] }
 0x861   :  { %6517 = vmatpush3.msra.mxu0 %v10823_v0  ;;  %6518 = vmatprep.mubr.msk.f32.mxu0 %vm7089_vm0, %v10185_v49  ;;  %v10829_v0 = vld [vmem:[#allocation51_spill] sm:$0xff] }
 0x862   :  { %10821 = vst [vmem:[#allocation134_spill] sm:$0xff] %v9207_v13  ;;  %3810 = vmatmul.mubr.f32.vlgmr.msra.gmra.mxu1 %v9207_v13  ;;  %6519 = vmatmul.mubr.f32.vlgmr.msra.gmra.mxu0 %v9207_v13 }
 0x863   :  { %3912 = vmatprep.subr.mxu1 %v10824_v33  ;;  %6521 = vmatprep.subr.mxu0 %v10185_v49  ;;  %v10832_v33 = vld [vmem:[#allocation52_spill] sm:$0xff] }
 0x864   :  { %3913 = vmatpush1.msra.mxu1 %v10825_v42  ;;  %6522 = vmatpush3.msra.mxu0 %v10826_v11  ;;  %v10834_v11 = vld [vmem:[#allocation24_spill] sm:$0xff]  ;;  %v10836_v42 = vld [vmem:[#allocation25_spill] sm:$0xff] }
 0x865   :  { %3914 = vmatprep.subr.mxu1 %v10827_v27  ;;  %6523 = vmatprep.subr.mxu0 %v10185_v49  ;;  %v10835_v27 = vld [vmem:[#allocation54_spill] sm:$0xff] }
 0x866   :  { %3915 = vmatpush1.msra.mxu1 %v10828_v22  ;;  %6524 = vmatpush3.msra.mxu0 %v10829_v0  ;;  %v10837_v0 = vld [vmem:[#allocation26_spill] sm:$0xff]  ;;  %v10839_v22 = vld [vmem:[#allocation27_spill] sm:$0xff] }
 0x867   :  { %3916 = vmatprep.subr.mxu1 %v10830_v14  ;;  %6525 = vmatprep.subr.mxu0 %v10185_v49  ;;  %v10838_v14 = vld [vmem:[#allocation56_spill] sm:$0xff] }
 0x868   :  { %3917 = vmatpush1.msra.mxu1 %v10831_v9  ;;  %6526 = vmatpush3.msra.mxu0 %v10832_v33  ;;  %v10840_v33 = vld [vmem:[#allocation28_spill] sm:$0xff]  ;;  %v10842_v9 = vld [vmem:[#allocation29_spill] sm:$0xff] }
 0x869   :  { %3918 = vmatprep.subr.mxu1 %v10833_v17  ;;  %6527 = vmatprep.subr.mxu0 %v10185_v49  ;;  %v10841_v17 = vld [vmem:[#allocation58_spill] sm:$0xff] }
 0x86a   :  { %3919 = vmatpush1.msra.mxu1 %v10834_v11  ;;  %6528 = vmatpush3.msra.mxu0 %v10835_v27  ;;  %v10843_v27 = vld [vmem:[#allocation30_spill] sm:$0xff]  ;;  %v10845_v11 = vld [vmem:[#allocation31_spill] sm:$0xff] }
 0x86b   :  { %3920 = vmatprep.subr.mxu1 %v10836_v42  ;;  %6529 = vmatprep.subr.mxu0 %v10185_v49  ;;  %v10844_v42 = vld [vmem:[#allocation60_spill] sm:$0xff] }
 0x86c   :  { %3921 = vmatpush1.msra.mxu1 %v10837_v0  ;;  %6530 = vmatpush3.msra.mxu0 %v10838_v14  ;;  %v10846_v14 = vld [vmem:[#allocation32_spill] sm:$0xff]  ;;  %v10848_v0 = vld [vmem:[#allocation33_spill] sm:$0xff] }
 0x86d   :  { %3922 = vmatprep.subr.mxu1 %v10839_v22  ;;  %6531 = vmatprep.subr.mxu0 %v10185_v49  ;;  %v10847_v22 = vld [vmem:[#allocation62_spill] sm:$0xff] }
 0x86e   :  { %3923 = vmatpush1.msra.mxu1 %v10840_v33  ;;  %6532 = vmatpush3.msra.mxu0 %v10841_v17  ;;  %v10849_v17 = vld [vmem:[#allocation34_spill] sm:$0xff]  ;;  %v10851_v33 = vld [vmem:[#allocation35_spill] sm:$0xff] }
 0x86f   :  { %3924 = vmatprep.subr.mxu1 %v10842_v9  ;;  %6533 = vmatprep.subr.mxu0 %v10185_v49  ;;  %v10850_v9 = vld [vmem:[#allocation64_spill] sm:$0xff] }
 0x870   :  { %3925 = vmatpush1.msra.mxu1 %v10843_v27  ;;  %6534 = vmatpush3.msra.mxu0 %v10844_v42  ;;  %v10852_v42 = vld [vmem:[#allocation36_spill] sm:$0xff]  ;;  %v10854_v27 = vld [vmem:[#allocation37_spill] sm:$0xff] }
 0x871   :  { %3926 = vmatprep.subr.mxu1 %v10845_v11  ;;  %6535 = vmatprep.subr.mxu0 %v10185_v49  ;;  %v10853_v11 = vld [vmem:[#allocation66_spill] sm:$0xff] }
 0x872   :  { %3927 = vmatpush1.msra.mxu1 %v10846_v14  ;;  %6536 = vmatpush3.msra.mxu0 %v10847_v22  ;;  %v10855_v22 = vld [vmem:[#allocation38_spill] sm:$0xff]  ;;  %v10857_v14 = vld [vmem:[#allocation39_spill] sm:$0xff] }
 0x873   :  { %3928 = vmatprep.subr.mxu1 %v10848_v0  ;;  %6537 = vmatprep.subr.mxu0 %v10185_v49  ;;  %v10856_v0 = vld [vmem:[#allocation68_spill] sm:$0xff] }
 0x874   :  { %3929 = vmatpush1.msra.mxu1 %v10849_v17  ;;  %6538 = vmatpush3.msra.mxu0 %v10850_v9  ;;  %v10858_v9 = vld [vmem:[#allocation40_spill] sm:$0xff]  ;;  %v10860_v17 = vld [vmem:[#allocation41_spill] sm:$0xff] }
 0x875   :  { %3930 = vmatprep.subr.mxu1 %v10851_v33  ;;  %6539 = vmatprep.subr.mxu0 %v10185_v49  ;;  %v10859_v33 = vld [vmem:[#allocation70_spill] sm:$0xff] }
 0x876   :  { %3931 = vmatpush1.msra.mxu1 %v10852_v42  ;;  %6540 = vmatpush3.msra.mxu0 %v10853_v11  ;;  %v10861_v11 = vld [vmem:[#allocation42_spill] sm:$0xff]  ;;  %v10863_v42 = vld [vmem:[#allocation43_spill] sm:$0xff] }
 0x877   :  { %3932 = vmatprep.subr.mxu1 %v10854_v27  ;;  %6541 = vmatprep.subr.mxu0 %v10185_v49  ;;  %v10862_v27 = vld [vmem:[#allocation72_spill] sm:$0xff] }
 0x878   :  { %3933 = vmatpush1.msra.mxu1 %v10855_v22  ;;  %6542 = vmatpush3.msra.mxu0 %v10856_v0  ;;  %v10864_v0 = vld [vmem:[#allocation44_spill] sm:$0xff]  ;;  %v10866_v22 = vld [vmem:[#allocation45_spill] sm:$0xff] }
 0x879   :  { %3934 = vmatprep.subr.mxu1 %v10857_v14  ;;  %6543 = vmatprep.subr.mxu0 %v10185_v49  ;;  %v10865_v14 = vld [vmem:[#allocation74_spill] sm:$0xff] }
 0x87a   :  { %3935 = vmatpush1.msra.mxu1 %v10858_v9  ;;  %6544 = vmatpush3.msra.mxu0 %v10859_v33  ;;  %v10867_v33 = vld [vmem:[#allocation46_spill] sm:$0xff]  ;;  %v10869_v9 = vld [vmem:[#allocation47_spill] sm:$0xff] }
 0x87b   :  { %3936 = vmatprep.subr.mxu1 %v10860_v17  ;;  %6545 = vmatprep.subr.mxu0 %v10185_v49  ;;  %v10868_v17 = vld [vmem:[#allocation76_spill] sm:$0xff] }
 0x87c   :  { %3937 = vmatpush1.msra.mxu1 %v10861_v11  ;;  %6546 = vmatpush3.msra.mxu0 %v10862_v27  ;;  %v10870_v27 = vld [vmem:[#allocation48_spill] sm:$0xff]  ;;  %v10881_v11 = vld [vmem:[#allocation89_spill] sm:$0xff] }
 0x87d   :  { %3938 = vmatprep.subr.mxu1 %v10863_v42  ;;  %6547 = vmatprep.subr.mxu0 %v10185_v49  ;;  %v10871_v42 = vld [vmem:[#allocation78_spill] sm:$0xff] }
 0x87e   :  { %3939 = vmatpush1.msra.mxu1 %v10864_v0  ;;  %6548 = vmatpush3.msra.mxu0 %v10865_v14  ;;  %v10878_v14 = vld [vmem:[#allocation85_spill] sm:$0xff]  ;;  %v10879_v0 = vld [vmem:[#allocation87_spill] sm:$0xff] }
 0x87f   :  { %3940 = vmatprep.subr.mxu1 %v10866_v22  ;;  %6549 = vmatprep.subr.mxu0 %v10185_v49  ;;  %v10877_v22 = vld [vmem:[#allocation86_spill] sm:$0xff] }
 0x880   :  { %3941 = vmatpush1.msra.mxu1 %v10867_v33  ;;  %6550 = vmatpush3.msra.mxu0 %v10868_v17  ;;  %v10872_v33 = vld [vmem:[#allocation80_spill] sm:$0xff]  ;;  %v10874_v17 = vld [vmem:[#allocation83_spill] sm:$0xff] }
 0x881   :  { %3942 = vmatprep.subr.mxu1 %v10869_v9  ;;  %6551 = vmatprep.subr.mxu0 %v10185_v49  ;;  %v10873_v9 = vld [vmem:[#allocation81_spill] sm:$0xff] }
 0x882   :  { %3943 = vmatpush1.msra.mxu1 %v10870_v27  ;;  %3976 = vmatprep.mubr.f32.mxu1 %v10185_v49  ;;  %v10875_v27 = vld [vmem:[#allocation82_spill] sm:$0xff] }
 0x883   :  { %6552 = vmatpush3.msra.mxu0 %v10871_v42  ;;  %6553 = vmatprep.mubr.msk.f32.mxu0 %vm7089_vm0, %v10185_v49  ;;  %v10876_v42 = vld [vmem:[#allocation84_spill] sm:$0xff] }
 0x884   :  { %3977 = vmatmul.mubr.f32.vlgmr.msra.gmra.mxu1 %v9207_v13  ;;  %6554 = vmatmul.mubr.f32.vlgmr.msra.gmra.mxu0 %v9207_v13 }
 0x885   :  { %4053 = vmatprep.subr.mxu1 %v10872_v33  ;;  %6556 = vmatprep.subr.mxu0 %v10185_v49  ;;  %v10880_v33 = vld [vmem:[#allocation88_spill] sm:$0xff] }
 0x886   :  { %4054 = vmatpush1.msra.mxu1 %v10873_v9  ;;  %6557 = vmatpush3.msra.mxu0 %v10874_v17  ;;  %v10882_v17 = vld [vmem:[#allocation90_spill] sm:$0xff]  ;;  %v10884_v9 = vld [vmem:[#allocation91_spill] sm:$0xff] }
 0x887   :  { %4055 = vmatprep.subr.mxu1 %v10875_v27  ;;  %6558 = vmatprep.subr.mxu0 %v10185_v49  ;;  %v10883_v27 = vld [vmem:[#allocation92_spill] sm:$0xff] }
 0x888   :  { %4056 = vmatpush1.msra.mxu1 %v10876_v42  ;;  %6559 = vmatpush3.msra.mxu0 %v10877_v22  ;;  %v10885_v22 = vld [vmem:[#allocation93_spill] sm:$0xff]  ;;  %v10887_v42 = vld [vmem:[#allocation94_spill] sm:$0xff] }
 0x889   :  { %4057 = vmatprep.subr.mxu1 %v10878_v14  ;;  %6560 = vmatprep.subr.mxu0 %v10185_v49  ;;  %v10886_v14 = vld [vmem:[#allocation95_spill] sm:$0xff] }
 0x88a   :  { %4058 = vmatpush1.msra.mxu1 %v10879_v0  ;;  %6561 = vmatpush3.msra.mxu0 %v10880_v33  ;;  %v10888_v33 = vld [vmem:[#allocation96_spill] sm:$0xff]  ;;  %v10890_v0 = vld [vmem:[#allocation97_spill] sm:$0xff] }
 0x88b   :  { %4059 = vmatprep.subr.mxu1 %v10881_v11  ;;  %6562 = vmatprep.subr.mxu0 %v10185_v49  ;;  %v10889_v11 = vld [vmem:[#allocation98_spill] sm:$0xff] }
 0x88c   :  { %4060 = vmatpush1.msra.mxu1 %v10882_v17  ;;  %6563 = vmatpush3.msra.mxu0 %v10883_v27  ;;  %v10891_v27 = vld [vmem:[#allocation99_spill] sm:$0xff]  ;;  %v10893_v17 = vld [vmem:[#allocation100_spill] sm:$0xff] }
 0x88d   :  { %4061 = vmatprep.subr.mxu1 %v10884_v9  ;;  %6564 = vmatprep.subr.mxu0 %v10185_v49  ;;  %v10892_v9 = vld [vmem:[#allocation101_spill] sm:$0xff] }
 0x88e   :  { %4062 = vmatpush1.msra.mxu1 %v10885_v22  ;;  %6565 = vmatpush3.msra.mxu0 %v10886_v14  ;;  %v10894_v14 = vld [vmem:[#allocation102_spill] sm:$0xff]  ;;  %v10896_v22 = vld [vmem:[#allocation103_spill] sm:$0xff] }
 0x88f   :  { %4063 = vmatprep.subr.mxu1 %v10887_v42  ;;  %6566 = vmatprep.subr.mxu0 %v10185_v49  ;;  %v10895_v42 = vld [vmem:[#allocation104_spill] sm:$0xff] }
 0x890   :  { %4064 = vmatpush1.msra.mxu1 %v10888_v33  ;;  %6567 = vmatpush3.msra.mxu0 %v10889_v11  ;;  %v10897_v11 = vld [vmem:[#allocation105_spill] sm:$0xff]  ;;  %v10899_v33 = vld [vmem:[#allocation106_spill] sm:$0xff] }
 0x891   :  { %4065 = vmatprep.subr.mxu1 %v10890_v0  ;;  %6568 = vmatprep.subr.mxu0 %v10185_v49  ;;  %v10898_v0 = vld [vmem:[#allocation107_spill] sm:$0xff] }
 0x892   :  { %4066 = vmatpush1.msra.mxu1 %v10891_v27  ;;  %6569 = vmatpush3.msra.mxu0 %v10892_v9  ;;  %v10900_v9 = vld [vmem:[#allocation108_spill] sm:$0xff]  ;;  %v10902_v27 = vld [vmem:[#allocation109_spill] sm:$0xff] }
 0x893   :  { %4067 = vmatprep.subr.mxu1 %v10893_v17  ;;  %6570 = vmatprep.subr.mxu0 %v10185_v49  ;;  %v10901_v17 = vld [vmem:[#allocation110_spill] sm:$0xff] }
 0x894   :  { %4068 = vmatpush1.msra.mxu1 %v10894_v14  ;;  %6571 = vmatpush3.msra.mxu0 %v10895_v42  ;;  %v10903_v42 = vld [vmem:[#allocation111_spill] sm:$0xff]  ;;  %v10905_v14 = vld [vmem:[#allocation112_spill] sm:$0xff] }
 0x895   :  { %4069 = vmatprep.subr.mxu1 %v10896_v22  ;;  %6572 = vmatprep.subr.mxu0 %v10185_v49  ;;  %v10904_v22 = vld [vmem:[#allocation113_spill] sm:$0xff] }
 0x896   :  { %4070 = vmatpush1.msra.mxu1 %v10897_v11  ;;  %6573 = vmatpush3.msra.mxu0 %v10898_v0  ;;  %v10906_v0 = vld [vmem:[#allocation114_spill] sm:$0xff]  ;;  %v10908_v11 = vld [vmem:[#allocation115_spill] sm:$0xff] }
 0x897   :  { %4071 = vmatprep.subr.mxu1 %v10899_v33  ;;  %6574 = vmatprep.subr.mxu0 %v10185_v49  ;;  %v10907_v33 = vld [vmem:[#allocation116_spill] sm:$0xff] }
 0x898   :  { %4072 = vmatpush1.msra.mxu1 %v10900_v9  ;;  %6575 = vmatpush3.msra.mxu0 %v10901_v17  ;;  %v10909_v17 = vld [vmem:[#allocation117_spill] sm:$0xff]  ;;  %v10911_v9 = vld [vmem:[#allocation118_spill] sm:$0xff] }
 0x899   :  { %4073 = vmatprep.subr.mxu1 %v10902_v27  ;;  %6576 = vmatprep.subr.mxu0 %v10185_v49  ;;  %v10910_v27 = vld [vmem:[#allocation119_spill] sm:$0xff] }
 0x89a   :  { %4074 = vmatpush1.msra.mxu1 %v10903_v42  ;;  %6577 = vmatpush3.msra.mxu0 %v10904_v22  ;;  %v10912_v22 = vld [vmem:[#allocation120_spill] sm:$0xff]  ;;  %v10914_v42 = vld [vmem:[#allocation121_spill] sm:$0xff] }
 0x89b   :  { %4075 = vmatprep.subr.mxu1 %v10905_v14  ;;  %6578 = vmatprep.subr.mxu0 %v10185_v49  ;;  %v10913_v14 = vld [vmem:[#allocation122_spill] sm:$0xff] }
 0x89c   :  { %4076 = vmatpush1.msra.mxu1 %v10906_v0  ;;  %6579 = vmatpush3.msra.mxu0 %v10907_v33  ;;  %v10915_v33 = vld [vmem:[#allocation123_spill] sm:$0xff]  ;;  %v10917_v0 = vld [vmem:[#allocation124_spill] sm:$0xff] }
 0x89d   :  { %4077 = vmatprep.subr.mxu1 %v10908_v11  ;;  %6580 = vmatprep.subr.mxu0 %v10185_v49  ;;  %v10916_v11 = vld [vmem:[#allocation125_spill] sm:$0xff] }
 0x89e   :  { %4078 = vmatpush1.msra.mxu1 %v10909_v17  ;;  %6581 = vmatpush3.msra.mxu0 %v10910_v27  ;;  %v10918_v27 = vld [vmem:[#allocation126_spill] sm:$0xff] }
 0x89f   :  { %4079 = vmatprep.subr.mxu1 %v10911_v9  ;;  %6582 = vmatprep.subr.mxu0 %v10185_v49  ;;  %v10919_v9 = vld [vmem:[#allocation127_spill] sm:$0xff] }
 0x8a0   :  { %4080 = vmatpush1.msra.mxu1 %v10912_v22  ;;  %6583 = vmatpush3.msra.mxu0 %v10913_v14 }
 0x8a1   :  { %4081 = vmatprep.subr.mxu1 %v10914_v42  ;;  %6584 = vmatprep.subr.mxu0 %v10185_v49  ;;  %v10920_v42 = vld [vmem:[#allocation128_spill] sm:$0xff] }
 0x8a2   :  { %4082 = vmatpush1.msra.mxu1 %v10915_v33  ;;  %6585 = vmatpush3.msra.mxu0 %v10916_v11 }
 0x8a3   :  { %4083 = vmatprep.subr.mxu1 %v10917_v0  ;;  %6586 = vmatprep.subr.mxu0 %v10185_v49 }
 0x8a4   :  { %4084 = vmatpush1.msra.mxu1 %v10918_v27  ;;  %6587 = vmatpush3.msra.mxu0 %v10919_v9 }
 0x8a5   :  { %4117 = vmatprep.mubr.f32.mxu1 %v10185_v49  ;;  %6588 = vmatprep.mubr.msk.f32.mxu0 %vm7089_vm0, %v10185_v49 }
 0x8a6   :  { %4210 = vmatprep.subr.mxu1 %v10920_v42  ;;  %6591 = vmatprep.subr.mxu0 %v10185_v49 }
 0x901   :  { %v3725_v33 = vpop.f32.mrf.mxu0  ;;  %v3654_v11 = vpop.f32.mrf.mxu1 }
 0x902   :  { %v3655_v18 = vadd.f32 %v3654_v11, %v8212_v37  ;;  %v3726_v40 = vadd.f32 %v3725_v33, %v8228_v60 }
 0x903   :  { %v6485_v14 = vpop.f32.mrf.mxu0  ;;  %v3656_v22 = vpop.f32.mrf.mxu1 }
 0x904   :  { %v3657_v42 = vadd.f32 %v3656_v22, %v10457_v30  ;;  %v10921_v22 = vld [vmem:[#allocation73_spill] sm:$0xff] }
 0x922   :  { %v3811_v0 = vpop.f32.mrf.mxu1  ;;  %v3882_v17 = vpop.f32.mrf.mxu0 }
 0x923   :  { %v3812_v27 = vadd.f32 %v3811_v0, %v10455_v23  ;;  %v3883_v11 = vadd.f32 %v3882_v17, %v8231_v56 }
 0x924   :  { %v6520_v9 = vpop.f32.mrf.mxu0  ;;  %v3813_v4 = vpop.f32.mrf.mxu1 }
 0x925   :  { %v3886_v28 = vadd.f32 %v3812_v27, %v3655_v18  ;;  %v3814_v44 = vadd.f32 %v3813_v4, %v10456_v26 }
 0x927   :  { %v3888_v13 = vmul.f32 0.5, %v3886_v28  ;;  %v3887_v29 = vadd.f32 %v3814_v44, %v3657_v42 }
 0x929   :  { %6920 = vtanh.f32 %v3888_v13  ;;  %v3889_v31 = vmul.f32 0.5, %v3887_v29 }
 0x92b   :  { %6922 = vtanh.f32 %v3889_v31 }
 0x936   :  { %v6921_v14 = vpop.eup %6920 }
 0x937   :  { %v3892_v8 = vmul.f32 0.5, %v6921_v14 }
 0x938   :  { %v6923_v4 = vpop.eup %6922 }
 0x939   :  { %v3894_v19 = vadd.f32 0.5, %v3892_v8  ;;  %v3893_v29 = vmul.f32 0.5, %v6923_v4 }
 0x93b   :  { %v3896_v0 = vmul.f32 %v3894_v19, %v3726_v40  ;;  %v3895_v8 = vadd.f32 0.5, %v3893_v29 }
 0x93d   :  { %v3897_v9 = vadd.f32 %v3896_v0, %v3883_v11  ;;  %v10922_v11 = vld [vmem:[#allocation75_spill] sm:$0xff] }
 0x93f   :  { %6924 = vtanh.f32 %v3897_v9 }
 0x944   :  { %v3978_v28 = vpop.f32.mrf.mxu1  ;;  %v4049_v18 = vpop.f32.mrf.mxu0 }
 0x945   :  { %v3979_v13 = vadd.f32 %v3978_v28, %v8032_v36  ;;  %v4050_v4 = vadd.f32 %v4049_v18, %v10465_v7  ;;  %v10923_v18 = vld [vmem:[#allocation180_spill] sm:$0xff] }
 0x946   :  { %v6555_v27 = vpop.f32.mrf.mxu0  ;;  %v3980_v33 = vpop.f32.mrf.mxu1 }
 0x947   :  { %v4194_v44 = vadd.f32 %v3979_v13, %v10921_v22  ;;  %v3981_v19 = vadd.f32 %v3980_v33, %v8054_v41  ;;  %v10925_v33 = vld [vmem:[#allocation164_spill] sm:$0xff] }
 0x949   :  { %v4196_v42 = vmul.f32 0.5, %v4194_v44  ;;  %v4195_v0 = vadd.f32 %v3981_v19, %v10922_v11  ;;  %v10928_v19 = vld [vmem:[#allocation167_spill] sm:$0xff]  ;;  %v10929_v11 = vld [vmem:[#allocation168_spill] sm:$0xff] }
 0x94b   :  { %6926 = vtanh.f32 %v4196_v42  ;;  %v4197_v9 = vmul.f32 0.5, %v4195_v0  ;;  %v10924_v42 = vld [vmem:[#allocation163_spill] sm:$0xff]  ;;  %v10930_v0 = vld [vmem:[#allocation169_spill] sm:$0xff] }
 0x94c   :  { %v6925_v14 = vpop.eup %6924 }
 0x94d   :  { %v3899_v31 = vsub.f32 %v9139_v43, %v6925_v14  ;;  %6928 = vtanh.f32 %v4197_v9  ;;  %v10937_v43 = vld [vmem:[#allocation175_spill] sm:$0xff] }
 0x94f   :  { %v3900_v40 = vmul.f32 %v3899_v31, %v3895_v8  ;;  %v10926_v8 = vld [vmem:[#allocation165_spill] sm:$0xff]  ;;  %v10927_v31 = vld [vmem:[#allocation166_spill] sm:$0xff] }
 0x951   :  { %v9364_v17 = vadd.f32 %v6925_v14, %v3900_v40 }
 0x953   :  { %4118 = vmatmul.mubr.f32.vlgmr.msra.gmra.mxu1 %v9364_v17  ;;  %6589 = vmatmul.mubr.f32.vlgmr.msra.gmra.mxu0 %v9364_v17 }
 0x954   :  { %4211 = vmatpush1.msra.mxu1 %v10347_v1  ;;  %6592 = vmatpush3.msra.mxu0 %v10348_v32 }
 0x955   :  { %4212 = vmatprep.subr.mxu1 %v10349_v62  ;;  %6593 = vmatprep.subr.mxu0 %v10185_v49 }
 0x956   :  { %4213 = vmatpush1.msra.mxu1 %v10350_v52  ;;  %6594 = vmatpush3.msra.mxu0 %v10351_v12 }
 0x957   :  { %4214 = vmatprep.subr.mxu1 %v10352_v45  ;;  %6595 = vmatprep.subr.mxu0 %v10185_v49 }
 0x958   :  { %v6927_v28 = vpop.eup %6926  ;;  %4215 = vmatpush1.msra.mxu1 %v10461_v16  ;;  %6596 = vmatpush3.msra.mxu0 %v10462_v10 }
 0x959   :  { %v4200_v13 = vmul.f32 0.5, %v6927_v28  ;;  %4216 = vmatprep.subr.mxu1 %v10463_v21  ;;  %6597 = vmatprep.subr.mxu0 %v10185_v49  ;;  %v10931_v28 = vld [vmem:[#allocation134_spill] sm:$0xff] }
 0x95a   :  { %4217 = vmatpush1.msra.mxu1 %v10356_v6  ;;  %6598 = vmatpush3.msra.mxu0 %v10464_v5  ;;  %v6929_v29 = vpop.eup %6928 }
 0x95b   :  { %v4202_v27 = vadd.f32 0.5, %v4200_v13  ;;  %4218 = vmatprep.subr.mxu1 %v10466_v59  ;;  %6599 = vmatprep.subr.mxu0 %v10185_v49  ;;  %v4201_v14 = vmul.f32 0.5, %v6929_v29  ;;  %v10936_v29 = vld [vmem:[#allocation174_spill] sm:$0xff] }
 0x95c   :  { %4219 = vmatpush1.msra.mxu1 %v10467_v2  ;;  %6600 = vmatpush3.msra.mxu0 %v10468_v3 }
 0x95d   :  { %v4204_v22 = vmul.f32 %v4202_v27, %v4050_v4  ;;  %4220 = vmatprep.subr.mxu1 %v10469_v20  ;;  %6601 = vmatprep.subr.mxu0 %v10185_v49  ;;  %v4203_v9 = vadd.f32 0.5, %v4201_v14  ;;  %v10932_v4 = vld [vmem:[#allocation170_spill] sm:$0xff]  ;;  %v10933_v27 = vld [vmem:[#allocation171_spill] sm:$0xff] }
 0x95e   :  { %4221 = vmatpush1.msra.mxu1 %v10577_v50  ;;  %6602 = vmatpush3.msra.mxu0 %v10578_v38 }
 0x95f   :  { %v4205_v44 = vadd.f32 %v4204_v22, %v10923_v18  ;;  %4222 = vmatprep.subr.mxu1 %v10579_v63  ;;  %6603 = vmatprep.subr.mxu0 %v10185_v49  ;;  %v10934_v22 = vld [vmem:[#allocation172_spill] sm:$0xff] }
 0x960   :  { %4223 = vmatpush1.msra.mxu1 %v10580_v58  ;;  %6604 = vmatpush3.msra.mxu0 %v10581_v48 }
 0x961   :  { %6930 = vtanh.f32 %v4205_v44  ;;  %4224 = vmatprep.subr.mxu1 %v10582_v24  ;;  %6605 = vmatprep.subr.mxu0 %v10185_v49  ;;  %v10935_v44 = vld [vmem:[#allocation173_spill] sm:$0xff] }
 0x962   :  { %4225 = vmatpush1.msra.mxu1 %v10583_v47  ;;  %6606 = vmatpush3.msra.mxu0 %v10584_v15 }
 0x963   :  { %4226 = vmatprep.subr.mxu1 %v10585_v46  ;;  %6607 = vmatprep.subr.mxu0 %v10185_v49 }
 0x964   :  { %4227 = vmatpush1.msra.mxu1 %v10586_v57  ;;  %6608 = vmatpush3.msra.mxu0 %v10587_v61 }
 0x965   :  { %4228 = vmatprep.subr.mxu1 %v10693_v25  ;;  %6609 = vmatprep.subr.mxu0 %v10185_v49 }
 0x966   :  { %4229 = vmatpush1.msra.mxu1 %v10589_v35  ;;  %6610 = vmatpush3.msra.mxu0 %v10590_v54 }
 0x967   :  { %4230 = vmatprep.subr.mxu1 %v10694_v34  ;;  %6611 = vmatprep.subr.mxu0 %v10185_v49 }
 0x968   :  { %4231 = vmatpush1.msra.mxu1 %v10695_v51  ;;  %6612 = vmatpush3.msra.mxu0 %v10592_v53 }
 0x969   :  { %4232 = vmatprep.subr.mxu1 %v10696_v39  ;;  %6613 = vmatprep.subr.mxu0 %v10185_v49 }
 0x96a   :  { %4233 = vmatpush1.msra.mxu1 %v10594_v55  ;;  %6614 = vmatpush3.msra.mxu0 %v10924_v42 }
 0x96b   :  { %4234 = vmatprep.subr.mxu1 %v10925_v33  ;;  %6615 = vmatprep.subr.mxu0 %v10185_v49 }
 0x96c   :  { %4235 = vmatpush1.msra.mxu1 %v10926_v8  ;;  %6616 = vmatpush3.msra.mxu0 %v10927_v31 }
 0x96d   :  { %4236 = vmatprep.subr.mxu1 %v10928_v19  ;;  %6617 = vmatprep.subr.mxu0 %v10185_v49 }
 0x96e   :  { %v6931_v40 = vpop.eup %6930  ;;  %4237 = vmatpush1.msra.mxu1 %v10929_v11  ;;  %6618 = vmatpush3.msra.mxu0 %v10930_v0 }
 0x96f   :  { %v4207_v13 = vsub.f32 %v10931_v28, %v6931_v40  ;;  %4238 = vmatprep.subr.mxu1 %v10932_v4  ;;  %6619 = vmatprep.subr.mxu0 %v10185_v49  ;;  %v10939_v28 = vld [vmem:[#allocation17_spill] sm:$0xff] }
 0x970   :  { %4239 = vmatpush1.msra.mxu1 %v10933_v27  ;;  %6620 = vmatpush3.msra.mxu0 %v10934_v22  ;;  %v10948_v22 = vld [vmem:[#allocation23_spill] sm:$0xff] }
 0x971   :  { %v4208_v18 = vmul.f32 %v4207_v13, %v4203_v9  ;;  %4240 = vmatprep.subr.mxu1 %v10935_v44  ;;  %6621 = vmatprep.subr.mxu0 %v10185_v49  ;;  %v10940_v9 = vld [vmem:[#allocation18_spill] sm:$0xff]  ;;  %v10947_v44 = vld [vmem:[#allocation52_spill] sm:$0xff] }
 0x972   :  { %4241 = vmatpush1.msra.mxu1 %v10936_v29  ;;  %6622 = vmatpush3.msra.mxu0 %v10937_v43  ;;  %v10941_v13 = vld [vmem:[#allocation50_spill] sm:$0xff]  ;;  %v10942_v43 = vld [vmem:[#allocation19_spill] sm:$0xff]  ;;  %v10945_v29 = vld [vmem:[#allocation21_spill] sm:$0xff] }
 0x973   :  { %v9434_v14 = vadd.f32 %v6931_v40, %v4208_v18  ;;  %4274 = vmatprep.mubr.f32.mxu1 %v10185_v49  ;;  %6623 = vmatprep.mubr.msk.f32.mxu0 %vm7089_vm0, %v10185_v49  ;;  %v10943_v40 = vld [vmem:[#allocation20_spill] sm:$0xff]  ;;  %v10944_v18 = vld [vmem:[#allocation51_spill] sm:$0xff] }
 0x974   :  { %4377 = vmatprep.subr.mxu1 %v10939_v28  ;;  %6626 = vmatprep.subr.mxu0 %v10185_v49  ;;  %v10946_v28 = vld [vmem:[#allocation22_spill] sm:$0xff] }
 0x975   :  { %10938 = vst [vmem:[#allocation138_spill] sm:$0xff] %v9434_v14  ;;  %4275 = vmatmul.mubr.f32.vlgmr.msra.gmra.mxu1 %v9434_v14  ;;  %6624 = vmatmul.mubr.f32.vlgmr.msra.gmra.mxu0 %v9434_v14 }
 0x976   :  { %4378 = vmatpush1.msra.mxu1 %v10940_v9  ;;  %6627 = vmatpush3.msra.mxu0 %v10941_v13  ;;  %v10949_v9 = vld [vmem:[#allocation24_spill] sm:$0xff]  ;;  %v10951_v13 = vld [vmem:[#allocation25_spill] sm:$0xff] }
 0x977   :  { %4379 = vmatprep.subr.mxu1 %v10942_v43  ;;  %6628 = vmatprep.subr.mxu0 %v10185_v49  ;;  %v10950_v43 = vld [vmem:[#allocation54_spill] sm:$0xff] }
 0x978   :  { %4380 = vmatpush1.msra.mxu1 %v10943_v40  ;;  %6629 = vmatpush3.msra.mxu0 %v10944_v18  ;;  %v10952_v40 = vld [vmem:[#allocation26_spill] sm:$0xff]  ;;  %v10954_v18 = vld [vmem:[#allocation27_spill] sm:$0xff] }
 0x979   :  { %4381 = vmatprep.subr.mxu1 %v10945_v29  ;;  %6630 = vmatprep.subr.mxu0 %v10185_v49  ;;  %v10953_v29 = vld [vmem:[#allocation56_spill] sm:$0xff] }
 0x97a   :  { %4382 = vmatpush1.msra.mxu1 %v10946_v28  ;;  %6631 = vmatpush3.msra.mxu0 %v10947_v44  ;;  %v10955_v44 = vld [vmem:[#allocation28_spill] sm:$0xff]  ;;  %v10957_v28 = vld [vmem:[#allocation29_spill] sm:$0xff] }
 0x97b   :  { %4383 = vmatprep.subr.mxu1 %v10948_v22  ;;  %6632 = vmatprep.subr.mxu0 %v10185_v49  ;;  %v10956_v22 = vld [vmem:[#allocation58_spill] sm:$0xff] }
 0x97c   :  { %4384 = vmatpush1.msra.mxu1 %v10949_v9  ;;  %6633 = vmatpush3.msra.mxu0 %v10950_v43  ;;  %v10958_v9 = vld [vmem:[#allocation30_spill] sm:$0xff]  ;;  %v10959_v43 = vld [vmem:[#allocation60_spill] sm:$0xff] }
 0x97d   :  { %4385 = vmatprep.subr.mxu1 %v10951_v13  ;;  %6634 = vmatprep.subr.mxu0 %v10185_v49  ;;  %v10960_v13 = vld [vmem:[#allocation31_spill] sm:$0xff] }
 0x97e   :  { %4386 = vmatpush1.msra.mxu1 %v10952_v40  ;;  %6635 = vmatpush3.msra.mxu0 %v10953_v29  ;;  %v10961_v40 = vld [vmem:[#allocation32_spill] sm:$0xff]  ;;  %v10962_v29 = vld [vmem:[#allocation62_spill] sm:$0xff] }
 0x97f   :  { %4387 = vmatprep.subr.mxu1 %v10954_v18  ;;  %6636 = vmatprep.subr.mxu0 %v10185_v49  ;;  %v10963_v18 = vld [vmem:[#allocation33_spill] sm:$0xff] }
 0x980   :  { %4388 = vmatpush1.msra.mxu1 %v10955_v44  ;;  %6637 = vmatpush3.msra.mxu0 %v10956_v22  ;;  %v10964_v44 = vld [vmem:[#allocation34_spill] sm:$0xff]  ;;  %v10965_v22 = vld [vmem:[#allocation64_spill] sm:$0xff] }
 0x981   :  { %4389 = vmatprep.subr.mxu1 %v10957_v28  ;;  %6638 = vmatprep.subr.mxu0 %v10185_v49  ;;  %v10966_v28 = vld [vmem:[#allocation35_spill] sm:$0xff] }
 0x982   :  { %4390 = vmatpush1.msra.mxu1 %v10958_v9  ;;  %6639 = vmatpush3.msra.mxu0 %v10959_v43  ;;  %v10967_v9 = vld [vmem:[#allocation36_spill] sm:$0xff]  ;;  %v10968_v43 = vld [vmem:[#allocation66_spill] sm:$0xff] }
 0x983   :  { %4391 = vmatprep.subr.mxu1 %v10960_v13  ;;  %6640 = vmatprep.subr.mxu0 %v10185_v49  ;;  %v10969_v13 = vld [vmem:[#allocation37_spill] sm:$0xff] }
 0x984   :  { %4392 = vmatpush1.msra.mxu1 %v10961_v40  ;;  %6641 = vmatpush3.msra.mxu0 %v10962_v29  ;;  %v10970_v40 = vld [vmem:[#allocation38_spill] sm:$0xff]  ;;  %v10971_v29 = vld [vmem:[#allocation68_spill] sm:$0xff] }
 0x985   :  { %4393 = vmatprep.subr.mxu1 %v10963_v18  ;;  %6642 = vmatprep.subr.mxu0 %v10185_v49  ;;  %v10972_v18 = vld [vmem:[#allocation39_spill] sm:$0xff] }
 0x986   :  { %4394 = vmatpush1.msra.mxu1 %v10964_v44  ;;  %6643 = vmatpush3.msra.mxu0 %v10965_v22  ;;  %v10973_v44 = vld [vmem:[#allocation40_spill] sm:$0xff]  ;;  %v10974_v22 = vld [vmem:[#allocation70_spill] sm:$0xff] }
 0x987   :  { %4395 = vmatprep.subr.mxu1 %v10966_v28  ;;  %6644 = vmatprep.subr.mxu0 %v10185_v49  ;;  %v10975_v28 = vld [vmem:[#allocation41_spill] sm:$0xff] }
 0x988   :  { %4396 = vmatpush1.msra.mxu1 %v10967_v9  ;;  %6645 = vmatpush3.msra.mxu0 %v10968_v43  ;;  %v10976_v9 = vld [vmem:[#allocation42_spill] sm:$0xff]  ;;  %v10977_v43 = vld [vmem:[#allocation72_spill] sm:$0xff] }
 0x989   :  { %4397 = vmatprep.subr.mxu1 %v10969_v13  ;;  %6646 = vmatprep.subr.mxu0 %v10185_v49  ;;  %v10978_v13 = vld [vmem:[#allocation43_spill] sm:$0xff] }
 0x98a   :  { %4398 = vmatpush1.msra.mxu1 %v10970_v40  ;;  %6647 = vmatpush3.msra.mxu0 %v10971_v29  ;;  %v10979_v40 = vld [vmem:[#allocation44_spill] sm:$0xff]  ;;  %v10980_v29 = vld [vmem:[#allocation74_spill] sm:$0xff] }
 0x98b   :  { %4399 = vmatprep.subr.mxu1 %v10972_v18  ;;  %6648 = vmatprep.subr.mxu0 %v10185_v49  ;;  %v10981_v18 = vld [vmem:[#allocation45_spill] sm:$0xff] }
 0x98c   :  { %4400 = vmatpush1.msra.mxu1 %v10973_v44  ;;  %6649 = vmatpush3.msra.mxu0 %v10974_v22  ;;  %v10982_v44 = vld [vmem:[#allocation46_spill] sm:$0xff]  ;;  %v10983_v22 = vld [vmem:[#allocation76_spill] sm:$0xff] }
 0x98d   :  { %4401 = vmatprep.subr.mxu1 %v10975_v28  ;;  %6650 = vmatprep.subr.mxu0 %v10185_v49  ;;  %v10984_v28 = vld [vmem:[#allocation47_spill] sm:$0xff] }
 0x98e   :  { %4402 = vmatpush1.msra.mxu1 %v10976_v9  ;;  %6651 = vmatpush3.msra.mxu0 %v10977_v43  ;;  %v10985_v9 = vld [vmem:[#allocation48_spill] sm:$0xff]  ;;  %v10986_v43 = vld [vmem:[#allocation78_spill] sm:$0xff] }
 0x98f   :  { %4403 = vmatprep.subr.mxu1 %v10978_v13  ;;  %6652 = vmatprep.subr.mxu0 %v10185_v49  ;;  %v10987_v13 = vld [vmem:[#allocation80_spill] sm:$0xff] }
 0x990   :  { %4404 = vmatpush1.msra.mxu1 %v10979_v40  ;;  %6653 = vmatpush3.msra.mxu0 %v10980_v29  ;;  %v10988_v40 = vld [vmem:[#allocation81_spill] sm:$0xff]  ;;  %v10989_v29 = vld [vmem:[#allocation83_spill] sm:$0xff] }
 0x991   :  { %4405 = vmatprep.subr.mxu1 %v10981_v18  ;;  %6654 = vmatprep.subr.mxu0 %v10185_v49  ;;  %v10990_v18 = vld [vmem:[#allocation82_spill] sm:$0xff] }
 0x992   :  { %4406 = vmatpush1.msra.mxu1 %v10982_v44  ;;  %6655 = vmatpush3.msra.mxu0 %v10983_v22  ;;  %v10991_v44 = vld [vmem:[#allocation84_spill] sm:$0xff]  ;;  %v10992_v22 = vld [vmem:[#allocation86_spill] sm:$0xff] }
 0x993   :  { %4407 = vmatprep.subr.mxu1 %v10984_v28  ;;  %6656 = vmatprep.subr.mxu0 %v10185_v49  ;;  %v10993_v28 = vld [vmem:[#allocation85_spill] sm:$0xff] }
 0x994   :  { %4408 = vmatpush1.msra.mxu1 %v10985_v9  ;;  %4441 = vmatprep.mubr.f32.mxu1 %v10185_v49  ;;  %v10994_v9 = vld [vmem:[#allocation87_spill] sm:$0xff] }
 0x995   :  { %6657 = vmatpush3.msra.mxu0 %v10986_v43  ;;  %6658 = vmatprep.mubr.msk.f32.mxu0 %vm7089_vm0, %v10185_v49  ;;  %v10995_v43 = vld [vmem:[#allocation88_spill] sm:$0xff] }
 0x996   :  { %4442 = vmatmul.mubr.f32.vlgmr.msra.gmra.mxu1 %v9434_v14  ;;  %6659 = vmatmul.mubr.f32.vlgmr.msra.gmra.mxu0 %v9434_v14 }
 0x997   :  { %4518 = vmatprep.subr.mxu1 %v10987_v13  ;;  %6661 = vmatprep.subr.mxu0 %v10185_v49  ;;  %v10996_v13 = vld [vmem:[#allocation89_spill] sm:$0xff] }
 0x998   :  { %4519 = vmatpush1.msra.mxu1 %v10988_v40  ;;  %6662 = vmatpush3.msra.mxu0 %v10989_v29  ;;  %v10997_v40 = vld [vmem:[#allocation90_spill] sm:$0xff]  ;;  %v10998_v29 = vld [vmem:[#allocation92_spill] sm:$0xff] }
 0x999   :  { %4520 = vmatprep.subr.mxu1 %v10990_v18  ;;  %6663 = vmatprep.subr.mxu0 %v10185_v49  ;;  %v10999_v18 = vld [vmem:[#allocation91_spill] sm:$0xff] }
 0x99a   :  { %4521 = vmatpush1.msra.mxu1 %v10991_v44  ;;  %6664 = vmatpush3.msra.mxu0 %v10992_v22  ;;  %v11000_v44 = vld [vmem:[#allocation93_spill] sm:$0xff]  ;;  %v11001_v22 = vld [vmem:[#allocation95_spill] sm:$0xff] }
 0x99b   :  { %4522 = vmatprep.subr.mxu1 %v10993_v28  ;;  %6665 = vmatprep.subr.mxu0 %v10185_v49  ;;  %v11002_v28 = vld [vmem:[#allocation94_spill] sm:$0xff] }
 0x99c   :  { %4523 = vmatpush1.msra.mxu1 %v10994_v9  ;;  %6666 = vmatpush3.msra.mxu0 %v10995_v43  ;;  %v11003_v9 = vld [vmem:[#allocation96_spill] sm:$0xff]  ;;  %v11004_v43 = vld [vmem:[#allocation98_spill] sm:$0xff] }
 0x99d   :  { %4524 = vmatprep.subr.mxu1 %v10996_v13  ;;  %6667 = vmatprep.subr.mxu0 %v10185_v49  ;;  %v11005_v13 = vld [vmem:[#allocation97_spill] sm:$0xff] }
 0x99e   :  { %4525 = vmatpush1.msra.mxu1 %v10997_v40  ;;  %6668 = vmatpush3.msra.mxu0 %v10998_v29  ;;  %v11006_v40 = vld [vmem:[#allocation99_spill] sm:$0xff]  ;;  %v11007_v29 = vld [vmem:[#allocation101_spill] sm:$0xff] }
 0x99f   :  { %4526 = vmatprep.subr.mxu1 %v10999_v18  ;;  %6669 = vmatprep.subr.mxu0 %v10185_v49  ;;  %v11008_v18 = vld [vmem:[#allocation100_spill] sm:$0xff] }
 0x9a0   :  { %4527 = vmatpush1.msra.mxu1 %v11000_v44  ;;  %6670 = vmatpush3.msra.mxu0 %v11001_v22  ;;  %v11009_v44 = vld [vmem:[#allocation102_spill] sm:$0xff]  ;;  %v11010_v22 = vld [vmem:[#allocation104_spill] sm:$0xff] }
 0x9a1   :  { %4528 = vmatprep.subr.mxu1 %v11002_v28  ;;  %6671 = vmatprep.subr.mxu0 %v10185_v49  ;;  %v11011_v28 = vld [vmem:[#allocation103_spill] sm:$0xff] }
 0x9a2   :  { %4529 = vmatpush1.msra.mxu1 %v11003_v9  ;;  %6672 = vmatpush3.msra.mxu0 %v11004_v43  ;;  %v11012_v9 = vld [vmem:[#allocation105_spill] sm:$0xff]  ;;  %v11013_v43 = vld [vmem:[#allocation107_spill] sm:$0xff] }
 0x9a3   :  { %4530 = vmatprep.subr.mxu1 %v11005_v13  ;;  %6673 = vmatprep.subr.mxu0 %v10185_v49  ;;  %v11014_v13 = vld [vmem:[#allocation106_spill] sm:$0xff] }
 0x9a4   :  { %4531 = vmatpush1.msra.mxu1 %v11006_v40  ;;  %6674 = vmatpush3.msra.mxu0 %v11007_v29  ;;  %v11015_v40 = vld [vmem:[#allocation108_spill] sm:$0xff]  ;;  %v11016_v29 = vld [vmem:[#allocation110_spill] sm:$0xff] }
 0x9a5   :  { %4532 = vmatprep.subr.mxu1 %v11008_v18  ;;  %6675 = vmatprep.subr.mxu0 %v10185_v49  ;;  %v11017_v18 = vld [vmem:[#allocation109_spill] sm:$0xff] }
 0x9a6   :  { %4533 = vmatpush1.msra.mxu1 %v11009_v44  ;;  %6676 = vmatpush3.msra.mxu0 %v11010_v22  ;;  %v11018_v44 = vld [vmem:[#allocation111_spill] sm:$0xff]  ;;  %v11019_v22 = vld [vmem:[#allocation113_spill] sm:$0xff] }
 0x9a7   :  { %4534 = vmatprep.subr.mxu1 %v11011_v28  ;;  %6677 = vmatprep.subr.mxu0 %v10185_v49  ;;  %v11020_v28 = vld [vmem:[#allocation112_spill] sm:$0xff] }
 0x9a8   :  { %4535 = vmatpush1.msra.mxu1 %v11012_v9  ;;  %6678 = vmatpush3.msra.mxu0 %v11013_v43  ;;  %v11021_v9 = vld [vmem:[#allocation114_spill] sm:$0xff]  ;;  %v11022_v43 = vld [vmem:[#allocation116_spill] sm:$0xff] }
 0x9a9   :  { %4536 = vmatprep.subr.mxu1 %v11014_v13  ;;  %6679 = vmatprep.subr.mxu0 %v10185_v49  ;;  %v11023_v13 = vld [vmem:[#allocation115_spill] sm:$0xff] }
 0x9aa   :  { %4537 = vmatpush1.msra.mxu1 %v11015_v40  ;;  %6680 = vmatpush3.msra.mxu0 %v11016_v29  ;;  %v11024_v40 = vld [vmem:[#allocation117_spill] sm:$0xff]  ;;  %v11025_v29 = vld [vmem:[#allocation119_spill] sm:$0xff] }
 0x9ab   :  { %4538 = vmatprep.subr.mxu1 %v11017_v18  ;;  %6681 = vmatprep.subr.mxu0 %v10185_v49  ;;  %v11026_v18 = vld [vmem:[#allocation118_spill] sm:$0xff] }
 0x9ac   :  { %4539 = vmatpush1.msra.mxu1 %v11018_v44  ;;  %6682 = vmatpush3.msra.mxu0 %v11019_v22  ;;  %v11027_v44 = vld [vmem:[#allocation120_spill] sm:$0xff]  ;;  %v11028_v22 = vld [vmem:[#allocation122_spill] sm:$0xff] }
 0x9ad   :  { %4540 = vmatprep.subr.mxu1 %v11020_v28  ;;  %6683 = vmatprep.subr.mxu0 %v10185_v49  ;;  %v11029_v28 = vld [vmem:[#allocation121_spill] sm:$0xff] }
 0x9ae   :  { %4541 = vmatpush1.msra.mxu1 %v11021_v9  ;;  %6684 = vmatpush3.msra.mxu0 %v11022_v43  ;;  %v11030_v9 = vld [vmem:[#allocation123_spill] sm:$0xff]  ;;  %v11031_v43 = vld [vmem:[#allocation125_spill] sm:$0xff] }
 0x9af   :  { %4542 = vmatprep.subr.mxu1 %v11023_v13  ;;  %6685 = vmatprep.subr.mxu0 %v10185_v49  ;;  %v11032_v13 = vld [vmem:[#allocation124_spill] sm:$0xff] }
 0x9b0   :  { %4543 = vmatpush1.msra.mxu1 %v11024_v40  ;;  %6686 = vmatpush3.msra.mxu0 %v11025_v29  ;;  %v11033_v40 = vld [vmem:[#allocation126_spill] sm:$0xff]  ;;  %v11034_v29 = vld [vmem:[#allocation127_spill] sm:$0xff] }
 0x9b1   :  { %4544 = vmatprep.subr.mxu1 %v11026_v18  ;;  %6687 = vmatprep.subr.mxu0 %v10185_v49  ;;  %v11035_v18 = vld [vmem:[#allocation128_spill] sm:$0xff] }
 0x9b2   :  { %4545 = vmatpush1.msra.mxu1 %v11027_v44  ;;  %6688 = vmatpush3.msra.mxu0 %v11028_v22 }
 0x9b3   :  { %4546 = vmatprep.subr.mxu1 %v11029_v28  ;;  %6689 = vmatprep.subr.mxu0 %v10185_v49 }
 0x9b4   :  { %4547 = vmatpush1.msra.mxu1 %v11030_v9  ;;  %6690 = vmatpush3.msra.mxu0 %v11031_v43 }
 0x9b5   :  { %4548 = vmatprep.subr.mxu1 %v11032_v13  ;;  %6691 = vmatprep.subr.mxu0 %v10185_v49 }
 0x9b6   :  { %4549 = vmatpush1.msra.mxu1 %v11033_v40  ;;  %6692 = vmatpush3.msra.mxu0 %v11034_v29 }
 0x9b7   :  { %4582 = vmatprep.mubr.f32.mxu1 %v10185_v49  ;;  %6693 = vmatprep.mubr.msk.f32.mxu0 %vm7089_vm0, %v10185_v49 }
 0x9b8   :  { %4675 = vmatprep.subr.mxu1 %v11035_v18  ;;  %6696 = vmatprep.subr.mxu0 %v10185_v49 }
 0xa13   :  { %v4190_v44 = vpop.f32.mrf.mxu0  ;;  %v4119_v28 = vpop.f32.mrf.mxu1 }
 0xa14   :  { %v4120_v27 = vadd.f32 %v4119_v28, %v8212_v37  ;;  %v4191_v33 = vadd.f32 %v4190_v44, %v8228_v60 }
 0xa15   :  { %v6590_v22 = vpop.f32.mrf.mxu0  ;;  %v4121_v9 = vpop.f32.mrf.mxu1 }
 0xa16   :  { %v4122_v18 = vadd.f32 %v4121_v9, %v10457_v30  ;;  %v11036_v9 = vld [vmem:[#allocation77_spill] sm:$0xff] }
 0xa35   :  { %v4276_v43 = vpop.f32.mrf.mxu1  ;;  %v4347_v13 = vpop.f32.mrf.mxu0 }
 0xa36   :  { %v4277_v40 = vadd.f32 %v4276_v43, %v10455_v23  ;;  %v4348_v28 = vadd.f32 %v4347_v13, %v8231_v56 }
 0xa37   :  { %v6625_v29 = vpop.f32.mrf.mxu0  ;;  %v4278_v0 = vpop.f32.mrf.mxu1 }
 0xa38   :  { %v4351_v4 = vadd.f32 %v4277_v40, %v4120_v27  ;;  %v4279_v11 = vadd.f32 %v4278_v0, %v10456_v26 }
 0xa3a   :  { %v4353_v14 = vmul.f32 0.5, %v4351_v4  ;;  %v4352_v19 = vadd.f32 %v4279_v11, %v4122_v18 }
 0xa3c   :  { %6932 = vtanh.f32 %v4353_v14  ;;  %v4354_v31 = vmul.f32 0.5, %v4352_v19 }
 0xa3e   :  { %6934 = vtanh.f32 %v4354_v31 }
 0xa49   :  { %v6933_v22 = vpop.eup %6932 }
 0xa4a   :  { %v4357_v8 = vmul.f32 0.5, %v6933_v22 }
 0xa4b   :  { %v6935_v40 = vpop.eup %6934 }
 0xa4c   :  { %v4359_v42 = vadd.f32 0.5, %v4357_v8  ;;  %v4358_v18 = vmul.f32 0.5, %v6935_v40 }
 0xa4e   :  { %v4361_v43 = vmul.f32 %v4359_v42, %v4191_v33  ;;  %v4360_v8 = vadd.f32 0.5, %v4358_v18 }
 0xa50   :  { %v4362_v29 = vadd.f32 %v4361_v43, %v4348_v28  ;;  %v11037_v28 = vld [vmem:[#allocation79_spill] sm:$0xff] }
 0xa52   :  { %6936 = vtanh.f32 %v4362_v29 }
 0xa56   :  { %v4443_v4 = vpop.f32.mrf.mxu1  ;;  %v4514_v27 = vpop.f32.mrf.mxu0 }
 0xa57   :  { %v4444_v14 = vadd.f32 %v4443_v4, %v8032_v36  ;;  %v5291_v4 = vld [vmem:[#allocation10 + $0x20] sm:$0xff]  }
 0xa58   :  { %v6660_v0 = vpop.f32.mrf.mxu0  ;;  %v4445_v22 = vpop.f32.mrf.mxu1 }
 0xa59   :  { %v4659_v11 = vadd.f32 %v4444_v14, %v11036_v9  ;;  %v4446_v42 = vadd.f32 %v4445_v22, %v8054_v41  ;;  %v5228_v14 = vunpack.c.l.bf16 %v5291_v4  ;;  %v5290_v0 = vld [vmem:[#allocation10 + $0x18] sm:$0xff]   ;;  %v5288_v22 = vld [vmem:[#allocation10 + $0x8] sm:$0xff]  }
 0xa5a   :  { %v5225_v40 = vunpack.c.h.bf16 %v5290_v0  ;;  %v5224_v9 = vunpack.c.l.bf16 %v5290_v0 }
 0xa5b   :  { %v4661_v19 = vmul.f32 0.5, %v4659_v11  ;;  %v4660_v43 = vadd.f32 %v4446_v42, %v11037_v28  ;;  %v5289_v11 = vld [vmem:[#allocation10 + $0x10] sm:$0xff]  }
 0xa5c   :  { %v5220_v18 = vunpack.c.l.bf16 %v5289_v11  ;;  %v5301_v28 = vld [vmem:[%s9765_s19 + $0x38] sm:$0xff]  }
 0xa5d   :  { %6938 = vtanh.f32 %v4661_v19  ;;  %v4662_v36 = vmul.f32 0.5, %v4660_v43  ;;  %v5221_v19 = vunpack.c.h.bf16 %v5289_v11  ;;  %v5300_v43 = vld [vmem:[%s9765_s19 + $0x30] sm:$0xff]  }
 0xa5f   :  { %v6937_v44 = vpop.eup %6936  ;;  %6940 = vtanh.f32 %v4662_v36  ;;  %v5273_v36 = vunpack.c.h.bf16 %v5301_v28 }
 0xa60   :  { %v4364_v31 = vsub.f32 %v9364_v17, %v6937_v44 }
 0xa62   :  { %v4365_v33 = vmul.f32 %v4364_v31, %v4360_v8  ;;  %v5216_v8 = vunpack.c.l.bf16 %v5288_v22  ;;  %v5211_v31 = vld [vmem:[#allocation10] sm:$0xff]  }
 0xa63   :  { %v5213_v42 = vunpack.c.h.bf16 %v5211_v31 }
 0xa64   :  { %v9589_v13 = vadd.f32 %v6937_v44, %v4365_v33  ;;  %v5217_v44 = vunpack.c.h.bf16 %v5288_v22  ;;  %v5212_v33 = vunpack.c.l.bf16 %v5211_v31 }
 0xa66   :  { %4583 = vmatmul.mubr.f32.vlgmr.msra.gmra.mxu1 %v9589_v13  ;;  %6694 = vmatmul.mubr.f32.vlgmr.msra.gmra.mxu0 %v9589_v13 }
 0xa67   :  { %4676 = vmatpush1.msra.mxu1 %v10347_v1  ;;  %6697 = vmatpush3.msra.mxu0 %v10348_v32  ;;  %v4515_v1 = vadd.f32 %v4514_v27, %v10465_v7  ;;  %v5229_v27 = vunpack.c.h.bf16 %v5291_v4  ;;  %v2513_v4 = vpop.permute.xlu1 %2512 }
 0xa68   :  { %4677 = vmatprep.subr.mxu1 %v10349_v62  ;;  %6698 = vmatprep.subr.mxu0 %v10185_v49 }
 0xa69   :  { %4678 = vmatpush1.msra.mxu1 %v10350_v52  ;;  %6699 = vmatpush3.msra.mxu0 %v10351_v12  ;;  %v11038_v52 = vld [vmem:[#allocation182_spill] sm:$0xff] }
 0xa6a   :  { %v6939_v41 = vpop.eup %6938  ;;  %4679 = vmatprep.subr.mxu1 %v10352_v45  ;;  %6700 = vmatprep.subr.mxu0 %v10185_v49 }
 0xa6b   :  { %v4665_v29 = vmul.f32 0.5, %v6939_v41  ;;  %4680 = vmatpush1.msra.mxu1 %v10461_v16  ;;  %6701 = vmatpush3.msra.mxu0 %v10462_v10  ;;  %v11039_v16 = vld [vmem:[#allocation163_spill] sm:$0xff]  ;;  %v11040_v10 = vld [vmem:[#allocation164_spill] sm:$0xff]  ;;  %v5272_v41 = vunpack.c.l.bf16 %v5301_v28 }
 0xa6c   :  { %4681 = vmatprep.subr.mxu1 %v10463_v21  ;;  %6702 = vmatprep.subr.mxu0 %v10185_v49  ;;  %v6941_v45 = vpop.eup %6940  ;;  %v11041_v21 = vld [vmem:[#allocation165_spill] sm:$0xff] }
 0xa6d   :  { %v4667_v32 = vadd.f32 0.5, %v4665_v29  ;;  %4682 = vmatpush1.msra.mxu1 %v10356_v6  ;;  %6703 = vmatpush3.msra.mxu0 %v10464_v5  ;;  %v4666_v6 = vmul.f32 0.5, %v6941_v45  ;;  %v11042_v5 = vld [vmem:[#allocation166_spill] sm:$0xff]  ;;  %v5269_v29 = vunpack.c.h.bf16 %v5300_v43 }
 0xa6e   :  { %4683 = vmatprep.subr.mxu1 %v10466_v59  ;;  %6704 = vmatprep.subr.mxu0 %v10185_v49  ;;  %v11043_v59 = vld [vmem:[#allocation167_spill] sm:$0xff] }
 0xa6f   :  { %v4669_v62 = vmul.f32 %v4667_v32, %v4515_v1  ;;  %4684 = vmatpush1.msra.mxu1 %v10467_v2  ;;  %6705 = vmatpush3.msra.mxu0 %v10468_v3  ;;  %v4668_v2 = vadd.f32 0.5, %v4666_v6  ;;  %v11044_v3 = vld [vmem:[#allocation168_spill] sm:$0xff]  ;;  %v5299_v1 = vld [vmem:[%s9765_s19 + $0x28] sm:$0xff]   ;;  %v5268_v32 = vunpack.c.l.bf16 %v5300_v43 }
 0xa70   :  { %4685 = vmatprep.subr.mxu1 %v10469_v20  ;;  %6706 = vmatprep.subr.mxu0 %v10185_v49  ;;  %v11045_v20 = vld [vmem:[#allocation169_spill] sm:$0xff]  ;;  %v5297_v6 = vld [vmem:[%s9765_s19 + $0x18] sm:$0xff]  }
 0xa71   :  { %v4670_v12 = vadd.f32 %v4669_v62, %v11038_v52  ;;  %4686 = vmatpush1.msra.mxu1 %v10577_v50  ;;  %6707 = vmatpush3.msra.mxu0 %v10578_v38  ;;  %v11046_v50 = vld [vmem:[#allocation138_spill] sm:$0xff]  ;;  %v5265_v62 = vunpack.c.h.bf16 %v5299_v1  ;;  %v5298_v52 = vld [vmem:[%s9765_s19 + $0x20] sm:$0xff]  }
 0xa72   :  { %4687 = vmatprep.subr.mxu1 %v10579_v63  ;;  %6708 = vmatprep.subr.mxu0 %v10185_v49  ;;  %v11047_v63 = vld [vmem:[#allocation170_spill] sm:$0xff]  ;;  %v5261_v45 = vunpack.c.h.bf16 %v5298_v52 }
 0xa73   :  { %6942 = vtanh.f32 %v4670_v12  ;;  %4688 = vmatpush1.msra.mxu1 %v10580_v58  ;;  %6709 = vmatpush3.msra.mxu0 %v10581_v48  ;;  %v11048_v58 = vld [vmem:[#allocation171_spill] sm:$0xff]  ;;  %v11049_v48 = vld [vmem:[#allocation172_spill] sm:$0xff]  ;;  %v5264_v12 = vunpack.c.l.bf16 %v5299_v1 }
 0xa74   :  { %4689 = vmatprep.subr.mxu1 %v10582_v24  ;;  %6710 = vmatprep.subr.mxu0 %v10185_v49 }
 0xa75   :  { %4690 = vmatpush1.msra.mxu1 %v10583_v47  ;;  %6711 = vmatpush3.msra.mxu0 %v10584_v15  ;;  %v11050_v47 = vld [vmem:[#allocation173_spill] sm:$0xff]  ;;  %v11051_v15 = vld [vmem:[#allocation174_spill] sm:$0xff] }
 0xa76   :  { %4691 = vmatprep.subr.mxu1 %v10585_v46  ;;  %6712 = vmatprep.subr.mxu0 %v10185_v49 }
 0xa77   :  { %4692 = vmatpush1.msra.mxu1 %v10586_v57  ;;  %6713 = vmatpush3.msra.mxu0 %v10587_v61  ;;  %v11052_v57 = vld [vmem:[#allocation175_spill] sm:$0xff]  ;;  %v5294_v61 = vld [vmem:[#allocation10 + $0x38] sm:$0xff]  }
 0xa78   :  { %4693 = vmatprep.subr.mxu1 %v10693_v25  ;;  %6714 = vmatprep.subr.mxu0 %v10185_v49 }
 0xa79   :  { %4694 = vmatpush1.msra.mxu1 %v10589_v35  ;;  %6715 = vmatpush3.msra.mxu0 %v10590_v54  ;;  %v5240_v35 = vunpack.c.l.bf16 %v5294_v61  ;;  %v5293_v54 = vld [vmem:[#allocation10 + $0x30] sm:$0xff]  }
 0xa7a   :  { %4695 = vmatprep.subr.mxu1 %v10694_v34  ;;  %6716 = vmatprep.subr.mxu0 %v10185_v49  ;;  %v5236_v25 = vunpack.c.l.bf16 %v5293_v54  ;;  %v5292_v34 = vld [vmem:[#allocation10 + $0x28] sm:$0xff]  }
 0xa7b   :  { %4696 = vmatpush1.msra.mxu1 %v10695_v51  ;;  %6717 = vmatpush3.msra.mxu0 %v10592_v53  ;;  %v5237_v53 = vunpack.c.h.bf16 %v5293_v54  ;;  %v5233_v51 = vunpack.c.h.bf16 %v5292_v34 }
 0xa7c   :  { %4697 = vmatprep.subr.mxu1 %v10696_v39  ;;  %6718 = vmatprep.subr.mxu0 %v10185_v49  ;;  %v5232_v39 = vunpack.c.l.bf16 %v5292_v34 }
 0xa7d   :  { %4698 = vmatpush1.msra.mxu1 %v10594_v55  ;;  %6719 = vmatpush3.msra.mxu0 %v11039_v16  ;;  %v5241_v55 = vunpack.c.h.bf16 %v5294_v61  ;;  %v5260_v16 = vunpack.c.l.bf16 %v5298_v52 }
 0xa7e   :  { %4699 = vmatprep.subr.mxu1 %v11040_v10  ;;  %6720 = vmatprep.subr.mxu0 %v10185_v49  ;;  %v5257_v10 = vunpack.c.h.bf16 %v5297_v6 }
 0xa7f   :  { %4700 = vmatpush1.msra.mxu1 %v11041_v21  ;;  %6721 = vmatpush3.msra.mxu0 %v11042_v5  ;;  %v5296_v21 = vld [vmem:[%s9765_s19 + $0x10] sm:$0xff]   ;;  %v5256_v5 = vunpack.c.l.bf16 %v5297_v6 }
 0xa80   :  { %v6943_v7 = vpop.eup %6942  ;;  %4701 = vmatprep.subr.mxu1 %v11043_v59  ;;  %6722 = vmatprep.subr.mxu0 %v10185_v49  ;;  %v5252_v59 = vunpack.c.l.bf16 %v5296_v21 }
 0xa81   :  { %4702 = vmatpush1.msra.mxu1 %v11044_v3  ;;  %6723 = vmatpush3.msra.mxu0 %v11045_v20  ;;  %v4672_v38 = vsub.f32 %v11046_v50, %v6943_v7 }
 0xa82   :  { %4703 = vmatprep.subr.mxu1 %v11047_v63  ;;  %6724 = vmatprep.subr.mxu0 %v10185_v49 }
 0xa83   :  { %4704 = vmatpush1.msra.mxu1 %v11048_v58  ;;  %6725 = vmatpush3.msra.mxu0 %v11049_v48  ;;  %v4673_v24 = vmul.f32 %v4672_v38, %v4668_v2 }
 0xa84   :  { %4705 = vmatprep.subr.mxu1 %v11050_v47  ;;  %6726 = vmatprep.subr.mxu0 %v10185_v49 }
 0xa85   :  { %4706 = vmatpush1.msra.mxu1 %v11051_v15  ;;  %4739 = vmatprep.mubr.f32.mxu1 %v10185_v49  ;;  %v4674_v46 = vadd.f32 %v6943_v7, %v4673_v24  ;;  %v5253_v7 = vunpack.c.h.bf16 %v5296_v21 }
 0xa86   :  { %6727 = vmatpush3.msra.mxu0 %v11052_v57  ;;  %6728 = vmatprep.mubr.msk.f32.mxu0 %vm7089_vm0, %v10185_v49 }
 0xa87   :  { %4740 = vmatmul.mubr.f32.vlgmr.msra.gmra.mxu1 %v4674_v46  ;;  %6729 = vmatmul.mubr.f32.vlgmr.msra.gmra.mxu0 %v4674_v46 }
 0xa88   :  { %6731 = vmatprep.subr.mxu1 %v10185_v49  ;;  %6763 = vmatprep.mubr.msk.f32.mxu1 %vm7089_vm0, %v10185_v49 }
 0xa89   :  { %6766 = vmatprep.subr.mxu0 %v10185_v49  ;;  %6798 = vmatprep.mubr.msk.f32.mxu0 %vm7089_vm0, %v10185_v49  ;;  %vm5073_vm0 = vcmask 15360  }
 0xa8a   :  { %6732 = vmatpush3.msra.mxu1 %v5241_v55  ;;  %6767 = vmatpush3.msra.mxu0 %v5273_v36 }
 0xa8b   :  { %6733 = vmatprep.subr.mxu1 %v10185_v49  ;;  %6768 = vmatprep.subr.mxu0 %v10185_v49 }
 0xa8c   :  { %6734 = vmatpush3.msra.mxu1 %v5240_v35  ;;  %6769 = vmatpush3.msra.mxu0 %v5272_v41 }
 0xa8d   :  { %6735 = vmatprep.subr.mxu1 %v10185_v49  ;;  %6770 = vmatprep.subr.mxu0 %v10185_v49 }
 0xa8e   :  { %6736 = vmatpush3.msra.mxu1 %v5237_v53  ;;  %6771 = vmatpush3.msra.mxu0 %v5269_v29 }
 0xa8f   :  { %6737 = vmatprep.subr.mxu1 %v10185_v49  ;;  %6772 = vmatprep.subr.mxu0 %v10185_v49 }
 0xa90   :  { %6738 = vmatpush3.msra.mxu1 %v5236_v25  ;;  %6773 = vmatpush3.msra.mxu0 %v5268_v32 }
 0xa91   :  { %6739 = vmatprep.subr.mxu1 %v10185_v49  ;;  %6774 = vmatprep.subr.mxu0 %v10185_v49 }
 0xa92   :  { %6740 = vmatpush3.msra.mxu1 %v5233_v51  ;;  %6775 = vmatpush3.msra.mxu0 %v5265_v62 }
 0xa93   :  { %6741 = vmatprep.subr.mxu1 %v10185_v49  ;;  %6776 = vmatprep.subr.mxu0 %v10185_v49 }
 0xa94   :  { %6742 = vmatpush3.msra.mxu1 %v5232_v39  ;;  %6777 = vmatpush3.msra.mxu0 %v5264_v12  ;;  %v6819_v39 = vpop.permute.xlu0 %6818 }
 0xa95   :  { %6743 = vmatprep.subr.mxu1 %v10185_v49  ;;  %6778 = vmatprep.subr.mxu0 %v10185_v49 }
 0xa96   :  { %6744 = vmatpush3.msra.mxu1 %v5229_v27  ;;  %6779 = vmatpush3.msra.mxu0 %v5261_v45  ;;  %v6821_v27 = vunpack.i.h.bf16 %v6819_v39 }
 0xa97   :  { %6745 = vmatprep.subr.mxu1 %v10185_v49  ;;  %6780 = vmatprep.subr.mxu0 %v10185_v49 }
 0xa98   :  { %6746 = vmatpush3.msra.mxu1 %v5228_v14  ;;  %6781 = vmatpush3.msra.mxu0 %v5260_v16  ;;  %v6820_v14 = vunpack.i.l.bf16 %v6819_v39 }
 0xa99   :  { %6747 = vmatprep.subr.mxu1 %v10185_v49  ;;  %6782 = vmatprep.subr.mxu0 %v10185_v49 }
 0xa9a   :  { %6748 = vmatpush3.msra.mxu1 %v5225_v40  ;;  %6783 = vmatpush3.msra.mxu0 %v5257_v10  ;;  %v2978_v40 = vpop.permute.xlu0 %2977 }
 0xa9b   :  { %6749 = vmatprep.subr.mxu1 %v10185_v49  ;;  %6784 = vmatprep.subr.mxu0 %v10185_v49 }
 0xa9c   :  { %6750 = vmatpush3.msra.mxu1 %v5224_v9  ;;  %6785 = vmatpush3.msra.mxu0 %v5256_v5  ;;  %v11054_v9 = vld [vmem:[#allocation53_spill] sm:$0xff] }
 0xa9d   :  { %6751 = vmatprep.subr.mxu1 %v10185_v49  ;;  %6786 = vmatprep.subr.mxu0 %v10185_v49  ;;  %v1585_v11 = vmul.f32 %v6820_v14, %v11054_v9 }
 0xa9e   :  { %6752 = vmatpush3.msra.mxu1 %v5221_v19  ;;  %6787 = vmatpush3.msra.mxu0 %v5253_v7  ;;  %v11055_v19 = vld [vmem:[#allocation129_spill] sm:$0xff]  ;;  %v3908_v43 = vpop.permute.xlu0 %3907 }
 0xa9f   :  { %6753 = vmatprep.subr.mxu1 %v10185_v49  ;;  %6788 = vmatprep.subr.mxu0 %v10185_v49  ;;  %v3910_v1 = vmul.f32 %v3908_v43, %v9364_v17 }
 0xaa0   :  { %6754 = vmatpush3.msra.mxu1 %v5220_v18  ;;  %6789 = vmatpush3.msra.mxu0 %v5252_v59  ;;  %v2515_v18 = vmul.f32 %v2513_v4, %v11055_v19 }
 0xaa1   :  { %6755 = vmatprep.subr.mxu1 %v10185_v49  ;;  %6790 = vmatprep.subr.mxu0 %v10185_v49 }
 0xaa2   :  { %6756 = vmatpush3.msra.mxu1 %v5217_v44  ;;  %v11056_v44 = vld [vmem:[#allocation131_spill] sm:$0xff]  ;;  %v4838_v16 = vpop.permute.xlu0 %4837 }
 0xaa3   :  { %6757 = vmatprep.subr.mxu1 %v10185_v49 }
 0xaa4   :  { %6758 = vmatpush3.msra.mxu1 %v5216_v8  ;;  %v2980_v8 = vmul.f32 %v2978_v40, %v11056_v44 }
 0xaa5   :  { %6759 = vmatprep.subr.mxu1 %v10185_v49 }
 0xaa6   :  { %6760 = vmatpush3.msra.mxu1 %v5213_v42  ;;  %v11057_v42 = vld [vmem:[#allocation133_spill] sm:$0xff] }
 0xaa7   :  { %6761 = vmatprep.subr.mxu1 %v10185_v49 }
 0xaa8   :  { %6762 = vmatpush3.msra.mxu1 %v5212_v33 }
 0xb26   :  { %v4655_v2 = vpop.f32.mrf.mxu0  ;;  %v4584_v20 = vpop.f32.mrf.mxu1 }
 0xb27   :  { %v4585_v58 = vadd.f32 %v4584_v20, %v8212_v37  ;;  %v4656_v25 = vadd.f32 %v4655_v2, %v8228_v60  ;;  %v3443_v60 = vpop.permute.xlu1 %3442  ;;  %v5295_v2 = vld [vmem:[%s9765_s19 + $0x8] sm:$0xff]  }
 0xb28   :  { %v6695_v3 = vpop.f32.mrf.mxu0  ;;  %v4586_v50 = vpop.f32.mrf.mxu1  ;;  %v3445_v33 = vmul.f32 %v3443_v60, %v11057_v42  ;;  %v5248_v17 = vunpack.c.l.bf16 %v5295_v2 }
 0xb29   :  { %v4587_v61 = vadd.f32 %v4586_v50, %v10457_v30  ;;  %v5249_v3 = vunpack.c.h.bf16 %v5295_v2 }
 0xb2b   :  { %v4373_v32 = vpop.permute.xlu1 %4372  ;;  %6791 = vmatpush3.msra.mxu0 %v5249_v3 }
 0xb2c   :  { %v4375_v12 = vmul.f32 %v4373_v32, %v9589_v13  ;;  %6792 = vmatprep.subr.mxu0 %v10185_v49 }
 0xb2d   :  { %6793 = vmatpush3.msra.mxu0 %v5248_v17 }
 0xb2e   :  { %6794 = vmatprep.subr.mxu0 %v10185_v49 }
 0xb2f   :  { %v4850_v7 = vpop.permute.xlu1 %4849 }
 0xb47   :  { %v4741_v38 = vpop.f32.mrf.mxu1  ;;  %v4812_v63 = vpop.f32.mrf.mxu0 }
 0xb48   :  { %v4742_v48 = vadd.f32 %v4741_v38, %v10455_v23  ;;  %v4813_v37 = vadd.f32 %v4812_v63, %v8231_v56  ;;  %v5144_v63 = vld [vmem:[%s9764_s18] ss:$0 sm:$0xff] }
 0xb49   :  { %v6730_v24 = vpop.f32.mrf.mxu0  ;;  %v4743_v46 = vpop.f32.mrf.mxu1 }
 0xb4a   :  { %v4816_v47 = vadd.f32 %v4742_v48, %v4585_v58  ;;  %v4744_v57 = vadd.f32 %v4743_v46, %v10456_v26  ;;  %v11053_v26 = vld [vmem:[#allocation55_spill] sm:$0xff]  ;;  %v11058_v58 = vld [vmem:[#allocation176_spill] sm:$0xff] }
 0xb4b   :  { %v2050_v0 = vmul.f32 %v6821_v27, %v11053_v26  ;;  %v5145_v46 = vld [vmem:[%s9766_s20] ss:$0 sm:$0xff] }
 0xb4c   :  { %v4818_v15 = vmul.f32 0.5, %v4816_v47  ;;  %v4817_v55 = vadd.f32 %v4744_v57, %v4587_v61 }
 0xb4d   :  { %v2051_v22 = vadd.f32 %v2050_v0, %v1585_v11 }
 0xb4e   :  { %6944 = vtanh.f32 %v4818_v15  ;;  %v4819_v35 = vmul.f32 0.5, %v4817_v55 }
 0xb4f   :  { %v2516_v31 = vadd.f32 %v2515_v18, %v2051_v22 }
 0xb50   :  { %6946 = vtanh.f32 %v4819_v35 }
 0xb51   :  { %v2981_v29 = vadd.f32 %v2980_v8, %v2516_v31 }
 0xb53   :  { %v3446_v52 = vadd.f32 %v3445_v33, %v2981_v29 }
 0xb55   :  { %v3911_v6 = vadd.f32 %v3910_v1, %v3446_v52 }
 0xb57   :  { %v4376_v10 = vadd.f32 %v4375_v12, %v3911_v6 }
 0xb5b   :  { %v6945_v54 = vpop.eup %6944 }
 0xb5c   :  { %v4822_v53 = vmul.f32 0.5, %v6945_v54 }
 0xb5d   :  { %v6947_v30 = vpop.eup %6946 }
 0xb5e   :  { %v4824_v34 = vadd.f32 0.5, %v4822_v53  ;;  %v4823_v56 = vmul.f32 0.5, %v6947_v30 }
 0xb60   :  { %v4826_v23 = vmul.f32 %v4824_v34, %v4656_v25  ;;  %v4825_v36 = vadd.f32 0.5, %v4823_v56 }
 0xb62   :  { %v4827_v51 = vadd.f32 %v4826_v23, %v4813_v37 }
 0xb64   :  { %6948 = vtanh.f32 %v4827_v51 }
 0xb71   :  { %v6949_v28 = vpop.eup %6948 }
 0xb72   :  { %v4829_v41 = vsub.f32 %v9589_v13, %v6949_v28  ;;  %v5243_v13 = vld [vmem:[%s9765_s19] sm:$0xff]  }
 0xb73   :  { %v5245_v20 = vunpack.c.h.bf16 %v5243_v13  ;;  %v5244_v50 = vunpack.c.l.bf16 %v5243_v13 }
 0xb74   :  { %v4830_v62 = vmul.f32 %v4829_v41, %v4825_v36 }
 0xb75   :  { %6795 = vmatpush3.msra.mxu0 %v5245_v20 }
 0xb76   :  { %v4831_v45 = vadd.f32 %v6949_v28, %v4830_v62  ;;  %6796 = vmatprep.subr.mxu0 %v10185_v49 }
 0xb77   :  { %6797 = vmatpush3.msra.mxu0 %v5244_v50 }
 0xb78   :  { %v4840_v21 = vmul.f32 %v4838_v16, %v4831_v45 }
 0xb7a   :  { %v4841_v5 = vadd.f32 %v4840_v21, %v4376_v10 }
 0xb7c   :  { %v4852_v59 = vmul.f32 %v4850_v7, %v4841_v5 }
 0xb7e   :  { %6764 = vmatmul.mubr.f32.vlgmr.msra.gmra.mxu1 %v4852_v59 }
 0xc3e   :  { %v4951_v38 = vpop.f32.mrf.mxu1 }
 0xc3f   :  { %v4952_v48 = vadd.f32 %v4951_v38, %v11058_v58 }
 0xc40   :  { %v6765_v24 = vpop.f32.mrf.mxu1 }
 0xc41   :  { %v4962_v47 = vadd.f32 %v5144_v63, %v4952_v48 }
 0xc43   :  { %v4963_v15 = vmax.f32 %v4962_v47, 0.0 }
 0xc45   :  { %6799 = vmatmul.mubr.f32.vlgmr.msra.gmra.mxu0 %v4963_v15 }
 0xd05   :  { %v5069_v57 = vpop.f32.mrf.mxu0 }
 0xd06   :  { %v5070_v61 = vadd.f32 %v5145_v46, %v5069_v57 }
 0xd07   :  { %v6800_v49 = vpop.f32.mrf.mxu0 }
 0xd08   :  { %5074 = vst.msk [vmem:[%s9767_s21] sm:$0xff] %vm5073_vm0, %v5070_v61 }
 0xd09   :  { %5079 = vsyncpa [#allocation4], 1 }
 0xd0a   :  { %5080 = vsyncpa [#allocation6], 1 }
 0xd0b   :  { %5081 = vsyncpa [#allocation9], 1 }
 0xd0c   :  { %5082 = vsyncpa [#allocation12], 1 }

</bundles_post_ra>
